<compile_context>
chip_gen: v7x
topology: tpu7x:2x2x1
jax: 0.10.0
libtpu: 0.0.40
codegen_flags: <defaults>
</compile_context>

<pallas_src>
import jax
import jax.numpy as jnp
import numpy as np
from jax.experimental import pallas as pl
from jax.experimental.pallas import tpu as pltpu

_EPS = 1e-5
# bf16 operands -> native MXU throughput on every TPU generation; accumulation
# stays f32 via preferred_element_type.  Flip to jnp.float32 for a
# tight-tolerance (5e-4) accuracy-CI path.
_MXU_DTYPE = jnp.bfloat16


def _round_up(x, m):
    return (x + m - 1) // m * m


def _make_kernel(N, H, W, Cpad):
    """Kernel for the in-kernel (H, W*N, C) layout; channel axes already padded."""
    H1, W1 = H - 2, W - 2            # after first 3x3 valid conv
    H2, W2 = H1 - 2, W1 - 2          # after second 3x3 valid conv
    Hp, Wp = H2 // 2, W2 // 2        # after 2x2 stride-2 max-pool

    def conv_relu_bn(x_mxu, w_flat, b_row, gamma, beta, ho, wo):
        # x_mxu: (h, w*N, cin) in _MXU_DTYPE; w_flat: (9*cin, cout) in _MXU_DTYPE
        # b_row / gamma / beta: (1, cout) f32.  Returns (ho*wo*N, cout) f32.
        cin = x_mxu.shape[-1]
        m = ho * wo * N

        # --- im2col: one staging operand, one MXU dot with K = 9*cin ---------
        taps = []
        for ky in range(3):
            for kx in range(3):
                # The W-window [kx, kx+wo) x all batches is a single contiguous
                # slice of the flattened (W*N) axis -> leading-dim slices only.
                taps.append(
                    x_mxu[ky:ky + ho, kx * N:(kx + wo) * N, :].reshape(m, cin))
        patches = jnp.concatenate(taps, axis=-1)              # (m, 9*cin), 128-aligned chunks
        acc = jnp.dot(patches, w_flat, preferred_element_type=jnp.float32)

        h = jnp.maximum(acc + b_row, 0.0)                     # conv bias + ReLU, (m, cout) f32

        # --- fused BatchNorm2d (training-mode biased batch statistics) -------
        # Column sums on the MXU (ones-row matmuls, f32 for accuracy); centered
        # variance avoids E[x^2]-mean^2 cancellation at large m.
        inv_m = 1.0 / float(m)
        ones_row = jnp.ones((1, m), jnp.float32)
        mean = jnp.dot(ones_row, h, preferred_element_type=jnp.float32) * inv_m   # (1, cout)
        d = h - mean
        var = jnp.dot(ones_row, d * d, preferred_element_type=jnp.float32) * inv_m
        scale = gamma * jax.lax.rsqrt(var + _EPS)             # (1, cout)
        shift = beta - mean * scale                           # (1, cout)
        return h * scale + shift                              # one FMA per element

    def kernel(x_ref, w1_ref, b1_ref, g1_ref, be1_ref,
               w2_ref, b2_ref, g2_ref, be2_ref,
               conv_ref, out_ref):
        # block 1: conv -> relu -> batchnorm  (single bf16 im2col dot + fused stats)
        h1 = conv_relu_bn(x_ref[...].astype(_MXU_DTYPE), w1_ref[...],
                          b1_ref[...], g1_ref[...], be1_ref[...], H1, W1)
        h1 = h1.reshape(H1, W1 * N, Cpad)

        # block 2: conv -> relu -> batchnorm
        h2 = conv_relu_bn(h1.astype(_MXU_DTYPE), w2_ref[...],
                          b2_ref[...], g2_ref[...], be2_ref[...], H2, W2)
        h2 = h2.reshape(H2, W2 * N, Cpad)

        conv_ref[...] = h2.astype(conv_ref.dtype)             # (H2, W2*N, Cpad), lane-dense

        # 2x2 stride-2 max-pool; reshapes split/reduce leading dims only.
        p = h2
        if H2 % 2:
            p = p[:Hp * 2]
        if W2 % 2:
            p = p[:, :Wp * 2 * N]
        p = p.reshape(Hp, 2, (Wp * 2) * N, Cpad).max(axis=1)  # pool over H pairs
        p = p.reshape(Hp, Wp, 2, N, Cpad).max(axis=2)         # pool over W pairs
        out_ref[...] = p.reshape(Hp, Wp * N, Cpad).astype(out_ref.dtype)

    return kernel, (H2, W2, Hp, Wp)


def contracting_path(x_nchw, params):
    """x_nchw: (N, Cin, H, W) f32.  Returns (conv, pooled) in NCHW like the module."""
    N, Cin, H, W = x_nchw.shape
    Cout = params["w1"].shape[-1]
    Cin_p = _round_up(max(Cin, 128), 128)      # lane-dense / concat-aligned channel axes
    Cout_p = _round_up(max(Cout, 128), 128)
    kernel, (H2, W2, Hp, Wp) = _make_kernel(N, H, W, Cout_p)

    def pad_to(a, axis, target):
        cfg = [(0, 0)] * a.ndim
        cfg[axis] = (0, target - a.shape[axis])
        return jnp.pad(a, cfg)

    # Glue (host-side XLA): PyTorch NCHW -> in-kernel (H, W*N, C) layout.
    x_k = jnp.transpose(x_nchw, (2, 3, 0, 1)).reshape(H, W * N, Cin).astype(jnp.float32)
    x_k = pad_to(x_k, 2, Cin_p)

    # Conv weights are HWIO; row index = (ky*3+kx)*cin_pad + c, cols padded to Cout_p.
    w1 = pad_to(pad_to(params["w1"], 2, Cin_p), 3, Cout_p)
    w1 = w1.reshape(9 * Cin_p, Cout_p).astype(_MXU_DTYPE)
    w2 = pad_to(pad_to(params["w2"], 2, Cout_p), 3, Cout_p)
    w2 = w2.reshape(9 * Cout_p, Cout_p).astype(_MXU_DTYPE)
    vec = lambda v: pad_to(v.reshape(1, Cout).astype(jnp.float32), 1, Cout_p)

    vmem = pl.BlockSpec(memory_space=pltpu.MemorySpace.VMEM)
    conv_k, out_k = pl.pallas_call(
        kernel,
        out_shape=(jax.ShapeDtypeStruct((H2, W2 * N, Cout_p), jnp.float32),
                   jax.ShapeDtypeStruct((Hp, Wp * N, Cout_p), jnp.float32)),
        in_specs=[vmem] * 9,
        out_specs=(vmem, vmem),
        # No vmem_limit_bytes request: the toy block fits the default scoped VMEM
        # and requesting the full 64 MiB would leave no headroom on v7x.
    )(x_k, w1, vec(params["b1"]), vec(params["g1"]), vec(params["be1"]),
      w2, vec(params["b2"]), vec(params["g2"]), vec(params["be2"]))

    # Strip channel padding and restore NCHW.
    conv = jnp.transpose(conv_k.reshape(H2, W2, N, Cout_p)[..., :Cout], (2, 3, 0, 1))
    out = jnp.transpose(out_k.reshape(Hp, Wp, N, Cout_p)[..., :Cout], (2, 3, 0, 1))
    return conv, out


def reference(x, p):
    def block(h, w, b, g, be):
        y = jax.lax.conv_general_dilated(
            h, w, (1, 1), "VALID", dimension_numbers=("NCHW", "HWIO", "NCHW"))
        y = y + b[None, :, None, None]
        y = jnp.maximum(y, 0.0)
        mean = jnp.mean(y, axis=(0, 2, 3), keepdims=True)
        var = jnp.mean((y - mean) ** 2, axis=(0, 2, 3), keepdims=True)
        return (y - mean) / jnp.sqrt(var + _EPS) * g[None, :, None, None] + be[None, :, None, None]

    c = block(x, p["w1"], p["b1"], p["g1"], p["be1"])
    c = block(c, p["w2"], p["b2"], p["g2"], p["be2"])
    pooled = jax.lax.reduce_window(c, -jnp.inf, jax.lax.max,
                                   (1, 1, 2, 2), (1, 1, 2, 2), "VALID")
    return c, pooled


if __name__ == "__main__":
    N, Cin, Cout, H, W = 2, 4, 8, 16, 16
    ks = jax.random.split(jax.random.PRNGKey(0), 9)
    x = jax.random.normal(ks[0], (N, Cin, H, W), jnp.float32)
    params = dict(
        w1=jax.random.normal(ks[1], (3, 3, Cin, Cout), jnp.float32) * (2.0 / (9 * Cin)) ** 0.5,
        b1=0.1 * jax.random.normal(ks[2], (Cout,), jnp.float32),
        g1=1.0 + 0.1 * jax.random.normal(ks[3], (Cout,), jnp.float32),
        be1=0.1 * jax.random.normal(ks[4], (Cout,), jnp.float32),
        w2=jax.random.normal(ks[5], (3, 3, Cout, Cout), jnp.float32) * (2.0 / (9 * Cout)) ** 0.5,
        b2=0.1 * jax.random.normal(ks[6], (Cout,), jnp.float32),
        g2=1.0 + 0.1 * jax.random.normal(ks[7], (Cout,), jnp.float32),
        be2=0.1 * jax.random.normal(ks[8], (Cout,), jnp.float32),
    )

    conv, out = jax.jit(contracting_path)(x, params)
    jax.block_until_ready((conv, out))

    conv_ref, out_ref = reference(x, params)
    assert conv.shape == (N, Cout, H - 4, W - 4)
    assert out.shape == (N, Cout, (H - 4) // 2, (W - 4) // 2)
    # bf16 MXU operands (f32 accumulation): tolerance loosened vs the f32 path
    # (set _MXU_DTYPE = jnp.float32 for atol/rtol = 5e-4).
    np.testing.assert_allclose(np.asarray(conv), np.asarray(conv_ref), atol=5e-2, rtol=5e-2)
    np.testing.assert_allclose(np.asarray(out), np.asarray(out_ref), atol=5e-2, rtol=5e-2)
    print("KERNEL_OK")
</pallas_src>

<mosaic_0001>
module attributes {stable_mosaic.version = 11 : i64} {
  func.func @kernel(%arg0: memref<16x32x128xf32, #tpu.memory_space<vmem>>, %arg1: memref<1152x128xbf16, #tpu.memory_space<vmem>>, %arg2: memref<1x128xf32, #tpu.memory_space<vmem>>, %arg3: memref<1x128xf32, #tpu.memory_space<vmem>>, %arg4: memref<1x128xf32, #tpu.memory_space<vmem>>, %arg5: memref<1152x128xbf16, #tpu.memory_space<vmem>>, %arg6: memref<1x128xf32, #tpu.memory_space<vmem>>, %arg7: memref<1x128xf32, #tpu.memory_space<vmem>>, %arg8: memref<1x128xf32, #tpu.memory_space<vmem>>, %arg9: memref<12x24x128xf32, #tpu.memory_space<vmem>>, %arg10: memref<6x12x128xf32, #tpu.memory_space<vmem>>) attributes {dimension_semantics = [], scalar_prefetch = 0 : i64, scratch_operands = 0 : i64, tpu.core_type = #tpu.core_type<tc>} {
    %c0 = arith.constant 0 : index
    %c0_0 = arith.constant 0 : index
    %c0_1 = arith.constant 0 : index
    %0 = vector.load %arg0[%c0, %c0_0, %c0_1] : memref<16x32x128xf32, #tpu.memory_space<vmem>>, vector<16x32x128xf32>
    %1 = arith.truncf %0 : vector<16x32x128xf32> to vector<16x32x128xbf16>
    %c0_2 = arith.constant 0 : index
    %c0_3 = arith.constant 0 : index
    %2 = vector.load %arg1[%c0_2, %c0_3] : memref<1152x128xbf16, #tpu.memory_space<vmem>>, vector<1152x128xbf16>
    %c0_4 = arith.constant 0 : index
    %c0_5 = arith.constant 0 : index
    %3 = vector.load %arg2[%c0_4, %c0_5] : memref<1x128xf32, #tpu.memory_space<vmem>>, vector<1x128xf32>
    %c0_6 = arith.constant 0 : index
    %c0_7 = arith.constant 0 : index
    %4 = vector.load %arg3[%c0_6, %c0_7] : memref<1x128xf32, #tpu.memory_space<vmem>>, vector<1x128xf32>
    %c0_8 = arith.constant 0 : index
    %c0_9 = arith.constant 0 : index
    %5 = vector.load %arg4[%c0_8, %c0_9] : memref<1x128xf32, #tpu.memory_space<vmem>>, vector<1x128xf32>
    %6 = vector.extract_strided_slice %1 {offsets = [0, 0, 0], sizes = [14, 28, 128], strides = [1, 1, 1]} : vector<16x32x128xbf16> to vector<14x28x128xbf16>
    %7 = vector.shape_cast %6 : vector<14x28x128xbf16> to vector<392x128xbf16>
    %8 = vector.extract_strided_slice %1 {offsets = [0, 2, 0], sizes = [14, 28, 128], strides = [1, 1, 1]} : vector<16x32x128xbf16> to vector<14x28x128xbf16>
    %9 = vector.shape_cast %8 : vector<14x28x128xbf16> to vector<392x128xbf16>
    %10 = vector.extract_strided_slice %1 {offsets = [0, 4, 0], sizes = [14, 28, 128], strides = [1, 1, 1]} : vector<16x32x128xbf16> to vector<14x28x128xbf16>
    %11 = vector.shape_cast %10 : vector<14x28x128xbf16> to vector<392x128xbf16>
    %12 = vector.extract_strided_slice %1 {offsets = [1, 0, 0], sizes = [14, 28, 128], strides = [1, 1, 1]} : vector<16x32x128xbf16> to vector<14x28x128xbf16>
    %13 = vector.shape_cast %12 : vector<14x28x128xbf16> to vector<392x128xbf16>
    %14 = vector.extract_strided_slice %1 {offsets = [1, 2, 0], sizes = [14, 28, 128], strides = [1, 1, 1]} : vector<16x32x128xbf16> to vector<14x28x128xbf16>
    %15 = vector.shape_cast %14 : vector<14x28x128xbf16> to vector<392x128xbf16>
    %16 = vector.extract_strided_slice %1 {offsets = [1, 4, 0], sizes = [14, 28, 128], strides = [1, 1, 1]} : vector<16x32x128xbf16> to vector<14x28x128xbf16>
    %17 = vector.shape_cast %16 : vector<14x28x128xbf16> to vector<392x128xbf16>
    %18 = vector.extract_strided_slice %1 {offsets = [2, 0, 0], sizes = [14, 28, 128], strides = [1, 1, 1]} : vector<16x32x128xbf16> to vector<14x28x128xbf16>
    %19 = vector.shape_cast %18 : vector<14x28x128xbf16> to vector<392x128xbf16>
    %20 = vector.extract_strided_slice %1 {offsets = [2, 2, 0], sizes = [14, 28, 128], strides = [1, 1, 1]} : vector<16x32x128xbf16> to vector<14x28x128xbf16>
    %21 = vector.shape_cast %20 : vector<14x28x128xbf16> to vector<392x128xbf16>
    %22 = vector.extract_strided_slice %1 {offsets = [2, 4, 0], sizes = [14, 28, 128], strides = [1, 1, 1]} : vector<16x32x128xbf16> to vector<14x28x128xbf16>
    %23 = vector.shape_cast %22 : vector<14x28x128xbf16> to vector<392x128xbf16>
    %24 = tpu.concatenate %7, %9, %11, %13, %15, %17, %19, %21, %23 in 1 : vector<392x128xbf16>, vector<392x128xbf16>, vector<392x128xbf16>, vector<392x128xbf16>, vector<392x128xbf16>, vector<392x128xbf16>, vector<392x128xbf16>, vector<392x128xbf16>, vector<392x128xbf16> -> vector<392x1152xbf16>
    %cst = arith.constant dense<0.000000e+00> : vector<392x128xf32>
    %25 = tpu.matmul %24, %2, %cst {dimension_numbers = #tpu.dot_dimension_numbers<[1], [0], [0], [1], [0, 0, 1, 1], [], []>} : vector<392x1152xbf16>, vector<1152x128xbf16>, vector<392x128xf32> -> vector<392x128xf32>
    %26 = vector.broadcast %3 : vector<1x128xf32> to vector<392x128xf32>
    %27 = arith.addf %25, %26 : vector<392x128xf32>
    %cst_10 = arith.constant 0.000000e+00 : f32
    %28 = vector.broadcast %cst_10 : f32 to vector<392x128xf32>
    %29 = arith.maximumf %27, %28 : vector<392x128xf32>
    %cst_11 = arith.constant 1.000000e+00 : f32
    %30 = vector.broadcast %cst_11 : f32 to vector<1x392xf32>
    %cst_12 = arith.constant dense<0.000000e+00> : vector<1x128xf32>
    %31 = tpu.matmul %30, %29, %cst_12 {dimension_numbers = #tpu.dot_dimension_numbers<[1], [0], [0], [1], [0, 0, 1, 1], [], []>} : vector<1x392xf32>, vector<392x128xf32>, vector<1x128xf32> -> vector<1x128xf32>
    %cst_13 = arith.constant 0.00255102036 : f32
    %32 = vector.broadcast %cst_13 : f32 to vector<1x128xf32>
    %33 = arith.mulf %31, %32 : vector<1x128xf32>
    %34 = vector.broadcast %33 : vector<1x128xf32> to vector<392x128xf32>
    %35 = arith.subf %29, %34 : vector<392x128xf32>
    %36 = arith.mulf %35, %35 : vector<392x128xf32>
    %cst_14 = arith.constant dense<0.000000e+00> : vector<1x128xf32>
    %37 = tpu.matmul %30, %36, %cst_14 {dimension_numbers = #tpu.dot_dimension_numbers<[1], [0], [0], [1], [0, 0, 1, 1], [], []>} : vector<1x392xf32>, vector<392x128xf32>, vector<1x128xf32> -> vector<1x128xf32>
    %cst_15 = arith.constant 0.00255102036 : f32
    %38 = vector.broadcast %cst_15 : f32 to vector<1x128xf32>
    %39 = arith.mulf %37, %38 : vector<1x128xf32>
    %cst_16 = arith.constant 9.99999974E-6 : f32
    %40 = vector.broadcast %cst_16 : f32 to vector<1x128xf32>
    %41 = arith.addf %39, %40 : vector<1x128xf32>
    %42 = math.rsqrt %41 : vector<1x128xf32>
    %43 = arith.mulf %4, %42 : vector<1x128xf32>
    %44 = arith.mulf %33, %43 : vector<1x128xf32>
    %45 = arith.subf %5, %44 : vector<1x128xf32>
    %46 = vector.broadcast %43 : vector<1x128xf32> to vector<392x128xf32>
    %47 = arith.mulf %29, %46 : vector<392x128xf32>
    %48 = vector.broadcast %45 : vector<1x128xf32> to vector<392x128xf32>
    %49 = arith.addf %47, %48 : vector<392x128xf32>
    %50 = vector.shape_cast %49 : vector<392x128xf32> to vector<14x28x128xf32>
    %51 = arith.truncf %50 : vector<14x28x128xf32> to vector<14x28x128xbf16>
    %c0_17 = arith.constant 0 : index
    %c0_18 = arith.constant 0 : index
    %52 = vector.load %arg5[%c0_17, %c0_18] : memref<1152x128xbf16, #tpu.memory_space<vmem>>, vector<1152x128xbf16>
    %c0_19 = arith.constant 0 : index
    %c0_20 = arith.constant 0 : index
    %53 = vector.load %arg6[%c0_19, %c0_20] : memref<1x128xf32, #tpu.memory_space<vmem>>, vector<1x128xf32>
    %c0_21 = arith.constant 0 : index
    %c0_22 = arith.constant 0 : index
    %54 = vector.load %arg7[%c0_21, %c0_22] : memref<1x128xf32, #tpu.memory_space<vmem>>, vector<1x128xf32>
    %c0_23 = arith.constant 0 : index
    %c0_24 = arith.constant 0 : index
    %55 = vector.load %arg8[%c0_23, %c0_24] : memref<1x128xf32, #tpu.memory_space<vmem>>, vector<1x128xf32>
    %56 = vector.extract_strided_slice %51 {offsets = [0, 0, 0], sizes = [12, 24, 128], strides = [1, 1, 1]} : vector<14x28x128xbf16> to vector<12x24x128xbf16>
    %57 = vector.shape_cast %56 : vector<12x24x128xbf16> to vector<288x128xbf16>
    %58 = vector.extract_strided_slice %51 {offsets = [0, 2, 0], sizes = [12, 24, 128], strides = [1, 1, 1]} : vector<14x28x128xbf16> to vector<12x24x128xbf16>
    %59 = vector.shape_cast %58 : vector<12x24x128xbf16> to vector<288x128xbf16>
    %60 = vector.extract_strided_slice %51 {offsets = [0, 4, 0], sizes = [12, 24, 128], strides = [1, 1, 1]} : vector<14x28x128xbf16> to vector<12x24x128xbf16>
    %61 = vector.shape_cast %60 : vector<12x24x128xbf16> to vector<288x128xbf16>
    %62 = vector.extract_strided_slice %51 {offsets = [1, 0, 0], sizes = [12, 24, 128], strides = [1, 1, 1]} : vector<14x28x128xbf16> to vector<12x24x128xbf16>
    %63 = vector.shape_cast %62 : vector<12x24x128xbf16> to vector<288x128xbf16>
    %64 = vector.extract_strided_slice %51 {offsets = [1, 2, 0], sizes = [12, 24, 128], strides = [1, 1, 1]} : vector<14x28x128xbf16> to vector<12x24x128xbf16>
    %65 = vector.shape_cast %64 : vector<12x24x128xbf16> to vector<288x128xbf16>
    %66 = vector.extract_strided_slice %51 {offsets = [1, 4, 0], sizes = [12, 24, 128], strides = [1, 1, 1]} : vector<14x28x128xbf16> to vector<12x24x128xbf16>
    %67 = vector.shape_cast %66 : vector<12x24x128xbf16> to vector<288x128xbf16>
    %68 = vector.extract_strided_slice %51 {offsets = [2, 0, 0], sizes = [12, 24, 128], strides = [1, 1, 1]} : vector<14x28x128xbf16> to vector<12x24x128xbf16>
    %69 = vector.shape_cast %68 : vector<12x24x128xbf16> to vector<288x128xbf16>
    %70 = vector.extract_strided_slice %51 {offsets = [2, 2, 0], sizes = [12, 24, 128], strides = [1, 1, 1]} : vector<14x28x128xbf16> to vector<12x24x128xbf16>
    %71 = vector.shape_cast %70 : vector<12x24x128xbf16> to vector<288x128xbf16>
    %72 = vector.extract_strided_slice %51 {offsets = [2, 4, 0], sizes = [12, 24, 128], strides = [1, 1, 1]} : vector<14x28x128xbf16> to vector<12x24x128xbf16>
    %73 = vector.shape_cast %72 : vector<12x24x128xbf16> to vector<288x128xbf16>
    %74 = tpu.concatenate %57, %59, %61, %63, %65, %67, %69, %71, %73 in 1 : vector<288x128xbf16>, vector<288x128xbf16>, vector<288x128xbf16>, vector<288x128xbf16>, vector<288x128xbf16>, vector<288x128xbf16>, vector<288x128xbf16>, vector<288x128xbf16>, vector<288x128xbf16> -> vector<288x1152xbf16>
    %cst_25 = arith.constant dense<0.000000e+00> : vector<288x128xf32>
    %75 = tpu.matmul %74, %52, %cst_25 {dimension_numbers = #tpu.dot_dimension_numbers<[1], [0], [0], [1], [0, 0, 1, 1], [], []>} : vector<288x1152xbf16>, vector<1152x128xbf16>, vector<288x128xf32> -> vector<288x128xf32>
    %76 = vector.broadcast %53 : vector<1x128xf32> to vector<288x128xf32>
    %77 = arith.addf %75, %76 : vector<288x128xf32>
    %cst_26 = arith.constant 0.000000e+00 : f32
    %78 = vector.broadcast %cst_26 : f32 to vector<288x128xf32>
    %79 = arith.maximumf %77, %78 : vector<288x128xf32>
    %cst_27 = arith.constant 1.000000e+00 : f32
    %80 = vector.broadcast %cst_27 : f32 to vector<1x288xf32>
    %cst_28 = arith.constant dense<0.000000e+00> : vector<1x128xf32>
    %81 = tpu.matmul %80, %79, %cst_28 {dimension_numbers = #tpu.dot_dimension_numbers<[1], [0], [0], [1], [0, 0, 1, 1], [], []>} : vector<1x288xf32>, vector<288x128xf32>, vector<1x128xf32> -> vector<1x128xf32>
    %cst_29 = arith.constant 0.00347222225 : f32
    %82 = vector.broadcast %cst_29 : f32 to vector<1x128xf32>
    %83 = arith.mulf %81, %82 : vector<1x128xf32>
    %84 = vector.broadcast %83 : vector<1x128xf32> to vector<288x128xf32>
    %85 = arith.subf %79, %84 : vector<288x128xf32>
    %86 = arith.mulf %85, %85 : vector<288x128xf32>
    %cst_30 = arith.constant dense<0.000000e+00> : vector<1x128xf32>
    %87 = tpu.matmul %80, %86, %cst_30 {dimension_numbers = #tpu.dot_dimension_numbers<[1], [0], [0], [1], [0, 0, 1, 1], [], []>} : vector<1x288xf32>, vector<288x128xf32>, vector<1x128xf32> -> vector<1x128xf32>
    %cst_31 = arith.constant 0.00347222225 : f32
    %88 = vector.broadcast %cst_31 : f32 to vector<1x128xf32>
    %89 = arith.mulf %87, %88 : vector<1x128xf32>
    %cst_32 = arith.constant 9.99999974E-6 : f32
    %90 = vector.broadcast %cst_32 : f32 to vector<1x128xf32>
    %91 = arith.addf %89, %90 : vector<1x128xf32>
    %92 = math.rsqrt %91 : vector<1x128xf32>
    %93 = arith.mulf %54, %92 : vector<1x128xf32>
    %94 = arith.mulf %83, %93 : vector<1x128xf32>
    %95 = arith.subf %55, %94 : vector<1x128xf32>
    %96 = vector.broadcast %93 : vector<1x128xf32> to vector<288x128xf32>
    %97 = arith.mulf %79, %96 : vector<288x128xf32>
    %98 = vector.broadcast %95 : vector<1x128xf32> to vector<288x128xf32>
    %99 = arith.addf %97, %98 : vector<288x128xf32>
    %100 = vector.shape_cast %99 : vector<288x128xf32> to vector<12x24x128xf32>
    %c0_33 = arith.constant 0 : index
    %c0_34 = arith.constant 0 : index
    %c0_35 = arith.constant 0 : index
    %101 = vector.load %arg9[%c0_33, %c0_34, %c0_35] : memref<12x24x128xf32, #tpu.memory_space<vmem>>, vector<12x24x128xf32>
    tpu.vector_store %arg9[%c0_33, %c0_34, %c0_35], %100 {strides = array<i32>} : memref<12x24x128xf32, #tpu.memory_space<vmem>>, vector<12x24x128xf32>,
    %102 = vector.shape_cast %100 : vector<12x24x128xf32> to vector<6x2x24x128xf32>
    %cst_36 = arith.constant dense<0xFF800000> : vector<6x24x128xf32>
    %103 = vector.multi_reduction <maximumf>, %102, %cst_36 [1] : vector<6x2x24x128xf32> to vector<6x24x128xf32>
    %104 = vector.shape_cast %103 : vector<6x24x128xf32> to vector<6x6x2x2x128xf32>
    %cst_37 = arith.constant dense<0xFF800000> : vector<6x6x2x128xf32>
    %105 = vector.multi_reduction <maximumf>, %104, %cst_37 [2] : vector<6x6x2x2x128xf32> to vector<6x6x2x128xf32>
    %106 = vector.shape_cast %105 : vector<6x6x2x128xf32> to vector<6x12x128xf32>
    %c0_38 = arith.constant 0 : index
    %c0_39 = arith.constant 0 : index
    %c0_40 = arith.constant 0 : index
    %107 = vector.load %arg10[%c0_38, %c0_39, %c0_40] : memref<6x12x128xf32, #tpu.memory_space<vmem>>, vector<6x12x128xf32>
    tpu.vector_store %arg10[%c0_38, %c0_39, %c0_40], %106 {strides = array<i32>} : memref<6x12x128xf32, #tpu.memory_space<vmem>>, vector<6x12x128xf32>,
    return
  }
}

</mosaic_0001>

<bundles_post_ra>
// kernel: contracting_path.1
= control target key start
LH: loop header
LB: loop body
LE: loop exit
PB: predicated region body
PF: predicated region fallthrough
CT: control target
= control target key end

     0   :  { %v18202_v0 = vmov 0   ;;  %v11319_v4 = vmov 1983009808   ;;  %v310_v6 = vlaneseq  ;;  %vm782_vm0 = vcmask 1040384   ;;  %s18191_s1 = inlined_call_operand.vmem [shape: bf16[1152,128], index: 1, kind: input, shape index: {}]   ;;  %s18192_s0 = inlined_call_operand.vmem [shape: f32[16,32,128], index: 0, kind: input, shape index: {}]   ;;  %s18193_s2 = inlined_call_operand.vmem [shape: f32[1,128], index: 2, kind: input, shape index: {}]   ;;  %s18194_s5 = inlined_call_operand.vmem [shape: bf16[1152,128], index: 5, kind: input, shape index: {}]   ;;  %s18195_s3 = inlined_call_operand.vmem [shape: f32[1,128], index: 3, kind: input, shape index: {}]   ;;  %s18196_s4 = inlined_call_operand.vmem [shape: f32[1,128], index: 4, kind: input, shape index: {}]   ;;  %s18197_s6 = inlined_call_operand.vmem [shape: f32[1,128], index: 6, kind: input, shape index: {}]   ;;  %s18198_s7 = inlined_call_operand.vmem [shape: f32[1,128], index: 7, kind: input, shape index: {}]   ;;  %s18199_s8 = inlined_call_operand.vmem [shape: f32[1,128], index: 8, kind: input, shape index: {}]   ;;  %s18200_s9 = inlined_call_operand.vmem [shape: f32[12,24,128], index: 9, kind: output, shape index: {0}]   ;;  %s18201_s10 = inlined_call_operand.vmem [shape: f32[6,12,128], index: 10, kind: output, shape index: {1}]  }
   0x1   :  { %4012 = vmatprep.subr.bf16.mxu0 %v18202_v0  ;;  %v11170_v1 = vld [vmem:[%s18191_s1] sm:$0xff]   ;;  %v11171_v2 = vld [vmem:[%s18191_s1 + $0x8] sm:$0xff]   ;;  %v11172_v3 = vld [vmem:[%s18191_s1 + $0x10] sm:$0xff]   ;;  %v308_v5 = vunpack.c.l.s4 %v11319_v4  ;;  %vm783_vm1 = vcmask 1042434   ;;  %vm785_vm2 = vcmask 1044484   ;;  %vm787_vm5 = vcmask 1046534  }
   0x2   :  { %4013 = vmatpush1.bf16.msra.mxu0 %v11170_v1  ;;  %v11173_v7 = vld [vmem:[%s18191_s1 + $0x18] sm:$0xff]   ;;  %v11395_v9 = vshrl.u32 %v310_v6, 7  ;;  %v11174_v10 = vld [vmem:[%s18191_s1 + $0x20] sm:$0xff]   ;;  %v36_v13 = vld [vmem:[%s18192_s0 + $0x8] sm:$0xff]  ;;  %vm11321_vm7 = vmmov 0   ;;  %vm5221_vm8 = vcmask 64512  }
   0x3   :  { %4014 = vmatprep.subr.bf16.mxu0 %v18202_v0  ;;  %v309_v8 = vunpack.c.0.s8 %v308_v5  ;;  %v35_v12 = vld [vmem:[%s18192_s0] sm:$0xff]  ;;  %v37_v14 = vld [vmem:[%s18192_s0 + $0x10] sm:$0xff]  ;;  %v11416_v15 = vld [vmem:[%s18192_s0 + $0x18] sm:$0xff]  ;;  %v9418_v17 = vpack.c.bf16 %v36_v13, %v36_v13  ;;  %vm6208_vm9 = vcmask 1042432   ;;  %vm6209_vm10 = vcmask 1046532  }
   0x4   :  { %18737 = vst [vmem:[#allocation2_spill] sm:$0xff] %v11395_v9  ;;  %v99_v16 = vpack.c.bf16 %v36_v13, %v35_v12  ;;  %vm784_vm3 = vmor %vm782_vm0, %vm783_vm1  ;;  %v39_v18 = vld [vmem:[%s18192_s0 + $0x20] sm:$0xff]  ;;  %v11175_v19 = vld [vmem:[%s18191_s1 + $0x28] sm:$0xff]   ;;  %v100_v20 = vpack.c.bf16 %v11416_v15, %v37_v14  ;;  %v9419_v62 = vpack.c.bf16 %v11416_v15, %v11416_v15  ;;  %vm6331_vm12 = vcmask 1041408  }
   0x5   :  { %v11402_v11 = vsub.s32 %v309_v8, %v11395_v9  ;;  %v40_v21 = vld [vmem:[%s18192_s0 + $0x28] sm:$0xff]  ;;  %vm786_vm4 = vmor %vm784_vm3, %vm785_vm2  ;;  %v11176_v30 = vld [vmem:[%s18191_s1 + $0x30] sm:$0xff]   ;;  %vm6332_vm13 = vcmask 1045508   ;;  %vm8191_vm15 = vcmask 261120  }
   0x6   :  { %4015 = vmatpush1.bf16.msra.mxu0 %v11171_v2  ;;  %v101_v24 = vpack.c.bf16 %v40_v21, %v39_v18  ;;  %vm11451_vm6 = vmor %vm786_vm4, %vm787_vm5  ;;  %v11177_v37 = vld [vmem:[%s18191_s1 + $0x38] sm:$0xff]   ;;  %v41_v42 = vld [vmem:[%s18192_s0 + $0x30] sm:$0xff]  ;;  %v9420_v47 = vpack.c.bf16 %v40_v21, %v40_v21 }
   0x7   :  { %4016 = vmatprep.subr.bf16.mxu0 %v18202_v0  ;;  %18738 = vst [vmem:[#allocation3_spill] sm:$0xff] %v11402_v11  ;;  %v11430_v22 = vrot.slane %v99_v16, %v11402_v11  ;;  %v11433_v23 = vrot.slane %v9418_v17, %v11402_v11  ;;  %v11436_v25 = vrot.slane %v100_v20, %v11402_v11  ;;  %v11475_v43 = vld [vmem:[%s18192_s0 + $0x38] sm:$0xff]  ;;  %v11178_v51 = vld [vmem:[%s18191_s1 + $0x40] sm:$0xff]   ;;  %v11179_v61 = vld [vmem:[%s18191_s1 + $0x48] sm:$0xff]  }
   0x8   :  { %v11460_v36 = vrot.slane %v101_v24, %v11402_v11  ;;  %v102_v50 = vpack.c.bf16 %v11475_v43, %v41_v42  ;;  %v11497_v55 = vrot.slane %v9420_v47, %v11402_v11  ;;  %v43_v2 = vld [vmem:[%s18192_s0 + $0x40] sm:$0xff]  ;;  %v11180_v8 = vld [vmem:[%s18191_s1 + $0x50] sm:$0xff]   ;;  %v11540_v14 = vrot.slane %v9419_v62, %v11402_v11  ;;  %v11181_v21 = vld [vmem:[%s18191_s1 + $0x58] sm:$0xff]  }
   0x9   :  { %v11440_v26 = vcombine.high %v11430_v22, %v11430_v22  ;;  %v11444_v27 = vcombine.high %v11433_v23, %v11433_v23  ;;  %v9446_v28 = vrot.slane %v11430_v22, 9  ;;  %v794_v29 = vrot.slane %v11433_v23, 7  ;;  %v11184_v62 = vld [vmem:[%s18191_s1 + $0x70] sm:$0xff]   ;;  %vm15330_vm11 = vmor %vm6208_vm9, %vm6209_vm10 }
   0xa   :  { %4017 = vmatpush1.bf16.msra.mxu0 %v11172_v3  ;;  %v800_v32 = vrot.slane %v11436_v25, 7  ;;  %v11486_v46 = vcombine.high %v11460_v36, %v11460_v36  ;;  %v9447_v57 = vrot.slane %v11460_v36, 9  ;;  %v11502_v58 = vcombine.high %v11497_v55, %v11497_v55  ;;  %v44_v3 = vld [vmem:[%s18192_s0 + $0x48] sm:$0xff]  ;;  %vm15898_vm14 = vmor %vm6331_vm12, %vm6332_vm13 }
   0xb   :  { %4018 = vmatprep.subr.bf16.mxu0 %v18202_v0  ;;  %v791_v33 = vrot.slane %v11440_v26, 7  ;;  %v796_v34 = vrot.slane %v794_v29, 2  ;;  %v797_v35 = vrot.slane %v11444_v27, 7  ;;  %v11505_v59 = vrot.slane %v102_v50, %v11402_v11  ;;  %v45_v50 = vld [vmem:[%s18192_s0 + $0x50] sm:$0xff] }
   0xc   :  { %v813_v54 = vrot.slane %v11486_v46, 7  ;;  %v816_v63 = vrot.slane %v11497_v55, 7  ;;  %v819_v1 = vrot.slane %v11502_v58, 7  ;;  %v11523_v4 = vcombine.high %v11436_v25, %v11436_v25 }
   0xd   :  { %v792_v38 = vsel %vm11451_vm6, %v9446_v28, %v791_v33  ;;  %v793_v39 = vrot.slane %v791_v33, 2  ;;  %v798_v40 = vsel %vm11451_vm6, %v796_v34, %v797_v35  ;;  %v799_v41 = vrot.slane %v797_v35, 2 }
   0xe   :  { %4019 = vmatpush1.bf16.msra.mxu0 %v11173_v7  ;;  %v815_v60 = vrot.slane %v813_v54, 2  ;;  %v11527_v5 = vsel %vm11451_vm6, %v9447_v57, %v813_v54  ;;  %v818_v7 = vrot.slane %v816_v63, 2  ;;  %v822_v12 = vrot.slane %v11505_v59, 7 }
   0xf   :  { %4020 = vmatprep.subr.bf16.mxu0 %v18202_v0  ;;  %v795_v44 = vsel %vm11451_vm6, %v793_v39, %v794_v29  ;;  %v801_v45 = vsel %vm11451_vm6, %v799_v41, %v800_v32  ;;  %18741 = vst [vmem:[#allocation4_spill] sm:$0xff] %v11527_v5  ;;  %v103_v15 = vpack.c.bf16 %v44_v3, %v43_v2  ;;  %v803_v18 = vrot.slane %v11523_v4, 7 }
  0x10   :  { %v1654_v48 = vcombine.low %v792_v38, %v795_v44  ;;  %v1655_v49 = vcombine.low %v798_v40, %v801_v45  ;;  %v11531_v6 = vsel %vm11451_vm6, %v815_v60, %v816_v63  ;;  %v11545_v16 = vsel %vm11451_vm6, %v818_v7, %v819_v1  ;;  %v11183_v44 = vld [vmem:[%s18191_s1 + $0x68] sm:$0xff]  }
  0x11   :  { %18742 = vst [vmem:[#allocation5_spill] sm:$0xff] %v11531_v6  ;;  %18743 = vst [vmem:[#allocation6_spill] sm:$0xff] %v11545_v16  ;;  %v9422_v20 = vpack.c.bf16 %v44_v3, %v44_v3  ;;  %v768_v24 = vcombine.high %v11540_v14, %v11540_v14  ;;  %v806_v28 = vrot.slane %v11540_v14, 7  ;;  %v11561_v29 = vrot.slane %v103_v15, %v11402_v11 }
  0x12   :  { %4021 = vmatpush1.bf16.msra.mxu0 %v11174_v10  ;;  %v1662_v52 = vrot.slane %v1654_v48, %v11402_v11  ;;  %v1669_v53 = vrot.slane %v1655_v49, %v11402_v11  ;;  %v821_v10 = vrot.slane %v819_v1, 2  ;;  %v802_v33 = vrot.slane %v800_v32, 2 }
  0x13   :  { %4022 = vmatprep.subr.bf16.mxu0 %v18202_v0  ;;  %v805_v34 = vrot.slane %v803_v18, 2  ;;  %v11570_v35 = vrot.slane %v9422_v20, %v11402_v11  ;;  %v808_v38 = vrot.slane %v806_v28, 2  ;;  %v809_v39 = vrot.slane %v768_v24, 7 }
  0x14   :  { %v1670_v56 = vcombine.low %v1662_v52, %v1669_v53  ;;  %v11549_v17 = vsel %vm11451_vm6, %v821_v10, %v822_v12  ;;  %v11576_v40 = vcombine.high %v11561_v29, %v11561_v29  ;;  %v11601_v49 = vcombine.high %v11505_v59, %v11505_v59 }
  0x15   :  { %18744 = vst [vmem:[#allocation7_spill] sm:$0xff] %v11549_v17  ;;  %v11580_v41 = vcombine.high %v11570_v35, %v11570_v35  ;;  %v807_v45 = vsel %vm11451_vm6, %v805_v34, %v806_v28  ;;  %v810_v47 = vsel %vm11451_vm6, %v808_v38, %v809_v39  ;;  %v1213_v52 = vcombine.low %v11430_v22, %v11440_v26 }
  0x16   :  { %4023 = vmatpush1.bf16.msra.mxu0 %v11175_v19  ;;  %4044 = vmatprep.mubr.bf16.mxu0 %v1670_v56  ;;  %v1265_v32 = vcombine.low %v11561_v29, %v11576_v40  ;;  %v1214_v56 = vcombine.low %v11433_v23, %v11444_v27  ;;  %v1672_v60 = vcombine.low %v810_v47, %v11527_v5  ;;  %v825_v22 = vrot.slane %v11601_v49, 7 }
  0x17   :  { %4024 = vmatprep.subr.bf16.mxu0 %v18202_v0  ;;  %v1281_v42 = vcombine.low %v11570_v35, %v11580_v41  ;;  %v835_v7 = vrot.slane %v11576_v40, 7  ;;  %v1221_v10 = vrot.slane %v1213_v52, %v11402_v11  ;;  %v1230_v34 = vcombine.low %v11436_v25, %v11523_v4 }
  0x18   :  { %v11615_v53 = vrot.slane %v1265_v32, %v11402_v11  ;;  %v838_v38 = vrot.slane %v11570_v35, 7  ;;  %v1231_v39 = vcombine.low %v11540_v14, %v11460_v36  ;;  %v1688_v32 = vcombine.low %v11531_v6, %v11545_v16 }
  0x19   :  { %v11618_v54 = vrot.slane %v1281_v42, %v11402_v11 }
  0x1a   :  { %4025 = vmatpush1.bf16.msra.mxu0 %v11176_v30  ;;  %v11182_v30 = vld [vmem:[%s18191_s1 + $0x60] sm:$0xff]   ;;  %18745 = vst [vmem:[#allocation8_spill] sm:$0xff] %v11615_v53 }
  0x1b   :  { %4026 = vmatprep.subr.bf16.mxu0 %v18202_v0  ;;  %18746 = vst [vmem:[#allocation9_spill] sm:$0xff] %v11618_v54 }
  0x1e   :  { %4027 = vmatpush1.bf16.msra.mxu0 %v11177_v37  ;;  %v9421_v37 = vpack.c.bf16 %v11475_v43, %v11475_v43  ;;  %v804_v43 = vsel %vm11451_vm6, %v802_v33, %v803_v18  ;;  %v1686_v18 = vrot.slane %v1672_v60, %v11402_v11  ;;  %v48_v33 = vld [vmem:[%s18192_s0 + $0x68] sm:$0xff]  ;;  %v11186_v60 = vld [vmem:[%s18191_s1 + $0x80] sm:$0xff]  }
  0x1f   :  { %4028 = vmatprep.subr.bf16.mxu0 %v18202_v0  ;;  %v1671_v57 = vcombine.low %v804_v43, %v807_v45  ;;  %v837_v43 = vrot.slane %v835_v7, 2 }
  0x20   :  { %v11597_v48 = vrot.slane %v9421_v37, %v11402_v11  ;;  %v9448_v37 = vrot.slane %v11561_v29, 9 }
  0x21   :  { %v1679_v15 = vrot.slane %v1671_v57, %v11402_v11 }
  0x22   :  { %4029 = vmatpush1.bf16.msra.mxu0 %v11178_v51  ;;  %v11610_v51 = vld [vmem:[%s18192_s0 + $0x58] sm:$0xff]  ;;  %v11629_v63 = vcombine.high %v11597_v48, %v11597_v48  ;;  %v828_v3 = vrot.slane %v11597_v48, 7 }
  0x23   :  { %4030 = vmatprep.subr.bf16.mxu0 %v18202_v0  ;;  %v104_v1 = vpack.c.bf16 %v11610_v51, %v45_v50  ;;  %v1687_v45 = vcombine.low %v1679_v15, %v1686_v18  ;;  %v9423_v50 = vpack.c.bf16 %v11610_v51, %v11610_v51  ;;  %v1696_v51 = vrot.slane %v1688_v32, %v11402_v11 }
  0x24   :  { %18747 = vst [vmem:[#allocation10_spill] sm:$0xff] %v11629_v63  ;;  %v831_v24 = vrot.slane %v11629_v63, 7  ;;  %v830_v42 = vrot.slane %v828_v3, 2  ;;  %v11698_v15 = vsel %vm11451_vm6, %v9448_v37, %v835_v7  ;;  %v11702_v18 = vsel %vm11451_vm6, %v837_v43, %v838_v38  ;;  %v11187_v37 = vld [vmem:[%s18191_s1 + $0x88] sm:$0xff]  }
  0x25   :  { %v11650_v28 = vrot.slane %v104_v1, %v11402_v11  ;;  %v1247_v1 = vcombine.low %v11486_v46, %v11497_v55  ;;  %18751 = vst [vmem:[#allocation14_spill] sm:$0xff] %v11698_v15  ;;  %18752 = vst [vmem:[#allocation15_spill] sm:$0xff] %v11702_v18 }
  0x26   :  { %4031 = vmatpush1.bf16.msra.mxu0 %v11179_v61  ;;  %v824_v61 = vrot.slane %v822_v12, 2  ;;  %v1228_v12 = vrot.slane %v1214_v56, %v11402_v11  ;;  %v841_v56 = vrot.slane %v11580_v41, 7 }
  0x27   :  { %4032 = vmatprep.subr.bf16.mxu0 %v18202_v0  ;;  %v11673_v52 = vcombine.high %v11650_v28, %v11650_v28  ;;  %v844_v57 = vrot.slane %v11650_v28, 7  ;;  %v1255_v19 = vrot.slane %v1247_v1, %v11402_v11  ;;  %v51_v1 = vld [vmem:[%s18192_s0 + $0x80] sm:$0xff] }
  0x28   :  { %v11646_v20 = vsel %vm11451_vm6, %v824_v61, %v825_v22  ;;  %v1238_v61 = vrot.slane %v1230_v34, %v11402_v11  ;;  %v9424_v34 = vpack.c.bf16 %v48_v33, %v48_v33  ;;  %v843_v32 = vrot.slane %v841_v56, 2 }
  0x29   :  { %18748 = vst [vmem:[#allocation11_spill] sm:$0xff] %v11646_v20  ;;  %v1689_v47 = vcombine.low %v11549_v17, %v11646_v20  ;;  %v847_v7 = vrot.slane %v11673_v52, 7  ;;  %v11191_v20 = vld [vmem:[%s18191_s1 + $0xa8] sm:$0xff]  }
  0x2a   :  { %4033 = vmatpush1.bf16.msra.mxu0 %v11180_v8  ;;  %v11185_v8 = vld [vmem:[%s18191_s1 + $0x78] sm:$0xff]  }
  0x2b   :  { %4034 = vmatprep.subr.bf16.mxu0 %v18202_v0 }
  0x2e   :  { %4035 = vmatpush1.bf16.msra.mxu0 %v11181_v21  ;;  %v827_v21 = vrot.slane %v825_v22, 2  ;;  %v1245_v22 = vrot.slane %v1231_v39, %v11402_v11  ;;  %v840_v39 = vrot.slane %v838_v38, 2  ;;  %v11728_v38 = vrot.slane %v9424_v34, %v11402_v11 }
  0x2f   :  { %4036 = vmatprep.subr.bf16.mxu0 %v18202_v0 }
  0x30   :  { %18754 = vst [vmem:[#allocation17_spill] sm:$0xff] %v11728_v38 }
  0x32   :  { %4037 = vmatpush1.bf16.msra.mxu0 %v11182_v30  ;;  %v47_v30 = vld [vmem:[%s18192_s0 + $0x60] sm:$0xff] }
  0x33   :  { %4038 = vmatprep.subr.bf16.mxu0 %v18202_v0 }
  0x36   :  { %4039 = vmatpush1.bf16.msra.mxu0 %v11183_v44  ;;  %v1229_v44 = vcombine.low %v1221_v10, %v1228_v12  ;;  %v11690_v10 = vsel %vm11451_vm6, %v827_v21, %v828_v3  ;;  %v11694_v12 = vsel %vm11451_vm6, %v830_v42, %v831_v24  ;;  %v50_v3 = vld [vmem:[%s18192_s0 + $0x78] sm:$0xff]  ;;  %v1703_v21 = vrot.slane %v1689_v47, %v11402_v11 }
  0x37   :  { %4040 = vmatprep.subr.bf16.mxu0 %v18202_v0  ;;  %18749 = vst [vmem:[#allocation12_spill] sm:$0xff] %v11690_v10  ;;  %18750 = vst [vmem:[#allocation13_spill] sm:$0xff] %v11694_v12  ;;  %v11712_v24 = vrot.slane %v9423_v50, %v11402_v11  ;;  %v846_v42 = vrot.slane %v844_v57, 2  ;;  %v9425_v34 = vpack.c.bf16 %v50_v3, %v50_v3 }
  0x38   :  { %v1704_v50 = vcombine.low %v1696_v51, %v1703_v21 }
  0x39   :  { %v850_v2 = vrot.slane %v11712_v24, 7  ;;  %v11757_v21 = vsel %vm11451_vm6, %v846_v42, %v847_v7 }
  0x3a   :  { %4041 = vmatpush1.bf16.msra.mxu0 %v11184_v62  ;;  %v105_v62 = vpack.c.bf16 %v48_v33, %v47_v30  ;;  %v49_v30 = vld [vmem:[%s18192_s0 + $0x70] sm:$0xff]  ;;  %v1246_v33 = vcombine.low %v1238_v61, %v1245_v22  ;;  %18758 = vst [vmem:[#allocation21_spill] sm:$0xff] %v11757_v21 }
  0x3b   :  { %4042 = vmatprep.subr.bf16.mxu0 %v18202_v0  ;;  %v106_v47 = vpack.c.bf16 %v50_v3, %v49_v30  ;;  %v11746_v30 = vsel %vm11451_vm6, %v840_v39, %v841_v56  ;;  %v52_v56 = vld [vmem:[%s18192_s0 + $0x88] sm:$0xff]  ;;  %v11189_v3 = vld [vmem:[%s18191_s1 + $0x98] sm:$0xff]  }
  0x3c   :  { %v11719_v43 = vrot.slane %v105_v62, %v11402_v11  ;;  %v11188_v62 = vld [vmem:[%s18191_s1 + $0x90] sm:$0xff]   ;;  %18756 = vst [vmem:[#allocation19_spill] sm:$0xff] %v11746_v30 }
  0x3e   :  { %4043 = vmatpush1.bf16.msra.mxu0 %v11185_v8  ;;  %v1248_v8 = vcombine.low %v11502_v58, %v11505_v59  ;;  %18753 = vst [vmem:[#allocation16_spill] sm:$0xff] %v11719_v43  ;;  %v11737_v61 = vcombine.high %v11719_v43, %v11719_v43 }
  0x3f   :  { %4244 = vmatprep.subr.bf16.mxu0 %v18202_v0 }
  0x40   :  { %v1262_v13 = vrot.slane %v1248_v8, %v11402_v11  ;;  %v11753_v8 = vsel %vm11451_vm6, %v843_v32, %v844_v57  ;;  %v11771_v57 = vcombine.high %v11728_v38, %v11728_v38  ;;  %v857_v42 = vrot.slane %v11737_v61, 7 }
  0x41   :  { %4045 = vmatmul.mubr.bf16.vlgmr.msra.gmra.mrb[0].mxu0 %v1229_v44  ;;  %v1705_v44 = vcombine.low %v11690_v10, %v11694_v12  ;;  %18757 = vst [vmem:[#allocation20_spill] sm:$0xff] %v11753_v8 }
  0x42   :  { %4052 = vmatprep.mubr.bf16.mxu0 %v1687_v45  ;;  %4245 = vmatpush1.bf16.msra.mxu0 %v11186_v60  ;;  %v1706_v45 = vcombine.low %v11698_v15, %v11702_v18  ;;  %v849_v60 = vrot.slane %v847_v7, 2  ;;  %18761 = vst [vmem:[#allocation24_spill] sm:$0xff] %v11771_v57  ;;  %v11775_v7 = vcombine.high %v11712_v24, %v11712_v24 }
  0x43   :  { %4246 = vmatprep.subr.bf16.mxu0 %v18202_v0  ;;  %v1713_v22 = vrot.slane %v1705_v44, %v11402_v11  ;;  %v11780_v32 = vcombine.low %v1255_v19, %v1262_v13  ;;  %v860_v44 = vrot.slane %v11728_v38, 7  ;;  %v11793_v13 = vrot.slane %v9425_v34, %v11402_v11 }
  0x44   :  { %v11742_v51 = vrot.slane %v1706_v45, %v11402_v11  ;;  %v11767_v39 = vsel %vm11451_vm6, %v849_v60, %v850_v2  ;;  %18762 = vst [vmem:[#allocation25_spill] sm:$0xff] %v11775_v7  ;;  %v853_v9 = vrot.slane %v11775_v7, 7  ;;  %v54_v7 = vld [vmem:[%s18192_s0 + $0x98] sm:$0xff] }
  0x45   :  { %18760 = vst [vmem:[#allocation23_spill] sm:$0xff] %v11767_v39  ;;  %18763 = vst [vmem:[#allocation26_spill] sm:$0xff] %v11780_v32  ;;  %v1723_v60 = vcombine.low %v11757_v21, %v11767_v39  ;;  %v859_v39 = vrot.slane %v857_v42, 2  ;;  %v862_v34 = vrot.slane %v860_v44, 2  ;;  %v1282_v21 = vcombine.low %v11650_v28, %v11673_v52 }
  0x46   :  { %4247 = vmatpush1.bf16.msra.mxu0 %v11187_v37  ;;  %18755 = vst [vmem:[#allocation18_spill] sm:$0xff] %v11742_v51  ;;  %v11760_v37 = vrot.slane %v106_v47, %v11402_v11  ;;  %v1721_v45 = vcombine.low %v1713_v22, %v11742_v51  ;;  %v1722_v47 = vcombine.low %v11746_v30, %v11753_v8  ;;  %18764 = vst [vmem:[#allocation27_spill] sm:$0xff] %v11793_v13  ;;  %v11190_v22 = vld [vmem:[%s18191_s1 + $0xa0] sm:$0xff]   ;;  %v18766_v8 = vmov 0  }
  0x47   :  { %4248 = vmatprep.subr.bf16.mxu0 %v18202_v0  ;;  %v863_v51 = vrot.slane %v11771_v57, 7  ;;  %v872_v12 = vrot.slane %v11793_v13, 7  ;;  %v11834_v10 = vrot.slane %v1723_v60, %v11402_v11 }
  0x48   :  { %18759 = vst [vmem:[#allocation22_spill] sm:$0xff] %v11760_v37  ;;  %v11797_v19 = vcombine.high %v11760_v37, %v11760_v37 }
  0x49   :  { %4053 = vmatmul.mubr.bf16.gmra.mrb[4].mxu0 %v1246_v33  ;;  %v1264_v33 = vcombine.low %v11601_v49, %v11597_v48  ;;  %18771 = vst [vmem:[#allocation33_spill] sm:$0xff] %v11834_v10  ;;  %v874_v17 = vrot.slane %v872_v12, 2 }
  0x4a   :  { %4060 = vmatprep.mubr.bf16.mxu0 %v1704_v50  ;;  %4249 = vmatpush1.bf16.msra.mxu0 %v11188_v62  ;;  %v107_v50 = vpack.c.bf16 %v52_v56, %v51_v1  ;;  %18765 = vst [vmem:[#allocation28_spill] sm:$0xff] %v11797_v19  ;;  %v9426_v62 = vpack.c.bf16 %v52_v56, %v52_v56  ;;  %v9449_v1 = vrot.slane %v11719_v43, 9  ;;  %v866_v56 = vrot.slane %v11760_v37, 7 }
  0x4b   :  { %4250 = vmatprep.subr.bf16.mxu0 %v18202_v0  ;;  %v852_v0 = vrot.slane %v850_v2, 2  ;;  %v53_v2 = vld [vmem:[%s18192_s0 + $0x90] sm:$0xff]  ;;  %v869_v30 = vrot.slane %v11797_v19, 7 }
  0x4c   :  { %v11816_v18 = vrot.slane %v107_v50, %v11402_v11  ;;  %v11825_v15 = vrot.slane %v9426_v62, %v11402_v11  ;;  %v11831_v50 = vrot.slane %v1722_v47, %v11402_v11  ;;  %v11846_v62 = vsel %vm11451_vm6, %v859_v39, %v860_v44 }
  0x4d   :  { %18774 = vst [vmem:[#allocation36_spill] sm:$0xff] %v11846_v62  ;;  %v11854_v47 = vcombine.high %v11793_v13, %v11793_v13 }
  0x4e   :  { %4251 = vmatpush1.bf16.msra.mxu0 %v11189_v3  ;;  %18767 = vst [vmem:[#allocation29_spill] sm:$0xff] %v11816_v18  ;;  %v11820_v3 = vrot.slane %v1264_v33, %v11402_v11  ;;  %18769 = vst [vmem:[#allocation31_spill] sm:$0xff] %v11825_v15  ;;  %v11838_v33 = vsel %vm11451_vm6, %v852_v0, %v853_v9  ;;  %v11857_v0 = vrot.slane %v1282_v21, %v11402_v11 }
  0x4f   :  { %4252 = vmatprep.subr.bf16.mxu0 %v18766_v8  ;;  %18770 = vst [vmem:[#allocation32_spill] sm:$0xff] %v11831_v50  ;;  %18772 = vst [vmem:[#allocation34_spill] sm:$0xff] %v11838_v33  ;;  %v11861_v9 = vcombine.high %v11816_v18, %v11816_v18  ;;  %v11868_v44 = vcombine.high %v11825_v15, %v11825_v15  ;;  %v1738_v60 = vcombine.low %v11831_v50, %v11834_v10  ;;  %v11192_v50 = vld [vmem:[%s18191_s1 + $0xb0] sm:$0xff]  }
  0x50   :  { %18768 = vst [vmem:[#allocation30_spill] sm:$0xff] %v11820_v3  ;;  %18776 = vst [vmem:[#allocation38_spill] sm:$0xff] %v11854_v47  ;;  %v1280_v39 = vcombine.low %v11820_v3, %v11615_v53  ;;  %v868_v53 = vrot.slane %v866_v56, 2  ;;  %v871_v3 = vrot.slane %v869_v30, 2  ;;  %v875_v10 = vrot.slane %v11854_v47, 7 }
  0x51   :  { %4061 = vmatmul.mubr.bf16.gmra.mrb[8].mxu0 %v11780_v32  ;;  %v11842_v32 = vsel %vm11451_vm6, %v9449_v1, %v857_v42  ;;  %18777 = vst [vmem:[#allocation39_spill] sm:$0xff] %v11857_v0  ;;  %18778 = vst [vmem:[#allocation40_spill] sm:$0xff] %v11861_v9  ;;  %v108_v42 = vpack.c.bf16 %v54_v7, %v53_v2  ;;  %v865_v1 = vrot.slane %v863_v51, 2  ;;  %v56_v2 = vld [vmem:[%s18192_s0 + $0xa8] sm:$0xff] }
  0x52   :  { %4068 = vmatprep.mubr.bf16.mxu0 %v1721_v45  ;;  %18773 = vst [vmem:[#allocation35_spill] sm:$0xff] %v11842_v32  ;;  %v11850_v45 = vsel %vm11451_vm6, %v862_v34, %v863_v51  ;;  %4253 = vmatpush1.bf16.msra.mxu0 %v11190_v22  ;;  %18779 = vst [vmem:[#allocation41_spill] sm:$0xff] %v11868_v44  ;;  %v1739_v21 = vcombine.low %v11838_v33, %v11842_v32  ;;  %v55_v34 = vld [vmem:[%s18192_s0 + $0xa0] sm:$0xff]  ;;  %v882_v32 = vrot.slane %v11825_v15, 7 }
  0x53   :  { %18775 = vst [vmem:[#allocation37_spill] sm:$0xff] %v11850_v45  ;;  %4254 = vmatprep.subr.bf16.mxu0 %v18766_v8  ;;  %v1740_v22 = vcombine.low %v11846_v62, %v11850_v45  ;;  %v11888_v51 = vcombine.low %v11618_v54, %v11857_v0  ;;  %v879_v45 = vrot.slane %v11861_v9, 7  ;;  %v9427_v62 = vpack.c.bf16 %v54_v7, %v54_v7 }
  0x54   :  { %v11894_v33 = vrot.slane %v108_v42, %v11402_v11  ;;  %v109_v16 = vpack.c.bf16 %v56_v2, %v55_v34  ;;  %v11898_v6 = vrot.slane %v1739_v21, %v11402_v11  ;;  %v1298_v54 = vcombine.low %v11712_v24, %v11719_v43 }
  0x55   :  { %18780 = vst [vmem:[#allocation42_spill] sm:$0xff] %v11888_v51  ;;  %v11901_v0 = vrot.slane %v1740_v22, %v11402_v11  ;;  %v11909_v7 = vsel %vm11451_vm6, %v865_v1, %v866_v56  ;;  %v11913_v42 = vsel %vm11451_vm6, %v868_v53, %v869_v30  ;;  %v11921_v21 = vsel %vm11451_vm6, %v874_v17, %v875_v10  ;;  %v11193_v22 = vld [vmem:[%s18191_s1 + $0xb8] sm:$0xff]  }
  0x56   :  { %4255 = vmatpush1.bf16.msra.mxu0 %v11191_v20  ;;  %18781 = vst [vmem:[#allocation43_spill] sm:$0xff] %v11894_v33  ;;  %v885_v20 = vrot.slane %v11868_v44, 7  ;;  %18782 = vst [vmem:[#allocation44_spill] sm:$0xff] %v11898_v6  ;;  %v9450_v56 = vrot.slane %v11816_v18, 9  ;;  %v881_v1 = vrot.slane %v879_v45, 2  ;;  %v884_v34 = vrot.slane %v882_v32, 2 }
  0x57   :  { %4256 = vmatprep.subr.bf16.mxu0 %v18766_v8  ;;  %18783 = vst [vmem:[#allocation45_spill] sm:$0xff] %v11901_v0  ;;  %18784 = vst [vmem:[#allocation46_spill] sm:$0xff] %v11909_v7  ;;  %v11929_v53 = vcombine.high %v11894_v33, %v11894_v33  ;;  %v888_v10 = vrot.slane %v11894_v33, 7  ;;  %v11937_v30 = vrot.slane %v109_v16, %v11402_v11  ;;  %v57_v16 = vld [vmem:[%s18192_s0 + $0xb0] sm:$0xff] }
  0x58   :  { %18785 = vst [vmem:[#allocation47_spill] sm:$0xff] %v11913_v42  ;;  %18787 = vst [vmem:[#allocation49_spill] sm:$0xff] %v11921_v21  ;;  %v887_v17 = vrot.slane %v885_v20, 2  ;;  %v9428_v47 = vpack.c.bf16 %v56_v2, %v56_v2  ;;  %v11194_v2 = vld [vmem:[%s18191_s1 + $0xc0] sm:$0xff]  }
  0x59   :  { %4069 = vmatmul.mubr.bf16.gmra.mrb[12].mxu0 %v1280_v39  ;;  %v1299_v39 = vcombine.low %v11737_v61, %v11728_v38  ;;  %18788 = vst [vmem:[#allocation50_spill] sm:$0xff] %v11929_v53  ;;  %18790 = vst [vmem:[#allocation52_spill] sm:$0xff] %v11937_v30  ;;  %v11946_v38 = vrot.slane %v1298_v54, %v11402_v11  ;;  %v11964_v54 = vsel %vm11451_vm6, %v9450_v56, %v879_v45 }
  0x5a   :  { %4076 = vmatprep.mubr.bf16.mxu0 %v1738_v60  ;;  %v11917_v60 = vsel %vm11451_vm6, %v871_v3, %v872_v12  ;;  %4257 = vmatpush1.bf16.msra.mxu0 %v11192_v50  ;;  %v11933_v12 = vrot.slane %v9427_v62, %v11402_v11  ;;  %v1755_v3 = vcombine.low %v11898_v6, %v11901_v0  ;;  %v11957_v0 = vld [vmem:[%s18192_s0 + $0xb8] sm:$0xff] }
  0x5b   :  { %18786 = vst [vmem:[#allocation48_spill] sm:$0xff] %v11917_v60  ;;  %4258 = vmatprep.subr.bf16.mxu0 %v18766_v8  ;;  %v1756_v50 = vcombine.low %v11909_v7, %v11913_v42  ;;  %v1757_v5 = vcombine.low %v11917_v60, %v11921_v21  ;;  %18791 = vst [vmem:[#allocation53_spill] sm:$0xff] %v11946_v38  ;;  %v11949_v62 = vrot.slane %v1299_v39, %v11402_v11 }
  0x5c   :  { %18789 = vst [vmem:[#allocation51_spill] sm:$0xff] %v11933_v12  ;;  %18793 = vst [vmem:[#allocation55_spill] sm:$0xff] %v11964_v54  ;;  %v11968_v39 = vsel %vm11451_vm6, %v881_v1, %v882_v32  ;;  %v11972_v6 = vsel %vm11451_vm6, %v884_v34, %v885_v20  ;;  %v891_v21 = vrot.slane %v11929_v53, 7  ;;  %v11983_v45 = vcombine.high %v11937_v30, %v11937_v30 }
  0x5d   :  { %18792 = vst [vmem:[#allocation54_spill] sm:$0xff] %v11949_v62  ;;  %18794 = vst [vmem:[#allocation56_spill] sm:$0xff] %v11968_v39  ;;  %v11987_v32 = vcombine.high %v11933_v12, %v11933_v12  ;;  %v894_v20 = vrot.slane %v11933_v12, 7  ;;  %v11991_v56 = vrot.slane %v1756_v50, %v11402_v11  ;;  %v11994_v1 = vrot.slane %v1757_v5, %v11402_v11  ;;  %v59_v50 = vld [vmem:[%s18192_s0 + $0xc0] sm:$0xff]  ;;  %v12012_v5 = vld [vmem:[%s18192_s0 + $0xc8] sm:$0xff] }
  0x5e   :  { %4259 = vmatpush1.bf16.msra.mxu0 %v11193_v22  ;;  %18795 = vst [vmem:[#allocation57_spill] sm:$0xff] %v11972_v6  ;;  %v11979_v22 = vsel %vm11451_vm6, %v887_v17, %v888_v10  ;;  %18797 = vst [vmem:[#allocation59_spill] sm:$0xff] %v11983_v45  ;;  %v110_v34 = vpack.c.bf16 %v11957_v0, %v57_v16  ;;  %v11998_v17 = vrot.slane %v9428_v47, %v11402_v11  ;;  %v11195_v47 = vld [vmem:[%s18191_s1 + $0xc8] sm:$0xff]  }
  0x5f   :  { %4260 = vmatprep.subr.bf16.mxu0 %v18766_v8  ;;  %18796 = vst [vmem:[#allocation58_spill] sm:$0xff] %v11979_v22  ;;  %18798 = vst [vmem:[#allocation60_spill] sm:$0xff] %v11987_v32  ;;  %v1314_v42 = vcombine.low %v11946_v38, %v11949_v62  ;;  %v1315_v60 = vcombine.low %v11771_v57, %v11760_v37  ;;  %v1773_v16 = vcombine.low %v11964_v54, %v11968_v39 }
  0x60   :  { %18799 = vst [vmem:[#allocation61_spill] sm:$0xff] %v11991_v56  ;;  %18800 = vst [vmem:[#allocation62_spill] sm:$0xff] %v11994_v1  ;;  %v1774_v38 = vcombine.low %v11972_v6, %v11979_v22  ;;  %v890_v7 = vrot.slane %v888_v10, 2  ;;  %v893_v62 = vrot.slane %v891_v21, 2  ;;  %v9451_v37 = vrot.slane %v11937_v30, 9 }
  0x61   :  { %4077 = vmatmul.mubr.bf16.gmra.mrb[16].mxu0 %v11888_v51  ;;  %18801 = vst [vmem:[#allocation63_spill] sm:$0xff] %v11998_v17  ;;  %v896_v51 = vrot.slane %v894_v20, 2  ;;  %v12029_v39 = vcombine.high %v11998_v17, %v11998_v17  ;;  %v12032_v22 = vrot.slane %v110_v34, %v11402_v11  ;;  %v111_v10 = vpack.c.bf16 %v12012_v5, %v59_v50 }
  0x62   :  { %4084 = vmatprep.mubr.bf16.mxu0 %v1755_v3  ;;  %v1316_v3 = vcombine.low %v11797_v19, %v11793_v13  ;;  %4261 = vmatpush1.bf16.msra.mxu0 %v11194_v2  ;;  %v897_v13 = vrot.slane %v11987_v32, 7  ;;  %v901_v2 = vrot.slane %v11983_v45, 7  ;;  %v1772_v19 = vcombine.low %v11991_v56, %v11994_v1  ;;  %v11196_v1 = vld [vmem:[%s18191_s1 + $0xd0] sm:$0xff]  }
  0x63   :  { %4262 = vmatprep.subr.bf16.mxu0 %v18766_v8  ;;  %18802 = vst [vmem:[#allocation64_spill] sm:$0xff] %v12032_v22  ;;  %v12036_v6 = vrot.slane %v1315_v60, %v11402_v11  ;;  %v12045_v56 = vrot.slane %v1773_v16, %v11402_v11  ;;  %v12048_v54 = vrot.slane %v1774_v38, %v11402_v11  ;;  %v61_v16 = vld [vmem:[%s18192_s0 + $0xd0] sm:$0xff] }
  0x64   :  { %v12039_v32 = vrot.slane %v1316_v3, %v11402_v11  ;;  %v12052_v34 = vsel %vm11451_vm6, %v890_v7, %v891_v21  ;;  %v12056_v60 = vsel %vm11451_vm6, %v893_v62, %v894_v20  ;;  %v12061_v3 = vsel %vm11451_vm6, %v896_v51, %v897_v13 }
  0x65   :  { %18803 = vst [vmem:[#allocation65_spill] sm:$0xff] %v12036_v6  ;;  %18805 = vst [vmem:[#allocation67_spill] sm:$0xff] %v12045_v56  ;;  %v12065_v50 = vsel %vm11451_vm6, %v9451_v37, %v901_v2  ;;  %v9429_v38 = vpack.c.bf16 %v11957_v0, %v11957_v0  ;;  %v904_v7 = vrot.slane %v11998_v17, 7  ;;  %v12072_v21 = vcombine.high %v12032_v22, %v12032_v22 }
  0x66   :  { %18804 = vst [vmem:[#allocation66_spill] sm:$0xff] %v12039_v32  ;;  %4263 = vmatpush1.bf16.msra.mxu0 %v11195_v47  ;;  %18806 = vst [vmem:[#allocation68_spill] sm:$0xff] %v12048_v54  ;;  %v910_v62 = vrot.slane %v12032_v22, 7  ;;  %v12077_v13 = vrot.slane %v111_v10, %v11402_v11  ;;  %v1332_v37 = vcombine.low %v11816_v18, %v11861_v9 }
  0x67   :  { %18807 = vst [vmem:[#allocation69_spill] sm:$0xff] %v12052_v34  ;;  %18808 = vst [vmem:[#allocation70_spill] sm:$0xff] %v12056_v60  ;;  %4264 = vmatprep.subr.bf16.mxu0 %v18766_v8  ;;  %v1333_v0 = vcombine.low %v11825_v15, %v11868_v44  ;;  %v1789_v51 = vcombine.low %v12045_v56, %v12048_v54  ;;  %v1790_v20 = vcombine.low %v12052_v34, %v12056_v60 }
  0x68   :  { %18809 = vst [vmem:[#allocation71_spill] sm:$0xff] %v12061_v3  ;;  %18810 = vst [vmem:[#allocation72_spill] sm:$0xff] %v12065_v50  ;;  %v1791_v47 = vcombine.low %v12061_v3, %v12065_v50  ;;  %v12103_v10 = vrot.slane %v9429_v38, %v11402_v11  ;;  %v903_v54 = vrot.slane %v901_v2, 2  ;;  %v9430_v56 = vpack.c.bf16 %v12012_v5, %v12012_v5 }
  0x69   :  { %4085 = vmatmul.mubr.bf16.gmra.mrb[20].mxu0 %v1314_v42  ;;  %18811 = vst [vmem:[#allocation73_spill] sm:$0xff] %v12072_v21  ;;  %v907_v42 = vrot.slane %v12029_v39, 7  ;;  %18812 = vst [vmem:[#allocation74_spill] sm:$0xff] %v12077_v13  ;;  %v912_v50 = vrot.slane %v910_v62, 2  ;;  %v913_v60 = vrot.slane %v12072_v21, 7  ;;  %v12110_v3 = vcombine.high %v12077_v13, %v12077_v13 }
  0x6a   :  { %4092 = vmatprep.mubr.bf16.mxu0 %v1772_v19  ;;  %4265 = vmatpush1.bf16.msra.mxu0 %v11196_v1  ;;  %v12085_v19 = vcombine.low %v12036_v6, %v12039_v32  ;;  %v12099_v1 = vld [vmem:[%s18192_s0 + $0xd8] sm:$0xff]  ;;  %18814 = vst [vmem:[#allocation76_spill] sm:$0xff] %v12103_v10  ;;  %v906_v32 = vrot.slane %v904_v7, 2  ;;  %v12113_v34 = vrot.slane %v1332_v37, %v11402_v11 }
  0x6b   :  { %4266 = vmatprep.subr.bf16.mxu0 %v18766_v8  ;;  %v909_v6 = vrot.slane %v907_v42, 2  ;;  %18815 = vst [vmem:[#allocation77_spill] sm:$0xff] %v12110_v3  ;;  %v12116_v44 = vrot.slane %v1333_v0, %v11402_v11  ;;  %v112_v2 = vpack.c.bf16 %v12099_v1, %v61_v16  ;;  %v12120_v38 = vrot.slane %v1790_v20, %v11402_v11 }
  0x6c   :  { %18813 = vst [vmem:[#allocation75_spill] sm:$0xff] %v12085_v19  ;;  %18816 = vst [vmem:[#allocation78_spill] sm:$0xff] %v12113_v34  ;;  %v12123_v5 = vrot.slane %v1791_v47, %v11402_v11  ;;  %v12128_v18 = vsel %vm11451_vm6, %v903_v54, %v904_v7  ;;  %v12132_v37 = vsel %vm11451_vm6, %v906_v32, %v907_v42  ;;  %v916_v20 = vrot.slane %v12103_v10, 7  ;;  %v11197_v47 = vld [vmem:[%s18191_s1 + $0xd8] sm:$0xff]  }
  0x6d   :  { %18817 = vst [vmem:[#allocation79_spill] sm:$0xff] %v12116_v44  ;;  %18818 = vst [vmem:[#allocation80_spill] sm:$0xff] %v12120_v38  ;;  %v12136_v0 = vcombine.high %v12103_v10, %v12103_v10  ;;  %v12144_v16 = vsel %vm11451_vm6, %v909_v6, %v910_v62  ;;  %v12148_v54 = vsel %vm11451_vm6, %v912_v50, %v913_v60  ;;  %v923_v7 = vrot.slane %v12110_v3, 7 }
  0x6e   :  { %18819 = vst [vmem:[#allocation81_spill] sm:$0xff] %v12123_v5  ;;  %18820 = vst [vmem:[#allocation82_spill] sm:$0xff] %v12128_v18  ;;  %v12151_v32 = vrot.slane %v9430_v56, %v11402_v11  ;;  %v1348_v42 = vcombine.low %v12113_v34, %v12116_v44  ;;  %4267 = vmatpush1.bf16.msra.mxu0 %v11197_v47  ;;  %v1806_v6 = vcombine.low %v12120_v38, %v12123_v5 }
  0x6f   :  { %18821 = vst [vmem:[#allocation83_spill] sm:$0xff] %v12132_v37  ;;  %18822 = vst [vmem:[#allocation84_spill] sm:$0xff] %v12136_v0  ;;  %v1349_v62 = vcombine.low %v11894_v33, %v11929_v53  ;;  %v1350_v50 = vcombine.low %v11933_v12, %v11937_v30  ;;  %v1807_v56 = vcombine.low %v12128_v18, %v12132_v37  ;;  %4268 = vmatprep.subr.bf16.mxu0 %v18766_v8 }
  0x70   :  { %18823 = vst [vmem:[#allocation85_spill] sm:$0xff] %v12144_v16  ;;  %18824 = vst [vmem:[#allocation86_spill] sm:$0xff] %v12148_v54  ;;  %v1808_v47 = vcombine.low %v12144_v16, %v12148_v54  ;;  %v915_v5 = vrot.slane %v913_v60, 2  ;;  %v918_v38 = vrot.slane %v916_v20, 2  ;;  %v919_v34 = vrot.slane %v12136_v0, 7  ;;  %v11198_v0 = vld [vmem:[%s18191_s1 + $0xe0] sm:$0xff]  }
  0x71   :  { %4093 = vmatmul.mubr.bf16.gmra.mrb[24].mxu0 %v12085_v19  ;;  %18825 = vst [vmem:[#allocation87_spill] sm:$0xff] %v12151_v32  ;;  %v12157_v19 = vrot.slane %v112_v2, %v11402_v11  ;;  %v64_v2 = vld [vmem:[%s18192_s0 + $0xe8] sm:$0xff]  ;;  %v9452_v44 = vrot.slane %v12077_v13, 9  ;;  %v925_v37 = vrot.slane %v923_v7, 2  ;;  %v926_v18 = vrot.slane %v12151_v32, 7 }
  0x72   :  { %4100 = vmatprep.mubr.bf16.mxu0 %v1789_v51  ;;  %v63_v51 = vld [vmem:[%s18192_s0 + $0xe0] sm:$0xff]  ;;  %v12181_v30 = vcombine.high %v12151_v32, %v12151_v32  ;;  %v9431_v53 = vpack.c.bf16 %v12099_v1, %v12099_v1  ;;  %v12190_v54 = vrot.slane %v1349_v62, %v11402_v11  ;;  %v12193_v16 = vrot.slane %v1350_v50, %v11402_v11 }
  0x73   :  { %18826 = vst [vmem:[#allocation88_spill] sm:$0xff] %v12157_v19  ;;  %v12187_v12 = vcombine.high %v12157_v19, %v12157_v19  ;;  %v113_v60 = vpack.c.bf16 %v64_v2, %v63_v51  ;;  %v12199_v33 = vrot.slane %v1807_v56, %v11402_v11  ;;  %v12202_v1 = vrot.slane %v1808_v47, %v11402_v11 }
  0x74   :  { %18827 = vst [vmem:[#allocation89_spill] sm:$0xff] %v12181_v30  ;;  %18829 = vst [vmem:[#allocation91_spill] sm:$0xff] %v12190_v54  ;;  %v12206_v51 = vsel %vm11451_vm6, %v915_v5, %v916_v20  ;;  %v12210_v62 = vsel %vm11451_vm6, %v918_v38, %v919_v34  ;;  %v12214_v50 = vsel %vm11451_vm6, %v9452_v44, %v923_v7  ;;  %v929_v56 = vrot.slane %v12181_v30, 7  ;;  %v65_v5 = vld [vmem:[%s18192_s0 + $0xf0] sm:$0xff]  ;;  %v66_v34 = vld [vmem:[%s18192_s0 + $0xf8] sm:$0xff] }
  0x75   :  { %18828 = vst [vmem:[#allocation90_spill] sm:$0xff] %v12187_v12  ;;  %18830 = vst [vmem:[#allocation92_spill] sm:$0xff] %v12193_v16  ;;  %v932_v47 = vrot.slane %v12157_v19, 7  ;;  %4269 = vmatpush1.bf16.msra.mxu0 %v11198_v0  ;;  %v11199_v44 = vld [vmem:[%s18191_s1 + $0xe8] sm:$0xff]   ;;  %v12232_v38 = vrot.slane %v9431_v53, %v11402_v11  ;;  %v9432_v20 = vpack.c.bf16 %v64_v2, %v64_v2  ;;  %v928_v57 = vrot.slane %v926_v18, 2 }
  0x76   :  { %18831 = vst [vmem:[#allocation93_spill] sm:$0xff] %v12199_v33  ;;  %18832 = vst [vmem:[#allocation94_spill] sm:$0xff] %v12202_v1  ;;  %v12236_v7 = vrot.slane %v113_v60, %v11402_v11  ;;  %4270 = vmatprep.subr.bf16.mxu0 %v18766_v8  ;;  %v1367_v0 = vcombine.low %v12029_v39, %v12032_v22  ;;  %v1365_v9 = vcombine.low %v12190_v54, %v12193_v16 }
  0x77   :  { %18833 = vst [vmem:[#allocation95_spill] sm:$0xff] %v12206_v51  ;;  %18834 = vst [vmem:[#allocation96_spill] sm:$0xff] %v12210_v62  ;;  %v1824_v53 = vcombine.low %v12206_v51, %v12210_v62  ;;  %v114_v15 = vpack.c.bf16 %v66_v34, %v65_v5  ;;  %v1823_v60 = vcombine.low %v12199_v33, %v12202_v1  ;;  %v931_v63 = vrot.slane %v929_v56, 2 }
  0x78   :  { %18835 = vst [vmem:[#allocation97_spill] sm:$0xff] %v12214_v50  ;;  %18837 = vst [vmem:[#allocation99_spill] sm:$0xff] %v12232_v38  ;;  %v934_v43 = vrot.slane %v932_v47, 2  ;;  %v938_v22 = vrot.slane %v12232_v38, 7  ;;  %v12257_v16 = vcombine.high %v12236_v7, %v12236_v7  ;;  %v12270_v1 = vcombine.high %v12232_v38, %v12232_v38 }
  0x79   :  { %4101 = vmatmul.mubr.bf16.gmra.mrb[28].mxu0 %v1348_v42  ;;  %v12218_v42 = vsel %vm11451_vm6, %v925_v37, %v926_v18  ;;  %v935_v37 = vrot.slane %v12187_v12, 7  ;;  %18838 = vst [vmem:[#allocation100_spill] sm:$0xff] %v12236_v7  ;;  %v12264_v18 = vrot.slane %v1367_v0, %v11402_v11  ;;  %v12276_v33 = vrot.slane %v1824_v53, %v11402_v11 }
  0x7a   :  { %4108 = vmatprep.mubr.bf16.mxu0 %v1806_v6  ;;  %18836 = vst [vmem:[#allocation98_spill] sm:$0xff] %v12218_v42  ;;  %v1366_v6 = vcombine.low %v11983_v45, %v11998_v17  ;;  %v1825_v2 = vcombine.low %v12214_v50, %v12218_v42  ;;  %4271 = vmatpush1.bf16.msra.mxu0 %v11199_v44  ;;  %18840 = vst [vmem:[#allocation102_spill] sm:$0xff] %v12257_v16  ;;  %v940_v53 = vrot.slane %v938_v22, 2 }
  0x7b   :  { %v937_v45 = vrot.slane %v935_v37, 2  ;;  %v12253_v17 = vrot.slane %v9432_v20, %v11402_v11  ;;  %4272 = vmatprep.subr.bf16.mxu0 %v18766_v8  ;;  %18842 = vst [vmem:[#allocation104_spill] sm:$0xff] %v12264_v18  ;;  %v1383_v44 = vcombine.low %v12072_v21, %v12103_v10  ;;  %18843 = vst [vmem:[#allocation105_spill] sm:$0xff] %v12270_v1  ;;  %v11200_v20 = vld [vmem:[%s18191_s1 + $0xf0] sm:$0xff]  }
  0x7c   :  { %v12261_v5 = vrot.slane %v1366_v6, %v11402_v11  ;;  %18844 = vst [vmem:[#allocation106_spill] sm:$0xff] %v12276_v33  ;;  %v12279_v6 = vrot.slane %v1825_v2, %v11402_v11  ;;  %v9433_v0 = vpack.c.bf16 %v66_v34, %v66_v34  ;;  %v12282_v42 = vrot.slane %v114_v15, %v11402_v11  ;;  %v67_v34 = vld [vmem:[%s18192_s0 + $0x100] sm:$0xff]  ;;  %v68_v15 = vld [vmem:[%s18192_s0 + $0x108] sm:$0xff] }
  0x7d   :  { %18839 = vst [vmem:[#allocation101_spill] sm:$0xff] %v12253_v17  ;;  %v12286_v62 = vsel %vm11451_vm6, %v928_v57, %v929_v56  ;;  %v12290_v50 = vsel %vm11451_vm6, %v931_v63, %v932_v47  ;;  %v11201_v57 = vld [vmem:[%s18191_s1 + $0xf8] sm:$0xff]   ;;  %v12307_v63 = vsel %vm11451_vm6, %v937_v45, %v938_v22  ;;  %v945_v56 = vrot.slane %v12257_v16, 7 }
  0x7e   :  { %18841 = vst [vmem:[#allocation103_spill] sm:$0xff] %v12261_v5  ;;  %18845 = vst [vmem:[#allocation107_spill] sm:$0xff] %v12279_v6  ;;  %4273 = vmatpush1.bf16.msra.mxu0 %v11200_v20  ;;  %v948_v47 = vrot.slane %v12253_v17, 7  ;;  %v941_v2 = vrot.slane %v12270_v1, 7  ;;  %v12322_v45 = vcombine.low %v12261_v5, %v12264_v18  ;;  %v12325_v20 = vrot.slane %v9433_v0, %v11402_v11 }
  0x7f   :  { %18846 = vst [vmem:[#allocation108_spill] sm:$0xff] %v12282_v42  ;;  %18847 = vst [vmem:[#allocation109_spill] sm:$0xff] %v12286_v62  ;;  %4274 = vmatprep.subr.bf16.mxu0 %v18766_v8  ;;  %v12329_v51 = vcombine.high %v12282_v42, %v12282_v42  ;;  %v115_v54 = vpack.c.bf16 %v68_v15, %v67_v34  ;;  %v1841_v22 = vcombine.low %v12286_v62, %v12290_v50 }
  0x80   :  { %18848 = vst [vmem:[#allocation110_spill] sm:$0xff] %v12290_v50  ;;  %18850 = vst [vmem:[#allocation112_spill] sm:$0xff] %v12307_v63  ;;  %v9434_v10 = vpack.c.bf16 %v68_v15, %v68_v15  ;;  %v12338_v18 = vrot.slane %v1383_v44, %v11402_v11  ;;  %v947_v0 = vrot.slane %v945_v56, 2  ;;  %v950_v5 = vrot.slane %v948_v47, 2 }
  0x81   :  { %4109 = vmatmul.mubr.bf16.gmra.mrb[32].mxu0 %v1365_v9  ;;  %v12294_v9 = vsel %vm11451_vm6, %v934_v43, %v935_v37  ;;  %v12311_v43 = vcombine.high %v12253_v17, %v12253_v17  ;;  %v1384_v37 = vcombine.low %v12077_v13, %v12110_v3  ;;  %18852 = vst [vmem:[#allocation114_spill] sm:$0xff] %v12322_v45  ;;  %18853 = vst [vmem:[#allocation115_spill] sm:$0xff] %v12325_v20 }
  0x82   :  { %4116 = vmatprep.mubr.bf16.mxu0 %v1823_v60  ;;  %18849 = vst [vmem:[#allocation111_spill] sm:$0xff] %v12294_v9  ;;  %v9453_v60 = vrot.slane %v12236_v7, 9  ;;  %18854 = vst [vmem:[#allocation116_spill] sm:$0xff] %v12329_v51  ;;  %v1840_v3 = vcombine.low %v12276_v33, %v12279_v6  ;;  %v1842_v1 = vcombine.low %v12294_v9, %v12307_v63  ;;  %4275 = vmatpush1.bf16.msra.mxu0 %v11201_v57 }
  0x83   :  { %18851 = vst [vmem:[#allocation113_spill] sm:$0xff] %v12311_v43  ;;  %18855 = vst [vmem:[#allocation117_spill] sm:$0xff] %v12338_v18  ;;  %v951_v13 = vrot.slane %v12311_v43, 7  ;;  %4476 = vmatprep.subr.bf16.mxu0 %v18766_v8  ;;  %v12343_v34 = vrot.slane %v1384_v37, %v11402_v11  ;;  %v12347_v6 = vsel %vm11451_vm6, %v940_v53, %v941_v2  ;;  %v954_v44 = vrot.slane %v12282_v42, 7 }
  0x84   :  { %18857 = vst [vmem:[#allocation119_spill] sm:$0xff] %v12347_v6  ;;  %v12351_v15 = vsel %vm11451_vm6, %v9453_v60, %v945_v56  ;;  %v12357_v57 = vcombine.high %v12325_v20, %v12325_v20  ;;  %v957_v33 = vrot.slane %v12329_v51, 7  ;;  %v960_v37 = vrot.slane %v12325_v20, 7 }
  0x85   :  { %18856 = vst [vmem:[#allocation118_spill] sm:$0xff] %v12343_v34  ;;  %18858 = vst [vmem:[#allocation120_spill] sm:$0xff] %v12351_v15  ;;  %v12362_v63 = vrot.slane %v115_v54, %v11402_v11  ;;  %v12365_v53 = vrot.slane %v1841_v22, %v11402_v11  ;;  %v12368_v56 = vrot.slane %v1842_v1, %v11402_v11  ;;  %v69_v1 = vld [vmem:[%s18192_s0 + $0x110] sm:$0xff] }
  0x86   :  { %18859 = vst [vmem:[#allocation121_spill] sm:$0xff] %v12357_v57  ;;  %v12371_v2 = vrot.slane %v9434_v10, %v11402_v11  ;;  %v1400_v60 = vcombine.low %v12151_v32, %v12181_v30  ;;  %v1401_v50 = vcombine.low %v12157_v19, %v12187_v12  ;;  %v12379_v54 = vsel %vm11451_vm6, %v947_v0, %v948_v47  ;;  %v70_v10 = vld [vmem:[%s18192_s0 + $0x118] sm:$0xff] }
  0x87   :  { %18860 = vst [vmem:[#allocation122_spill] sm:$0xff] %v12362_v63  ;;  %18861 = vst [vmem:[#allocation123_spill] sm:$0xff] %v12365_v53  ;;  %v1399_v22 = vcombine.low %v12338_v18, %v12343_v34  ;;  %v1858_v9 = vcombine.low %v12347_v6, %v12351_v15  ;;  %v953_v47 = vrot.slane %v951_v13, 2  ;;  %v956_v0 = vrot.slane %v954_v44, 2  ;;  %v72_v6 = vld [vmem:[%s18192_s0 + $0x128] sm:$0xff] }
  0x88   :  { %18862 = vst [vmem:[#allocation124_spill] sm:$0xff] %v12368_v56  ;;  %18863 = vst [vmem:[#allocation125_spill] sm:$0xff] %v12371_v2  ;;  %v959_v62 = vrot.slane %v957_v33, 2  ;;  %v12398_v12 = vcombine.high %v12362_v63, %v12362_v63  ;;  %v1857_v30 = vcombine.low %v12365_v53, %v12368_v56  ;;  %v116_v34 = vpack.c.bf16 %v70_v10, %v69_v1 }
  0x89   :  { %4117 = vmatmul.mubr.bf16.gmra.mrb[36].mxu0 %v12322_v45  ;;  %18864 = vst [vmem:[#allocation126_spill] sm:$0xff] %v12379_v54  ;;  %v962_v45 = vrot.slane %v960_v37, 2  ;;  %v12406_v15 = vcombine.high %v12371_v2, %v12371_v2  ;;  %v12415_v18 = vrot.slane %v1400_v60, %v11402_v11  ;;  %v12418_v56 = vrot.slane %v1401_v50, %v11402_v11 }
  0x8a   :  { %4124 = vmatprep.mubr.bf16.mxu0 %v1840_v3  ;;  %v12383_v3 = vsel %vm11451_vm6, %v950_v5, %v951_v13  ;;  %v963_v5 = vrot.slane %v12357_v57, 7  ;;  %18866 = vst [vmem:[#allocation128_spill] sm:$0xff] %v12398_v12  ;;  %v71_v13 = vld [vmem:[%s18192_s0 + $0x120] sm:$0xff]  ;;  %v12421_v1 = vrot.slane %v1858_v9, %v11402_v11  ;;  %v12425_v53 = vsel %vm11451_vm6, %v953_v47, %v954_v44 }
  0x8b   :  { %18865 = vst [vmem:[#allocation127_spill] sm:$0xff] %v12383_v3  ;;  %v1859_v19 = vcombine.low %v12379_v54, %v12383_v3  ;;  %18867 = vst [vmem:[#allocation129_spill] sm:$0xff] %v12406_v15  ;;  %v12429_v3 = vsel %vm11451_vm6, %v956_v0, %v957_v33  ;;  %v9435_v54 = vpack.c.bf16 %v70_v10, %v70_v10  ;;  %v967_v9 = vrot.slane %v12398_v12, 7 }
  0x8c   :  { %18868 = vst [vmem:[#allocation130_spill] sm:$0xff] %v12415_v18  ;;  %18869 = vst [vmem:[#allocation131_spill] sm:$0xff] %v12418_v56  ;;  %v12433_v60 = vsel %vm11451_vm6, %v959_v62, %v960_v37  ;;  %v12437_v50 = vsel %vm11451_vm6, %v962_v45, %v963_v5  ;;  %v117_v57 = vpack.c.bf16 %v72_v6, %v71_v13  ;;  %v970_v10 = vrot.slane %v12371_v2, 7 }
  0x8d   :  { %18870 = vst [vmem:[#allocation132_spill] sm:$0xff] %v12421_v1  ;;  %18871 = vst [vmem:[#allocation133_spill] sm:$0xff] %v12425_v53  ;;  %v12441_v44 = vrot.slane %v1859_v19, %v11402_v11  ;;  %v12444_v33 = vrot.slane %v116_v34, %v11402_v11  ;;  %v1417_v62 = vcombine.low %v12232_v38, %v12236_v7  ;;  %v9454_v47 = vrot.slane %v12362_v63, 9 }
  0x8e   :  { %18872 = vst [vmem:[#allocation134_spill] sm:$0xff] %v12429_v3  ;;  %18873 = vst [vmem:[#allocation135_spill] sm:$0xff] %v12433_v60  ;;  %v1418_v45 = vcombine.low %v12257_v16, %v12253_v17  ;;  %v12454_v37 = vcombine.low %v12415_v18, %v12418_v56  ;;  %v1876_v19 = vcombine.low %v12433_v60, %v12437_v50  ;;  %v969_v0 = vrot.slane %v967_v9, 2 }
  0x8f   :  { %18874 = vst [vmem:[#allocation136_spill] sm:$0xff] %v12437_v50  ;;  %18875 = vst [vmem:[#allocation137_spill] sm:$0xff] %v12441_v44  ;;  %v12461_v34 = vrot.slane %v9435_v54, %v11402_v11  ;;  %v12466_v5 = vcombine.high %v12444_v33, %v12444_v33  ;;  %v12469_v13 = vrot.slane %v117_v57, %v11402_v11  ;;  %v972_v18 = vrot.slane %v970_v10, 2  ;;  %v74_v57 = vld [vmem:[%s18192_s0 + $0x138] sm:$0xff] }
  0x90   :  { %18876 = vst [vmem:[#allocation138_spill] sm:$0xff] %v12444_v33  ;;  %18877 = vst [vmem:[#allocation139_spill] sm:$0xff] %v12454_v37  ;;  %v1874_v56 = vcombine.low %v12421_v1, %v12441_v44  ;;  %v976_v50 = vrot.slane %v12444_v33, 7  ;;  %v12475_v54 = vrot.slane %v1417_v62, %v11402_v11  ;;  %v12478_v60 = vrot.slane %v1418_v45, %v11402_v11 }
  0x91   :  { %4125 = vmatmul.mubr.bf16.gmra.mrb[40].mxu0 %v1399_v22  ;;  %v973_v22 = vrot.slane %v12406_v15, 7  ;;  %18878 = vst [vmem:[#allocation140_spill] sm:$0xff] %v12461_v34  ;;  %18879 = vst [vmem:[#allocation141_spill] sm:$0xff] %v12466_v5  ;;  %v9436_v17 = vpack.c.bf16 %v72_v6, %v72_v6  ;;  %v12490_v1 = vrot.slane %v1876_v19, %v11402_v11 }
  0x92   :  { %4132 = vmatprep.mubr.bf16.mxu0 %v1857_v30  ;;  %v1875_v30 = vcombine.low %v12425_v53, %v12429_v3  ;;  %18880 = vst [vmem:[#allocation142_spill] sm:$0xff] %v12469_v13  ;;  %18881 = vst [vmem:[#allocation143_spill] sm:$0xff] %v12475_v54  ;;  %v73_v53 = vld [vmem:[%s18192_s0 + $0x130] sm:$0xff]  ;;  %v12494_v62 = vcombine.high %v12461_v34, %v12461_v34  ;;  %v12499_v45 = vsel %vm11451_vm6, %v9454_v47, %v967_v9 }
  0x93   :  { %v975_v3 = vrot.slane %v973_v22, 2  ;;  %18882 = vst [vmem:[#allocation144_spill] sm:$0xff] %v12478_v60  ;;  %18884 = vst [vmem:[#allocation146_spill] sm:$0xff] %v12490_v1  ;;  %v12503_v7 = vsel %vm11451_vm6, %v969_v0, %v970_v10  ;;  %v12507_v6 = vcombine.high %v12469_v13, %v12469_v13  ;;  %v12512_v19 = vsel %vm11451_vm6, %v972_v18, %v973_v22 }
  0x94   :  { %v12487_v44 = vrot.slane %v1875_v30, %v11402_v11  ;;  %18885 = vst [vmem:[#allocation147_spill] sm:$0xff] %v12494_v62  ;;  %18886 = vst [vmem:[#allocation148_spill] sm:$0xff] %v12499_v45  ;;  %v979_v30 = vrot.slane %v12466_v5, 7  ;;  %v982_v9 = vrot.slane %v12461_v34, 7  ;;  %v118_v47 = vpack.c.bf16 %v74_v57, %v73_v53  ;;  %v75_v53 = vld [vmem:[%s18192_s0 + $0x140] sm:$0xff] }
  0x95   :  { %18887 = vst [vmem:[#allocation149_spill] sm:$0xff] %v12503_v7  ;;  %18888 = vst [vmem:[#allocation150_spill] sm:$0xff] %v12507_v6  ;;  %v1433_v10 = vcombine.low %v12475_v54, %v12478_v60  ;;  %v12522_v0 = vrot.slane %v9436_v17, %v11402_v11  ;;  %v1434_v18 = vcombine.low %v12311_v43, %v12282_v42  ;;  %v76_v54 = vld [vmem:[%s18192_s0 + $0x148] sm:$0xff]  ;;  %v985_v60 = vrot.slane %v12494_v62, 7 }
  0x96   :  { %18883 = vst [vmem:[#allocation145_spill] sm:$0xff] %v12487_v44  ;;  %18889 = vst [vmem:[#allocation151_spill] sm:$0xff] %v12512_v19  ;;  %v1435_v22 = vcombine.low %v12329_v51, %v12325_v20  ;;  %v1892_v17 = vcombine.low %v12499_v45, %v12503_v7  ;;  %v984_v42 = vrot.slane %v982_v9, 2  ;;  %v989_v20 = vrot.slane %v12507_v6, 7 }
  0x97   :  { %18891 = vst [vmem:[#allocation153_spill] sm:$0xff] %v12522_v0  ;;  %v12544_v51 = vrot.slane %v118_v47, %v11402_v11  ;;  %v12548_v43 = vcombine.high %v12522_v0, %v12522_v0  ;;  %v119_v16 = vpack.c.bf16 %v76_v54, %v75_v53  ;;  %v12551_v7 = vrot.slane %v1434_v18, %v11402_v11 }
  0x98   :  { %v9437_v18 = vpack.c.bf16 %v74_v57, %v74_v57  ;;  %v991_v45 = vrot.slane %v989_v20, 2 }
  0x99   :  { %4133 = vmatmul.mubr.bf16.gmra.mrb[44].mxu0 %v12454_v37  ;;  %v12516_v37 = vsel %vm11451_vm6, %v975_v3, %v976_v50  ;;  %v978_v3 = vrot.slane %v976_v50, 2  ;;  %v9455_v50 = vrot.slane %v12469_v13, 9  ;;  %18892 = vst [vmem:[#allocation154_spill] sm:$0xff] %v12544_v51  ;;  %18893 = vst [vmem:[#allocation155_spill] sm:$0xff] %v12548_v43  ;;  %v12586_v57 = vrot.slane %v119_v16, %v11402_v11 }
  0x9a   :  { %4140 = vmatprep.mubr.bf16.mxu0 %v1874_v56  ;;  %18890 = vst [vmem:[#allocation152_spill] sm:$0xff] %v12516_v37  ;;  %v1891_v56 = vcombine.low %v12487_v44, %v12490_v1  ;;  %v1893_v1 = vcombine.low %v12512_v19, %v12516_v37  ;;  %v981_v44 = vrot.slane %v979_v30, 2  ;;  %18894 = vst [vmem:[#allocation156_spill] sm:$0xff] %v12551_v7 }
  0x9b   :  { %v12554_v37 = vrot.slane %v1435_v22, %v11402_v11  ;;  %v12558_v62 = vsel %vm11451_vm6, %v978_v3, %v979_v30  ;;  %v12561_v19 = vrot.slane %v1892_v17, %v11402_v11  ;;  %v12572_v22 = vsel %vm11451_vm6, %v984_v42, %v985_v60  ;;  %18903 = vst [vmem:[#allocation165_spill] sm:$0xff] %v12586_v57  ;;  %v12602_v17 = vld [vmem:[%s18192_s0 + $0x158] sm:$0xff] }
  0x9c   :  { %18896 = vst [vmem:[#allocation158_spill] sm:$0xff] %v12558_v62  ;;  %v12564_v47 = vrot.slane %v1893_v1, %v11402_v11  ;;  %v12568_v53 = vsel %vm11451_vm6, %v981_v44, %v982_v9  ;;  %18900 = vst [vmem:[#allocation162_spill] sm:$0xff] %v12572_v22  ;;  %v12576_v30 = vsel %vm11451_vm6, %v9455_v50, %v989_v20  ;;  %v998_v3 = vrot.slane %v12544_v51, 7 }
  0x9d   :  { %18895 = vst [vmem:[#allocation157_spill] sm:$0xff] %v12554_v37  ;;  %18897 = vst [vmem:[#allocation159_spill] sm:$0xff] %v12561_v19  ;;  %v12582_v1 = vcombine.high %v12544_v51, %v12544_v51  ;;  %v995_v44 = vrot.slane %v12548_v43, 7  ;;  %v12590_v42 = vcombine.low %v12551_v7, %v12554_v37  ;;  %v1451_v60 = vcombine.low %v12362_v63, %v12398_v12 }
  0x9e   :  { %18898 = vst [vmem:[#allocation160_spill] sm:$0xff] %v12564_v47  ;;  %18899 = vst [vmem:[#allocation161_spill] sm:$0xff] %v12568_v53  ;;  %v1452_v9 = vcombine.low %v12371_v2, %v12406_v15  ;;  %v1908_v16 = vcombine.low %v12561_v19, %v12564_v47  ;;  %v1909_v50 = vcombine.low %v12558_v62, %v12568_v53  ;;  %v1000_v63 = vrot.slane %v998_v3, 2 }
  0x9f   :  { %18901 = vst [vmem:[#allocation163_spill] sm:$0xff] %v12576_v30  ;;  %18902 = vst [vmem:[#allocation164_spill] sm:$0xff] %v12582_v1  ;;  %v1910_v37 = vcombine.low %v12572_v22, %v12576_v30  ;;  %v12611_v7 = vrot.slane %v9437_v18, %v11402_v11  ;;  %v9438_v12 = vpack.c.bf16 %v76_v54, %v76_v54  ;;  %v997_v2 = vrot.slane %v995_v44, 2 }
  0xa0   :  { %18904 = vst [vmem:[#allocation166_spill] sm:$0xff] %v12590_v42  ;;  %v1001_v38 = vrot.slane %v12582_v1, 7  ;;  %v12616_v32 = vcombine.high %v12586_v57, %v12586_v57  ;;  %v12620_v19 = vrot.slane %v1451_v60, %v11402_v11  ;;  %v12623_v30 = vrot.slane %v1452_v9, %v11402_v11  ;;  %v80_v60 = vld [vmem:[%s18192_s0 + $0x168] sm:$0xff] }
  0xa1   :  { %4141 = vmatmul.mubr.bf16.gmra.mrb[48].mxu0 %v1433_v10  ;;  %v992_v10 = vrot.slane %v12522_v0, 7  ;;  %18905 = vst [vmem:[#allocation167_spill] sm:$0xff] %v12611_v7  ;;  %v12627_v20 = vrot.slane %v1909_v50, %v11402_v11  ;;  %v12630_v54 = vrot.slane %v1910_v37, %v11402_v11  ;;  %v1004_v18 = vrot.slane %v12611_v7, 7 }
  0xa2   :  { %4148 = vmatprep.mubr.bf16.mxu0 %v1891_v56  ;;  %v77_v56 = vld [vmem:[%s18192_s0 + $0x150] sm:$0xff]  ;;  %18906 = vst [vmem:[#allocation168_spill] sm:$0xff] %v12616_v32  ;;  %18907 = vst [vmem:[#allocation169_spill] sm:$0xff] %v12620_v19  ;;  %v12648_v37 = vrot.slane %v9438_v12, %v11402_v11  ;;  %v12652_v53 = vcombine.high %v12611_v7, %v12611_v7  ;;  %v12656_v22 = vsel %vm11451_vm6, %v997_v2, %v998_v3 }
  0xa3   :  { %v994_v15 = vrot.slane %v992_v10, 2  ;;  %v120_v47 = vpack.c.bf16 %v12602_v17, %v77_v56  ;;  %18908 = vst [vmem:[#allocation170_spill] sm:$0xff] %v12623_v30  ;;  %18909 = vst [vmem:[#allocation171_spill] sm:$0xff] %v12627_v20  ;;  %v79_v56 = vld [vmem:[%s18192_s0 + $0x160] sm:$0xff]  ;;  %v12641_v9 = vsel %vm11451_vm6, %v991_v45, %v992_v10  ;;  %v1011_v45 = vrot.slane %v12616_v32, 7 }
  0xa4   :  { %18910 = vst [vmem:[#allocation172_spill] sm:$0xff] %v12630_v54  ;;  %18911 = vst [vmem:[#allocation173_spill] sm:$0xff] %v12641_v9  ;;  %v1467_v12 = vcombine.low %v12620_v19, %v12623_v30  ;;  %v1468_v10 = vcombine.low %v12444_v33, %v12466_v5  ;;  %v121_v2 = vpack.c.bf16 %v80_v60, %v79_v56  ;;  %v1003_v62 = vrot.slane %v1001_v38, 2 }
  0xa5   :  { %v12645_v50 = vsel %vm11451_vm6, %v994_v15, %v995_v44  ;;  %18913 = vst [vmem:[#allocation175_spill] sm:$0xff] %v12652_v53  ;;  %18914 = vst [vmem:[#allocation176_spill] sm:$0xff] %v12656_v22  ;;  %v12664_v15 = vrot.slane %v120_v47, %v11402_v11  ;;  %v1469_v44 = vcombine.low %v12461_v34, %v12469_v13  ;;  %v1007_v19 = vrot.slane %v12652_v53, 7 }
  0xa6   :  { %18912 = vst [vmem:[#allocation174_spill] sm:$0xff] %v12645_v50  ;;  %v1925_v3 = vcombine.low %v12627_v20, %v12630_v54  ;;  %v9456_v30 = vrot.slane %v12586_v57, 9  ;;  %v12682_v5 = vcombine.high %v12648_v37, %v12648_v37  ;;  %v1013_v56 = vrot.slane %v1011_v45, 2 }
  0xa7   :  { %v1014_v13 = vrot.slane %v12648_v37, 7  ;;  %v9439_v54 = vpack.c.bf16 %v12602_v17, %v12602_v17  ;;  %v12692_v20 = vrot.slane %v1468_v10, %v11402_v11  ;;  %v1485_v17 = vcombine.low %v12507_v6, %v12522_v0 }
  0xa8   :  { %18916 = vst [vmem:[#allocation178_spill] sm:$0xff] %v12682_v5  ;;  %v12707_v53 = vsel %vm11451_vm6, %v1003_v62, %v1004_v18  ;;  %v12718_v10 = vsel %vm11451_vm6, %v9456_v30, %v1011_v45  ;;  %v82_v62 = vld [vmem:[%s18192_s0 + $0x178] sm:$0xff]  ;;  %v1020_v30 = vrot.slane %v12664_v15, 7  ;;  %v1486_v45 = vcombine.low %v12548_v43, %v12544_v51 }
  0xa9   :  { %4149 = vmatmul.mubr.bf16.gmra.mrb[52].mxu0 %v12590_v42  ;;  %v1006_v42 = vrot.slane %v1004_v18, 2  ;;  %18918 = vst [vmem:[#allocation180_spill] sm:$0xff] %v12692_v20  ;;  %18922 = vst [vmem:[#allocation184_spill] sm:$0xff] %v12707_v53  ;;  %v12729_v18 = vsel %vm11451_vm6, %v1013_v56, %v1014_v13  ;;  %v1016_v0 = vrot.slane %v1014_v13, 2 }
  0xaa   :  { %4156 = vmatprep.mubr.bf16.mxu0 %v1908_v16  ;;  %v12660_v16 = vsel %vm11451_vm6, %v1000_v63, %v1001_v38  ;;  %v1926_v63 = vcombine.low %v12641_v9, %v12645_v50  ;;  %v12689_v38 = vcombine.high %v12664_v15, %v12664_v15  ;;  %v12695_v50 = vrot.slane %v121_v2, %v11402_v11  ;;  %v81_v2 = vld [vmem:[%s18192_s0 + $0x170] sm:$0xff] }
  0xab   :  { %18915 = vst [vmem:[#allocation177_spill] sm:$0xff] %v12660_v16  ;;  %v1927_v47 = vcombine.low %v12656_v22, %v12660_v16  ;;  %v9440_v16 = vpack.c.bf16 %v80_v60, %v80_v60  ;;  %v12698_v22 = vrot.slane %v1469_v44, %v11402_v11  ;;  %18925 = vst [vmem:[#allocation187_spill] sm:$0xff] %v12718_v10  ;;  %v1017_v44 = vrot.slane %v12682_v5, 7 }
  0xac   :  { %18917 = vst [vmem:[#allocation179_spill] sm:$0xff] %v12689_v38  ;;  %18919 = vst [vmem:[#allocation181_spill] sm:$0xff] %v12695_v50  ;;  %v12701_v9 = vrot.slane %v1926_v63, %v11402_v11  ;;  %v12743_v63 = vcombine.high %v12695_v50, %v12695_v50  ;;  %v122_v6 = vpack.c.bf16 %v82_v62, %v81_v2  ;;  %v1022_v34 = vrot.slane %v1020_v30, 2 }
  0xad   :  { %18920 = vst [vmem:[#allocation182_spill] sm:$0xff] %v12698_v22  ;;  %v12710_v60 = vrot.slane %v1927_v47, %v11402_v11  ;;  %18926 = vst [vmem:[#allocation188_spill] sm:$0xff] %v12729_v18  ;;  %v1484_v47 = vcombine.low %v12692_v20, %v12698_v22  ;;  %v1019_v43 = vrot.slane %v1017_v44, 2  ;;  %v12762_v22 = vrot.slane %v1486_v45, %v11402_v11 }
  0xae   :  { %18921 = vst [vmem:[#allocation183_spill] sm:$0xff] %v12701_v9  ;;  %18929 = vst [vmem:[#allocation191_spill] sm:$0xff] %v12743_v63 }
  0xaf   :  { %18923 = vst [vmem:[#allocation185_spill] sm:$0xff] %v12710_v60  ;;  %v1942_v51 = vcombine.low %v12701_v9, %v12710_v60  ;;  %18932 = vst [vmem:[#allocation194_spill] sm:$0xff] %v12762_v22  ;;  %v1033_v60 = vrot.slane %v12743_v63, 7  ;;  %v1502_v9 = vcombine.low %v12582_v1, %v12611_v7  ;;  %v12789_v20 = vsel %vm11451_vm6, %v1019_v43, %v1020_v30 }
  0xb0   :  { %18937 = vst [vmem:[#allocation199_spill] sm:$0xff] %v12789_v20  ;;  %v9457_v30 = vrot.slane %v12695_v50, 9 }
  0xb1   :  { %4157 = vmatmul.mubr.bf16.gmra.mrb[56].mxu0 %v1467_v12  ;;  %v12714_v12 = vsel %vm11451_vm6, %v1006_v42, %v1007_v19  ;;  %v12732_v19 = vrot.slane %v9439_v54, %v11402_v11  ;;  %v1023_v42 = vrot.slane %v12689_v38, 7  ;;  %v12748_v54 = vrot.slane %v1485_v17, %v11402_v11 }
  0xb2   :  { %4164 = vmatprep.mubr.bf16.mxu0 %v1925_v3  ;;  %18924 = vst [vmem:[#allocation186_spill] sm:$0xff] %v12714_v12  ;;  %v12739_v3 = vrot.slane %v9440_v16, %v11402_v11  ;;  %v1943_v56 = vcombine.low %v12707_v53, %v12714_v12  ;;  %v1944_v16 = vcombine.low %v12718_v10, %v12729_v18 }
  0xb3   :  { %18927 = vst [vmem:[#allocation189_spill] sm:$0xff] %v12732_v19  ;;  %18930 = vst [vmem:[#allocation192_spill] sm:$0xff] %v12748_v54  ;;  %v1025_v33 = vrot.slane %v1023_v42, 2  ;;  %v1026_v21 = vrot.slane %v12732_v19, 7  ;;  %v12759_v17 = vcombine.high %v12732_v19, %v12732_v19  ;;  %v1503_v18 = vcombine.low %v12586_v57, %v12616_v32 }
  0xb4   :  { %18928 = vst [vmem:[#allocation190_spill] sm:$0xff] %v12739_v3  ;;  %v12766_v2 = vcombine.high %v12739_v3, %v12739_v3  ;;  %v1036_v13 = vrot.slane %v12739_v3, 7  ;;  %v9441_v12 = vpack.c.bf16 %v82_v62, %v82_v62  ;;  %v12775_v10 = vrot.slane %v122_v6, %v11402_v11  ;;  %v83_v6 = vld [vmem:[%s18192_s0 + $0x180] sm:$0xff] }
  0xb5   :  { %18931 = vst [vmem:[#allocation193_spill] sm:$0xff] %v12759_v17  ;;  %v12778_v45 = vrot.slane %v1943_v56, %v11402_v11  ;;  %v12781_v53 = vrot.slane %v1944_v16, %v11402_v11  ;;  %v12799_v62 = vsel %vm11451_vm6, %v1022_v34, %v1023_v42  ;;  %v1029_v43 = vrot.slane %v12759_v17, 7 }
  0xb6   :  { %18933 = vst [vmem:[#allocation195_spill] sm:$0xff] %v12775_v10  ;;  %18938 = vst [vmem:[#allocation200_spill] sm:$0xff] %v12799_v62  ;;  %v1035_v56 = vrot.slane %v1033_v60, 2  ;;  %v1038_v16 = vrot.slane %v1036_v13, 2  ;;  %v1039_v32 = vrot.slane %v12766_v2, 7  ;;  %v12810_v7 = vcombine.low %v12748_v54, %v12762_v22 }
  0xb7   :  { %18934 = vst [vmem:[#allocation196_spill] sm:$0xff] %v12778_v45  ;;  %18935 = vst [vmem:[#allocation197_spill] sm:$0xff] %v12781_v53  ;;  %v12813_v34 = vrot.slane %v9441_v12, %v11402_v11  ;;  %v1959_v42 = vcombine.low %v12778_v45, %v12781_v53  ;;  %v12826_v22 = vrot.slane %v1502_v9, %v11402_v11  ;;  %v1042_v9 = vrot.slane %v12775_v10, 7 }
  0xb8   :  { %18940 = vst [vmem:[#allocation202_spill] sm:$0xff] %v12810_v7  ;;  %v12829_v12 = vrot.slane %v1503_v18, %v11402_v11  ;;  %v12841_v53 = vsel %vm11451_vm6, %v1035_v56, %v1036_v13  ;;  %v1520_v45 = vcombine.low %v12664_v15, %v12689_v38 }
  0xb9   :  { %4165 = vmatmul.mubr.bf16.gmra.mrb[60].mxu0 %v1484_v47  ;;  %v12785_v47 = vsel %vm11451_vm6, %v1016_v0, %v1017_v44  ;;  %v12803_v0 = vsel %vm11451_vm6, %v1025_v33, %v1026_v21  ;;  %v1028_v44 = vrot.slane %v1026_v21, 2  ;;  %18941 = vst [vmem:[#allocation203_spill] sm:$0xff] %v12813_v34  ;;  %v12817_v33 = vcombine.high %v12775_v10, %v12775_v10 }
  0xba   :  { %4172 = vmatprep.mubr.bf16.mxu0 %v1942_v51  ;;  %18936 = vst [vmem:[#allocation198_spill] sm:$0xff] %v12785_v47  ;;  %v84_v51 = vld [vmem:[%s18192_s0 + $0x188] sm:$0xff]  ;;  %18939 = vst [vmem:[#allocation201_spill] sm:$0xff] %v12803_v0  ;;  %v1960_v17 = vcombine.low %v12785_v47, %v12789_v20  ;;  %v1961_v57 = vcombine.low %v12799_v62, %v12803_v0  ;;  %v12851_v18 = vcombine.high %v12813_v34, %v12813_v34 }
  0xbb   :  { %18942 = vst [vmem:[#allocation204_spill] sm:$0xff] %v12817_v33  ;;  %v123_v21 = vpack.c.bf16 %v84_v51, %v83_v6  ;;  %v9442_v1 = vpack.c.bf16 %v84_v51, %v84_v51  ;;  %18943 = vst [vmem:[#allocation205_spill] sm:$0xff] %v12826_v22  ;;  %v12833_v54 = vsel %vm11451_vm6, %v1028_v44, %v1029_v43  ;;  %v1045_v44 = vrot.slane %v12817_v33, 7 }
  0xbc   :  { %18944 = vst [vmem:[#allocation206_spill] sm:$0xff] %v12829_v12  ;;  %18945 = vst [vmem:[#allocation207_spill] sm:$0xff] %v12833_v54  ;;  %v12837_v6 = vsel %vm11451_vm6, %v9457_v30, %v1033_v60  ;;  %v12845_v51 = vsel %vm11451_vm6, %v1038_v16, %v1039_v32  ;;  %v1048_v60 = vrot.slane %v12813_v34, 7  ;;  %v12859_v13 = vrot.slane %v1960_v17, %v11402_v11  ;;  %v85_v17 = vld [vmem:[%s18192_s0 + $0x190] sm:$0xff] }
  0xbd   :  { %18946 = vst [vmem:[#allocation208_spill] sm:$0xff] %v12837_v6  ;;  %18947 = vst [vmem:[#allocation209_spill] sm:$0xff] %v12841_v53  ;;  %v12856_v43 = vrot.slane %v123_v21, %v11402_v11  ;;  %v12862_v30 = vrot.slane %v1961_v57, %v11402_v11  ;;  %v12865_v56 = vrot.slane %v9442_v1, %v11402_v11  ;;  %v86_v57 = vld [vmem:[%s18192_s0 + $0x198] sm:$0xff]  ;;  %v1041_v0 = vrot.slane %v1039_v32, 2 }
  0xbe   :  { %18948 = vst [vmem:[#allocation210_spill] sm:$0xff] %v12845_v51  ;;  %18949 = vst [vmem:[#allocation211_spill] sm:$0xff] %v12851_v18  ;;  %v1519_v16 = vcombine.low %v12648_v37, %v12682_v5  ;;  %v1977_v21 = vcombine.low %v12833_v54, %v12837_v6  ;;  %v1518_v1 = vcombine.low %v12826_v22, %v12829_v12  ;;  %v1044_v20 = vrot.slane %v1042_v9, 2  ;;  %v87_v22 = vld [vmem:[%s18192_s0 + $0x1a0] sm:$0xff] }
  0xbf   :  { %18950 = vst [vmem:[#allocation212_spill] sm:$0xff] %v12859_v13  ;;  %18951 = vst [vmem:[#allocation213_spill] sm:$0xff] %v12862_v30  ;;  %v1047_v62 = vrot.slane %v1045_v44, 2  ;;  %v1050_v47 = vrot.slane %v1048_v60, 2  ;;  %v1051_v6 = vrot.slane %v12851_v18, 7  ;;  %v12886_v54 = vcombine.high %v12856_v43, %v12856_v43 }
  0xc0   :  { %v124_v38 = vpack.c.bf16 %v86_v57, %v85_v17  ;;  %v12892_v12 = vcombine.high %v12865_v56, %v12865_v56  ;;  %v12898_v32 = vrot.slane %v1520_v45, %v11402_v11  ;;  %v88_v17 = vld [vmem:[%s18192_s0 + $0x1a8] sm:$0xff]  ;;  %v12918_v45 = vsel %vm11451_vm6, %v1044_v20, %v1045_v44 }
  0xc1   :  { %4173 = vmatmul.mubr.bf16.gmra.mrb[64].mxu0 %v12810_v7  ;;  %v1976_v7 = vcombine.low %v12859_v13, %v12862_v30  ;;  %18957 = vst [vmem:[#allocation219_spill] sm:$0xff] %v12918_v45  ;;  %v12922_v13 = vsel %vm11451_vm6, %v1047_v62, %v1048_v60  ;;  %v12926_v18 = vsel %vm11451_vm6, %v1050_v47, %v1051_v6  ;;  %v1058_v5 = vrot.slane %v12865_v56, 7 }
  0xc2   :  { %4180 = vmatprep.mubr.bf16.mxu0 %v1959_v42  ;;  %v1978_v42 = vcombine.low %v12841_v53, %v12845_v51  ;;  %v12895_v51 = vrot.slane %v1519_v16, %v11402_v11  ;;  %18953 = vst [vmem:[#allocation215_spill] sm:$0xff] %v12898_v32  ;;  %v12901_v53 = vrot.slane %v1977_v21, %v11402_v11  ;;  %18958 = vst [vmem:[#allocation220_spill] sm:$0xff] %v12922_v13 }
  0xc3   :  { %v12914_v16 = vsel %vm11451_vm6, %v1041_v0, %v1042_v9  ;;  %v9443_v21 = vpack.c.bf16 %v86_v57, %v86_v57  ;;  %18959 = vst [vmem:[#allocation221_spill] sm:$0xff] %v12926_v18  ;;  %v12931_v0 = vrot.slane %v124_v38, %v11402_v11  ;;  %v1061_v20 = vrot.slane %v12892_v12, 7 }
  0xc4   :  { %18952 = vst [vmem:[#allocation214_spill] sm:$0xff] %v12895_v51  ;;  %18954 = vst [vmem:[#allocation216_spill] sm:$0xff] %v12901_v53  ;;  %v12910_v30 = vrot.slane %v1978_v42, %v11402_v11  ;;  %v1055_v42 = vrot.slane %v12886_v54, 7  ;;  %v125_v9 = vpack.c.bf16 %v88_v17, %v87_v22  ;;  %v12936_v44 = vcombine.low %v12895_v51, %v12898_v32 }
  0xc5   :  { %18956 = vst [vmem:[#allocation218_spill] sm:$0xff] %v12914_v16  ;;  %v1536_v62 = vcombine.low %v12732_v19, %v12695_v50  ;;  %v1537_v6 = vcombine.low %v12743_v63, %v12739_v3  ;;  %v1995_v38 = vcombine.low %v12922_v13, %v12926_v18  ;;  %v12949_v22 = vrot.slane %v9443_v21, %v11402_v11  ;;  %v89_v3 = vld [vmem:[%s18192_s0 + $0x1b0] sm:$0xff] }
  0xc6   :  { %18955 = vst [vmem:[#allocation217_spill] sm:$0xff] %v12910_v30  ;;  %18960 = vst [vmem:[#allocation222_spill] sm:$0xff] %v12936_v44  ;;  %v1993_v47 = vcombine.low %v12901_v53, %v12910_v30  ;;  %v9458_v60 = vrot.slane %v12856_v43, 9  ;;  %v1057_v57 = vrot.slane %v1055_v42, 2  ;;  %v1063_v32 = vrot.slane %v1061_v20, 2 }
  0xc7   :  { %v1064_v51 = vrot.slane %v12931_v0, 7  ;;  %v12955_v30 = vcombine.high %v12931_v0, %v12931_v0  ;;  %v12958_v53 = vrot.slane %v125_v9, %v11402_v11  ;;  %v12961_v18 = vrot.slane %v1536_v62, %v11402_v11 }
  0xc8   :  { %v12964_v21 = vrot.slane %v1537_v6, %v11402_v11  ;;  %v12981_v9 = vsel %vm11451_vm6, %v9458_v60, %v1055_v42  ;;  %v12985_v62 = vsel %vm11451_vm6, %v1057_v57, %v1058_v5  ;;  %v1070_v60 = vrot.slane %v12949_v22, 7 }
  0xc9   :  { %4181 = vmatmul.mubr.bf16.gmra.mrb[68].mxu0 %v1518_v1  ;;  %v1060_v1 = vrot.slane %v1058_v5, 2  ;;  %18961 = vst [vmem:[#allocation223_spill] sm:$0xff] %v12961_v18  ;;  %18965 = vst [vmem:[#allocation227_spill] sm:$0xff] %v12981_v9  ;;  %v13001_v42 = vcombine.high %v12958_v53, %v12958_v53  ;;  %v1067_v5 = vrot.slane %v12955_v30, 7  ;;  %v2011_v50 = vcombine.low %v12981_v9, %v12985_v62 }
  0xca   :  { %4188 = vmatprep.mubr.bf16.mxu0 %v1976_v7  ;;  %v1994_v7 = vcombine.low %v12914_v16, %v12918_v45  ;;  %v9444_v45 = vpack.c.bf16 %v88_v17, %v88_v17  ;;  %18962 = vst [vmem:[#allocation224_spill] sm:$0xff] %v12964_v21  ;;  %v12970_v16 = vrot.slane %v1995_v38, %v11402_v11  ;;  %v90_v17 = vld [vmem:[%s18192_s0 + $0x1b8] sm:$0xff]  ;;  %18966 = vst [vmem:[#allocation228_spill] sm:$0xff] %v12985_v62 }
  0xcb   :  { %v12989_v6 = vsel %vm11451_vm6, %v1060_v1, %v1061_v20  ;;  %v12997_v38 = vsel %vm11451_vm6, %v1063_v32, %v1064_v51  ;;  %v126_v57 = vpack.c.bf16 %v90_v17, %v89_v3  ;;  %v1552_v1 = vcombine.low %v12961_v18, %v12964_v21 }
  0xcc   :  { %v12967_v13 = vrot.slane %v1994_v7, %v11402_v11  ;;  %18964 = vst [vmem:[#allocation226_spill] sm:$0xff] %v12970_v16  ;;  %18967 = vst [vmem:[#allocation229_spill] sm:$0xff] %v12989_v6  ;;  %v12993_v7 = vcombine.high %v12949_v22, %v12949_v22  ;;  %v13006_v20 = vrot.slane %v9444_v45, %v11402_v11  ;;  %v1066_v45 = vrot.slane %v1064_v51, 2 }
  0xcd   :  { %18969 = vst [vmem:[#allocation231_spill] sm:$0xff] %v12997_v38  ;;  %v1553_v32 = vcombine.low %v12766_v2, %v12775_v10  ;;  %v2012_v3 = vcombine.low %v12989_v6, %v12997_v38  ;;  %v1069_v19 = vrot.slane %v1067_v5, 2  ;;  %v1072_v18 = vrot.slane %v1070_v60, 2 }
  0xce   :  { %18963 = vst [vmem:[#allocation225_spill] sm:$0xff] %v12967_v13  ;;  %18968 = vst [vmem:[#allocation230_spill] sm:$0xff] %v12993_v7  ;;  %v1073_v63 = vrot.slane %v12993_v7, 7  ;;  %v9459_v21 = vrot.slane %v12958_v53, 9  ;;  %v13037_v38 = vrot.slane %v2011_v50, %v11402_v11  ;;  %v13044_v6 = vsel %vm11451_vm6, %v1066_v45, %v1067_v5 }
  0xcf   :  { %v13031_v62 = vrot.slane %v1553_v32, %v11402_v11  ;;  %v13040_v7 = vrot.slane %v2012_v3, %v11402_v11  ;;  %v9445_v45 = vpack.c.bf16 %v90_v17, %v90_v17 }
  0xd0   :  { %18972 = vst [vmem:[#allocation234_spill] sm:$0xff] %v13037_v38 }
  0xd1   :  { %4189 = vmatmul.mubr.bf16.gmra.mrb[72].mxu0 %v12936_v44  ;;  %v1554_v44 = vcombine.low %v12817_v33, %v12813_v34  ;;  %v13028_v34 = vrot.slane %v126_v57, %v11402_v11  ;;  %18970 = vst [vmem:[#allocation232_spill] sm:$0xff] %v13031_v62  ;;  %18973 = vst [vmem:[#allocation235_spill] sm:$0xff] %v13040_v7  ;;  %v13048_v57 = vsel %vm11451_vm6, %v1069_v19, %v1070_v60 }
  0xd2   :  { %4196 = vmatprep.mubr.bf16.mxu0 %v1993_v47  ;;  %v2010_v47 = vcombine.low %v12967_v13, %v12970_v16  ;;  %v1077_v16 = vrot.slane %v13001_v42, 7  ;;  %v13025_v13 = vcombine.high %v13006_v20, %v13006_v20  ;;  %18974 = vst [vmem:[#allocation236_spill] sm:$0xff] %v13048_v57  ;;  %v2028_v60 = vcombine.low %v13044_v6, %v13048_v57 }
  0xd3   :  { %v13034_v51 = vrot.slane %v1554_v44, %v11402_v11  ;;  %v13060_v44 = vcombine.high %v13028_v34, %v13028_v34  ;;  %v1086_v32 = vrot.slane %v13028_v34, 7 }
  0xd4   :  { %v13056_v50 = vsel %vm11451_vm6, %v9459_v21, %v1077_v16  ;;  %v1083_v5 = vrot.slane %v13025_v13, 7  ;;  %v1571_v21 = vcombine.low %v12865_v56, %v12892_v12  ;;  %v1079_v9 = vrot.slane %v1077_v16, 2 }
  0xd5   :  { %18971 = vst [vmem:[#allocation233_spill] sm:$0xff] %v13034_v51  ;;  %18975 = vst [vmem:[#allocation237_spill] sm:$0xff] %v13056_v50  ;;  %v13067_v19 = vcombine.low %v13031_v62, %v13034_v51  ;;  %v1088_v62 = vrot.slane %v1086_v32, 2  ;;  %v1089_v33 = vrot.slane %v13060_v44, 7  ;;  %v13088_v57 = vrot.slane %v2028_v60, %v11402_v11 }
  0xd6   :  { %v1085_v51 = vrot.slane %v1083_v5, 2  ;;  %v13094_v16 = vrot.slane %v9445_v45, %v11402_v11 }
  0xd7   :  { %18977 = vst [vmem:[#allocation239_spill] sm:$0xff] %v13088_v57 }
  0xd9   :  { %4197 = vmatmul.mubr.bf16.gmra.mrb[76].mxu0 %v1552_v1  ;;  %v13052_v1 = vsel %vm11451_vm6, %v1072_v18, %v1073_v63  ;;  %v2027_v63 = vcombine.low %v13037_v38, %v13040_v7  ;;  %v1570_v18 = vcombine.low %v12856_v43, %v12886_v54  ;;  %v13085_v38 = vrot.slane %v1571_v21, %v11402_v11 }
  0xda   :  { %4204 = vmatprep.mubr.bf16.mxu0 %v2010_v47  ;;  %v1080_v47 = vrot.slane %v13006_v20, 7  ;;  %v2029_v3 = vcombine.low %v13052_v1, %v13056_v50  ;;  %v13110_v21 = vsel %vm11451_vm6, %v1088_v62, %v1089_v33  ;;  %v13126_v62 = vcombine.high %v13094_v16, %v13094_v16 }
  0xdb   :  { %v13082_v7 = vrot.slane %v1570_v18, %v11402_v11  ;;  %18981 = vst [vmem:[#allocation243_spill] sm:$0xff] %v13110_v21 }
  0xdc   :  { %v1082_v10 = vrot.slane %v1080_v47, 2  ;;  %v13091_v17 = vrot.slane %v2029_v3, %v11402_v11  ;;  %v13098_v50 = vsel %vm11451_vm6, %v1079_v9, %v1080_v47  ;;  %v1587_v3 = vcombine.low %v12931_v0, %v12955_v30 }
  0xdd   :  { %18976 = vst [vmem:[#allocation238_spill] sm:$0xff] %v13082_v7  ;;  %v1586_v60 = vcombine.low %v13082_v7, %v13085_v38  ;;  %v1588_v9 = vcombine.low %v12949_v22, %v12958_v53  ;;  %v1091_v7 = vrot.slane %v1089_v33, 2 }
  0xde   :  { %18978 = vst [vmem:[#allocation240_spill] sm:$0xff] %v13091_v17  ;;  %v13102_v18 = vsel %vm11451_vm6, %v1082_v10, %v1083_v5  ;;  %v2044_v10 = vcombine.low %v13088_v57, %v13091_v17  ;;  %v1092_v5 = vrot.slane %v13094_v16, 7 }
  0xdf   :  { %18979 = vst [vmem:[#allocation241_spill] sm:$0xff] %v13102_v18  ;;  %v13133_v45 = vrot.slane %v1588_v9, %v11402_v11  ;;  %v1605_v9 = vcombine.low %v13025_v13, %v13028_v34 }
  0xe1   :  { %4205 = vmatmul.mubr.bf16.gmra.mrb[80].mxu0 %v13067_v19  ;;  %18982 = vst [vmem:[#allocation244_spill] sm:$0xff] %v13133_v45 }
  0xe2   :  { %4212 = vmatprep.mubr.bf16.mxu0 %v2027_v63  ;;  %v13106_v63 = vsel %vm11451_vm6, %v1085_v51, %v1086_v32  ;;  %v2045_v51 = vcombine.low %v13098_v50, %v13102_v18  ;;  %v13130_v32 = vrot.slane %v1587_v3, %v11402_v11  ;;  %v1095_v18 = vrot.slane %v13126_v62, 7 }
  0xe3   :  { %18980 = vst [vmem:[#allocation242_spill] sm:$0xff] %v13106_v63  ;;  %v2046_v47 = vcombine.low %v13106_v63, %v13110_v21  ;;  %v1094_v21 = vrot.slane %v1092_v5, 2  ;;  %v1604_v3 = vcombine.low %v13001_v42, %v13006_v20 }
  0xe4   :  { %v13136_v17 = vrot.slane %v2045_v51, %v11402_v11  ;;  %v13152_v51 = vsel %vm11451_vm6, %v1091_v7, %v1092_v5  ;;  %v1621_v5 = vcombine.low %v13060_v44, %v13094_v16 }
  0xe5   :  { %v13139_v57 = vrot.slane %v2046_v47, %v11402_v11  ;;  %v13156_v33 = vsel %vm11451_vm6, %v1094_v21, %v1095_v18  ;;  %v13159_v47 = vrot.slane %v1604_v3, %v11402_v11  ;;  %v2129_v18 = vcombine.low %v11497_v55, %v11502_v58 }
  0xe6   :  { %18983 = vst [vmem:[#allocation245_spill] sm:$0xff] %v13136_v17  ;;  %18985 = vst [vmem:[#allocation247_spill] sm:$0xff] %v13156_v33  ;;  %v2062_v63 = vcombine.low %v13152_v51, %v13156_v33  ;;  %v2536_v21 = vcombine.low %v11460_v36, %v11486_v46  ;;  %v2095_v55 = vcombine.low %v11440_v26, %v11433_v23 }
  0xe7   :  { %18984 = vst [vmem:[#allocation246_spill] sm:$0xff] %v13139_v57  ;;  %18986 = vst [vmem:[#allocation248_spill] sm:$0xff] %v13159_v47  ;;  %v2096_v46 = vcombine.low %v11444_v27, %v11436_v25  ;;  %v2112_v25 = vcombine.low %v11523_v4, %v11540_v14  ;;  %v9466_v27 = vcombine.high %v11540_v14, %v11460_v36  ;;  %v11203_v14 = vld [vmem:[%s18191_s1 + $0x108] sm:$0xff]  }
  0xe8   :  { %v13171_v7 = vrot.slane %v2062_v63, %v11402_v11  ;;  %v2543_v3 = vrot.slane %v2536_v21, %v11402_v11  ;;  %v13184_v63 = vrot.slane %v1621_v5, %v11402_v11 }
  0xe9   :  { %4213 = vmatmul.mubr.bf16.gmra.mrb[84].mxu0 %v1586_v60  ;;  %v1603_v60 = vcombine.low %v13130_v32, %v13133_v45  ;;  %v13162_v45 = vrot.slane %v1605_v9, %v11402_v11  ;;  %v2130_v9 = vcombine.low %v11505_v59, %v11601_v49  ;;  %v2110_v21 = vrot.slane %v2096_v46, %v11402_v11 }
  0xea   :  { %4220 = vmatprep.mubr.bf16.mxu0 %v2044_v10  ;;  %v2061_v10 = vcombine.low %v13136_v17, %v13139_v57  ;;  %18988 = vst [vmem:[#allocation250_spill] sm:$0xff] %v13171_v7  ;;  %18989 = vst [vmem:[#allocation251_spill] sm:$0xff] %v13184_v63  ;;  %v2147_v49 = vcombine.low %v11576_v40, %v11570_v35  ;;  %v2120_v46 = vrot.slane %v2112_v25, %v11402_v11 }
  0xeb   :  { %18987 = vst [vmem:[#allocation249_spill] sm:$0xff] %v13162_v45  ;;  %v13168_v57 = vcombine.low %v13159_v47, %v13162_v45  ;;  %v2144_v5 = vrot.slane %v2130_v9, %v11402_v11  ;;  %v19036_v45 = vld [vmem:[#allocation100_spill] sm:$0xff]  ;;  %v19053_v47 = vld [vmem:[#allocation141_spill] sm:$0xff] }
  0xec   :  { %v2161_v4 = vrot.slane %v2147_v49, %v11402_v11 }
  0xf1   :  { %4221 = vmatmul.mubr.bf16.gmra.mrb[88].mxu0 %v1603_v60  ;;  %v2137_v60 = vrot.slane %v2129_v18, %v11402_v11  ;;  %v2103_v18 = vrot.slane %v2095_v55, %v11402_v11  ;;  %v11202_v55 = vld [vmem:[%s18191_s1 + $0x100] sm:$0xff]  }
  0xf2   :  { %4228 = vmatprep.mubr.bf16.mxu0 %v2061_v10  ;;  %v2545_v10 = vcombine.low %v11597_v48, %v11561_v29 }
  0xf3   :  { %v2544_v58 = vcombine.low %v2543_v3, %v2137_v60  ;;  %v2111_v26 = vcombine.low %v2103_v18, %v2110_v21  ;;  %v2163_v3 = vcombine.low %v11580_v41, %v11650_v28  ;;  %v2164_v41 = vcombine.low %v11673_v52, %v11712_v24  ;;  %v18991_v28 = vld [vmem:[#allocation16_spill] sm:$0xff]  ;;  %v11205_v52 = vld [vmem:[%s18191_s1 + $0x118] sm:$0xff]  }
  0xf4   :  { %v2552_v23 = vrot.slane %v2545_v10, %v11402_v11  ;;  %v2555_v9 = vcombine.low %v18991_v28, %v11737_v61  ;;  %v11204_v10 = vld [vmem:[%s18191_s1 + $0x110] sm:$0xff]   ;;  %v2145_v61 = vcombine.low %v2137_v60, %v2144_v5 }
  0xf5   :  { %v2171_v36 = vrot.slane %v2163_v3, %v11402_v11  ;;  %v13230_v18 = vrot.slane %v2164_v41, %v11402_v11  ;;  %v18996_v3 = vld [vmem:[#allocation28_spill] sm:$0xff] }
  0xf6   :  { %v2553_v59 = vcombine.low %v2144_v5, %v2552_v23  ;;  %v2562_v21 = vrot.slane %v2555_v9, %v11402_v11  ;;  %v18993_v23 = vld [vmem:[#allocation10_spill] sm:$0xff] }
  0xf7   :  { %v13218_v40 = vcombine.low %v2161_v4, %v2171_v36  ;;  %18992 = vst [vmem:[#allocation16_spill] sm:$0xff] %v13230_v18 }
  0xf8   :  { %v2563_v25 = vcombine.low %v13230_v18, %v2562_v21  ;;  %v19000_v21 = vld [vmem:[#allocation40_spill] sm:$0xff] }
  0xf9   :  { %4229 = vmatmul.mubr.bf16.gmra.mrb[92].mxu0 %v13168_v57  ;;  %18990 = vst [vmem:[#allocation252_spill] sm:$0xff] %v13218_v40 }
  0xfa   :  { %4236 = vmatprep.mubr.bf16.mxu0 %v13171_v7 }
 0x101   :  { %4237 = vmatmul.mubr.bf16.gmra.mrb[96].mxu0 %v13184_v63 }
 0x102   :  { %4276 = vmatprep.mubr.bf16.mxu0 %v2544_v58  ;;  %v2127_v58 = vrot.slane %v9466_v27, %v11402_v11  ;;  %v18994_v27 = vld [vmem:[#allocation24_spill] sm:$0xff] }
 0x104   :  { %v2128_v35 = vcombine.low %v2120_v46, %v2127_v58  ;;  %v11206_v58 = vld [vmem:[%s18191_s1 + $0x120] sm:$0xff]  }
 0x109   :  { %4277 = vmatmul.mubr.bf16.vlgmr.msra.gmra.mrb[0].mxu0 %v2111_v26  ;;  %v2146_v26 = vcombine.low %v11597_v48, %v18993_v23  ;;  %v19002_v23 = vld [vmem:[#allocation27_spill] sm:$0xff] }
 0x10a   :  { %4284 = vmatprep.mubr.bf16.mxu0 %v2553_v59  ;;  %4477 = vmatpush1.bf16.msra.mxu0 %v11202_v55  ;;  %v18995_v59 = vld [vmem:[#allocation17_spill] sm:$0xff]  ;;  %v18997_v55 = vld [vmem:[#allocation22_spill] sm:$0xff] }
 0x10b   :  { %4478 = vmatprep.subr.bf16.mxu0 %v18766_v8  ;;  %v2181_v49 = vcombine.low %v18995_v59, %v18994_v27  ;;  %v2197_v46 = vcombine.low %v18997_v55, %v18996_v3  ;;  %v2154_v60 = vrot.slane %v2146_v26, %v11402_v11  ;;  %v11209_v59 = vld [vmem:[%s18191_s1 + $0x138] sm:$0xff]   ;;  %v9467_v3 = vcombine.high %v11712_v24, %v18991_v28 }
 0x10d   :  { %v2195_v5 = vrot.slane %v2181_v49, %v11402_v11  ;;  %v2162_v41 = vcombine.low %v2154_v60, %v2161_v4  ;;  %v2179_v49 = vcombine.low %v2171_v36, %v13230_v18  ;;  %v13287_v36 = vrot.slane %v9467_v3, %v11402_v11  ;;  %v19011_v3 = vld [vmem:[#allocation63_spill] sm:$0xff] }
 0x10e   :  { %4479 = vmatpush1.bf16.msra.mxu0 %v11203_v14  ;;  %v2205_v14 = vrot.slane %v2197_v46, %v11402_v11  ;;  %v19004_v46 = vld [vmem:[#allocation43_spill] sm:$0xff] }
 0x10f   :  { %4480 = vmatprep.subr.bf16.mxu0 %v18766_v8  ;;  %19008 = vst [vmem:[#allocation17_spill] sm:$0xff] %v13287_v36 }
 0x110   :  { %v13255_v9 = vcombine.low %v2195_v5, %v2205_v14 }
 0x111   :  { %4285 = vmatmul.mubr.bf16.gmra.mrb[4].mxu0 %v2128_v35  ;;  %v11207_v35 = vld [vmem:[%s18191_s1 + $0x128] sm:$0xff]  }
 0x112   :  { %4292 = vmatprep.mubr.bf16.mxu0 %v13218_v40  ;;  %4481 = vmatpush1.bf16.msra.mxu0 %v11204_v10  ;;  %18998 = vst [vmem:[#allocation10_spill] sm:$0xff] %v13255_v9  ;;  %v18999_v10 = vld [vmem:[#allocation31_spill] sm:$0xff]  ;;  %v19035_v40 = vld [vmem:[#allocation102_spill] sm:$0xff] }
 0x113   :  { %4482 = vmatprep.subr.bf16.mxu0 %v18766_v8  ;;  %v2594_v7 = vcombine.low %v19036_v45, %v19035_v40  ;;  %v11217_v40 = vld [vmem:[%s18191_s1 + $0x178] sm:$0xff]  }
 0x116   :  { %4483 = vmatpush1.bf16.msra.mxu0 %v11205_v52  ;;  %v2214_v52 = vcombine.low %v19000_v21, %v18999_v10  ;;  %v11210_v21 = vld [vmem:[%s18191_s1 + $0x140] sm:$0xff]  }
 0x117   :  { %4484 = vmatprep.subr.bf16.mxu0 %v18766_v8 }
 0x118   :  { %v13267_v4 = vrot.slane %v2214_v52, %v11402_v11 }
 0x119   :  { %4293 = vmatmul.mubr.bf16.gmra.mrb[8].mxu0 %v2145_v61  ;;  %v19001_v61 = vld [vmem:[#allocation29_spill] sm:$0xff] }
 0x11a   :  { %4300 = vmatprep.mubr.bf16.mxu0 %v2563_v25  ;;  %4485 = vmatpush1.bf16.msra.mxu0 %v11206_v58  ;;  %v2565_v26 = vcombine.low %v19002_v23, %v19001_v61  ;;  %v11208_v25 = vld [vmem:[%s18191_s1 + $0x130] sm:$0xff]   ;;  %19003 = vst [vmem:[#allocation24_spill] sm:$0xff] %v13267_v4  ;;  %v19005_v58 = vld [vmem:[#allocation41_spill] sm:$0xff] }
 0x11b   :  { %4486 = vmatprep.subr.bf16.mxu0 %v18766_v8  ;;  %v2215_v60 = vcombine.low %v19005_v58, %v19004_v46  ;;  %v19012_v46 = vld [vmem:[#allocation59_spill] sm:$0xff]  ;;  %v19013_v58 = vld [vmem:[#allocation52_spill] sm:$0xff] }
 0x11c   :  { %v2572_v27 = vrot.slane %v2565_v26, %v11402_v11  ;;  %v11211_v26 = vld [vmem:[%s18191_s1 + $0x148] sm:$0xff]  }
 0x11d   :  { %v2229_v28 = vrot.slane %v2215_v60, %v11402_v11  ;;  %v2575_v60 = vcombine.low %v19013_v58, %v19012_v46  ;;  %v19018_v46 = vld [vmem:[#allocation74_spill] sm:$0xff] }
 0x11e   :  { %4487 = vmatpush1.bf16.msra.mxu0 %v11207_v35  ;;  %v2573_v55 = vcombine.low %v2572_v27, %v13267_v4  ;;  %v19006_v35 = vld [vmem:[#allocation51_spill] sm:$0xff]  ;;  %v19009_v27 = vld [vmem:[#allocation38_spill] sm:$0xff] }
 0x11f   :  { %4488 = vmatprep.subr.bf16.mxu0 %v18766_v8 }
 0x121   :  { %4301 = vmatmul.mubr.bf16.gmra.mrb[12].mxu0 %v2162_v41  ;;  %v19007_v41 = vld [vmem:[#allocation50_spill] sm:$0xff] }
 0x122   :  { %4308 = vmatprep.mubr.bf16.mxu0 %v13255_v9  ;;  %4489 = vmatpush1.bf16.msra.mxu0 %v11208_v25  ;;  %v2231_v10 = vcombine.low %v19007_v41, %v19006_v35  ;;  %v2196_v25 = vcombine.low %v13287_v36, %v2195_v5  ;;  %v11212_v41 = vld [vmem:[%s18191_s1 + $0x150] sm:$0xff]  }
 0x123   :  { %4490 = vmatprep.subr.bf16.mxu0 %v18766_v8 }
 0x124   :  { %v2239_v52 = vrot.slane %v2231_v10, %v11402_v11 }
 0x126   :  { %4491 = vmatpush1.bf16.msra.mxu0 %v11209_v59  ;;  %v2198_v59 = vcombine.low %v19002_v23, %v19009_v27  ;;  %v19016_v27 = vld [vmem:[#allocation73_spill] sm:$0xff] }
 0x127   :  { %4492 = vmatprep.subr.bf16.mxu0 %v18766_v8 }
 0x128   :  { %v13309_v5 = vrot.slane %v2198_v59, %v11402_v11  ;;  %v19019_v59 = vld [vmem:[#allocation76_spill] sm:$0xff] }
 0x129   :  { %4309 = vmatmul.mubr.bf16.gmra.mrb[16].mxu0 %v2179_v49  ;;  %v13298_v49 = vcombine.low %v2229_v28, %v2239_v52  ;;  %v2584_v9 = vcombine.low %v19019_v59, %v19018_v46 }
 0x12a   :  { %4316 = vmatprep.mubr.bf16.mxu0 %v2573_v55  ;;  %4493 = vmatpush1.bf16.msra.mxu0 %v11210_v21  ;;  %v2248_v55 = vcombine.low %v19011_v3, %v12029_v39  ;;  %19014 = vst [vmem:[#allocation22_spill] sm:$0xff] %v13309_v5  ;;  %v2582_v39 = vrot.slane %v2575_v60, %v11402_v11  ;;  %v19017_v3 = vld [vmem:[#allocation64_spill] sm:$0xff] }
 0x12b   :  { %4494 = vmatprep.subr.bf16.mxu0 %v18766_v8  ;;  %19010 = vst [vmem:[#allocation28_spill] sm:$0xff] %v13298_v49  ;;  %v2213_v21 = vcombine.low %v2205_v14, %v13309_v5  ;;  %v2230_v14 = vcombine.low %v13267_v4, %v2229_v28  ;;  %v19023_v5 = vld [vmem:[#allocation88_spill] sm:$0xff]  ;;  %v19034_v4 = vld [vmem:[#allocation90_spill] sm:$0xff] }
 0x12c   :  { %v13313_v10 = vrot.slane %v2248_v55, %v11402_v11  ;;  %v11213_v55 = vld [vmem:[%s18191_s1 + $0x158] sm:$0xff]  }
 0x12e   :  { %4495 = vmatpush1.bf16.msra.mxu0 %v11211_v26  ;;  %19015 = vst [vmem:[#allocation31_spill] sm:$0xff] %v13313_v10  ;;  %v2583_v26 = vcombine.low %v2582_v39, %v13313_v10  ;;  %v9468_v39 = vcombine.high %v19006_v35, %v19013_v58 }
 0x12f   :  { %4496 = vmatprep.subr.bf16.mxu0 %v18766_v8 }
 0x131   :  { %4317 = vmatmul.mubr.bf16.gmra.mrb[20].mxu0 %v2196_v25  ;;  %v2249_v25 = vcombine.low %v19017_v3, %v19016_v27  ;;  %v19021_v27 = vld [vmem:[#allocation87_spill] sm:$0xff]  ;;  %v19022_v3 = vld [vmem:[#allocation77_spill] sm:$0xff] }
 0x132   :  { %4324 = vmatprep.mubr.bf16.mxu0 %v13298_v49  ;;  %4497 = vmatpush1.bf16.msra.mxu0 %v11212_v41  ;;  %v2591_v41 = vrot.slane %v2584_v9, %v11402_v11  ;;  %v2266_v49 = vcombine.low %v19022_v3, %v19021_v27  ;;  %v11214_v9 = vld [vmem:[%s18191_s1 + $0x160] sm:$0xff]  }
 0x133   :  { %4498 = vmatprep.subr.bf16.mxu0 %v18766_v8  ;;  %v13327_v60 = vrot.slane %v2249_v25, %v11402_v11  ;;  %v13343_v25 = vrot.slane %v9468_v39, %v11402_v11 }
 0x134   :  { %v2280_v28 = vrot.slane %v2266_v49, %v11402_v11  ;;  %v19030_v49 = vld [vmem:[#allocation7_spill] sm:$0xff] }
 0x135   :  { %19020 = vst [vmem:[#allocation40_spill] sm:$0xff] %v13327_v60  ;;  %19025 = vst [vmem:[#allocation29_spill] sm:$0xff] %v13343_v25  ;;  %v2247_v39 = vcombine.low %v2239_v52, %v13343_v25  ;;  %v11216_v52 = vld [vmem:[%s18191_s1 + $0x170] sm:$0xff]  }
 0x136   :  { %4499 = vmatpush1.bf16.msra.mxu0 %v11213_v55  ;;  %v11215_v55 = vld [vmem:[%s18191_s1 + $0x168] sm:$0xff]  }
 0x137   :  { %4500 = vmatprep.subr.bf16.mxu0 %v18766_v8 }
 0x139   :  { %4325 = vmatmul.mubr.bf16.gmra.mrb[24].mxu0 %v2213_v21  ;;  %v2592_v21 = vcombine.low %v13327_v60, %v2591_v41  ;;  %v19027_v41 = vld [vmem:[#allocation5_spill] sm:$0xff] }
 0x13a   :  { %4332 = vmatprep.mubr.bf16.mxu0 %v2583_v26  ;;  %v19024_v26 = vld [vmem:[#allocation89_spill] sm:$0xff]  ;;  %4501 = vmatpush1.bf16.msra.mxu0 %v11214_v9  ;;  %v19033_v9 = vld [vmem:[#allocation99_spill] sm:$0xff] }
 0x13b   :  { %v2282_v18 = vcombine.low %v19024_v26, %v19023_v5  ;;  %4502 = vmatprep.subr.bf16.mxu0 %v18766_v8  ;;  %v19026_v5 = vld [vmem:[#allocation4_spill] sm:$0xff]  ;;  %v2283_v36 = vcombine.low %v19034_v4, %v19033_v9 }
 0x13c   :  { %v19028_v27 = vcombine.low %v19026_v5, %v19027_v41  ;;  %v2601_v41 = vrot.slane %v2594_v7, %v11402_v11  ;;  %v19040_v7 = vld [vmem:[#allocation101_spill] sm:$0xff] }
 0x13d   :  { %v2290_v58 = vrot.slane %v2282_v18, %v11402_v11  ;;  %v13376_v5 = vrot.slane %v2283_v36, %v11402_v11 }
 0x13e   :  { %4503 = vmatpush1.bf16.msra.mxu0 %v11215_v55  ;;  %v2264_v55 = vcombine.low %v13313_v10, %v13327_v60 }
 0x13f   :  { %v13364_v26 = vcombine.low %v2280_v28, %v2290_v58  ;;  %4504 = vmatprep.subr.bf16.mxu0 %v18766_v8  ;;  %19037 = vst [vmem:[#allocation43_spill] sm:$0xff] %v13376_v5  ;;  %v2602_v36 = vcombine.low %v13376_v5, %v2601_v41 }
 0x141   :  { %4333 = vmatmul.mubr.bf16.gmra.mrb[28].mxu0 %v2230_v14  ;;  %v13355_v14 = vrot.slane %v19028_v27, %v11402_v11  ;;  %19032 = vst [vmem:[#allocation27_spill] sm:$0xff] %v13364_v26  ;;  %v19038_v27 = vld [vmem:[#allocation84_spill] sm:$0xff] }
 0x142   :  { %4340 = vmatprep.mubr.bf16.mxu0 %v2592_v21  ;;  %v19029_v21 = vld [vmem:[#allocation6_spill] sm:$0xff]  ;;  %4505 = vmatpush1.bf16.msra.mxu0 %v11216_v52  ;;  %v19042_v52 = vld [vmem:[#allocation108_spill] sm:$0xff] }
 0x143   :  { %v19031_v3 = vcombine.low %v19029_v21, %v19030_v49  ;;  %4506 = vmatprep.subr.bf16.mxu0 %v18766_v8  ;;  %v19039_v21 = vld [vmem:[#allocation113_spill] sm:$0xff] }
 0x144   :  { %v2300_v49 = vcombine.low %v19040_v7, %v19039_v21  ;;  %v19045_v21 = vld [vmem:[#allocation125_spill] sm:$0xff]  ;;  %v19046_v7 = vld [vmem:[#allocation128_spill] sm:$0xff] }
 0x145   :  { %v13362_v18 = vrot.slane %v19031_v3, %v11402_v11  ;;  %v19041_v3 = vld [vmem:[#allocation116_spill] sm:$0xff]  ;;  %v2333_v10 = vcombine.low %v19046_v7, %v19045_v21  ;;  %v19051_v21 = vld [vmem:[#allocation129_spill] sm:$0xff] }
 0x146   :  { %4507 = vmatpush1.bf16.msra.mxu0 %v11217_v40  ;;  %v2314_v60 = vrot.slane %v2300_v49, %v11402_v11  ;;  %v19048_v40 = vld [vmem:[#allocation115_spill] sm:$0xff]  ;;  %v19050_v49 = vld [vmem:[#allocation138_spill] sm:$0xff] }
 0x147   :  { %4708 = vmatprep.subr.bf16.mxu0 %v18766_v8  ;;  %v2334_v7 = vcombine.low %v19051_v21, %v19050_v49  ;;  %v19057_v49 = vld [vmem:[#allocation155_spill] sm:$0xff]  ;;  %v19058_v21 = vld [vmem:[#allocation153_spill] sm:$0xff] }
 0x148   :  { %v2367_v17 = vcombine.low %v19058_v21, %v19057_v49  ;;  %v19063_v49 = vld [vmem:[#allocation154_spill] sm:$0xff] }
 0x149   :  { %4341 = vmatmul.mubr.bf16.gmra.mrb[32].mxu0 %v2247_v39  ;;  %v2265_v39 = vcombine.low %v19019_v59, %v19038_v27 }
 0x14a   :  { %4348 = vmatprep.mubr.bf16.mxu0 %v13364_v26  ;;  %v2316_v26 = vcombine.low %v19042_v52, %v19041_v3  ;;  %v19047_v3 = vld [vmem:[#allocation122_spill] sm:$0xff] }
 0x14b   :  { %v13396_v4 = vrot.slane %v2265_v39, %v11402_v11  ;;  %v2604_v52 = vcombine.low %v19048_v40, %v19047_v3 }
 0x14c   :  { %v2324_v27 = vrot.slane %v2316_v26, %v11402_v11  ;;  %v2298_v26 = vcombine.low %v2290_v58, %v13376_v5 }
 0x14d   :  { %19043 = vst [vmem:[#allocation41_spill] sm:$0xff] %v13396_v4  ;;  %v2281_v41 = vcombine.low %v13396_v4, %v2280_v28  ;;  %v2611_v39 = vrot.slane %v2604_v52, %v11402_v11  ;;  %v9469_v28 = vcombine.high %v19033_v9, %v19036_v45  ;;  %v19052_v4 = vld [vmem:[#allocation140_spill] sm:$0xff]  ;;  %v19055_v45 = vld [vmem:[#allocation121_spill] sm:$0xff] }
 0x14e   :  { %v13401_v25 = vcombine.low %v2314_v60, %v2324_v27 }
 0x150   :  { %19044 = vst [vmem:[#allocation51_spill] sm:$0xff] %v13401_v25 }
 0x151   :  { %4349 = vmatmul.mubr.bf16.gmra.mrb[36].mxu0 %v2264_v55  ;;  %v13409_v55 = vrot.slane %v2333_v10, %v11402_v11  ;;  %v2348_v10 = vrot.slane %v2334_v7, %v11402_v11 }
 0x152   :  { %4356 = vmatprep.mubr.bf16.mxu0 %v2602_v36 }
 0x153   :  { %19049 = vst [vmem:[#allocation50_spill] sm:$0xff] %v13409_v55  ;;  %v2612_v36 = vcombine.low %v2611_v39, %v13409_v55  ;;  %v2317_v39 = vcombine.low %v19048_v40, %v19055_v45  ;;  %v19062_v45 = vld [vmem:[#allocation164_spill] sm:$0xff] }
 0x154   :  { %v2368_v21 = vcombine.low %v19063_v49, %v19062_v45  ;;  %v19068_v49 = vld [vmem:[#allocation178_spill] sm:$0xff] }
 0x159   :  { %4357 = vmatmul.mubr.bf16.gmra.mrb[40].mxu0 %v2281_v41  ;;  %v2350_v41 = vcombine.low %v19053_v47, %v19052_v4  ;;  %v19059_v47 = vld [vmem:[#allocation150_spill] sm:$0xff] }
 0x15a   :  { %4364 = vmatprep.mubr.bf16.mxu0 %v13401_v25  ;;  %v13421_v25 = vrot.slane %v9469_v28, %v11402_v11  ;;  %v13435_v28 = vrot.slane %v2317_v39, %v11402_v11  ;;  %v13449_v39 = vrot.slane %v2368_v21, %v11402_v11 }
 0x15b   :  { %v2358_v58 = vrot.slane %v2350_v41, %v11402_v11 }
 0x15c   :  { %19054 = vst [vmem:[#allocation38_spill] sm:$0xff] %v13421_v25  ;;  %v2315_v52 = vcombine.low %v13421_v25, %v2314_v60  ;;  %19061 = vst [vmem:[#allocation59_spill] sm:$0xff] %v13435_v28  ;;  %v2332_v7 = vcombine.low %v2324_v27, %v13435_v28  ;;  %v19064_v25 = vld [vmem:[#allocation165_spill] sm:$0xff]  ;;  %v2401_v28 = vcombine.low %v19068_v49, %v12664_v15 }
 0x15d   :  { %v13428_v5 = vcombine.low %v2348_v10, %v2358_v58  ;;  %19066 = vst [vmem:[#allocation52_spill] sm:$0xff] %v13449_v39 }
 0x15f   :  { %19056 = vst [vmem:[#allocation63_spill] sm:$0xff] %v13428_v5 }
 0x161   :  { %4365 = vmatmul.mubr.bf16.gmra.mrb[44].mxu0 %v2298_v26  ;;  %v19060_v26 = vld [vmem:[#allocation142_spill] sm:$0xff] }
 0x162   :  { %4372 = vmatprep.mubr.bf16.mxu0 %v2612_v36  ;;  %v2614_v63 = vcombine.low %v19060_v26, %v19059_v47  ;;  %v13439_v36 = vrot.slane %v2367_v17, %v11402_v11  ;;  %v19065_v47 = vld [vmem:[#allocation167_spill] sm:$0xff] }
 0x164   :  { %v2621_v60 = vrot.slane %v2614_v63, %v11402_v11  ;;  %v9470_v63 = vcombine.high %v19052_v4, %v19060_v26 }
 0x166   :  { %v2622_v41 = vcombine.low %v2621_v60, %v13439_v36  ;;  %v19067_v60 = vld [vmem:[#allocation168_spill] sm:$0xff] }
 0x167   :  { %v2385_v45 = vcombine.low %v19067_v60, %v12648_v37  ;;  %v19073_v37 = vld [vmem:[#allocation191_spill] sm:$0xff]  ;;  %v19074_v60 = vld [vmem:[#allocation181_spill] sm:$0xff] }
 0x168   :  { %v2633_v33 = vcombine.low %v19074_v60, %v19073_v37 }
 0x169   :  { %4373 = vmatmul.mubr.bf16.gmra.mrb[48].mxu0 %v2315_v52  ;;  %v2623_v52 = vcombine.low %v19065_v47, %v19064_v25 }
 0x16a   :  { %4380 = vmatprep.mubr.bf16.mxu0 %v13428_v5  ;;  %v2349_v5 = vcombine.low %v13409_v55, %v2348_v10  ;;  %v2409_v10 = vrot.slane %v2401_v28, %v11402_v11  ;;  %v2383_v28 = vcombine.low %v13439_v36, %v13449_v39 }
 0x16b   :  { %v2630_v17 = vrot.slane %v2623_v52, %v11402_v11  ;;  %v19071_v52 = vld [vmem:[#allocation189_spill] sm:$0xff] }
 0x16d   :  { %v2631_v27 = vcombine.low %v13449_v39, %v2630_v17  ;;  %v19072_v17 = vld [vmem:[#allocation179_spill] sm:$0xff] }
 0x16e   :  { %v2402_v55 = vcombine.low %v19072_v17, %v19071_v52  ;;  %v19077_v17 = vld [vmem:[#allocation204_spill] sm:$0xff] }
 0x170   :  { %v13474_v15 = vrot.slane %v2402_v55, %v11402_v11 }
 0x171   :  { %4381 = vmatmul.mubr.bf16.gmra.mrb[52].mxu0 %v2332_v7  ;;  %v13461_v7 = vrot.slane %v9470_v63, %v11402_v11 }
 0x172   :  { %4388 = vmatprep.mubr.bf16.mxu0 %v2622_v41  ;;  %v2399_v41 = vrot.slane %v2385_v45, %v11402_v11  ;;  %v19076_v45 = vld [vmem:[#allocation190_spill] sm:$0xff] }
 0x173   :  { %19069 = vst [vmem:[#allocation73_spill] sm:$0xff] %v13461_v7  ;;  %v2366_v21 = vcombine.low %v2358_v58, %v13461_v7  ;;  %v19075_v58 = vld [vmem:[#allocation175_spill] sm:$0xff]  ;;  %v2419_v49 = vcombine.low %v19076_v45, %v12766_v2 }
 0x174   :  { %v13466_v26 = vcombine.low %v2399_v41, %v2409_v10  ;;  %v2384_v63 = vcombine.low %v19065_v47, %v19075_v58  ;;  %v19080_v2 = vld [vmem:[#allocation203_spill] sm:$0xff] }
 0x175   :  { %v2643_v45 = vcombine.low %v19080_v2, %v12856_v43 }
 0x176   :  { %19070 = vst [vmem:[#allocation64_spill] sm:$0xff] %v13466_v26  ;;  %v13487_v55 = vrot.slane %v2384_v63, %v11402_v11 }
 0x177   :  { %v2650_v63 = vrot.slane %v2643_v45, %v11402_v11  ;;  %v2653_v45 = vcombine.low %v12958_v53, %v13001_v42  ;;  %v94_v42 = vld [vmem:[%s18192_s0 + $0x1d8] sm:$0xff] }
 0x178   :  { %19079 = vst [vmem:[#allocation74_spill] sm:$0xff] %v13487_v55  ;;  %v2400_v39 = vcombine.low %v13487_v55, %v2399_v41  ;;  %v9471_v41 = vcombine.high %v19071_v52, %v19074_v60  ;;  %v91_v60 = vld [vmem:[%s18192_s0 + $0x1c0] sm:$0xff] }
 0x179   :  { %4389 = vmatmul.mubr.bf16.gmra.mrb[56].mxu0 %v2349_v5  ;;  %v2640_v5 = vrot.slane %v2633_v33, %v11402_v11  ;;  %v2433_v33 = vrot.slane %v2419_v49, %v11402_v11  ;;  %v19087_v55 = vld [vmem:[#allocation30_spill] sm:$0xff] }
 0x17a   :  { %4396 = vmatprep.mubr.bf16.mxu0 %v2631_v27 }
 0x17b   :  { %v2641_v27 = vcombine.low %v13474_v15, %v2640_v5  ;;  %v2452_v5 = vcombine.low %v12886_v54, %v12865_v56  ;;  %v2453_v54 = vcombine.low %v12892_v12, %v12931_v0  ;;  %v2469_v56 = vcombine.low %v12955_v30, %v12949_v22  ;;  %v92_v12 = vld [vmem:[%s18192_s0 + $0x1c8] sm:$0xff] }
 0x17c   :  { %v19081_v30 = vld [vmem:[#allocation211_spill] sm:$0xff] }
 0x181   :  { %4397 = vmatmul.mubr.bf16.gmra.mrb[60].mxu0 %v2366_v21  ;;  %v19078_v21 = vld [vmem:[#allocation195_spill] sm:$0xff] }
 0x182   :  { %4404 = vmatprep.mubr.bf16.mxu0 %v13466_v26  ;;  %v2435_v37 = vcombine.low %v19078_v21, %v19077_v17  ;;  %v2467_v17 = vrot.slane %v2453_v54, %v11402_v11  ;;  %v2436_v21 = vcombine.low %v19080_v2, %v19081_v30  ;;  %v9460_v54 = vpack.c.bf16 %v92_v12, %v92_v12 }
 0x184   :  { %v2443_v26 = vrot.slane %v2435_v37, %v11402_v11 }
 0x186   :  { %v13492_v58 = vcombine.low %v2433_v33, %v2443_v26 }
 0x189   :  { %4405 = vmatmul.mubr.bf16.gmra.mrb[64].mxu0 %v2383_v28  ;;  %v13500_v28 = vrot.slane %v2452_v5, %v11402_v11  ;;  %v2486_v5 = vcombine.low %v13006_v20, %v13025_v13  ;;  %v93_v13 = vld [vmem:[%s18192_s0 + $0x1d0] sm:$0xff] }
 0x18a   :  { %4412 = vmatprep.mubr.bf16.mxu0 %v2641_v27  ;;  %v2417_v27 = vcombine.low %v2409_v10, %v13474_v15  ;;  %v2477_v10 = vrot.slane %v2469_v56, %v11402_v11  ;;  %v2487_v56 = vcombine.low %v13028_v34, %v13060_v44  ;;  %v128_v30 = vpack.c.bf16 %v94_v42, %v93_v13 }
 0x18b   :  { %v2651_v49 = vcombine.low %v2650_v63, %v13500_v28  ;;  %v127_v63 = vpack.c.bf16 %v92_v12, %v91_v60  ;;  %v13555_v12 = vrot.slane %v9460_v54, %v11402_v11 }
 0x18c   :  { %v13525_v37 = vcombine.low %v2467_v17, %v2477_v10  ;;  %v13570_v44 = vrot.slane %v128_v30, %v11402_v11 }
 0x18d   :  { %v13567_v34 = vcombine.high %v13555_v12, %v13555_v12 }
 0x18f   :  { %v2672_v13 = vcombine.low %v13567_v34, %v13570_v44 }
 0x191   :  { %4413 = vmatmul.mubr.bf16.gmra.mrb[68].mxu0 %v2400_v39  ;;  %v13512_v39 = vrot.slane %v9471_v41, %v11402_v11  ;;  %v2660_v41 = vrot.slane %v2653_v45, %v11402_v11  ;;  %v2468_v45 = vcombine.low %v13500_v28, %v2467_v17  ;;  %v2686_v17 = vrot.slane %v2672_v13, %v11402_v11  ;;  %v19082_v13 = vld [vmem:[#allocation26_spill] sm:$0xff] }
 0x192   :  { %4420 = vmatprep.mubr.bf16.mxu0 %v13492_v58 }
 0x193   :  { %v2434_v0 = vcombine.low %v13512_v39, %v2433_v33  ;;  %v13536_v33 = vrot.slane %v2486_v5, %v11402_v11 }
 0x195   :  { %v2661_v60 = vcombine.low %v2660_v41, %v13536_v33 }
 0x199   :  { %4421 = vmatmul.mubr.bf16.gmra.mrb[72].mxu0 %v2417_v27  ;;  %v13532_v27 = vrot.slane %v2436_v21, %v11402_v11  ;;  %v13558_v21 = vrot.slane %v2487_v56, %v11402_v11  ;;  %v9461_v56 = vpack.c.bf16 %v94_v42, %v94_v42 }
 0x19a   :  { %4428 = vmatprep.mubr.bf16.mxu0 %v2651_v49  ;;  %v13540_v49 = vrot.slane %v127_v63, %v11402_v11  ;;  %v9472_v63 = vcombine.high %v12949_v22, %v12958_v53 }
 0x19b   :  { %v2451_v20 = vcombine.low %v2443_v26, %v13532_v27 }
 0x19c   :  { %v13563_v26 = vcombine.high %v13540_v49, %v13540_v49 }
 0x19e   :  { %v2671_v54 = vcombine.low %v13563_v26, %v13555_v12 }
 0x1a1   :  { %4429 = vmatmul.mubr.bf16.gmra.mrb[76].mxu0 %v2434_v0  ;;  %v2662_v0 = vcombine.low %v13094_v16, %v13540_v49 }
 0x1a2   :  { %4436 = vmatprep.mubr.bf16.mxu0 %v13525_v37 }
 0x1a3   :  { %v2669_v5 = vrot.slane %v2662_v0, %v11402_v11  ;;  %v13587_v0 = vrot.slane %v9461_v56, %v11402_v11 }
 0x1a5   :  { %v2670_v41 = vcombine.low %v13558_v21, %v2669_v5  ;;  %v13593_v5 = vcombine.high %v13570_v44, %v13570_v44 }
 0x1a7   :  { %v2688_v42 = vcombine.low %v13593_v5, %v13587_v0 }
 0x1a9   :  { %4437 = vmatmul.mubr.bf16.gmra.mrb[80].mxu0 %v2451_v20  ;;  %v13581_v20 = vrot.slane %v9472_v63, %v11402_v11  ;;  %v2503_v63 = vcombine.low %v13094_v16, %v13126_v62 }
 0x1aa   :  { %4444 = vmatprep.mubr.bf16.mxu0 %v2661_v60  ;;  %v2679_v60 = vrot.slane %v2671_v54, %v11402_v11  ;;  %v9473_v54 = vcombine.high %v11597_v48, %v11561_v29  ;;  %v19088_v29 = vcombine.low %v13355_v14, %v13362_v18  ;;  %v19093_v18 = vld [vmem:[#allocation25_spill] sm:$0xff] }
 0x1ab   :  { %v2485_v53 = vcombine.low %v2477_v10, %v13581_v20  ;;  %v13601_v10 = vrot.slane %v2688_v42, %v11402_v11  ;;  %v19085_v42 = vld [vmem:[#allocation14_spill] sm:$0xff] }
 0x1ac   :  { %v13589_v30 = vcombine.low %v2679_v60, %v2686_v17  ;;  %v3169_v56 = vrot.slane %v9473_v54, %v11402_v11  ;;  %v19083_v60 = vld [vmem:[#allocation12_spill] sm:$0xff]  ;;  %v19084_v17 = vld [vmem:[#allocation11_spill] sm:$0xff] }
 0x1ae   :  { %v3170_v7 = vcombine.low %v19087_v55, %v3169_v56  ;;  %v19089_v56 = vld [vmem:[#allocation19_spill] sm:$0xff] }
 0x1b1   :  { %4445 = vmatmul.mubr.bf16.gmra.mrb[84].mxu0 %v2468_v45  ;;  %v2502_v45 = vcombine.low %v13536_v33, %v13558_v21 }
 0x1b2   :  { %4452 = vmatprep.mubr.bf16.mxu0 %v2670_v41  ;;  %v13607_v41 = vrot.slane %v2503_v63, %v11402_v11  ;;  %v11218_v63 = vld [vmem:[%s18191_s1 + $0x180] sm:$0xff]  }
 0x1b9   :  { %4453 = vmatmul.mubr.bf16.gmra.mrb[88].mxu0 %v2485_v53  ;;  %v2738_v53 = vcombine.low %v19084_v17, %v19083_v60  ;;  %v19090_v60 = vld [vmem:[#allocation15_spill] sm:$0xff] }
 0x1ba   :  { %4460 = vmatprep.mubr.bf16.mxu0 %v13589_v30  ;;  %v2755_v17 = vcombine.low %v19090_v60, %v19089_v56  ;;  %v19096_v56 = vld [vmem:[#allocation23_spill] sm:$0xff] }
 0x1bb   :  { %v2746_v48 = vrot.slane %v2738_v53, %v11402_v11  ;;  %v3171_v53 = vcombine.low %v11712_v24, %v19093_v18  ;;  %v11221_v24 = vld [vmem:[%s18191_s1 + $0x198] sm:$0xff]   ;;  %v11222_v18 = vld [vmem:[%s18191_s1 + $0x1a0] sm:$0xff]  }
 0x1c1   :  { %4461 = vmatmul.mubr.bf16.gmra.mrb[92].mxu0 %v2502_v45  ;;  %v19086_v45 = vld [vmem:[#allocation13_spill] sm:$0xff] }
 0x1c2   :  { %4468 = vmatprep.mubr.bf16.mxu0 %v13601_v10  ;;  %v2739_v62 = vcombine.low %v19086_v45, %v19085_v42  ;;  %v19091_v42 = vld [vmem:[#allocation21_spill] sm:$0xff]  ;;  %v19092_v45 = vld [vmem:[#allocation20_spill] sm:$0xff] }
 0x1c3   :  { %v2756_v14 = vcombine.low %v19092_v45, %v19091_v42  ;;  %v19098_v42 = vld [vmem:[#allocation35_spill] sm:$0xff]  ;;  %v19099_v45 = vld [vmem:[#allocation54_spill] sm:$0xff] }
 0x1c4   :  { %v2753_v54 = vrot.slane %v2739_v62, %v11402_v11  ;;  %v2763_v62 = vrot.slane %v2755_v17, %v11402_v11 }
 0x1c6   :  { %v2754_v55 = vcombine.low %v2746_v48, %v2753_v54  ;;  %v3178_v48 = vrot.slane %v3171_v53, %v11402_v11 }
 0x1c9   :  { %4469 = vmatmul.mubr.bf16.gmra.mrb[96].mxu0 %v13607_v41 }
 0x1ca   :  { %4508 = vmatprep.mubr.bf16.mxu0 %v19082_v13  ;;  %v11219_v13 = vld [vmem:[%s18191_s1 + $0x188] sm:$0xff]  }
 0x1d1   :  { %4509 = vmatmul.mubr.bf16.vlgmr.msra.gmra.mrb[0].mxu0 %v19088_v29  ;;  %v19094_v29 = vld [vmem:[#allocation42_spill] sm:$0xff] }
 0x1d2   :  { %4516 = vmatprep.mubr.bf16.mxu0 %v3170_v7  ;;  %4709 = vmatpush1.bf16.msra.mxu0 %v11218_v63  ;;  %v11220_v7 = vld [vmem:[%s18191_s1 + $0x190] sm:$0xff]   ;;  %v2770_v63 = vrot.slane %v2756_v14, %v11402_v11  ;;  %v3179_v14 = vcombine.low %v3178_v48, %v19099_v45  ;;  %v19101_v48 = vld [vmem:[#allocation37_spill] sm:$0xff] }
 0x1d3   :  { %4710 = vmatprep.subr.bf16.mxu0 %v18766_v8 }
 0x1d4   :  { %v2771_v54 = vcombine.low %v2763_v62, %v2770_v63  ;;  %v11223_v62 = vld [vmem:[%s18191_s1 + $0x1a8] sm:$0xff]  }
 0x1d6   :  { %4711 = vmatpush1.bf16.msra.mxu0 %v11219_v13  ;;  %v19095_v13 = vld [vmem:[#allocation34_spill] sm:$0xff] }
 0x1d7   :  { %4712 = vmatprep.subr.bf16.mxu0 %v18766_v8  ;;  %v2772_v60 = vcombine.low %v19096_v56, %v19095_v13  ;;  %v19102_v13 = vld [vmem:[#allocation48_spill] sm:$0xff]  ;;  %v19103_v56 = vld [vmem:[#allocation47_spill] sm:$0xff] }
 0x1d9   :  { %4517 = vmatmul.mubr.bf16.gmra.mrb[4].mxu0 %v2754_v55  ;;  %v19097_v55 = vld [vmem:[#allocation36_spill] sm:$0xff]  ;;  %v2780_v53 = vrot.slane %v2772_v60, %v11402_v11 }
 0x1da   :  { %4524 = vmatprep.mubr.bf16.mxu0 %v19094_v29  ;;  %4713 = vmatpush1.bf16.msra.mxu0 %v11220_v7  ;;  %v2773_v17 = vcombine.low %v19098_v42, %v19097_v55  ;;  %v19100_v29 = vld [vmem:[#allocation46_spill] sm:$0xff]  ;;  %v2790_v55 = vcombine.low %v19103_v56, %v19102_v13  ;;  %v11224_v60 = vld [vmem:[%s18191_s1 + $0x1b0] sm:$0xff]  }
 0x1db   :  { %4714 = vmatprep.subr.bf16.mxu0 %v18766_v8  ;;  %v19110_v56 = vld [vmem:[#allocation60_spill] sm:$0xff] }
 0x1dc   :  { %v2787_v7 = vrot.slane %v2773_v17, %v11402_v11  ;;  %v2804_v17 = vrot.slane %v2790_v55, %v11402_v11  ;;  %v3189_v55 = vcombine.low %v19006_v35, %v19110_v56  ;;  %v11227_v35 = vld [vmem:[%s18191_s1 + $0x1c8] sm:$0xff]  }
 0x1de   :  { %4715 = vmatpush1.bf16.msra.mxu0 %v11221_v24  ;;  %v2788_v63 = vcombine.low %v2780_v53, %v2787_v7  ;;  %v2789_v24 = vcombine.low %v19101_v48, %v19100_v29  ;;  %v19105_v53 = vld [vmem:[#allocation55_spill] sm:$0xff]  ;;  %v19106_v7 = vld [vmem:[#allocation49_spill] sm:$0xff]  ;;  %v19108_v29 = vld [vmem:[#allocation56_spill] sm:$0xff] }
 0x1df   :  { %4716 = vmatprep.subr.bf16.mxu0 %v18766_v8 }
 0x1e0   :  { %v2797_v42 = vrot.slane %v2789_v24, %v11402_v11  ;;  %v19109_v24 = vld [vmem:[#allocation79_spill] sm:$0xff] }
 0x1e1   :  { %4525 = vmatmul.mubr.bf16.gmra.mrb[8].mxu0 %v2771_v54  ;;  %v9474_v54 = vcombine.high %v19002_v23, %v19001_v61  ;;  %v11225_v61 = vld [vmem:[%s18191_s1 + $0x1b8] sm:$0xff]  }
 0x1e2   :  { %4532 = vmatprep.mubr.bf16.mxu0 %v3179_v14  ;;  %4717 = vmatpush1.bf16.msra.mxu0 %v11222_v18  ;;  %v19104_v14 = vld [vmem:[#allocation75_spill] sm:$0xff]  ;;  %v2805_v23 = vcombine.low %v2797_v42, %v2804_v17  ;;  %v3196_v17 = vrot.slane %v3189_v55, %v11402_v11 }
 0x1e3   :  { %4718 = vmatprep.subr.bf16.mxu0 %v18766_v8  ;;  %v3187_v18 = vrot.slane %v9474_v54, %v11402_v11  ;;  %v11226_v54 = vld [vmem:[%s18191_s1 + $0x1c0] sm:$0xff]  }
 0x1e5   :  { %v3188_v13 = vcombine.low %v3187_v18, %v19109_v24  ;;  %v19111_v18 = vld [vmem:[#allocation69_spill] sm:$0xff] }
 0x1e6   :  { %4719 = vmatpush1.bf16.msra.mxu0 %v11223_v62  ;;  %v2806_v62 = vcombine.low %v19106_v7, %v19105_v53  ;;  %v19113_v7 = vld [vmem:[#allocation71_spill] sm:$0xff] }
 0x1e7   :  { %4720 = vmatprep.subr.bf16.mxu0 %v18766_v8 }
 0x1e9   :  { %4533 = vmatmul.mubr.bf16.gmra.mrb[12].mxu0 %v2788_v63  ;;  %v19107_v63 = vld [vmem:[#allocation57_spill] sm:$0xff] }
 0x1ea   :  { %4540 = vmatprep.mubr.bf16.mxu0 %v19104_v14  ;;  %4721 = vmatpush1.bf16.msra.mxu0 %v11224_v60  ;;  %v2807_v48 = vcombine.low %v19108_v29, %v19107_v63  ;;  %v2814_v60 = vrot.slane %v2806_v62, %v11402_v11  ;;  %v19115_v62 = vld [vmem:[#allocation91_spill] sm:$0xff] }
 0x1eb   :  { %4722 = vmatprep.subr.bf16.mxu0 %v18766_v8  ;;  %v3197_v29 = vcombine.low %v19115_v62, %v3196_v17  ;;  %v19118_v17 = vld [vmem:[#allocation85_spill] sm:$0xff] }
 0x1ec   :  { %v2821_v42 = vrot.slane %v2807_v48, %v11402_v11  ;;  %v11228_v48 = vld [vmem:[%s18191_s1 + $0x1d0] sm:$0xff]  }
 0x1ee   :  { %4723 = vmatpush1.bf16.msra.mxu0 %v11225_v61  ;;  %v2822_v14 = vcombine.low %v2814_v60, %v2821_v42  ;;  %v19112_v61 = vld [vmem:[#allocation58_spill] sm:$0xff]  ;;  %v19117_v60 = vld [vmem:[#allocation72_spill] sm:$0xff] }
 0x1ef   :  { %4724 = vmatprep.subr.bf16.mxu0 %v18766_v8  ;;  %v2823_v53 = vcombine.low %v19112_v61, %v19111_v18  ;;  %v9475_v61 = vcombine.high %v19019_v59, %v19018_v46  ;;  %v19123_v59 = vld [vmem:[#allocation97_spill] sm:$0xff] }
 0x1f1   :  { %4541 = vmatmul.mubr.bf16.gmra.mrb[16].mxu0 %v2805_v23  ;;  %v19114_v23 = vld [vmem:[#allocation70_spill] sm:$0xff] }
 0x1f2   :  { %4548 = vmatprep.mubr.bf16.mxu0 %v3188_v13  ;;  %4725 = vmatpush1.bf16.msra.mxu0 %v11226_v54  ;;  %v2824_v63 = vcombine.low %v19114_v23, %v19113_v7  ;;  %v2831_v13 = vrot.slane %v2823_v53, %v11402_v11  ;;  %v19116_v54 = vld [vmem:[#allocation82_spill] sm:$0xff]  ;;  %v11229_v7 = vld [vmem:[%s18191_s1 + $0x1d8] sm:$0xff]  }
 0x1f3   :  { %4726 = vmatprep.subr.bf16.mxu0 %v18766_v8  ;;  %v2840_v42 = vcombine.low %v19117_v60, %v19116_v54  ;;  %v19120_v23 = vld [vmem:[#allocation114_spill] sm:$0xff]  ;;  %v19125_v54 = vld [vmem:[#allocation117_spill] sm:$0xff] }
 0x1f4   :  { %v2838_v56 = vrot.slane %v2824_v63, %v11402_v11  ;;  %v3205_v63 = vrot.slane %v9475_v61, %v11402_v11 }
 0x1f6   :  { %4727 = vmatpush1.bf16.msra.mxu0 %v11227_v35  ;;  %v2839_v55 = vcombine.low %v2831_v13, %v2838_v56  ;;  %v19119_v35 = vld [vmem:[#allocation83_spill] sm:$0xff]  ;;  %v19122_v13 = vld [vmem:[#allocation86_spill] sm:$0xff]  ;;  %v19124_v56 = vld [vmem:[#allocation96_spill] sm:$0xff]  ;;  %v3206_v60 = vcombine.low %v19125_v54, %v3205_v63 }
 0x1f7   :  { %4728 = vmatprep.subr.bf16.mxu0 %v18766_v8  ;;  %v2841_v18 = vcombine.low %v19119_v35, %v19118_v17  ;;  %v19129_v63 = vld [vmem:[#allocation110_spill] sm:$0xff] }
 0x1f9   :  { %4549 = vmatmul.mubr.bf16.gmra.mrb[20].mxu0 %v2822_v14  ;;  %v2848_v14 = vrot.slane %v2840_v42, %v11402_v11  ;;  %v2855_v53 = vrot.slane %v2841_v18, %v11402_v11  ;;  %v11230_v42 = vld [vmem:[%s18191_s1 + $0x1e0] sm:$0xff]   ;;  %v11231_v18 = vld [vmem:[%s18191_s1 + $0x1e8] sm:$0xff]  }
 0x1fa   :  { %4556 = vmatprep.mubr.bf16.mxu0 %v3197_v29  ;;  %4729 = vmatpush1.bf16.msra.mxu0 %v11228_v48  ;;  %v19121_v48 = vld [vmem:[#allocation95_spill] sm:$0xff] }
 0x1fb   :  { %4730 = vmatprep.subr.bf16.mxu0 %v18766_v8  ;;  %v2856_v29 = vcombine.low %v2848_v14, %v2855_v53  ;;  %v2857_v46 = vcombine.low %v19122_v13, %v19121_v48  ;;  %v19126_v14 = vld [vmem:[#allocation109_spill] sm:$0xff]  ;;  %v19127_v53 = vld [vmem:[#allocation98_spill] sm:$0xff] }
 0x1fd   :  { %v2865_v17 = vrot.slane %v2857_v46, %v11402_v11  ;;  %v11232_v46 = vld [vmem:[%s18191_s1 + $0x1f0] sm:$0xff]  }
 0x1fe   :  { %4731 = vmatpush1.bf16.msra.mxu0 %v11229_v7  ;;  %v2874_v7 = vcombine.low %v19127_v53, %v19126_v14  ;;  %v19135_v14 = vld [vmem:[#allocation120_spill] sm:$0xff] }
 0x1ff   :  { %4732 = vmatprep.subr.bf16.mxu0 %v18766_v8 }
 0x201   :  { %4557 = vmatmul.mubr.bf16.gmra.mrb[24].mxu0 %v2839_v55  ;;  %v2858_v55 = vcombine.low %v19124_v56, %v19123_v59  ;;  %v2882_v59 = vrot.slane %v2874_v7, %v11402_v11  ;;  %v19136_v7 = vld [vmem:[#allocation144_spill] sm:$0xff] }
 0x202   :  { %4564 = vmatprep.mubr.bf16.mxu0 %v19120_v23  ;;  %4733 = vmatpush1.bf16.msra.mxu0 %v11230_v42  ;;  %v19128_v23 = vld [vmem:[#allocation111_spill] sm:$0xff] }
 0x203   :  { %v2872_v35 = vrot.slane %v2858_v55, %v11402_v11  ;;  %4734 = vmatprep.subr.bf16.mxu0 %v18766_v8  ;;  %v2875_v48 = vcombine.low %v19129_v63, %v19128_v23  ;;  %v19131_v55 = vld [vmem:[#allocation139_spill] sm:$0xff] }
 0x205   :  { %v2873_v61 = vcombine.low %v2865_v17, %v2872_v35  ;;  %v2889_v56 = vrot.slane %v2875_v48, %v11402_v11  ;;  %v19132_v17 = vld [vmem:[#allocation119_spill] sm:$0xff]  ;;  %v19133_v35 = vld [vmem:[#allocation112_spill] sm:$0xff] }
 0x206   :  { %4735 = vmatpush1.bf16.msra.mxu0 %v11231_v18  ;;  %v2891_v18 = vcombine.low %v19133_v35, %v19132_v17  ;;  %v9476_v17 = vcombine.high %v19048_v40, %v19047_v3 }
 0x207   :  { %4736 = vmatprep.subr.bf16.mxu0 %v18766_v8  ;;  %v2890_v42 = vcombine.low %v2882_v59, %v2889_v56  ;;  %v19139_v59 = vld [vmem:[#allocation135_spill] sm:$0xff]  ;;  %v19140_v56 = vld [vmem:[#allocation134_spill] sm:$0xff] }
 0x208   :  { %v2899_v63 = vrot.slane %v2891_v18, %v11402_v11  ;;  %v3223_v35 = vrot.slane %v9476_v17, %v11402_v11  ;;  %v19149_v17 = vld [vmem:[#allocation152_spill] sm:$0xff] }
 0x209   :  { %4565 = vmatmul.mubr.bf16.gmra.mrb[28].mxu0 %v2856_v29  ;;  %v19130_v29 = vld [vmem:[#allocation105_spill] sm:$0xff] }
 0x20a   :  { %4572 = vmatprep.mubr.bf16.mxu0 %v3206_v60  ;;  %v3207_v13 = vcombine.low %v19033_v9, %v19130_v29  ;;  %4737 = vmatpush1.bf16.msra.mxu0 %v11232_v46  ;;  %v11233_v9 = vld [vmem:[%s18191_s1 + $0x1f8] sm:$0xff]   ;;  %v19138_v46 = vld [vmem:[#allocation127_spill] sm:$0xff] }
 0x20b   :  { %4738 = vmatprep.subr.bf16.mxu0 %v18766_v8  ;;  %v2909_v8 = vcombine.low %v19140_v56, %v19139_v59  ;;  %v19147_v59 = vld [vmem:[#allocation147_spill] sm:$0xff]  ;;  %v19148_v56 = vld [vmem:[#allocation158_spill] sm:$0xff] }
 0x20c   :  { %v3214_v60 = vrot.slane %v3207_v13, %v11402_v11  ;;  %v19137_v13 = vld [vmem:[#allocation133_spill] sm:$0xff]  ;;  %v3225_v3 = vcombine.low %v19052_v4, %v19147_v59  ;;  %v19156_v59 = vld [vmem:[#allocation174_spill] sm:$0xff] }
 0x20e   :  { %v3215_v23 = vcombine.low %v3214_v60, %v19136_v7  ;;  %4739 = vmatpush1.bf16.msra.mxu0 %v11233_v9  ;;  %v2923_v9 = vrot.slane %v2909_v8, %v11402_v11 }
 0x211   :  { %4573 = vmatmul.mubr.bf16.gmra.mrb[32].mxu0 %v2873_v61  ;;  %v19134_v61 = vld [vmem:[#allocation126_spill] sm:$0xff] }
 0x212   :  { %4580 = vmatprep.mubr.bf16.mxu0 %v19131_v55  ;;  %v2892_v53 = vcombine.low %v19135_v14, %v19134_v61  ;;  %v2908_v55 = vcombine.low %v19138_v46, %v19137_v13  ;;  %v19142_v61 = vld [vmem:[#allocation148_spill] sm:$0xff]  ;;  %v19146_v13 = vld [vmem:[#allocation170_spill] sm:$0xff] }
 0x213   :  { %v19143_v14 = vld [vmem:[#allocation136_spill] sm:$0xff]  ;;  %v3224_v46 = vcombine.low %v3223_v35, %v19146_v13 }
 0x214   :  { %v2906_v48 = vrot.slane %v2892_v53, %v11402_v11  ;;  %v2916_v60 = vrot.slane %v2908_v55, %v11402_v11  ;;  %v2925_v53 = vcombine.low %v19143_v14, %v19142_v61  ;;  %v19152_v14 = vld [vmem:[#allocation180_spill] sm:$0xff] }
 0x216   :  { %v2907_v29 = vcombine.low %v2899_v63, %v2906_v48  ;;  %v2924_v18 = vcombine.low %v2916_v60, %v2923_v9  ;;  %v19145_v63 = vld [vmem:[#allocation149_spill] sm:$0xff]  ;;  %v2933_v40 = vrot.slane %v2925_v53, %v11402_v11  ;;  %v2942_v60 = vcombine.low %v19149_v17, %v19148_v56  ;;  %v19150_v9 = vld [vmem:[#allocation162_spill] sm:$0xff] }
 0x217   :  { %v18504_v17 = vmov 0.0  }
 0x218   :  { %v2950_v4 = vrot.slane %v2942_v60, %v11402_v11  ;;  %10090 = vmatprep.subr.bf16.mxu0 %v18504_v17  ;;  %10468 = vmatprep.subr.bf16.mxu1 %v18504_v17 }
 0x219   :  { %4581 = vmatmul.mubr.bf16.gmra.mrb[36].mxu0 %v2890_v42  ;;  %v19141_v42 = vld [vmem:[#allocation166_spill] sm:$0xff]  ;;  %10166 = vmatprep.mubr.msk.bf16.mxu1 %vm11321_vm7, %v18504_v17 }
 0x21a   :  { %4588 = vmatprep.mubr.bf16.mxu0 %v3215_v23  ;;  %v19144_v23 = vld [vmem:[#allocation151_spill] sm:$0xff] }
 0x21b   :  { %v2926_v48 = vcombine.low %v19145_v63, %v19144_v23  ;;  %v19153_v23 = vld [vmem:[#allocation173_spill] sm:$0xff]  ;;  %v19154_v63 = vld [vmem:[#allocation163_spill] sm:$0xff] }
 0x21d   :  { %v2940_v8 = vrot.slane %v2926_v48, %v11402_v11  ;;  %v2959_v48 = vcombine.low %v19154_v63, %v19153_v23  ;;  %v13814_v63 = vld [vmem:[%s18191_s1 + $0x200] sm:$0xff]  }
 0x21e   :  { %10476 = vmatpush3.bf16.msra.mxu1 %v13814_v63 }
 0x21f   :  { %v2941_v55 = vcombine.low %v2933_v40, %v2940_v8  ;;  %v9477_v40 = vcombine.high %v19065_v47, %v19064_v25  ;;  %v2967_v8 = vrot.slane %v2959_v48, %v11402_v11  ;;  %v19161_v25 = vld [vmem:[#allocation186_spill] sm:$0xff]  ;;  %10469 = vmatprep.subr.bf16.mxu1 %v18504_v17 }
 0x221   :  { %4589 = vmatmul.mubr.bf16.gmra.mrb[40].mxu0 %v2907_v29  ;;  %v3232_v29 = vrot.slane %v3225_v3, %v11402_v11  ;;  %v3241_v56 = vrot.slane %v9477_v40, %v11402_v11  ;;  %v19165_v40 = vld [vmem:[#allocation200_spill] sm:$0xff] }
 0x222   :  { %4596 = vmatprep.mubr.bf16.mxu0 %v19141_v42  ;;  %v19151_v42 = vld [vmem:[#allocation161_spill] sm:$0xff] }
 0x223   :  { %v2943_v61 = vcombine.low %v19151_v42, %v19150_v9  ;;  %v3233_v35 = vcombine.low %v19152_v14, %v3232_v29  ;;  %v19158_v9 = vld [vmem:[#allocation184_spill] sm:$0xff]  ;;  %v19159_v42 = vld [vmem:[#allocation177_spill] sm:$0xff] }
 0x229   :  { %4597 = vmatmul.mubr.bf16.gmra.mrb[44].mxu0 %v2924_v18  ;;  %v2957_v18 = vrot.slane %v2943_v61, %v11402_v11  ;;  %v2976_v61 = vcombine.low %v19159_v42, %v19158_v9  ;;  %v19168_v42 = vld [vmem:[#allocation222_spill] sm:$0xff] }
 0x22a   :  { %4604 = vmatprep.mubr.bf16.mxu0 %v3224_v46  ;;  %v19155_v46 = vld [vmem:[#allocation176_spill] sm:$0xff] }
 0x22b   :  { %v2958_v53 = vcombine.low %v2950_v4, %v2957_v18  ;;  %v2960_v3 = vcombine.low %v19156_v59, %v19155_v46  ;;  %v19162_v4 = vld [vmem:[#allocation205_spill] sm:$0xff]  ;;  %v19163_v46 = vld [vmem:[#allocation198_spill] sm:$0xff]  ;;  %v19164_v59 = vld [vmem:[#allocation188_spill] sm:$0xff] }
 0x22c   :  { %v3242_v18 = vcombine.low %v19162_v4, %v3241_v56 }
 0x22d   :  { %v2974_v29 = vrot.slane %v2960_v3, %v11402_v11  ;;  %v2993_v3 = vcombine.low %v19164_v59, %v19163_v46  ;;  %v19173_v59 = vld [vmem:[#allocation224_spill] sm:$0xff] }
 0x22f   :  { %v2975_v60 = vcombine.low %v2967_v8, %v2974_v29  ;;  %v19166_v8 = vld [vmem:[#allocation199_spill] sm:$0xff] }
 0x230   :  { %v2994_v29 = vcombine.low %v19166_v8, %v19165_v40  ;;  %v19174_v8 = vld [vmem:[#allocation218_spill] sm:$0xff] }
 0x231   :  { %4605 = vmatmul.mubr.bf16.gmra.mrb[48].mxu0 %v2941_v55  ;;  %v19157_v55 = vld [vmem:[#allocation202_spill] sm:$0xff] }
 0x232   :  { %4612 = vmatprep.mubr.bf16.mxu0 %v3233_v35  ;;  %v19160_v35 = vld [vmem:[#allocation187_spill] sm:$0xff]  ;;  %v3008_v9 = vrot.slane %v2994_v29, %v11402_v11  ;;  %v19175_v29 = vld [vmem:[#allocation210_spill] sm:$0xff] }
 0x233   :  { %v2977_v47 = vcombine.low %v19161_v25, %v19160_v35  ;;  %v19169_v25 = vld [vmem:[#allocation207_spill] sm:$0xff] }
 0x235   :  { %v2991_v23 = vrot.slane %v2977_v47, %v11402_v11  ;;  %v19170_v47 = vld [vmem:[#allocation201_spill] sm:$0xff] }
 0x239   :  { %4613 = vmatmul.mubr.bf16.gmra.mrb[52].mxu0 %v2958_v53  ;;  %v2984_v53 = vrot.slane %v2976_v61, %v11402_v11 }
 0x23a   :  { %4620 = vmatprep.mubr.bf16.mxu0 %v19157_v55  ;;  %v19167_v55 = vld [vmem:[#allocation193_spill] sm:$0xff] }
 0x23b   :  { %v2992_v48 = vcombine.low %v2984_v53, %v2991_v23  ;;  %v3243_v56 = vcombine.low %v19071_v52, %v19167_v55  ;;  %v19171_v53 = vld [vmem:[#allocation209_spill] sm:$0xff]  ;;  %v19172_v23 = vld [vmem:[#allocation208_spill] sm:$0xff]  ;;  %v3027_v55 = vcombine.low %v19175_v29, %v19174_v8 }
 0x23c   :  { %v3011_v46 = vcombine.low %v19172_v23, %v19171_v53  ;;  %v19180_v23 = vld [vmem:[#allocation229_spill] sm:$0xff] }
 0x23d   :  { %v3250_v61 = vrot.slane %v3243_v56, %v11402_v11  ;;  %v19176_v56 = vld [vmem:[#allocation220_spill] sm:$0xff] }
 0x23f   :  { %v3251_v40 = vcombine.low %v3250_v61, %v19173_v59 }
 0x241   :  { %4621 = vmatmul.mubr.bf16.gmra.mrb[56].mxu0 %v2975_v60  ;;  %v3001_v60 = vrot.slane %v2993_v3, %v11402_v11 }
 0x242   :  { %4628 = vmatprep.mubr.bf16.mxu0 %v3242_v18  ;;  %v3010_v18 = vcombine.low %v19170_v47, %v19169_v25  ;;  %v3035_v25 = vrot.slane %v3027_v55, %v11402_v11 }
 0x243   :  { %v3009_v35 = vcombine.low %v3001_v60, %v3008_v9  ;;  %v19177_v60 = vld [vmem:[#allocation219_spill] sm:$0xff] }
 0x244   :  { %v3018_v52 = vrot.slane %v3010_v18, %v11402_v11  ;;  %v3028_v9 = vcombine.low %v19177_v60, %v19176_v56  ;;  %v19183_v56 = vld [vmem:[#allocation231_spill] sm:$0xff] }
 0x245   :  { %v3061_v60 = vcombine.low %v19183_v56, %v13044_v6  ;;  %v9479_v6 = vcombine.high %v13094_v16, %v13540_v49  ;;  %v13889_v16 = vld [vmem:[%s18191_s1 + $0x210] sm:$0xff]  }
 0x246   :  { %v3042_v61 = vrot.slane %v3028_v9, %v11402_v11  ;;  %v19184_v9 = vld [vmem:[#allocation236_spill] sm:$0xff] }
 0x248   :  { %v3043_v18 = vcombine.low %v3035_v25, %v3042_v61 }
 0x249   :  { %4629 = vmatmul.mubr.bf16.gmra.mrb[60].mxu0 %v2992_v48  ;;  %v3025_v48 = vrot.slane %v3011_v46, %v11402_v11  ;;  %v19181_v46 = vld [vmem:[#allocation228_spill] sm:$0xff] }
 0x24a   :  { %4636 = vmatprep.mubr.bf16.mxu0 %v19168_v42  ;;  %v9478_v42 = vcombine.high %v19080_v2, %v12856_v43  ;;  %v19178_v43 = vld [vmem:[#allocation227_spill] sm:$0xff]  ;;  %v19179_v2 = vld [vmem:[#allocation221_spill] sm:$0xff] }
 0x24b   :  { %v3026_v3 = vcombine.low %v3018_v52, %v3025_v48  ;;  %v3044_v53 = vcombine.low %v19179_v2, %v19178_v43  ;;  %v19182_v48 = vld [vmem:[#allocation230_spill] sm:$0xff]  ;;  %v19187_v2 = vld [vmem:[#allocation241_spill] sm:$0xff] }
 0x24c   :  { %v3259_v47 = vrot.slane %v9478_v42, %v11402_v11  ;;  %v3062_v42 = vcombine.low %v19184_v9, %v13052_v1  ;;  %v19186_v43 = vld [vmem:[#allocation242_spill] sm:$0xff]  ;;  %v9462_v1 = vrot.slane %v13540_v49, 9 }
 0x24e   :  { %v3260_v52 = vcombine.low %v3259_v47, %v13085_v38  ;;  %v3076_v61 = vrot.slane %v3062_v42, %v11402_v11  ;;  %v19185_v47 = vld [vmem:[#allocation237_spill] sm:$0xff]  ;;  %v19190_v42 = vld [vmem:[#allocation251_spill] sm:$0xff] }
 0x251   :  { %4637 = vmatmul.mubr.bf16.gmra.mrb[64].mxu0 %v3009_v35  ;;  %v13846_v35 = vld [vmem:[%s18191_s1 + $0x208] sm:$0xff]  }
 0x252   :  { %4644 = vmatprep.mubr.bf16.mxu0 %v3251_v40  ;;  %10477 = vmatpush3.bf16.msra.mxu1 %v13846_v35  ;;  %v3045_v40 = vcombine.low %v19181_v46, %v19180_v23  ;;  %v1135_v46 = vrot.slane %v13563_v26, 7 }
 0x253   :  { %10470 = vmatprep.subr.bf16.mxu1 %v18504_v17 }
 0x254   :  { %v3059_v8 = vrot.slane %v3045_v40, %v11402_v11 }
 0x256   :  { %10478 = vmatpush3.bf16.msra.mxu1 %v13889_v16 }
 0x257   :  { %10471 = vmatprep.subr.bf16.mxu1 %v18504_v17 }
 0x259   :  { %4645 = vmatmul.mubr.bf16.gmra.mrb[68].mxu0 %v3026_v3  ;;  %v3261_v3 = vcombine.low %v12949_v22, %v19182_v48  ;;  %v3069_v22 = vrot.slane %v3061_v60, %v11402_v11  ;;  %v3277_v48 = vrot.slane %v9479_v6, %v11402_v11  ;;  %v19189_v60 = vld [vmem:[#allocation247_spill] sm:$0xff] }
 0x25a   :  { %4652 = vmatprep.mubr.bf16.mxu0 %v13067_v19  ;;  %v3052_v19 = vrot.slane %v3044_v53, %v11402_v11  ;;  %v3079_v53 = vcombine.low %v19187_v2, %v19186_v43  ;;  %v1147_v2 = vrot.slane %v13593_v5, 7 }
 0x25b   :  { %v3268_v29 = vrot.slane %v3261_v3, %v11402_v11  ;;  %v3077_v23 = vcombine.low %v3069_v22, %v3076_v61  ;;  %v1138_v3 = vrot.slane %v13555_v12, 7  ;;  %v1137_v22 = vrot.slane %v1135_v46, 2 }
 0x25c   :  { %v3060_v55 = vcombine.low %v3052_v19, %v3059_v8  ;;  %v1141_v19 = vrot.slane %v13567_v34, 7  ;;  %v1144_v8 = vrot.slane %v13570_v44, 7 }
 0x25d   :  { %v3269_v25 = vcombine.low %v13130_v32, %v3268_v29  ;;  %v1140_v61 = vrot.slane %v1138_v3, 2 }
 0x25e   :  { %v1146_v43 = vrot.slane %v1144_v8, 2 }
 0x25f   :  { %v13913_v6 = vsel %vm11451_vm6, %v1140_v61, %v1141_v19 }
 0x261   :  { %4653 = vmatmul.mubr.bf16.gmra.mrb[72].mxu0 %v3043_v18  ;;  %v3078_v18 = vcombine.low %v19185_v47, %v13098_v50  ;;  %v13882_v50 = vsel %vm11451_vm6, %v9462_v1, %v1135_v46  ;;  %v1143_v47 = vrot.slane %v1141_v19, 2  ;;  %v13932_v1 = vld [vmem:[%s18191_s1 + $0x218] sm:$0xff]   ;;  %v1150_v19 = vrot.slane %v13587_v0, 7 }
 0x262   :  { %4660 = vmatprep.mubr.bf16.mxu0 %v3260_v52  ;;  %v3093_v52 = vrot.slane %v3079_v53, %v11402_v11  ;;  %v3096_v9 = vcombine.low %v19189_v60, %v13882_v50  ;;  %10479 = vmatpush3.bf16.msra.mxu1 %v13932_v1 }
 0x263   :  { %v3086_v40 = vrot.slane %v3078_v18, %v11402_v11  ;;  %v3280_v18 = vcombine.low %v13570_v44, %v13593_v5  ;;  %v13923_v44 = vsel %vm11451_vm6, %v1143_v47, %v1144_v8  ;;  %v13927_v5 = vsel %vm11451_vm6, %v1146_v43, %v1147_v2  ;;  %10472 = vmatprep.subr.bf16.mxu1 %v18504_v17 }
 0x264   :  { %v3110_v53 = vrot.slane %v3096_v9, %v11402_v11  ;;  %v1149_v9 = vrot.slane %v1147_v2, 2  ;;  %v11240_v2 = vld [vmem:[%s18191_s1 + $0x230] sm:$0xff]  }
 0x265   :  { %v3094_v29 = vcombine.low %v3086_v40, %v3093_v52  ;;  %v3113_v52 = vcombine.low %v13923_v44, %v13927_v5 }
 0x269   :  { %4661 = vmatmul.mubr.bf16.gmra.mrb[76].mxu0 %v3060_v55  ;;  %v19188_v55 = vld [vmem:[#allocation243_spill] sm:$0xff] }
 0x26a   :  { %4668 = vmatprep.mubr.bf16.mxu0 %v3269_v25  ;;  %v3095_v56 = vcombine.low %v19188_v55, %v13152_v51  ;;  %v3278_v25 = vcombine.low %v19190_v42, %v3277_v48  ;;  %v11238_v55 = vld [vmem:[%s18191_s1 + $0x220] sm:$0xff]  }
 0x26b   :  { %10480 = vmatpush3.bf16.msra.mxu1 %v11238_v55 }
 0x26c   :  { %v3103_v51 = vrot.slane %v3095_v56, %v11402_v11  ;;  %10473 = vmatprep.subr.bf16.mxu1 %v18504_v17 }
 0x26e   :  { %v3111_v46 = vcombine.low %v3103_v51, %v3110_v53  ;;  %v11241_v51 = vld [vmem:[%s18191_s1 + $0x238] sm:$0xff]  }
 0x271   :  { %4669 = vmatmul.mubr.bf16.gmra.mrb[80].mxu0 %v3077_v23  ;;  %v13909_v23 = vsel %vm11451_vm6, %v1137_v22, %v1138_v3  ;;  %v1132_v3 = vcombine.high %v13587_v0, %v13587_v0  ;;  %v11239_v22 = vld [vmem:[%s18191_s1 + $0x228] sm:$0xff]  }
 0x272   :  { %4676 = vmatprep.mubr.bf16.mxu0 %v13168_v57  ;;  %v3279_v57 = vcombine.low %v13555_v12, %v13567_v34  ;;  %v13919_v34 = vrot.slane %v3280_v18, %v11402_v11  ;;  %v3112_v40 = vcombine.low %v13909_v23, %v13913_v6  ;;  %10481 = vmatpush3.bf16.msra.mxu1 %v11239_v22 }
 0x273   :  { %v1153_v56 = vrot.slane %v1132_v3, 7  ;;  %v3296_v60 = vcombine.low %v13587_v0, %v1132_v3  ;;  %10474 = vmatprep.subr.bf16.mxu1 %v18504_v17  ;;  %v19193_v3 = vld [vmem:[#allocation44_spill] sm:$0xff] }
 0x274   :  { %v13916_v12 = vrot.slane %v3279_v57, %v11402_v11  ;;  %v3120_v8 = vrot.slane %v3112_v40, %v11402_v11  ;;  %v13958_v57 = vsel %vm11451_vm6, %v1149_v9, %v1150_v19  ;;  %v19192_v40 = vld [vmem:[#allocation18_spill] sm:$0xff] }
 0x275   :  { %v3303_v47 = vrot.slane %v3296_v60, %v11402_v11 }
 0x276   :  { %v3295_v48 = vcombine.low %v13916_v12, %v13919_v34  ;;  %10482 = vmatpush3.bf16.msra.mxu1 %v11240_v2 }
 0x277   :  { %10475 = vmatprep.subr.bf16.mxu1 %v18504_v17 }
 0x279   :  { %4677 = vmatmul.mubr.bf16.gmra.mrb[84].mxu0 %v3094_v29  ;;  %v3127_v29 = vrot.slane %v3113_v52, %v11402_v11 }
 0x27a   :  { %4684 = vmatprep.mubr.bf16.mxu0 %v3278_v25  ;;  %v1152_v25 = vrot.slane %v1150_v19, 2  ;;  %10483 = vmatpush3.bf16.msra.mxu1 %v11241_v51  ;;  %v19194_v19 = vld [vmem:[#allocation33_spill] sm:$0xff] }
 0x27b   :  { %v3128_v61 = vcombine.low %v3120_v8, %v3127_v29  ;;  %v3409_v8 = vcombine.low %v19194_v19, %v19193_v3  ;;  %v19195_v29 = vld [vmem:[#allocation8_spill] sm:$0xff]  ;;  %v95_v3 = vld [vmem:[%s18192_s0 + $0x1e0] sm:$0xff] }
 0x27c   :  { %v13962_v18 = vsel %vm11451_vm6, %v1152_v25, %v1153_v56  ;;  %v19196_v56 = vld [vmem:[#allocation9_spill] sm:$0xff] }
 0x27d   :  { %v3129_v43 = vcombine.low %v13958_v57, %v13962_v18  ;;  %v19197_v60 = vcombine.low %v19195_v29, %v19196_v56  ;;  %v19200_v25 = vld [vmem:[#allocation61_spill] sm:$0xff]  ;;  %v19214_v29 = vld [vmem:[#allocation94_spill] sm:$0xff] }
 0x27f   :  { %v3136_v53 = vrot.slane %v3129_v43, %v11402_v11 }
 0x281   :  { %4685 = vmatmul.mubr.bf16.gmra.mrb[88].mxu0 %v3111_v46  ;;  %v19191_v46 = vld [vmem:[#allocation32_spill] sm:$0xff] }
 0x282   :  { %4692 = vmatprep.mubr.bf16.mxu0 %v3295_v48  ;;  %v3408_v52 = vcombine.low %v19192_v40, %v19191_v46  ;;  %v3521_v48 = vcombine.low %v13474_v15, %v13512_v39  ;;  %v19198_v15 = vld [vmem:[#allocation53_spill] sm:$0xff]  ;;  %v19199_v39 = vld [vmem:[#allocation39_spill] sm:$0xff]  ;;  %v19208_v40 = vld [vmem:[#allocation68_spill] sm:$0xff] }
 0x283   :  { %v3320_v9 = vcombine.low %v19199_v39, %v19198_v15 }
 0x284   :  { %10167 = vmatmul.mubr.bf16.vlgmr.msra.gmra.mrb[0].mxu1 %v3521_v48  ;;  %v19210_v48 = vld [vmem:[#allocation81_spill] sm:$0xff] }
 0x285   :  { %10170 = vmatprep.mubr.msk.bf16.mxu1 %vm11321_vm7, %v18504_v17 }
 0x289   :  { %4693 = vmatmul.mubr.bf16.gmra.mrb[92].mxu0 %v3128_v61  ;;  %v19201_v61 = vld [vmem:[#allocation45_spill] sm:$0xff] }
 0x28a   :  { %4700 = vmatprep.mubr.bf16.mxu0 %v3303_v47  ;;  %v3410_v47 = vcombine.low %v19201_v61, %v19200_v25 }
 0x28c   :  { %10171 = vmatmul.mubr.bf16.gmra.mrb[4].mxu1 %v13492_v58  ;;  %v19202_v58 = vld [vmem:[#allocation65_spill] sm:$0xff] }
 0x28d   :  { %10174 = vmatprep.mubr.msk.bf16.mxu1 %vm11321_vm7, %v18504_v17  ;;  %v3321_v43 = vcombine.low %v19099_v45, %v19202_v58 }
 0x291   :  { %4701 = vmatmul.mubr.bf16.gmra.mrb[96].mxu0 %v3136_v53  ;;  %v19203_v53 = vld [vmem:[#allocation67_spill] sm:$0xff] }
 0x292   :  { %4740 = vmatprep.mubr.bf16.mxu0 %v3408_v52 }
 0x299   :  { %4741 = vmatmul.mubr.bf16.vlgmr.msra.gmra.mrb[0].mxu0 %v19197_v60 }
 0x29a   :  { %4748 = vmatprep.mubr.bf16.mxu0 %v3409_v8  ;;  %10091 = vmatpush3.bf16.msra.mxu0 %v13814_v63  ;;  %v3522_v63 = vcombine.low %v13532_v27, %v13500_v28  ;;  %v19205_v28 = vld [vmem:[#allocation78_spill] sm:$0xff] }
 0x29b   :  { %10092 = vmatprep.subr.bf16.mxu0 %v18504_v17  ;;  %v19206_v27 = vld [vmem:[#allocation66_spill] sm:$0xff] }
 0x29c   :  { %10175 = vmatmul.mubr.bf16.gmra.mrb[8].mxu1 %v3522_v63  ;;  %v3322_v45 = vcombine.low %v19206_v27, %v19205_v28  ;;  %v19213_v8 = vld [vmem:[#allocation106_spill] sm:$0xff]  ;;  %v19216_v28 = vld [vmem:[#allocation123_spill] sm:$0xff] }
 0x29d   :  { %10178 = vmatprep.mubr.msk.bf16.mxu1 %vm11321_vm7, %v18504_v17  ;;  %v3414_v56 = vcombine.low %v19214_v29, %v19213_v8  ;;  %v19219_v8 = vld [vmem:[#allocation118_spill] sm:$0xff] }
 0x29e   :  { %10093 = vmatpush3.bf16.msra.mxu0 %v13846_v35  ;;  %v19204_v35 = vld [vmem:[#allocation62_spill] sm:$0xff] }
 0x29f   :  { %10094 = vmatprep.subr.bf16.mxu0 %v18504_v17  ;;  %v3411_v46 = vcombine.low %v19204_v35, %v19203_v53 }
 0x2a1   :  { %4749 = vmatmul.mubr.bf16.gmra.mrb[4].mxu0 %v3320_v9 }
 0x2a2   :  { %4756 = vmatprep.mubr.bf16.mxu0 %v3410_v47  ;;  %10095 = vmatpush3.bf16.msra.mxu0 %v13889_v16  ;;  %v19207_v16 = vld [vmem:[#allocation80_spill] sm:$0xff] }
 0x2a3   :  { %10096 = vmatprep.subr.bf16.mxu0 %v18504_v17  ;;  %v3412_v52 = vcombine.low %v19208_v40, %v19207_v16  ;;  %v19215_v47 = vld [vmem:[#allocation104_spill] sm:$0xff] }
 0x2a4   :  { %10179 = vmatmul.mubr.bf16.gmra.mrb[12].mxu1 %v13525_v37  ;;  %v3323_v37 = vcombine.low %v19109_v24, %v19115_v62  ;;  %v19211_v62 = vld [vmem:[#allocation103_spill] sm:$0xff]  ;;  %v3325_v63 = vcombine.low %v19215_v47, %v19125_v54 }
 0x2a5   :  { %10182 = vmatprep.mubr.msk.bf16.mxu1 %vm11321_vm7, %v18504_v17 }
 0x2a6   :  { %10097 = vmatpush3.bf16.msra.mxu0 %v13932_v1  ;;  %v3523_v1 = vcombine.low %v13581_v20, %v13536_v33  ;;  %v96_v33 = vld [vmem:[%s18192_s0 + $0x1e8] sm:$0xff]  ;;  %v3524_v20 = vcombine.low %v13558_v21, %v13607_v41  ;;  %v97_v21 = vld [vmem:[%s18192_s0 + $0x1f0] sm:$0xff]  ;;  %v98_v41 = vld [vmem:[%s18192_s0 + $0x1f8] sm:$0xff] }
 0x2a7   :  { %10098 = vmatprep.subr.bf16.mxu0 %v18504_v17  ;;  %v9463_v60 = vpack.c.bf16 %v96_v33, %v96_v33  ;;  %v130_v39 = vpack.c.bf16 %v98_v41, %v97_v21 }
 0x2a9   :  { %4757 = vmatmul.mubr.bf16.gmra.mrb[8].mxu0 %v3321_v43  ;;  %v1171_v9 = vrot.slane %v9463_v60, %v11402_v11  ;;  %v1181_v61 = vrot.slane %v130_v39, %v11402_v11 }
 0x2aa   :  { %4764 = vmatprep.mubr.bf16.mxu0 %v3411_v46  ;;  %10099 = vmatpush3.bf16.msra.mxu0 %v11238_v55  ;;  %v19209_v55 = vld [vmem:[#allocation93_spill] sm:$0xff] }
 0x2ab   :  { %10100 = vmatprep.subr.bf16.mxu0 %v18504_v17  ;;  %v1173_v25 = vcombine.high %v1171_v9, %v1171_v9  ;;  %v14066_v53 = vcombine.high %v1181_v61, %v1181_v61  ;;  %v1196_v35 = vrot.slane %v1171_v9, 7 }
 0x2ac   :  { %10183 = vmatmul.mubr.bf16.gmra.mrb[16].mxu1 %v3523_v1 }
 0x2ad   :  { %10186 = vmatprep.mubr.msk.bf16.mxu1 %vm11321_vm7, %v18504_v17  ;;  %v1199_v46 = vrot.slane %v1173_v25, 7  ;;  %v1198_v40 = vrot.slane %v1196_v35, 2  ;;  %v3534_v47 = vcombine.low %v1171_v9, %v1173_v25 }
 0x2ae   :  { %10101 = vmatpush3.bf16.msra.mxu0 %v11239_v22  ;;  %v3413_v22 = vcombine.low %v19210_v48, %v19209_v55 }
 0x2af   :  { %10102 = vmatprep.subr.bf16.mxu0 %v18504_v17 }
 0x2b1   :  { %4765 = vmatmul.mubr.bf16.gmra.mrb[12].mxu0 %v3322_v45  ;;  %v1202_v45 = vrot.slane %v1181_v61, 7 }
 0x2b2   :  { %4772 = vmatprep.mubr.bf16.mxu0 %v3412_v52  ;;  %10103 = vmatpush3.bf16.msra.mxu0 %v11240_v2  ;;  %v129_v2 = vpack.c.bf16 %v96_v33, %v95_v3  ;;  %v1201_v52 = vrot.slane %v1199_v46, 2 }
 0x2b3   :  { %10104 = vmatprep.subr.bf16.mxu0 %v18504_v17  ;;  %v1204_v1 = vrot.slane %v1202_v45, 2 }
 0x2b4   :  { %10187 = vmatmul.mubr.bf16.gmra.mrb[20].mxu1 %v3524_v20  ;;  %v14040_v24 = vrot.slane %v129_v2, %v11402_v11  ;;  %v1203_v3 = vsel %vm11451_vm6, %v1201_v52, %v1202_v45 }
 0x2b5   :  { %10190 = vmatprep.mubr.msk.bf16.mxu1 %vm11321_vm7, %v18504_v17 }
 0x2b6   :  { %10105 = vmatpush3.bf16.msra.mxu0 %v11241_v51  ;;  %v19212_v51 = vld [vmem:[#allocation92_spill] sm:$0xff]  ;;  %v14048_v15 = vcombine.high %v14040_v24, %v14040_v24  ;;  %v9480_v43 = vcombine.high %v13587_v0, %v14040_v24 }
 0x2b7   :  { %v3324_v19 = vcombine.low %v19212_v51, %v19211_v62  ;;  %v3359_v62 = vcombine.low %v1173_v25, %v1181_v61 }
 0x2b8   :  { %v1193_v58 = vrot.slane %v14048_v15, 7  ;;  %v3532_v16 = vrot.slane %v9480_v43, %v11402_v11  ;;  %v3358_v2 = vcombine.low %v14048_v15, %v1171_v9  ;;  %v19220_v43 = vld [vmem:[#allocation132_spill] sm:$0xff] }
 0x2b9   :  { %4773 = vmatmul.mubr.bf16.gmra.mrb[16].mxu0 %v3323_v37  ;;  %v1205_v37 = vrot.slane %v14066_v53, 7  ;;  %v14093_v21 = vrot.slane %v3359_v62, %v11402_v11 }
 0x2ba   :  { %4780 = vmatprep.mubr.bf16.mxu0 %v3413_v22  ;;  %v1195_v54 = vrot.slane %v1193_v58, 2  ;;  %v3533_v55 = vcombine.low %v13601_v10, %v3532_v16  ;;  %v1200_v22 = vsel %vm11451_vm6, %v1198_v40, %v1199_v46  ;;  %v9464_v10 = vpack.c.bf16 %v98_v41, %v98_v41 }
 0x2bb   :  { %v1206_v33 = vsel %vm11451_vm6, %v1204_v1, %v1205_v37  ;;  %v14090_v60 = vrot.slane %v3358_v2, %v11402_v11  ;;  %v3535_v41 = vcombine.low %v1181_v61, %v14066_v53  ;;  %v1207_v16 = vrot.slane %v1205_v37, 2  ;;  %v19223_v37 = vld [vmem:[#allocation131_spill] sm:$0xff] }
 0x2bc   :  { %10191 = vmatmul.mubr.bf16.gmra.mrb[24].mxu1 %v13589_v30  ;;  %v19217_v30 = vld [vmem:[#allocation107_spill] sm:$0xff]  ;;  %v1197_v48 = vsel %vm11451_vm6, %v1195_v54, %v1196_v35  ;;  %v3464_v51 = vcombine.low %v1203_v3, %v1206_v33  ;;  %v19221_v35 = vld [vmem:[#allocation124_spill] sm:$0xff]  ;;  %v19224_v33 = vld [vmem:[#allocation145_spill] sm:$0xff] }
 0x2bd   :  { %10194 = vmatprep.mubr.msk.bf16.mxu1 %vm11321_vm7, %v18504_v17  ;;  %v3415_v27 = vcombine.low %v19217_v30, %v19216_v28  ;;  %v3463_v20 = vcombine.low %v1197_v48, %v1200_v22  ;;  %v3416_v46 = vcombine.low %v19221_v35, %v19220_v43  ;;  %v3374_v28 = vcombine.low %v14090_v60, %v14093_v21  ;;  %v19222_v48 = vld [vmem:[#allocation143_spill] sm:$0xff]  ;;  %v19230_v43 = vld [vmem:[#allocation157_spill] sm:$0xff] }
 0x2be   :  { %v14098_v39 = vrot.slane %v3464_v51, %v11402_v11  ;;  %v3549_v45 = vrot.slane %v3535_v41, %v11402_v11  ;;  %v3327_v22 = vcombine.low %v19223_v37, %v19222_v48  ;;  %v19229_v41 = vld [vmem:[#allocation169_spill] sm:$0xff]  ;;  %v19237_v48 = vld [vmem:[#allocation196_spill] sm:$0xff] }
 0x2bf   :  { %v3329_v35 = vcombine.low %v19230_v43, %v19229_v41  ;;  %v19238_v37 = vld [vmem:[#allocation185_spill] sm:$0xff]  ;;  %v19247_v41 = vld [vmem:[#allocation215_spill] sm:$0xff] }
 0x2c1   :  { %4781 = vmatmul.mubr.bf16.gmra.mrb[20].mxu0 %v3324_v19  ;;  %v19218_v19 = vld [vmem:[#allocation130_spill] sm:$0xff] }
 0x2c2   :  { %4788 = vmatprep.mubr.bf16.mxu0 %v3414_v56  ;;  %v3326_v29 = vcombine.low %v19219_v8, %v19218_v19  ;;  %v14087_v56 = vrot.slane %v3463_v20, %v11402_v11  ;;  %v19225_v20 = vld [vmem:[#allocation137_spill] sm:$0xff]  ;;  %v19227_v8 = vld [vmem:[#allocation159_spill] sm:$0xff] }
 0x2c3   :  { %v3417_v2 = vcombine.low %v19225_v20, %v19224_v33  ;;  %v19239_v33 = vld [vmem:[#allocation194_spill] sm:$0xff] }
 0x2c4   :  { %10195 = vmatmul.mubr.bf16.gmra.mrb[28].mxu1 %v3533_v55  ;;  %v3479_v30 = vcombine.low %v14087_v56, %v14098_v39  ;;  %v3332_v20 = vcombine.low %v19239_v33, %v19162_v4  ;;  %v19250_v4 = vld [vmem:[#allocation232_spill] sm:$0xff]  ;;  %v19257_v33 = vld [vmem:[#allocation245_spill] sm:$0xff] }
 0x2c5   :  { %10198 = vmatprep.mubr.msk.bf16.mxu1 %vm11321_vm7, %v18504_v17 }
 0x2c9   :  { %4789 = vmatmul.mubr.bf16.gmra.mrb[24].mxu0 %v3325_v63  ;;  %v14102_v63 = vrot.slane %v9464_v10, %v11402_v11  ;;  %v19226_v10 = vld [vmem:[#allocation156_spill] sm:$0xff] }
 0x2ca   :  { %4796 = vmatprep.mubr.bf16.mxu0 %v3415_v27  ;;  %v3542_v27 = vrot.slane %v3534_v47, %v11402_v11  ;;  %v3328_v19 = vcombine.low %v19136_v7, %v19226_v10  ;;  %v19235_v7 = vld [vmem:[#allocation192_spill] sm:$0xff] }
 0x2cb   :  { %v1190_v9 = vcombine.high %v14102_v63, %v14102_v63  ;;  %v1208_v25 = vrot.slane %v14102_v63, 7  ;;  %v3375_v52 = vcombine.low %v14066_v53, %v14102_v63 }
 0x2cc   :  { %v3550_v61 = vcombine.low %v3542_v27, %v3549_v45  ;;  %v19232_v27 = vld [vmem:[#allocation160_spill] sm:$0xff] }
 0x2cd   :  { %v1211_v54 = vrot.slane %v1190_v9, 7  ;;  %v1210_v40 = vrot.slane %v1208_v25, 2  ;;  %v14119_v1 = vsel %vm11451_vm6, %v1207_v16, %v1208_v25  ;;  %v3551_v62 = vcombine.low %v14102_v63, %v1190_v9  ;;  %v19233_v25 = vld [vmem:[#allocation183_spill] sm:$0xff] }
 0x2ce   :  { %10199 = vmatmul.mubr.bf16.gmra.mrb[32].mxu1 %v3550_v61  ;;  %v3330_v9 = vcombine.low %v19146_v13, %v19152_v14  ;;  %v19234_v61 = vld [vmem:[#allocation172_spill] sm:$0xff]  ;;  %v19242_v13 = vld [vmem:[#allocation214_spill] sm:$0xff] }
 0x2cf   :  { %v14123_v55 = vsel %vm11451_vm6, %v1210_v40, %v1211_v54  ;;  %10202 = vmatprep.mubr.msk.bf16.mxu1 %vm11321_vm7, %v18504_v17  ;;  %v3558_v51 = vrot.slane %v3551_v62, %v11402_v11  ;;  %v3420_v16 = vcombine.low %v19234_v61, %v19233_v25  ;;  %v19236_v54 = vld [vmem:[#allocation182_spill] sm:$0xff]  ;;  %v19241_v62 = vld [vmem:[#allocation197_spill] sm:$0xff] }
 0x2d0   :  { %v3480_v3 = vcombine.low %v14119_v1, %v14123_v55  ;;  %v3331_v40 = vcombine.low %v19236_v54, %v19235_v7  ;;  %v19243_v14 = vld [vmem:[#allocation206_spill] sm:$0xff]  ;;  %v19254_v7 = vld [vmem:[#allocation233_spill] sm:$0xff]  ;;  %v19268_v1 = vld [vmem:[#allocation24_spill] sm:$0xff] }
 0x2d1   :  { %4797 = vmatmul.mubr.bf16.gmra.mrb[28].mxu0 %v3326_v29  ;;  %v19228_v29 = vld [vmem:[#allocation146_spill] sm:$0xff]  ;;  %v3333_v10 = vcombine.low %v19243_v14, %v19242_v13 }
 0x2d2   :  { %4804 = vmatprep.mubr.bf16.mxu0 %v3416_v46  ;;  %v3418_v47 = vcombine.low %v19228_v29, %v19227_v8  ;;  %v19231_v46 = vld [vmem:[#allocation171_spill] sm:$0xff]  ;;  %v19245_v8 = vld [vmem:[#allocation213_spill] sm:$0xff]  ;;  %v19252_v25 = vld [vmem:[#allocation226_spill] sm:$0xff] }
 0x2d3   :  { %v3419_v45 = vcombine.low %v19232_v27, %v19231_v46  ;;  %v19249_v46 = vld [vmem:[#allocation217_spill] sm:$0xff]  ;;  %v19261_v13 = vld [vmem:[#allocation250_spill] sm:$0xff] }
 0x2d4   :  { %v19262_v14 = vld [vmem:[#allocation246_spill] sm:$0xff] }
 0x2d5   :  { %v19269_v55 = vld [vmem:[#allocation22_spill] sm:$0xff] }
 0x2d6   :  { %10203 = vmatmul.mubr.bf16.gmra.mrb[36].mxu1 %v3558_v51 }
 0x2d9   :  { %4805 = vmatmul.mubr.bf16.gmra.mrb[32].mxu0 %v3327_v22  ;;  %v3421_v22 = vcombine.low %v19238_v37, %v19237_v48  ;;  %v19256_v48 = vld [vmem:[#allocation235_spill] sm:$0xff] }
 0x2da   :  { %4812 = vmatprep.mubr.bf16.mxu0 %v3417_v2  ;;  %v19240_v2 = vld [vmem:[#allocation212_spill] sm:$0xff] }
 0x2db   :  { %v3422_v51 = vcombine.low %v19241_v62, %v19240_v2  ;;  %v19260_v62 = vld [vmem:[#allocation244_spill] sm:$0xff] }
 0x2e1   :  { %4813 = vmatmul.mubr.bf16.gmra.mrb[36].mxu0 %v3328_v19  ;;  %v19244_v19 = vld [vmem:[#allocation216_spill] sm:$0xff] }
 0x2e2   :  { %4820 = vmatprep.mubr.bf16.mxu0 %v3418_v47  ;;  %v3423_v29 = vcombine.low %v19245_v8, %v19244_v19  ;;  %v19246_v47 = vld [vmem:[#allocation223_spill] sm:$0xff]  ;;  %v3429_v19 = vcombine.low %v13882_v50, %v13909_v23  ;;  %v3430_v8 = vcombine.low %v13913_v6, %v13923_v44  ;;  %v3340_v50 = vcombine.low %v13540_v49, %v13563_v26 }
 0x2e3   :  { %v3334_v43 = vcombine.low %v19247_v41, %v19246_v47  ;;  %v19263_v41 = vld [vmem:[#allocation249_spill] sm:$0xff]  ;;  %v3446_v6 = vcombine.low %v13927_v5, %v13958_v57 }
 0x2e4   :  { %v19265_v57 = vld [vmem:[#allocation17_spill] sm:$0xff] }
 0x2e5   :  { %v3454_v15 = vrot.slane %v3446_v6, %v11402_v11 }
 0x2e9   :  { %4821 = vmatmul.mubr.bf16.gmra.mrb[40].mxu0 %v3329_v35  ;;  %v19248_v35 = vld [vmem:[#allocation225_spill] sm:$0xff] }
 0x2ea   :  { %4828 = vmatprep.mubr.bf16.mxu0 %v3419_v45  ;;  %v3424_v27 = vcombine.low %v19249_v46, %v19248_v35  ;;  %v3335_v45 = vcombine.low %v19173_v59, %v19250_v4  ;;  %v19259_v59 = vld [vmem:[#allocation248_spill] sm:$0xff]  ;;  %v3347_v35 = vrot.slane %v3340_v50, %v11402_v11 }
 0x2f1   :  { %4829 = vmatmul.mubr.bf16.gmra.mrb[44].mxu0 %v3330_v9  ;;  %v19251_v9 = vld [vmem:[#allocation234_spill] sm:$0xff] }
 0x2f2   :  { %4836 = vmatprep.mubr.bf16.mxu0 %v3420_v16  ;;  %v3425_v61 = vcombine.low %v19252_v25, %v19251_v9  ;;  %v19253_v16 = vld [vmem:[#allocation238_spill] sm:$0xff] }
 0x2f3   :  { %v3336_v54 = vcombine.low %v19254_v7, %v19253_v16  ;;  %v19270_v16 = vld [vmem:[#allocation28_spill] sm:$0xff] }
 0x2f9   :  { %4837 = vmatmul.mubr.bf16.gmra.mrb[48].mxu0 %v3331_v40  ;;  %v19255_v40 = vld [vmem:[#allocation239_spill] sm:$0xff] }
 0x2fa   :  { %4844 = vmatprep.mubr.bf16.mxu0 %v3421_v22  ;;  %v3426_v37 = vcombine.low %v19256_v48, %v19255_v40  ;;  %v3337_v22 = vcombine.low %v13085_v38, %v13130_v32  ;;  %v3437_v38 = vrot.slane %v3429_v19, %v11402_v11  ;;  %v3444_v32 = vrot.slane %v3430_v8, %v11402_v11  ;;  %v19272_v40 = vld [vmem:[#allocation29_spill] sm:$0xff] }
 0x2fc   :  { %v3445_v23 = vcombine.low %v3437_v38, %v3444_v32  ;;  %v19275_v38 = vld [vmem:[#allocation27_spill] sm:$0xff] }
 0x301   :  { %4845 = vmatmul.mubr.bf16.gmra.mrb[52].mxu0 %v3332_v20  ;;  %v19258_v20 = vld [vmem:[#allocation240_spill] sm:$0xff] }
 0x302   :  { %4852 = vmatprep.mubr.bf16.mxu0 %v3422_v51  ;;  %v3427_v2 = vcombine.low %v19258_v20, %v19257_v33  ;;  %v3338_v51 = vcombine.low %v19260_v62, %v19259_v59  ;;  %v19274_v59 = vld [vmem:[#allocation40_spill] sm:$0xff] }
 0x309   :  { %4853 = vmatmul.mubr.bf16.gmra.mrb[56].mxu0 %v3333_v10  ;;  %v3428_v10 = vcombine.low %v19262_v14, %v19261_v13 }
 0x30a   :  { %4860 = vmatprep.mubr.bf16.mxu0 %v3423_v29  ;;  %v9465_v29 = vrot.slane %v14040_v24, 9 }
 0x30c   :  { %v1194_v47 = vsel %vm11451_vm6, %v9465_v29, %v1193_v58  ;;  %v3348_v58 = vcombine.low %v3347_v35, %v13916_v12  ;;  %v3487_v12 = vrot.slane %v3480_v3, %v11402_v11  ;;  %v3514_v3 = vcombine.low %v19269_v55, %v19268_v1  ;;  %v14313_v1 = vld [vmem:[%s18193_s2] ss:$0 sm:$0xff] }
 0x30d   :  { %v3447_v44 = vcombine.low %v13962_v18, %v1194_v47  ;;  %v19266_v18 = vld [vmem:[#allocation16_spill] sm:$0xff]  ;;  %v19276_v47 = vld [vmem:[#allocation38_spill] sm:$0xff] }
 0x30f   :  { %v3461_v31 = vrot.slane %v3447_v44, %v11402_v11 }
 0x311   :  { %4861 = vmatmul.mubr.bf16.gmra.mrb[60].mxu0 %v3334_v43  ;;  %v3339_v43 = vcombine.low %v19263_v41, %v19190_v42  ;;  %v3349_v42 = vcombine.low %v13587_v0, %v14040_v24  ;;  %v3462_v49 = vcombine.low %v3454_v15, %v3461_v31  ;;  %v3382_v0 = vrot.slane %v3375_v52, %v11402_v11  ;;  %v19277_v41 = vld [vmem:[#allocation43_spill] sm:$0xff] }
 0x312   :  { %4868 = vmatprep.mubr.bf16.mxu0 %v3424_v27  ;;  %v3513_v24 = vcombine.low %v19266_v18, %v19265_v57  ;;  %v19281_v18 = vld [vmem:[#allocation63_spill] sm:$0xff] }
 0x313   :  { %v3356_v26 = vrot.slane %v3349_v42, %v11402_v11 }
 0x315   :  { %v3357_v5 = vcombine.low %v13919_v34, %v3356_v26  ;;  %v19264_v34 = vld [vmem:[#allocation252_spill] sm:$0xff]  ;;  %v19280_v26 = vld [vmem:[#allocation59_spill] sm:$0xff] }
 0x319   :  { %4869 = vmatmul.mubr.bf16.gmra.mrb[64].mxu0 %v3335_v45 }
 0x31a   :  { %4876 = vmatprep.mubr.bf16.mxu0 %v3425_v61 }
 0x321   :  { %4877 = vmatmul.mubr.bf16.gmra.mrb[68].mxu0 %v3336_v54  ;;  %v19271_v54 = vld [vmem:[#allocation31_spill] sm:$0xff] }
 0x322   :  { %4884 = vmatprep.mubr.bf16.mxu0 %v3426_v37  ;;  %v3515_v48 = vcombine.low %v19272_v40, %v19271_v54 }
 0x329   :  { %4885 = vmatmul.mubr.bf16.gmra.mrb[72].mxu0 %v3337_v22 }
 0x32a   :  { %4892 = vmatprep.mubr.bf16.mxu0 %v3427_v2  ;;  %v19273_v2 = vld [vmem:[#allocation41_spill] sm:$0xff] }
 0x32b   :  { %v3516_v62 = vcombine.low %v19274_v59, %v19273_v2 }
 0x331   :  { %4893 = vmatmul.mubr.bf16.gmra.mrb[76].mxu0 %v3338_v51 }
 0x332   :  { %4900 = vmatprep.mubr.bf16.mxu0 %v3428_v10 }
 0x339   :  { %4901 = vmatmul.mubr.bf16.gmra.mrb[80].mxu0 %v3339_v43  ;;  %v3517_v43 = vcombine.low %v19277_v41, %v19276_v47 }
 0x33a   :  { %4908 = vmatprep.mubr.bf16.mxu0 %v3445_v23 }
 0x341   :  { %4909 = vmatmul.mubr.bf16.gmra.mrb[84].mxu0 %v3348_v58  ;;  %v19278_v58 = vld [vmem:[#allocation51_spill] sm:$0xff] }
 0x342   :  { %4916 = vmatprep.mubr.bf16.mxu0 %v3462_v49  ;;  %v19279_v49 = vld [vmem:[#allocation50_spill] sm:$0xff] }
 0x349   :  { %4917 = vmatmul.mubr.bf16.gmra.mrb[88].mxu0 %v3357_v5  ;;  %v3518_v5 = vcombine.low %v19280_v26, %v19279_v49 }
 0x34a   :  { %4924 = vmatprep.mubr.bf16.mxu0 %v3479_v30  ;;  %v19267_v30 = vld [vmem:[#allocation10_spill] sm:$0xff] }
 0x351   :  { %4925 = vmatmul.mubr.bf16.gmra.mrb[92].mxu0 %v3374_v28 }
 0x352   :  { %4932 = vmatprep.mubr.bf16.mxu0 %v3487_v12 }
 0x357   :  { %v14226_v56 = vpop.f32.mrb[0].mxu1 }
 0x358   :  { %v10168_v60 = vpop.f32.mrb[1].mxu1 }
 0x359   :  { %4933 = vmatmul.mubr.bf16.gmra.mrb[96].mxu0 %v3382_v0  ;;  %v14228_v21 = vpop.f32.mrb[2].mxu1 }
 0x35a   :  { %10106 = vmatprep.mubr.msk.bf16.mxu0 %vm11321_vm7, %v18504_v17  ;;  %v10169_v53 = vpop.f32.mrb[3].mxu1 }
 0x35b   :  { %v19283_v53 = vld [vmem:[#allocation74_spill] sm:$0xff] }
 0x35f   :  { %v14232_v39 = vpop.f32.mrb[4].mxu1 }
 0x360   :  { %v10172_v63 = vpop.f32.mrb[5].mxu1 }
 0x361   :  { %10107 = vmatmul.mubr.bf16.vlgmr.msra.gmra.mrb[0].mxu0 %v19264_v34  ;;  %v14234_v28 = vpop.f32.mrb[6].mxu1  ;;  %v19284_v63 = vld [vmem:[#allocation52_spill] sm:$0xff] }
 0x362   :  { %10110 = vmatprep.mubr.msk.bf16.mxu0 %vm11321_vm7, %v18504_v17  ;;  %v10173_v52 = vpop.f32.mrb[7].mxu1 }
 0x363   :  { %v19285_v52 = vld [vmem:[#allocation64_spill] sm:$0xff] }
 0x369   :  { %10111 = vmatmul.mubr.bf16.gmra.mrb[4].mxu0 %v3513_v24  ;;  %v19282_v24 = vld [vmem:[#allocation73_spill] sm:$0xff] }
 0x36a   :  { %10114 = vmatprep.mubr.msk.bf16.mxu0 %vm11321_vm7, %v18504_v17  ;;  %v3519_v60 = vcombine.low %v19282_v24, %v13439_v36 }
 0x36f   :  { %v14241_v46 = vpop.f32.mrb[8].mxu1 }
 0x370   :  { %v10176_v27 = vpop.f32.mrb[9].mxu1 }
 0x371   :  { %10115 = vmatmul.mubr.bf16.gmra.mrb[8].mxu0 %v19267_v30  ;;  %v14243_v4 = vpop.f32.mrb[10].mxu1  ;;  %v3520_v30 = vcombine.low %v19284_v63, %v19283_v53 }
 0x372   :  { %10118 = vmatprep.mubr.msk.bf16.mxu0 %vm11321_vm7, %v18504_v17  ;;  %v10177_v45 = vpop.f32.mrb[11].mxu1 }
 0x377   :  { %v14247_v9 = vpop.f32.mrb[12].mxu1 }
 0x378   :  { %v10180_v25 = vpop.f32.mrb[13].mxu1 }
 0x379   :  { %10119 = vmatmul.mubr.bf16.gmra.mrb[12].mxu0 %v3514_v3  ;;  %v14249_v61 = vpop.f32.mrb[14].mxu1 }
 0x37a   :  { %10122 = vmatprep.mubr.msk.bf16.mxu0 %vm11321_vm7, %v18504_v17  ;;  %v10181_v7 = vpop.f32.mrb[15].mxu1 }
 0x37f   :  { %v14256_v37 = vpop.f32.mrb[16].mxu1 }
 0x380   :  { %v10184_v22 = vpop.f32.mrb[17].mxu1 }
 0x381   :  { %10123 = vmatmul.mubr.bf16.gmra.mrb[16].mxu0 %v19270_v16  ;;  %v14258_v33 = vpop.f32.mrb[18].mxu1 }
 0x382   :  { %10126 = vmatprep.mubr.msk.bf16.mxu0 %vm11321_vm7, %v18504_v17  ;;  %v10185_v20 = vpop.f32.mrb[19].mxu1 }
 0x387   :  { %v14264_v51 = vpop.f32.mrb[20].mxu1 }
 0x388   :  { %v10188_v13 = vpop.f32.mrb[21].mxu1 }
 0x389   :  { %10127 = vmatmul.mubr.bf16.gmra.mrb[20].mxu0 %v3515_v48  ;;  %v14266_v14 = vpop.f32.mrb[22].mxu1 }
 0x38a   :  { %10130 = vmatprep.mubr.msk.bf16.mxu0 %vm11321_vm7, %v18504_v17  ;;  %v10189_v10 = vpop.f32.mrb[23].mxu1 }
 0x38f   :  { %v14270_v19 = vpop.f32.mrb[24].mxu1 }
 0x390   :  { %v10192_v8 = vpop.f32.mrb[25].mxu1 }
 0x391   :  { %10131 = vmatmul.mubr.bf16.gmra.mrb[24].mxu0 %v3516_v62  ;;  %v14272_v29 = vpop.f32.mrb[26].mxu1 }
 0x392   :  { %10134 = vmatprep.mubr.msk.bf16.mxu0 %vm11321_vm7, %v18504_v17  ;;  %v10193_v32 = vpop.f32.mrb[27].mxu1 }
 0x397   :  { %v14279_v50 = vpop.f32.mrb[28].mxu1 }
 0x398   :  { %v10196_v23 = vpop.f32.mrb[29].mxu1 }
 0x399   :  { %10135 = vmatmul.mubr.bf16.gmra.mrb[28].mxu0 %v19275_v38  ;;  %v14281_v6 = vpop.f32.mrb[30].mxu1 }
 0x39a   :  { %10138 = vmatprep.mubr.msk.bf16.mxu0 %vm11321_vm7, %v18504_v17  ;;  %v10197_v44 = vpop.f32.mrb[31].mxu1 }
 0x3a1   :  { %10139 = vmatmul.mubr.bf16.gmra.mrb[32].mxu0 %v3517_v43  ;;  %v14285_v35 = vpop.f32.mrb[32].mxu1 }
 0x3a2   :  { %10142 = vmatprep.mubr.msk.bf16.mxu0 %vm11321_vm7, %v18504_v17  ;;  %v10200_v15 = vpop.f32.mrb[33].mxu1 }
 0x3a3   :  { %v14287_v31 = vpop.f32.mrb[34].mxu1 }
 0x3a4   :  { %v10201_v42 = vpop.f32.mrb[35].mxu1 }
 0x3a9   :  { %10143 = vmatmul.mubr.bf16.gmra.mrb[36].mxu0 %v19278_v58  ;;  %v14294_v12 = vpop.f32.mrb[36].mxu1 }
 0x3aa   :  { %10146 = vmatprep.mubr.msk.bf16.mxu0 %vm11321_vm7, %v18504_v17  ;;  %v10204_v0 = vpop.f32.mrb[37].mxu1 }
 0x3ab   :  { %v5169_v34 = vpop.f32.mrb[38].mxu1 }
 0x3ac   :  { %v10205_v57 = vpop.f32.mrb[39].mxu1 }
 0x3b1   :  { %10147 = vmatmul.mubr.bf16.gmra.mrb[40].mxu0 %v3518_v5 }
 0x3b2   :  { %10150 = vmatprep.mubr.msk.bf16.mxu0 %vm11321_vm7, %v18504_v17 }
 0x3b9   :  { %10151 = vmatmul.mubr.bf16.gmra.mrb[44].mxu0 %v19281_v18 }
 0x3ba   :  { %10154 = vmatprep.mubr.msk.bf16.mxu0 %vm11321_vm7, %v18504_v17 }
 0x3c1   :  { %10155 = vmatmul.mubr.bf16.gmra.mrb[48].mxu0 %v3519_v60 }
 0x3c2   :  { %10158 = vmatprep.mubr.msk.bf16.mxu0 %vm11321_vm7, %v18504_v17 }
 0x3c9   :  { %10159 = vmatmul.mubr.bf16.gmra.mrb[52].mxu0 %v3520_v30 }
 0x3ca   :  { %10162 = vmatprep.mubr.msk.bf16.mxu0 %vm11321_vm7, %v18504_v17 }
 0x3d1   :  { %10163 = vmatmul.mubr.bf16.gmra.mrb[56].mxu0 %v19285_v52 }
 0x3e4   :  { %v4862_v55 = vpop.f32.mrb[60].mxu0 }
 0x3e5   :  { %v10514_v36 = vadd.f32 %v14313_v1, %v4862_v55  ;;  %v4864_v3 = vpop.f32.mrb[61].mxu0 }
 0x3e6   :  { %v4865_v27 = vpop.f32.mrb[62].mxu0 }
 0x3e7   :  { %v10516_v45 = vadd.f32 %v14313_v1, %v4865_v27  ;;  %v14318_v25 = vadd.f32 %v10514_v36, %v14226_v56  ;;  %v4867_v16 = vpop.f32.mrb[63].mxu0 }
 0x3e9   :  { %v14321_v7 = vadd.f32 %v10516_v45, %v14228_v21 }
 0x3ec   :  { %v4870_v54 = vpop.f32.mrb[64].mxu0 }
 0x3ed   :  { %v10518_v40 = vadd.f32 %v14313_v1, %v4870_v54  ;;  %v4872_v48 = vpop.f32.mrb[65].mxu0 }
 0x3ee   :  { %v4873_v22 = vpop.f32.mrb[66].mxu0 }
 0x3ef   :  { %v10520_v20 = vadd.f32 %v14313_v1, %v4873_v22  ;;  %v14326_v2 = vadd.f32 %v10518_v40, %v14232_v39  ;;  %v4875_v59 = vpop.f32.mrb[67].mxu0 }
 0x3f1   :  { %v14329_v62 = vadd.f32 %v10520_v20, %v14234_v28 }
 0x3f4   :  { %v4878_v56 = vpop.f32.mrb[68].mxu0 }
 0x3f5   :  { %v10522_v13 = vadd.f32 %v14313_v1, %v4878_v56  ;;  %v4880_v10 = vpop.f32.mrb[69].mxu0 }
 0x3f6   :  { %v4881_v21 = vpop.f32.mrb[70].mxu0 }
 0x3f7   :  { %v10524_v8 = vadd.f32 %v14313_v1, %v4881_v21  ;;  %v14334_v38 = vadd.f32 %v10522_v13, %v14241_v46  ;;  %v4883_v32 = vpop.f32.mrb[71].mxu0 }
 0x3f9   :  { %v14337_v47 = vadd.f32 %v10524_v8, %v14243_v4 }
 0x3fc   :  { %v4886_v39 = vpop.f32.mrb[72].mxu0 }
 0x3fd   :  { %v10526_v41 = vadd.f32 %v14313_v1, %v4886_v39  ;;  %v4888_v43 = vpop.f32.mrb[73].mxu0 }
 0x3fe   :  { %v4889_v28 = vpop.f32.mrb[74].mxu0  ;;  %v18506_v43 = vmov 1.0  }
 0x3ff   :  { %v10528_v23 = vadd.f32 %v14313_v1, %v4889_v28  ;;  %v14342_v44 = vadd.f32 %v10526_v41, %v14247_v9  ;;  %v4891_v15 = vpop.f32.mrb[75].mxu0  ;;  %5289 = vmatprep.mubr.f32.mxu1 %v18506_v43 }
 0x401   :  { %v14345_v58 = vadd.f32 %v10528_v23, %v14249_v61 }
 0x404   :  { %v4894_v46 = vpop.f32.mrb[76].mxu0 }
 0x405   :  { %v10530_v42 = vadd.f32 %v14313_v1, %v4894_v46  ;;  %v4896_v49 = vpop.f32.mrb[77].mxu0 }
 0x406   :  { %v4897_v4 = vpop.f32.mrb[78].mxu0 }
 0x407   :  { %v10532_v26 = vadd.f32 %v14313_v1, %v4897_v4  ;;  %v14350_v5 = vadd.f32 %v10530_v42, %v14256_v37  ;;  %v4899_v0 = vpop.f32.mrb[79].mxu0 }
 0x409   :  { %v14353_v34 = vadd.f32 %v10532_v26, %v14258_v33 }
 0x40c   :  { %v4902_v9 = vpop.f32.mrb[80].mxu0 }
 0x40d   :  { %v10534_v57 = vadd.f32 %v14313_v1, %v4902_v9  ;;  %v4904_v18 = vpop.f32.mrb[81].mxu0 }
 0x40e   :  { %v4905_v61 = vpop.f32.mrb[82].mxu0 }
 0x40f   :  { %v10536_v24 = vadd.f32 %v14313_v1, %v4905_v61  ;;  %v14358_v60 = vadd.f32 %v10534_v57, %v14264_v51  ;;  %v4907_v53 = vpop.f32.mrb[83].mxu0 }
 0x411   :  { %v14361_v63 = vadd.f32 %v10536_v24, %v14266_v14 }
 0x414   :  { %v4910_v37 = vpop.f32.mrb[84].mxu0 }
 0x415   :  { %v10538_v30 = vadd.f32 %v14313_v1, %v4910_v37  ;;  %v4912_v52 = vpop.f32.mrb[85].mxu0 }
 0x416   :  { %v4913_v33 = vpop.f32.mrb[86].mxu0 }
 0x417   :  { %v10540_v55 = vadd.f32 %v14313_v1, %v4913_v33  ;;  %v14366_v36 = vadd.f32 %v10538_v30, %v14270_v19  ;;  %v4915_v3 = vpop.f32.mrb[87].mxu0 }
 0x419   :  { %v14369_v27 = vadd.f32 %v10540_v55, %v14272_v29 }
 0x41c   :  { %v4918_v51 = vpop.f32.mrb[88].mxu0 }
 0x41d   :  { %v10542_v45 = vadd.f32 %v14313_v1, %v4918_v51  ;;  %v4920_v16 = vpop.f32.mrb[89].mxu0 }
 0x41e   :  { %v4921_v14 = vpop.f32.mrb[90].mxu0 }
 0x41f   :  { %v10544_v54 = vadd.f32 %v14313_v1, %v4921_v14  ;;  %v14374_v40 = vadd.f32 %v10542_v45, %v14279_v50  ;;  %v4923_v48 = vpop.f32.mrb[91].mxu0 }
 0x421   :  { %v14377_v22 = vadd.f32 %v10544_v54, %v14281_v6 }
 0x424   :  { %v4926_v19 = vpop.f32.mrb[92].mxu0 }
 0x425   :  { %v10546_v20 = vadd.f32 %v14313_v1, %v4926_v19  ;;  %v4928_v59 = vpop.f32.mrb[93].mxu0 }
 0x426   :  { %v4929_v29 = vpop.f32.mrb[94].mxu0 }
 0x427   :  { %v10548_v56 = vadd.f32 %v14313_v1, %v4929_v29  ;;  %v14382_v13 = vadd.f32 %v10546_v20, %v14285_v35  ;;  %v4931_v10 = vpop.f32.mrb[95].mxu0 }
 0x429   :  { %v14385_v21 = vadd.f32 %v10548_v56, %v14287_v31 }
 0x42c   :  { %v4934_v50 = vpop.f32.mrb[96].mxu0 }
 0x42d   :  { %v10550_v8 = vadd.f32 %v14313_v1, %v4934_v50  ;;  %v4936_v32 = vpop.f32.mrb[97].mxu0 }
 0x42e   :  { %v4937_v6 = vpop.f32.mrb[98].mxu0 }
 0x42f   :  { %v14389_v39 = vadd.f32 %v10550_v8, %v14294_v12  ;;  %v4938_v41 = vpop.f32.mrb[99].mxu0 }
 0x434   :  { %v4974_v28 = vpop.f32.mrb[0].mxu0 }
 0x435   :  { %v10108_v23 = vpop.f32.mrb[1].mxu0  ;;  %v10484_v50 = vadd.f32 %v14313_v1, %v4974_v28 }
 0x436   :  { %v4977_v35 = vpop.f32.mrb[2].mxu0 }
 0x437   :  { %v10109_v15 = vpop.f32.mrb[3].mxu0  ;;  %v10485_v59 = vadd.f32 %v14313_v1, %v4977_v35 }
 0x439   :  { %v14416_v41 = vmax.f32 %v10485_v59, 0.0 }
 0x43b   :  { %19286 = vst [vmem:[#allocation76_spill] sm:$0xff] %v14416_v41 }
 0x43c   :  { %v4982_v46 = vpop.f32.mrb[4].mxu0 }
 0x43d   :  { %v10112_v42 = vpop.f32.mrb[5].mxu0 }
 0x43e   :  { %v4985_v31 = vpop.f32.mrb[6].mxu0  ;;  %v14422_v42 = vmax.f32 %v10484_v50, 0.0 }
 0x43f   :  { %v10113_v49 = vpop.f32.mrb[7].mxu0  ;;  %v10487_v28 = vadd.f32 %v14313_v1, %v4985_v31 }
 0x440   :  { %19289 = vst [vmem:[#allocation88_spill] sm:$0xff] %v14422_v42  ;;  %v10282_v49 = vpack.c.bf16 %v14416_v41, %v14422_v42 }
 0x444   :  { %v4990_v4 = vpop.f32.mrb[8].mxu0 }
 0x445   :  { %v10116_v26 = vpop.f32.mrb[9].mxu0 }
 0x446   :  { %v4993_v0 = vpop.f32.mrb[10].mxu0 }
 0x447   :  { %v10117_v9 = vpop.f32.mrb[11].mxu0 }
 0x44c   :  { %v14392_v57 = vpop.f32.mrb[12].mxu0 }
 0x44d   :  { %v10120_v12 = vpop.f32.mrb[13].mxu0 }
 0x44e   :  { %v14394_v18 = vpop.f32.mrb[14].mxu0 }
 0x44f   :  { %v10121_v61 = vpop.f32.mrb[15].mxu0 }
 0x450   :  { %v10486_v61 = vadd.f32 %v14313_v1, %v4982_v46  ;;  %v10489_v46 = vadd.f32 %v14313_v1, %v4993_v0 }
 0x454   :  { %v14396_v24 = vpop.f32.mrb[16].mxu0 }
 0x455   :  { %v10124_v53 = vpop.f32.mrb[17].mxu0 }
 0x456   :  { %v14398_v37 = vpop.f32.mrb[18].mxu0 }
 0x457   :  { %v10125_v30 = vpop.f32.mrb[19].mxu0 }
 0x45c   :  { %v14400_v52 = vpop.f32.mrb[20].mxu0 }
 0x45d   :  { %v10128_v33 = vpop.f32.mrb[21].mxu0 }
 0x45e   :  { %v14402_v55 = vpop.f32.mrb[22].mxu0 }
 0x45f   :  { %v10129_v3 = vpop.f32.mrb[23].mxu0 }
 0x460   :  { %v14432_v3 = vmax.f32 %v10487_v28, 0.0 }
 0x462   :  { %19290 = vst [vmem:[#allocation89_spill] sm:$0xff] %v14432_v3 }
 0x464   :  { %v14404_v51 = vpop.f32.mrb[24].mxu0 }
 0x465   :  { %v10132_v45 = vpop.f32.mrb[25].mxu0 }
 0x466   :  { %v14406_v16 = vpop.f32.mrb[26].mxu0 }
 0x467   :  { %v10133_v14 = vpop.f32.mrb[27].mxu0 }
 0x46c   :  { %v14408_v54 = vpop.f32.mrb[28].mxu0 }
 0x46d   :  { %v10136_v48 = vpop.f32.mrb[29].mxu0 }
 0x46e   :  { %v14410_v19 = vpop.f32.mrb[30].mxu0  ;;  %v14438_v48 = vmax.f32 %v10486_v61, 0.0 }
 0x46f   :  { %v10137_v20 = vpop.f32.mrb[31].mxu0 }
 0x470   :  { %19293 = vst [vmem:[#allocation6_spill] sm:$0xff] %v14438_v48  ;;  %v10286_v20 = vpack.c.bf16 %v14432_v3, %v14438_v48 }
 0x474   :  { %v5038_v29 = vpop.f32.mrb[32].mxu0 }
 0x475   :  { %v10500_v56 = vadd.f32 %v14313_v1, %v5038_v29  ;;  %v10140_v10 = vpop.f32.mrb[33].mxu0 }
 0x476   :  { %v5041_v8 = vpop.f32.mrb[34].mxu0  ;;  %v10488_v10 = vadd.f32 %v14313_v1, %v4990_v4  ;;  %v10491_v4 = vadd.f32 %v14313_v1, %v14394_v18 }
 0x477   :  { %v10501_v32 = vadd.f32 %v14313_v1, %v5041_v8  ;;  %v10141_v6 = vpop.f32.mrb[35].mxu0  ;;  %v14418_v23 = vmax.f32 %v10500_v56, 0.0 }
 0x478   :  { %v14448_v6 = vmax.f32 %v10489_v46, 0.0  ;;  %v14454_v28 = vmax.f32 %v10488_v10, 0.0 }
 0x479   :  { %19287 = vst [vmem:[#allocation87_spill] sm:$0xff] %v14418_v23  ;;  %v14420_v15 = vmax.f32 %v10501_v32, 0.0 }
 0x47b   :  { %19288 = vst [vmem:[#allocation77_spill] sm:$0xff] %v14420_v15  ;;  %v10280_v35 = vpack.c.bf16 %v14420_v15, %v14418_v23 }
 0x47c   :  { %v5046_v26 = vpop.f32.mrb[36].mxu0 }
 0x47d   :  { %v10502_v9 = vadd.f32 %v14313_v1, %v5046_v26  ;;  %v10144_v12 = vpop.f32.mrb[37].mxu0  ;;  %10281 = vmatprep.subr.bf16.mxu1 %v10280_v35  ;;  %v10290_v26 = vpack.c.bf16 %v14448_v6, %v14454_v28 }
 0x47e   :  { %v5049_v53 = vpop.f32.mrb[38].mxu0  ;;  %10283 = vmatpush3.bf16.msra.mxu1 %v10282_v49 }
 0x47f   :  { %v10503_v30 = vadd.f32 %v14313_v1, %v5049_v53  ;;  %v10145_v33 = vpop.f32.mrb[39].mxu0  ;;  %v14434_v45 = vmax.f32 %v10502_v9, 0.0  ;;  %v10490_v53 = vadd.f32 %v14313_v1, %v14392_v57  ;;  %v10493_v57 = vadd.f32 %v14313_v1, %v14398_v37 }
 0x481   :  { %19291 = vst [vmem:[#allocation4_spill] sm:$0xff] %v14434_v45  ;;  %v14436_v14 = vmax.f32 %v10503_v30, 0.0  ;;  %v14472_v18 = vmax.f32 %v10490_v53, 0.0 }
 0x483   :  { %19292 = vst [vmem:[#allocation5_spill] sm:$0xff] %v14436_v14  ;;  %v10284_v31 = vpack.c.bf16 %v14436_v14, %v14434_v45 }
 0x484   :  { %v5054_v59 = vpop.f32.mrb[40].mxu0 }
 0x485   :  { %v10504_v29 = vadd.f32 %v14313_v1, %v5054_v59  ;;  %v10148_v56 = vpop.f32.mrb[41].mxu0  ;;  %10285 = vmatprep.subr.bf16.mxu1 %v10284_v31 }
 0x486   :  { %v5057_v50 = vpop.f32.mrb[42].mxu0  ;;  %10287 = vmatpush3.bf16.msra.mxu1 %v10286_v20  ;;  %v14466_v20 = vmax.f32 %v10491_v4, 0.0 }
 0x487   :  { %v10505_v8 = vadd.f32 %v14313_v1, %v5057_v50  ;;  %v10149_v32 = vpop.f32.mrb[43].mxu0  ;;  %v14450_v35 = vmax.f32 %v10504_v29, 0.0 }
 0x488   :  { %v10294_v56 = vpack.c.bf16 %v14466_v20, %v14472_v18  ;;  %v10492_v32 = vadd.f32 %v14313_v1, %v14396_v24  ;;  %v10495_v24 = vadd.f32 %v14313_v1, %v14402_v55 }
 0x489   :  { %19294 = vst [vmem:[#allocation7_spill] sm:$0xff] %v14450_v35  ;;  %v14452_v49 = vmax.f32 %v10505_v8, 0.0 }
 0x48a   :  { %v14490_v37 = vmax.f32 %v10492_v32, 0.0 }
 0x48b   :  { %19295 = vst [vmem:[#allocation99_spill] sm:$0xff] %v14452_v49  ;;  %v10288_v0 = vpack.c.bf16 %v14452_v49, %v14450_v35 }
 0x48c   :  { %v5062_v9 = vpop.f32.mrb[44].mxu0 }
 0x48d   :  { %v10506_v12 = vadd.f32 %v14313_v1, %v5062_v9  ;;  %v10152_v61 = vpop.f32.mrb[45].mxu0  ;;  %10289 = vmatprep.subr.bf16.mxu1 %v10288_v0  ;;  %v14484_v9 = vmax.f32 %v10493_v57, 0.0 }
 0x48e   :  { %v5065_v30 = vpop.f32.mrb[46].mxu0  ;;  %10291 = vmatpush3.bf16.msra.mxu1 %v10290_v26 }
 0x48f   :  { %v10507_v33 = vadd.f32 %v14313_v1, %v5065_v30  ;;  %v10153_v31 = vpop.f32.mrb[47].mxu0  ;;  %v14468_v46 = vmax.f32 %v10506_v12, 0.0  ;;  %v10298_v30 = vpack.c.bf16 %v14484_v9, %v14490_v37 }
 0x491   :  { %v14470_v59 = vmax.f32 %v10507_v33, 0.0 }
 0x493   :  { %v10292_v29 = vpack.c.bf16 %v14470_v59, %v14468_v46 }
 0x494   :  { %v5070_v10 = vpop.f32.mrb[48].mxu0 }
 0x495   :  { %v10508_v50 = vadd.f32 %v14313_v1, %v5070_v10  ;;  %v10156_v8 = vpop.f32.mrb[49].mxu0  ;;  %10293 = vmatprep.subr.bf16.mxu1 %v10292_v29 }
 0x496   :  { %v5073_v0 = vpop.f32.mrb[50].mxu0  ;;  %10295 = vmatpush3.bf16.msra.mxu1 %v10294_v56  ;;  %v10494_v56 = vadd.f32 %v14313_v1, %v14400_v52  ;;  %v14502_v8 = vmax.f32 %v10495_v24, 0.0  ;;  %v10497_v52 = vadd.f32 %v14313_v1, %v14406_v16  ;;  %v14525_v16 = vmax.f32 %v14321_v7, 0.0 }
 0x497   :  { %v10509_v26 = vadd.f32 %v14313_v1, %v5073_v0  ;;  %v10157_v4 = vpop.f32.mrb[51].mxu0  ;;  %v14486_v12 = vmax.f32 %v10508_v50, 0.0 }
 0x498   :  { %v14508_v55 = vmax.f32 %v10494_v56, 0.0 }
 0x499   :  { %v14488_v61 = vmax.f32 %v10509_v26, 0.0 }
 0x49a   :  { %v10302_v4 = vpack.c.bf16 %v14502_v8, %v14508_v55 }
 0x49b   :  { %v10296_v53 = vpack.c.bf16 %v14488_v61, %v14486_v12 }
 0x49c   :  { %v5078_v33 = vpop.f32.mrb[52].mxu0 }
 0x49d   :  { %v10510_v31 = vadd.f32 %v14313_v1, %v5078_v33  ;;  %v10160_v29 = vpop.f32.mrb[53].mxu0  ;;  %10297 = vmatprep.subr.bf16.mxu1 %v10296_v53  ;;  %v10496_v33 = vadd.f32 %v14313_v1, %v14404_v51  ;;  %v10498_v51 = vadd.f32 %v14313_v1, %v14408_v54  ;;  %v14554_v54 = vmax.f32 %v14326_v2, 0.0 }
 0x49e   :  { %v5081_v57 = vpop.f32.mrb[54].mxu0  ;;  %10299 = vmatpush3.bf16.msra.mxu1 %v10298_v30 }
 0x49f   :  { %v10511_v10 = vadd.f32 %v14313_v1, %v5081_v57  ;;  %v10161_v50 = vpop.f32.mrb[55].mxu0  ;;  %v14504_v32 = vmax.f32 %v10510_v31, 0.0  ;;  %v14520_v57 = vmax.f32 %v10497_v52, 0.0 }
 0x4a1   :  { %v14506_v0 = vmax.f32 %v10511_v10, 0.0  ;;  %v10499_v10 = vadd.f32 %v14313_v1, %v14410_v19 }
 0x4a3   :  { %v10300_v26 = vpack.c.bf16 %v14506_v0, %v14504_v32  ;;  %v14542_v7 = vmax.f32 %v10499_v10, 0.0  ;;  %v14581_v10 = vmax.f32 %v14353_v34, 0.0 }
 0x4a4   :  { %v5086_v53 = vpop.f32.mrb[56].mxu0 }
 0x4a5   :  { %v10512_v30 = vadd.f32 %v14313_v1, %v5086_v53  ;;  %v10164_v24 = vpop.f32.mrb[57].mxu0  ;;  %10301 = vmatprep.subr.bf16.mxu1 %v10300_v26  ;;  %v14531_v26 = vmax.f32 %v10496_v33, 0.0  ;;  %v18508_v33 = vmov 0.0|0.0  }
 0x4a6   :  { %v5089_v31 = vpop.f32.mrb[58].mxu0  ;;  %10303 = vmatpush3.bf16.msra.mxu1 %v10302_v4  ;;  %v14536_v4 = vmax.f32 %v14318_v25, 0.0  ;;  %v14546_v24 = vmax.f32 %v10498_v51, 0.0  ;;  %v14584_v51 = vmax.f32 %v14350_v5, 0.0  ;;  %v14599_v5 = vmax.f32 %v14369_v27, 0.0 }
 0x4a7   :  { %v10513_v29 = vadd.f32 %v14313_v1, %v5089_v31  ;;  %v10165_v56 = vpop.f32.mrb[59].mxu0  ;;  %v14527_v50 = vmax.f32 %v10512_v30, 0.0  ;;  %v10306_v19 = vpack.c.bf16 %v14520_v57, %v14531_v26  ;;  %v14549_v1 = vmax.f32 %v14329_v62, 0.0 }
 0x4a8   :  { %19296 = vst [vmem:[#allocation90_spill] sm:$0xff] %v14536_v4  ;;  %v10308_v30 = vpack.c.bf16 %v14525_v16, %v14536_v4  ;;  %v10310_v25 = vpack.c.bf16 %v14542_v7, %v14546_v24  ;;  %v14564_v62 = vmax.f32 %v14334_v38, 0.0  ;;  %v14572_v56 = vmax.f32 %v14345_v58, 0.0 }
 0x4a9   :  { %v14529_v53 = vmax.f32 %v10513_v29, 0.0  ;;  %v10313_v31 = vpack.c.bf16 %v14549_v1, %v14554_v54  ;;  %v14560_v29 = vmax.f32 %v14337_v47, 0.0  ;;  %v14575_v47 = vmax.f32 %v14342_v44, 0.0 }
 0x4aa   :  { %v10322_v58 = vpack.c.bf16 %v14581_v10, %v14584_v51  ;;  %v14590_v44 = vmax.f32 %v14361_v63, 0.0 }
 0x4ab   :  { %v10304_v52 = vpack.c.bf16 %v14529_v53, %v14527_v50  ;;  %v10316_v2 = vpack.c.bf16 %v14560_v29, %v14564_v62  ;;  %v10319_v38 = vpack.c.bf16 %v14572_v56, %v14575_v47 }
 0x4ad   :  { %10305 = vmatprep.subr.bf16.mxu1 %v10304_v52  ;;  %v14593_v52 = vmax.f32 %v14358_v60, 0.0  ;;  %v14608_v60 = vmax.f32 %v14377_v22, 0.0 }
 0x4ae   :  { %10307 = vmatpush3.bf16.msra.mxu1 %v10306_v19  ;;  %v14602_v19 = vmax.f32 %v14366_v36, 0.0  ;;  %v14617_v36 = vmax.f32 %v14385_v21, 0.0 }
 0x4af   :  { %10309 = vmatprep.subr.bf16.mxu1 %v10308_v30  ;;  %v10325_v34 = vpack.c.bf16 %v14590_v44, %v14593_v52  ;;  %v14611_v30 = vmax.f32 %v14374_v40, 0.0  ;;  %v14627_v40 = vmax.f32 %v14389_v39, 0.0 }
 0x4b0   :  { %v10328_v63 = vpack.c.bf16 %v14599_v5, %v14602_v19 }
 0x4b1   :  { %v10331_v27 = vpack.c.bf16 %v14608_v60, %v14611_v30 }
 0x4b2   :  { %10311 = vmatpush3.bf16.msra.mxu1 %v10310_v25  ;;  %v14620_v25 = vmax.f32 %v14382_v13, 0.0 }
 0x4b3   :  { %10312 = vmatprep.subr.bf16.mxu1 %v18508_v33 }
 0x4b4   :  { %v10334_v22 = vpack.c.bf16 %v14617_v36, %v14620_v25 }
 0x4b5   :  { %5290 = vmatmul.mubr.f32.vlgmr.msra.gmra.mrb[40].mxu1 %v18506_v43 }
 0x4b6   :  { %10314 = vmatpush1.bf16.msra.mxu1 %v10313_v31  ;;  %9554 = vmatprep.mubr.msk.f32.mxu1 %vm5221_vm8, %v18506_v43 }
 0x4b7   :  { %10315 = vmatprep.subr.bf16.mxu1 %v18508_v33 }
 0x4ba   :  { %10317 = vmatpush1.bf16.msra.mxu1 %v10316_v2 }
 0x4bb   :  { %10318 = vmatprep.subr.bf16.mxu1 %v18508_v33 }
 0x4be   :  { %10320 = vmatpush1.bf16.msra.mxu1 %v10319_v38 }
 0x4bf   :  { %10321 = vmatprep.subr.bf16.mxu1 %v18508_v33 }
 0x4c2   :  { %10323 = vmatpush1.bf16.msra.mxu1 %v10322_v58 }
 0x4c3   :  { %10324 = vmatprep.subr.bf16.mxu1 %v18508_v33 }
 0x4c6   :  { %10326 = vmatpush1.bf16.msra.mxu1 %v10325_v34 }
 0x4c7   :  { %10327 = vmatprep.subr.bf16.mxu1 %v18508_v33 }
 0x4ca   :  { %10329 = vmatpush1.bf16.msra.mxu1 %v10328_v63  ;;  %v19297_v63 = vld [vmem:[#allocation2_spill] sm:$0xff] }
 0x4cb   :  { %10330 = vmatprep.subr.bf16.mxu1 %v18508_v33 }
 0x4ce   :  { %10332 = vmatpush1.bf16.msra.mxu1 %v10331_v27  ;;  %v14635_v27 = vsub.s32 0, %v19297_v63 }
 0x4cf   :  { %10333 = vmatprep.subr.bf16.mxu1 %v18508_v33 }
 0x4d0   :  { %19298 = vst [vmem:[#allocation102_spill] sm:$0xff] %v14635_v27 }
 0x4d2   :  { %10335 = vmatpush1.bf16.msra.mxu1 %v10334_v22 }
 0x4d3   :  { %5327 = vmatprep.subr.mxu1 %v18504_v17 }
 0x4d6   :  { %5328 = vmatpush1.msra.mxu1 %v14627_v40 }
 0x4d7   :  { %5360 = vmatmul.mubr.f32.vlgmr.msra.gmra.mrb[42].mxu1 %v18506_v43 }
 0x4d8   :  { %5532 = vmatprep.mubr.f32.mxu1 %v18506_v43 }
 0x588   :  { %v9946_v13 = vpop.f32.mrb[40].mxu1 }
 0x589   :  { %v9947_v21 = vpop.f32.mrb[41].mxu1 }
 0x58a   :  { %v9948_v31 = vadd.f32 %v9947_v21, %v9946_v13 }
 0x5aa   :  { %v5361_v2 = vpop.f32.mrb[42].mxu1 }
 0x5ab   :  { %v5362_v38 = vadd.f32 %v9948_v31, %v5361_v2  ;;  %v5363_v58 = vpop.f32.mrb[43].mxu1 }
 0x5ad   :  { %v14632_v34 = vmul.f32 0.0025510204, %v5362_v38 }
 0x5af   :  { %v14639_v39 = vrot.slane %v14632_v34, %v14635_v27 }
 0x5b1   :  { %v5370_v22 = vsub.f32 %v14422_v42, %v14639_v39  ;;  %v5371_v17 = vsub.f32 %v14416_v41, %v14639_v39  ;;  %v5386_v13 = vsub.f32 %v14418_v23, %v14639_v39  ;;  %v5387_v21 = vsub.f32 %v14420_v15, %v14639_v39 }
 0x5b2   :  { %v5388_v31 = vsub.f32 %v14434_v45, %v14639_v39  ;;  %v5389_v2 = vsub.f32 %v14436_v14, %v14639_v39  ;;  %v5372_v63 = vsub.f32 %v14438_v48, %v14639_v39  ;;  %v5373_v43 = vsub.f32 %v14432_v3, %v14639_v39 }
 0x5b3   :  { %v5419_v38 = vmul.f32 %v5370_v22, %v5370_v22  ;;  %v5420_v58 = vmul.f32 %v5371_v17, %v5371_v17  ;;  %v5390_v33 = vsub.f32 %v14450_v35, %v14639_v39  ;;  %v5391_v11 = vsub.f32 %v14452_v49, %v14639_v39 }
 0x5b4   :  { %v5435_v15 = vmul.f32 %v5386_v13, %v5386_v13  ;;  %v5436_v23 = vmul.f32 %v5387_v21, %v5387_v21  ;;  %v5437_v41 = vmul.f32 %v5388_v31, %v5388_v31  ;;  %v5438_v42 = vmul.f32 %v5389_v2, %v5389_v2 }
 0x5b5   :  { %v10338_v45 = vpack.c.bf16 %v5420_v58, %v5419_v38  ;;  %v5374_v17 = vsub.f32 %v14454_v28, %v14639_v39  ;;  %v5375_v14 = vsub.f32 %v14448_v6, %v14639_v39  ;;  %v5392_v3 = vsub.f32 %v14468_v46, %v14639_v39 }
 0x5b6   :  { %v10336_v22 = vpack.c.bf16 %v5436_v23, %v5435_v15  ;;  %v5421_v48 = vmul.f32 %v5372_v63, %v5372_v63  ;;  %v5422_v35 = vmul.f32 %v5373_v43, %v5373_v43  ;;  %v5393_v49 = vsub.f32 %v14470_v59, %v14639_v39 }
 0x5b7   :  { %v10340_v13 = vpack.c.bf16 %v5438_v42, %v5437_v41  ;;  %v5439_v21 = vmul.f32 %v5390_v33, %v5390_v33  ;;  %v5440_v31 = vmul.f32 %v5391_v11, %v5391_v11  ;;  %v5376_v2 = vsub.f32 %v14472_v18, %v14639_v39 }
 0x5b8   :  { %10337 = vmatprep.subr.bf16.mxu1 %v10336_v22  ;;  %v5377_v23 = vsub.f32 %v14466_v20, %v14639_v39  ;;  %v5394_v15 = vsub.f32 %v14486_v12, %v14639_v39  ;;  %v5423_v38 = vmul.f32 %v5374_v17, %v5374_v17  ;;  %v5424_v43 = vmul.f32 %v5375_v14, %v5375_v14 }
 0x5b9   :  { %10339 = vmatpush3.bf16.msra.mxu1 %v10338_v45  ;;  %v10342_v58 = vpack.c.bf16 %v5422_v35, %v5421_v48  ;;  %v5395_v63 = vsub.f32 %v14488_v61, %v14639_v39  ;;  %v10344_v41 = vpack.c.bf16 %v5440_v31, %v5439_v21  ;;  %v5441_v42 = vmul.f32 %v5392_v3, %v5392_v3 }
 0x5ba   :  { %10341 = vmatprep.subr.bf16.mxu1 %v10340_v13  ;;  %v5442_v11 = vmul.f32 %v5393_v49, %v5393_v49  ;;  %v5378_v45 = vsub.f32 %v14490_v37, %v14639_v39  ;;  %v5379_v33 = vsub.f32 %v14484_v9, %v14639_v39  ;;  %v5396_v22 = vsub.f32 %v14504_v32, %v14639_v39 }
 0x5bb   :  { %v5425_v17 = vmul.f32 %v5376_v2, %v5376_v2  ;;  %v5426_v14 = vmul.f32 %v5377_v23, %v5377_v23  ;;  %v10346_v48 = vpack.c.bf16 %v5424_v43, %v5423_v38  ;;  %v5397_v35 = vsub.f32 %v14506_v0, %v14639_v39 }
 0x5bc   :  { %v10348_v13 = vpack.c.bf16 %v5442_v11, %v5441_v42  ;;  %v5443_v3 = vmul.f32 %v5394_v15, %v5394_v15  ;;  %v5444_v49 = vmul.f32 %v5395_v63, %v5395_v63  ;;  %v5380_v21 = vsub.f32 %v14508_v55, %v14639_v39 }
 0x5bd   :  { %10343 = vmatpush3.bf16.msra.mxu1 %v10342_v58  ;;  %v5381_v31 = vsub.f32 %v14502_v8, %v14639_v39  ;;  %v5398_v58 = vsub.f32 %v14527_v50, %v14639_v39  ;;  %v5427_v2 = vmul.f32 %v5378_v45, %v5378_v45  ;;  %v5428_v23 = vmul.f32 %v5379_v33, %v5379_v33 }
 0x5be   :  { %10345 = vmatprep.subr.bf16.mxu1 %v10344_v41  ;;  %v10350_v38 = vpack.c.bf16 %v5426_v14, %v5425_v17  ;;  %v5399_v43 = vsub.f32 %v14529_v53, %v14639_v39  ;;  %v10352_v41 = vpack.c.bf16 %v5444_v49, %v5443_v3  ;;  %v5445_v15 = vmul.f32 %v5396_v22, %v5396_v22 }
 0x5bf   :  { %v5446_v63 = vmul.f32 %v5397_v35, %v5397_v35  ;;  %v5382_v42 = vsub.f32 %v14531_v26, %v14639_v39  ;;  %v5383_v11 = vsub.f32 %v14520_v57, %v14639_v39  ;;  %v5429_v45 = vmul.f32 %v5380_v21, %v5380_v21 }
 0x5c0   :  { %v5430_v33 = vmul.f32 %v5381_v31, %v5381_v31  ;;  %v10354_v17 = vpack.c.bf16 %v5428_v23, %v5427_v2  ;;  %v5401_v14 = vsub.f32 %v14525_v16, %v14639_v39  ;;  %v5447_v22 = vmul.f32 %v5398_v58, %v5398_v58 }
 0x5c1   :  { %10347 = vmatpush3.bf16.msra.mxu1 %v10346_v48  ;;  %v5400_v48 = vsub.f32 %v14536_v4, %v14639_v39  ;;  %v5448_v35 = vmul.f32 %v5399_v43, %v5399_v43  ;;  %v5384_v3 = vsub.f32 %v14546_v24, %v14639_v39  ;;  %v5385_v49 = vsub.f32 %v14542_v7, %v14639_v39 }
 0x5c2   :  { %10349 = vmatprep.subr.bf16.mxu1 %v10348_v13  ;;  %v10356_v13 = vpack.c.bf16 %v5446_v63, %v5445_v15  ;;  %v10358_v4 = vpack.c.bf16 %v5430_v33, %v5429_v45  ;;  %v5450_v2 = vmul.f32 %v5401_v14, %v5401_v14  ;;  %v5402_v23 = vsub.f32 %v14554_v54, %v14639_v39 }
 0x5c3   :  { %v10360_v21 = vpack.c.bf16 %v5448_v35, %v5447_v22  ;;  %v5449_v31 = vmul.f32 %v5400_v48, %v5400_v48  ;;  %v5403_v58 = vsub.f32 %v14549_v1, %v14639_v39  ;;  %v5433_v43 = vmul.f32 %v5384_v3, %v5384_v3 }
 0x5c4   :  { %v5434_v15 = vmul.f32 %v5385_v49, %v5385_v49  ;;  %v5406_v33 = vsub.f32 %v14575_v47, %v14639_v39  ;;  %v19299_v14 = vmov 0.0|0.0   ;;  %v19300_v49 = vmov 1.0  }
 0x5c5   :  { %10351 = vmatpush3.bf16.msra.mxu1 %v10350_v38  ;;  %v5431_v38 = vmul.f32 %v5382_v42, %v5382_v42  ;;  %v5404_v42 = vsub.f32 %v14564_v62, %v14639_v39  ;;  %v5452_v48 = vmul.f32 %v5403_v58, %v5403_v58  ;;  %v5411_v58 = vsub.f32 %v14590_v44, %v14639_v39 }
 0x5c6   :  { %10353 = vmatprep.subr.bf16.mxu1 %v10352_v41  ;;  %v5432_v41 = vmul.f32 %v5383_v11, %v5383_v11  ;;  %v5405_v11 = vsub.f32 %v14560_v29, %v14639_v39  ;;  %v10366_v45 = vpack.c.bf16 %v5434_v15, %v5433_v43 }
 0x5c7   :  { %v5453_v22 = vmul.f32 %v5404_v42, %v5404_v42  ;;  %v5413_v42 = vsub.f32 %v14599_v5, %v14639_v39 }
 0x5c8   :  { %v10362_v63 = vpack.c.bf16 %v5432_v41, %v5431_v38  ;;  %v5454_v35 = vmul.f32 %v5405_v11, %v5405_v11  ;;  %v5408_v38 = vsub.f32 %v14584_v51, %v14639_v39  ;;  %v5409_v41 = vsub.f32 %v14581_v10, %v14639_v39 }
 0x5c9   :  { %10355 = vmatpush3.bf16.msra.mxu1 %v10354_v17  ;;  %v10364_v17 = vpack.c.bf16 %v5450_v2, %v5449_v31 }
 0x5ca   :  { %10357 = vmatprep.subr.bf16.mxu1 %v10356_v13  ;;  %v5407_v13 = vsub.f32 %v14572_v56, %v14639_v39  ;;  %v10372_v2 = vpack.c.bf16 %v5454_v35, %v5453_v22  ;;  %v5457_v43 = vmul.f32 %v5408_v38, %v5408_v38  ;;  %v5458_v15 = vmul.f32 %v5409_v41, %v5409_v41 }
 0x5cb   :  { %v5462_v22 = vmul.f32 %v5413_v42, %v5413_v42  ;;  %v5417_v38 = vsub.f32 %v14617_v36, %v14639_v39  ;;  %v19302_v42 = vmov 0  }
 0x5cc   :  { %v5456_v31 = vmul.f32 %v5407_v13, %v5407_v13 }
 0x5cd   :  { %10359 = vmatpush3.bf16.msra.mxu1 %v10358_v4  ;;  %v5451_v4 = vmul.f32 %v5402_v23, %v5402_v23  ;;  %v5410_v23 = vsub.f32 %v14593_v52, %v14639_v39 }
 0x5ce   :  { %10361 = vmatprep.subr.bf16.mxu1 %v10360_v21  ;;  %v5455_v21 = vmul.f32 %v5406_v33, %v5406_v33  ;;  %v5415_v33 = vsub.f32 %v14608_v60, %v14639_v39 }
 0x5cf   :  { %v10369_v3 = vpack.c.bf16 %v5452_v48, %v5451_v4  ;;  %v5459_v11 = vmul.f32 %v5410_v23, %v5410_v23  ;;  %v5460_v4 = vmul.f32 %v5411_v58, %v5411_v58  ;;  %v10378_v48 = vpack.c.bf16 %v5458_v15, %v5457_v43 }
 0x5d0   :  { %v5466_v23 = vmul.f32 %v5417_v38, %v5417_v38  ;;  %v5418_v43 = vsub.f32 %v14627_v40, %v14639_v39  ;;  %v11252_v38 = vld [vmem:[%s18194_s5 + $0x50] sm:$0xff]  }
 0x5d1   :  { %10363 = vmatpush3.bf16.msra.mxu1 %v10362_v63  ;;  %v10375_v63 = vpack.c.bf16 %v5456_v31, %v5455_v21  ;;  %v10381_v35 = vpack.c.bf16 %v5460_v4, %v5459_v11  ;;  %v5464_v21 = vmul.f32 %v5415_v33, %v5415_v33  ;;  %v11242_v11 = vld [vmem:[%s18194_s5] sm:$0xff]   ;;  %v11243_v4 = vld [vmem:[%s18194_s5 + $0x8] sm:$0xff]  }
 0x5d2   :  { %10365 = vmatprep.subr.bf16.mxu1 %v10364_v17  ;;  %v5412_v17 = vsub.f32 %v14602_v19, %v14639_v39  ;;  %v11247_v33 = vld [vmem:[%s18194_s5 + $0x28] sm:$0xff]  }
 0x5d4   :  { %v5461_v13 = vmul.f32 %v5412_v17, %v5412_v17  ;;  %v5467_v17 = vmul.f32 %v5418_v43, %v5418_v43 }
 0x5d5   :  { %10367 = vmatpush3.bf16.msra.mxu1 %v10366_v45  ;;  %v5414_v45 = vsub.f32 %v14611_v30, %v14639_v39 }
 0x5d6   :  { %10368 = vmatprep.subr.bf16.mxu1 %v19299_v14  ;;  %v10384_v31 = vpack.c.bf16 %v5462_v22, %v5461_v13  ;;  %v11248_v13 = vld [vmem:[%s18194_s5 + $0x30] sm:$0xff]   ;;  %v11249_v22 = vld [vmem:[%s18194_s5 + $0x38] sm:$0xff]  }
 0x5d7   :  { %v5463_v41 = vmul.f32 %v5414_v45, %v5414_v45  ;;  %v11246_v45 = vld [vmem:[%s18194_s5 + $0x20] sm:$0xff]  }
 0x5d8   :  { %5533 = vmatmul.mubr.f32.vlgmr.msra.gmra.mrb[44].mxu1 %v19300_v49 }
 0x5d9   :  { %10370 = vmatpush1.bf16.msra.mxu1 %v10369_v3  ;;  %9555 = vmatprep.mubr.msk.f32.mxu1 %vm5221_vm8, %v19300_v49  ;;  %v5416_v3 = vsub.f32 %v14620_v25, %v14639_v39  ;;  %v10387_v58 = vpack.c.bf16 %v5464_v21, %v5463_v41  ;;  %v11244_v39 = vld [vmem:[%s18194_s5 + $0x10] sm:$0xff]   ;;  %v11253_v41 = vld [vmem:[%s18194_s5 + $0x58] sm:$0xff]   ;;  %v11254_v21 = vld [vmem:[%s18194_s5 + $0x60] sm:$0xff]  }
 0x5da   :  { %10371 = vmatprep.subr.bf16.mxu1 %v19299_v14 }
 0x5dd   :  { %10373 = vmatpush1.bf16.msra.mxu1 %v10372_v2  ;;  %v5465_v2 = vmul.f32 %v5416_v3, %v5416_v3  ;;  %v11251_v3 = vld [vmem:[%s18194_s5 + $0x48] sm:$0xff]  }
 0x5de   :  { %10374 = vmatprep.subr.bf16.mxu1 %v19299_v14 }
 0x5df   :  { %v10390_v15 = vpack.c.bf16 %v5466_v23, %v5465_v2  ;;  %v11256_v2 = vld [vmem:[%s18194_s5 + $0x70] sm:$0xff]   ;;  %v11257_v23 = vld [vmem:[%s18194_s5 + $0x78] sm:$0xff]  }
 0x5e1   :  { %10376 = vmatpush1.bf16.msra.mxu1 %v10375_v63  ;;  %v19301_v63 = vmov 0.0  }
 0x5e2   :  { %10377 = vmatprep.subr.bf16.mxu1 %v19299_v14 }
 0x5e5   :  { %10379 = vmatpush1.bf16.msra.mxu1 %v10378_v48  ;;  %v11245_v48 = vld [vmem:[%s18194_s5 + $0x18] sm:$0xff]  }
 0x5e6   :  { %10380 = vmatprep.subr.bf16.mxu1 %v19299_v14 }
 0x5e9   :  { %10382 = vmatpush1.bf16.msra.mxu1 %v10381_v35  ;;  %v11250_v35 = vld [vmem:[%s18194_s5 + $0x40] sm:$0xff]  }
 0x5ea   :  { %10383 = vmatprep.subr.bf16.mxu1 %v19299_v14 }
 0x5ed   :  { %10385 = vmatpush1.bf16.msra.mxu1 %v10384_v31  ;;  %v11255_v31 = vld [vmem:[%s18194_s5 + $0x68] sm:$0xff]  }
 0x5ee   :  { %10386 = vmatprep.subr.bf16.mxu1 %v19299_v14 }
 0x5f1   :  { %10388 = vmatpush1.bf16.msra.mxu1 %v10387_v58 }
 0x5f2   :  { %10389 = vmatprep.subr.bf16.mxu1 %v19299_v14 }
 0x5f5   :  { %10391 = vmatpush1.bf16.msra.mxu1 %v10390_v15 }
 0x5f6   :  { %5570 = vmatprep.subr.mxu1 %v19301_v63 }
 0x5f9   :  { %5571 = vmatpush1.msra.mxu1 %v5467_v17 }
 0x5fa   :  { %5603 = vmatmul.mubr.f32.vlgmr.msra.gmra.mrb[46].mxu1 %v19300_v49  ;;  %7270 = vmatprep.subr.bf16.mxu1 %v19302_v42 }
 0x5fb   :  { %7271 = vmatpush1.bf16.msra.mxu1 %v11242_v11 }
 0x5fc   :  { %7272 = vmatprep.subr.bf16.mxu1 %v19302_v42 }
 0x5ff   :  { %7273 = vmatpush1.bf16.msra.mxu1 %v11243_v4 }
 0x600   :  { %7274 = vmatprep.subr.bf16.mxu1 %v19302_v42 }
 0x603   :  { %7275 = vmatpush1.bf16.msra.mxu1 %v11244_v39 }
 0x604   :  { %7276 = vmatprep.subr.bf16.mxu1 %v19302_v42 }
 0x607   :  { %7277 = vmatpush1.bf16.msra.mxu1 %v11245_v48 }
 0x608   :  { %7278 = vmatprep.subr.bf16.mxu1 %v19302_v42 }
 0x60b   :  { %7279 = vmatpush1.bf16.msra.mxu1 %v11246_v45  ;;  %v276_v45 = vld [vmem:[%s18195_s3] sm:$0x1] }
 0x60c   :  { %7280 = vmatprep.subr.bf16.mxu1 %v19302_v42 }
 0x60f   :  { %7281 = vmatpush1.bf16.msra.mxu1 %v11247_v33 }
 0x610   :  { %7282 = vmatprep.subr.bf16.mxu1 %v19302_v42 }
 0x613   :  { %7283 = vmatpush1.bf16.msra.mxu1 %v11248_v13 }
 0x614   :  { %7284 = vmatprep.subr.bf16.mxu1 %v19302_v42 }
 0x617   :  { %7285 = vmatpush1.bf16.msra.mxu1 %v11249_v22 }
 0x618   :  { %7286 = vmatprep.subr.bf16.mxu1 %v19302_v42 }
 0x61b   :  { %7287 = vmatpush1.bf16.msra.mxu1 %v11250_v35  ;;  %v277_v35 = vld [vmem:[%s18196_s4] sm:$0x1] }
 0x61c   :  { %7288 = vmatprep.subr.bf16.mxu1 %v19302_v42 }
 0x61f   :  { %7289 = vmatpush1.bf16.msra.mxu1 %v11251_v3 }
 0x620   :  { %7290 = vmatprep.subr.bf16.mxu1 %v19302_v42 }
 0x623   :  { %7291 = vmatpush1.bf16.msra.mxu1 %v11252_v38 }
 0x624   :  { %7292 = vmatprep.subr.bf16.mxu1 %v19302_v42 }
 0x627   :  { %7293 = vmatpush1.bf16.msra.mxu1 %v11253_v41  ;;  %v19303_v41 = vld [vmem:[#allocation88_spill] sm:$0xff] }
 0x628   :  { %7294 = vmatprep.subr.bf16.mxu1 %v19302_v42 }
 0x62b   :  { %7295 = vmatpush1.bf16.msra.mxu1 %v11254_v21 }
 0x62c   :  { %7296 = vmatprep.subr.bf16.mxu1 %v19302_v42 }
 0x62f   :  { %7297 = vmatpush1.bf16.msra.mxu1 %v11255_v31  ;;  %v19304_v31 = vld [vmem:[#allocation76_spill] sm:$0xff] }
 0x630   :  { %7298 = vmatprep.subr.bf16.mxu1 %v19302_v42 }
 0x633   :  { %7299 = vmatpush1.bf16.msra.mxu1 %v11256_v2 }
 0x634   :  { %7300 = vmatprep.subr.bf16.mxu1 %v19302_v42 }
 0x637   :  { %7301 = vmatpush1.bf16.msra.mxu1 %v11257_v23  ;;  %v19305_v23 = vld [vmem:[#allocation6_spill] sm:$0xff] }
 0x638   :  { %7447 = vmatprep.subr.bf16.mxu1 %v19302_v42 }
 0x6ab   :  { %v9981_v58 = vpop.f32.mrb[44].mxu1 }
 0x6ac   :  { %v9982_v43 = vpop.f32.mrb[45].mxu1 }
 0x6ad   :  { %v9983_v15 = vadd.f32 %v9982_v43, %v9981_v58 }
 0x6cd   :  { %v5604_v17 = vpop.f32.mrb[46].mxu1 }
 0x6ce   :  { %v5605_v11 = vadd.f32 %v9983_v15, %v5604_v17  ;;  %v5606_v4 = vpop.f32.mrb[47].mxu1 }
 0x6d0   :  { %v5608_v39 = vmul.f32 0.0025510204, %v5605_v11 }
 0x6d2   :  { %v5609_v48 = vadd.f32 1e-05, %v5608_v39 }
 0x6d4   :  { %11314 = vrsqrt.f32 %v5609_v48 }
 0x6de   :  { %v11315_v33 = vpop.eup %11314 }
 0x6df   :  { %v5611_v13 = vmul.f32 %v11315_v33, %v276_v45  ;;  %v19307_v45 = vld [vmem:[#allocation99_spill] sm:$0xff] }
 0x6e1   :  { %v5612_v22 = vmul.f32 %v5611_v13, %v14632_v34  ;;  %v14825_v3 = vrot.slane %v5611_v13, %v14635_v27  ;;  %v19306_v34 = vld [vmem:[#allocation89_spill] sm:$0xff] }
 0x6e3   :  { %v5613_v38 = vsub.f32 %v277_v35, %v5612_v22  ;;  %v14829_v21 = vmul.f32 %v14825_v3, %v19303_v41  ;;  %v14833_v2 = vmul.f32 %v14825_v3, %v19304_v31  ;;  %v14837_v58 = vmul.f32 %v14825_v3, %v19305_v23  ;;  %v19308_v35 = vld [vmem:[#allocation90_spill] sm:$0xff] }
 0x6e4   :  { %v14841_v43 = vmul.f32 %v14825_v3, %v19306_v34  ;;  %v14845_v15 = vmul.f32 %v14825_v3, %v14454_v28  ;;  %v14852_v11 = vmul.f32 %v14825_v3, %v14448_v6  ;;  %v14856_v4 = vmul.f32 %v14825_v3, %v14472_v18 }
 0x6e5   :  { %v14848_v17 = vrot.slane %v5613_v38, %v14635_v27  ;;  %v14860_v39 = vmul.f32 %v14825_v3, %v14466_v20  ;;  %v14864_v48 = vmul.f32 %v14825_v3, %v14490_v37  ;;  %v14868_v28 = vmul.f32 %v14825_v3, %v14484_v9 }
 0x6e6   :  { %v14872_v6 = vmul.f32 %v14825_v3, %v14508_v55  ;;  %v14876_v18 = vmul.f32 %v14825_v3, %v14502_v8  ;;  %v14880_v20 = vmul.f32 %v14825_v3, %v14531_v26  ;;  %v14884_v37 = vmul.f32 %v14825_v3, %v14520_v57 }
 0x6e7   :  { %v14888_v9 = vmul.f32 %v14825_v3, %v14546_v24  ;;  %v14892_v55 = vmul.f32 %v14825_v3, %v14542_v7  ;;  %v5641_v8 = vmul.f32 %v14825_v3, %v19307_v45  ;;  %v5642_v33 = vmul.f32 %v14825_v3, %v14468_v46 }
 0x6e8   :  { %v5643_v26 = vmul.f32 %v14825_v3, %v14470_v59  ;;  %v5644_v57 = vmul.f32 %v14825_v3, %v14486_v12  ;;  %v5645_v24 = vmul.f32 %v14825_v3, %v14488_v61  ;;  %v5646_v13 = vmul.f32 %v14825_v3, %v14504_v32 }
 0x6e9   :  { %v5647_v7 = vmul.f32 %v14825_v3, %v14506_v0  ;;  %v5648_v22 = vmul.f32 %v14825_v3, %v14527_v50  ;;  %v5649_v46 = vmul.f32 %v14825_v3, %v14529_v53  ;;  %v5650_v59 = vmul.f32 %v14825_v3, %v19308_v35 }
 0x6ea   :  { %v5651_v12 = vmul.f32 %v14825_v3, %v14525_v16  ;;  %v5652_v61 = vmul.f32 %v14825_v3, %v14554_v54  ;;  %v5653_v32 = vmul.f32 %v14825_v3, %v14549_v1  ;;  %v5654_v0 = vmul.f32 %v14825_v3, %v14564_v62 }
 0x6eb   :  { %v5655_v50 = vmul.f32 %v14825_v3, %v14560_v29  ;;  %v5656_v53 = vmul.f32 %v14825_v3, %v14575_v47  ;;  %v5657_v38 = vmul.f32 %v14825_v3, %v14572_v56  ;;  %v5658_v16 = vmul.f32 %v14825_v3, %v14584_v51 }
 0x6ec   :  { %v5659_v54 = vmul.f32 %v14825_v3, %v14581_v10  ;;  %v5660_v1 = vmul.f32 %v14825_v3, %v14593_v52  ;;  %v5661_v62 = vmul.f32 %v14825_v3, %v14590_v44  ;;  %v5662_v29 = vmul.f32 %v14825_v3, %v14602_v19 }
 0x6ed   :  { %v5663_v47 = vmul.f32 %v14825_v3, %v14599_v5  ;;  %v5664_v56 = vmul.f32 %v14825_v3, %v14611_v30  ;;  %v5665_v51 = vmul.f32 %v14825_v3, %v14608_v60  ;;  %v5666_v10 = vmul.f32 %v14825_v3, %v14620_v25 }
 0x6ee   :  { %v5667_v52 = vmul.f32 %v14825_v3, %v14617_v36  ;;  %v5668_v44 = vmul.f32 %v14825_v3, %v14627_v40  ;;  %v14951_v19 = vadd.f32 %v14848_v17, %v5641_v8  ;;  %v14954_v5 = vadd.f32 %v14848_v17, %v5642_v33 }
 0x6ef   :  { %v14957_v30 = vadd.f32 %v14848_v17, %v5643_v26  ;;  %v14960_v60 = vadd.f32 %v14848_v17, %v5644_v57  ;;  %v14963_v25 = vadd.f32 %v14848_v17, %v5645_v24  ;;  %v14966_v36 = vadd.f32 %v14848_v17, %v5646_v13 }
 0x6f0   :  { %v14969_v40 = vadd.f32 %v14848_v17, %v5647_v7  ;;  %v14972_v41 = vadd.f32 %v14848_v17, %v5648_v22  ;;  %v14975_v31 = vadd.f32 %v14848_v17, %v5649_v46  ;;  %v14978_v23 = vadd.f32 %v14848_v17, %v5650_v59 }
 0x6f1   :  { %19309 = vst [vmem:[#allocation100_spill] sm:$0xff] %v14960_v60  ;;  %19310 = vst [vmem:[#allocation84_spill] sm:$0xff] %v14963_v25  ;;  %v14981_v34 = vadd.f32 %v14848_v17, %v5651_v12  ;;  %v14984_v45 = vadd.f32 %v14848_v17, %v5652_v61  ;;  %v14987_v8 = vadd.f32 %v14848_v17, %v5653_v32 }
 0x6f2   :  { %v14990_v33 = vadd.f32 %v14848_v17, %v5654_v0  ;;  %v14993_v26 = vadd.f32 %v14848_v17, %v5655_v50  ;;  %v14996_v57 = vadd.f32 %v14848_v17, %v5656_v53  ;;  %v14999_v24 = vadd.f32 %v14848_v17, %v5657_v38  ;;  %v19322_v53 = vld [vmem:[#allocation87_spill] sm:$0xff] }
 0x6f3   :  { %19311 = vst [vmem:[#allocation113_spill] sm:$0xff] %v14981_v34  ;;  %v15002_v13 = vadd.f32 %v14848_v17, %v5658_v16  ;;  %v15005_v7 = vadd.f32 %v14848_v17, %v5659_v54  ;;  %v15008_v22 = vadd.f32 %v14848_v17, %v5660_v1  ;;  %v15011_v46 = vadd.f32 %v14848_v17, %v5661_v62  ;;  %v19323_v16 = vld [vmem:[#allocation77_spill] sm:$0xff]  ;;  %v19324_v1 = vld [vmem:[#allocation4_spill] sm:$0xff] }
 0x6f4   :  { %19312 = vst [vmem:[#allocation101_spill] sm:$0xff] %v14996_v57  ;;  %19313 = vst [vmem:[#allocation116_spill] sm:$0xff] %v14999_v24  ;;  %v15014_v35 = vadd.f32 %v14848_v17, %v5662_v29  ;;  %v15017_v59 = vadd.f32 %v14848_v17, %v5663_v47  ;;  %v15020_v12 = vadd.f32 %v14848_v17, %v5664_v56  ;;  %v19325_v29 = vld [vmem:[#allocation5_spill] sm:$0xff]  ;;  %v19326_v56 = vld [vmem:[#allocation7_spill] sm:$0xff] }
 0x6f5   :  { %19314 = vst [vmem:[#allocation108_spill] sm:$0xff] %v15002_v13  ;;  %19315 = vst [vmem:[#allocation125_spill] sm:$0xff] %v15005_v7  ;;  %v15023_v61 = vadd.f32 %v14848_v17, %v5665_v51  ;;  %v15026_v32 = vadd.f32 %v14848_v17, %v5666_v10  ;;  %v15029_v0 = vadd.f32 %v14848_v17, %v5667_v52 }
 0x6f6   :  { %19316 = vst [vmem:[#allocation128_spill] sm:$0xff] %v15014_v35  ;;  %19317 = vst [vmem:[#allocation122_spill] sm:$0xff] %v15017_v59  ;;  %v15032_v50 = vadd.f32 %v14848_v17, %v5668_v44  ;;  %v5636_v38 = vmul.f32 %v14825_v3, %v19322_v53  ;;  %v5637_v54 = vmul.f32 %v14825_v3, %v19323_v16 }
 0x6f7   :  { %19318 = vst [vmem:[#allocation115_spill] sm:$0xff] %v15020_v12  ;;  %19319 = vst [vmem:[#allocation138_spill] sm:$0xff] %v15023_v61  ;;  %v5638_v62 = vmul.f32 %v14825_v3, %v19324_v1  ;;  %v5639_v47 = vmul.f32 %v14825_v3, %v19325_v29  ;;  %v5640_v51 = vmul.f32 %v14825_v3, %v19326_v56 }
 0x6f8   :  { %19320 = vst [vmem:[#allocation129_spill] sm:$0xff] %v15026_v32  ;;  %19321 = vst [vmem:[#allocation140_spill] sm:$0xff] %v15032_v50  ;;  %v15046_v10 = vadd.f32 %v14848_v17, %v14829_v21  ;;  %v15050_v52 = vadd.f32 %v14848_v17, %v14833_v2  ;;  %v15054_v44 = vadd.f32 %v14848_v17, %v14837_v58 }
 0x6f9   :  { %v15058_v53 = vadd.f32 %v14848_v17, %v14841_v43  ;;  %v15062_v16 = vadd.f32 %v14848_v17, %v14845_v15  ;;  %v15066_v3 = vadd.f32 %v14848_v17, %v14852_v11  ;;  %v15070_v21 = vadd.f32 %v14848_v17, %v14856_v4 }
 0x6fa   :  { %v15074_v2 = vadd.f32 %v14848_v17, %v14860_v39  ;;  %v15078_v58 = vadd.f32 %v14848_v17, %v14864_v48  ;;  %v15082_v43 = vadd.f32 %v14848_v17, %v14868_v28  ;;  %v15086_v15 = vadd.f32 %v14848_v17, %v14872_v6 }
 0x6fb   :  { %v15090_v11 = vadd.f32 %v14848_v17, %v14876_v18  ;;  %v15094_v4 = vadd.f32 %v14848_v17, %v14880_v20  ;;  %v15098_v39 = vadd.f32 %v14848_v17, %v14884_v37  ;;  %v15102_v48 = vadd.f32 %v14848_v17, %v14888_v9 }
 0x6fc   :  { %19327 = vst [vmem:[#allocation141_spill] sm:$0xff] %v15086_v15  ;;  %v15106_v28 = vadd.f32 %v14848_v17, %v14892_v55  ;;  %v15109_v6 = vadd.f32 %v14848_v17, %v5636_v38  ;;  %v15112_v18 = vadd.f32 %v14848_v17, %v5637_v54  ;;  %v15115_v20 = vadd.f32 %v14848_v17, %v5638_v62 }
 0x6fd   :  { %v15118_v37 = vadd.f32 %v14848_v17, %v5639_v47  ;;  %v15121_v1 = vadd.f32 %v14848_v17, %v5640_v51  ;;  %v5773_v9 = vcombine.high %v15046_v10, %v15046_v10  ;;  %v5774_v55 = vcombine.high %v15050_v52, %v15050_v52 }
 0x6fe   :  { %19328 = vst [vmem:[#allocation121_spill] sm:$0xff] %v15106_v28  ;;  %19329 = vst [vmem:[#allocation155_spill] sm:$0xff] %v15109_v6  ;;  %v5775_v38 = vcombine.high %v15054_v44, %v15054_v44  ;;  %v5776_v54 = vcombine.high %v15058_v53, %v15058_v53  ;;  %v5777_v62 = vcombine.high %v15062_v16, %v15062_v16 }
 0x6ff   :  { %19330 = vst [vmem:[#allocation153_spill] sm:$0xff] %v15112_v18  ;;  %19331 = vst [vmem:[#allocation150_spill] sm:$0xff] %v15115_v20  ;;  %v5778_v29 = vcombine.high %v15066_v3, %v15066_v3  ;;  %v15137_v17 = vcombine.high %v15070_v21, %v15070_v21  ;;  %v5780_v47 = vcombine.high %v15074_v2, %v15074_v2 }
 0x700   :  { %19332 = vst [vmem:[#allocation142_spill] sm:$0xff] %v15118_v37  ;;  %v5781_v56 = vcombine.high %v15078_v58, %v15078_v58  ;;  %v5782_v51 = vcombine.high %v15082_v43, %v15082_v43  ;;  %v5783_v27 = vcombine.high %v15086_v15, %v15086_v15  ;;  %v5784_v63 = vcombine.high %v15090_v11, %v15090_v11 }
 0x701   :  { %19333 = vst [vmem:[#allocation164_spill] sm:$0xff] %v15137_v17  ;;  %v5785_v14 = vcombine.high %v15094_v4, %v15094_v4  ;;  %v15153_v49 = vcombine.high %v15098_v39, %v15098_v39  ;;  %v5787_v61 = vcombine.high %v15102_v48, %v15102_v48  ;;  %v5788_v12 = vcombine.high %v15106_v28, %v15106_v28 }
 0x702   :  { %v5789_v35 = vcombine.high %v15109_v6, %v15109_v6  ;;  %v5790_v59 = vcombine.high %v15112_v18, %v15112_v18  ;;  %v5791_v15 = vcombine.high %v15115_v20, %v15115_v20  ;;  %v5792_v42 = vcombine.high %v15118_v37, %v15118_v37 }
 0x703   :  { %19334 = vst [vmem:[#allocation154_spill] sm:$0xff] %v15153_v49  ;;  %v15169_v49 = vcombine.high %v15121_v1, %v15121_v1  ;;  %v5798_v20 = vcombine.high %v14963_v25, %v14963_v25  ;;  %v5799_v37 = vcombine.high %v14966_v36, %v14966_v36  ;;  %v5805_v60 = vcombine.high %v14984_v45, %v14984_v45 }
 0x704   :  { %v5806_v25 = vcombine.high %v14987_v8, %v14987_v8  ;;  %v5812_v34 = vcombine.high %v15005_v7, %v15005_v7  ;;  %v15217_v17 = vcombine.high %v15011_v46, %v15011_v46  ;;  %v5819_v28 = vcombine.high %v15026_v32, %v15026_v32 }
 0x705   :  { %19335 = vst [vmem:[#allocation165_spill] sm:$0xff] %v15169_v49  ;;  %v15185_v49 = vcombine.high %v14969_v40, %v14969_v40  ;;  %v5820_v6 = vcombine.high %v15029_v0, %v15029_v0  ;;  %v15224_v24 = vcombine.low %v15046_v10, %v5773_v9  ;;  %v15227_v18 = vcombine.low %v5798_v20, %v14966_v36 }
 0x706   :  { %19338 = vst [vmem:[#allocation178_spill] sm:$0xff] %v15217_v17  ;;  %v15230_v13 = vcombine.low %v15050_v52, %v5774_v55  ;;  %v15233_v7 = vcombine.low %v15054_v44, %v5775_v38  ;;  %v15236_v17 = vcombine.low %v5776_v54, %v15062_v16  ;;  %v15239_v32 = vcombine.low %v5799_v37, %v14969_v40 }
 0x707   :  { %19336 = vst [vmem:[#allocation167_spill] sm:$0xff] %v15185_v49  ;;  %v15201_v49 = vcombine.high %v14990_v33, %v14990_v33  ;;  %v15242_v57 = vcombine.low %v5777_v62, %v15066_v3  ;;  %v15245_v10 = vcombine.low %v5778_v29, %v15070_v21  ;;  %v15248_v36 = vcombine.low %v5805_v60, %v14987_v8 }
 0x708   :  { %v15251_v52 = vcombine.low %v5806_v25, %v14990_v33  ;;  %v15254_v44 = vcombine.low %v15074_v2, %v5780_v47  ;;  %v15257_v16 = vcombine.low %v15078_v58, %v5781_v56  ;;  %v15260_v40 = vcombine.low %v15082_v43, %v5782_v51  ;;  %v19362_v56 = vld [vmem:[#allocation84_spill] sm:$0xff] }
 0x709   :  { %19337 = vst [vmem:[#allocation168_spill] sm:$0xff] %v15201_v49  ;;  %v5813_v49 = vcombine.high %v15008_v22, %v15008_v22  ;;  %19339 = vst [vmem:[#allocation189_spill] sm:$0xff] %v15245_v10  ;;  %v15263_v3 = vcombine.low %v5812_v34, %v15008_v22  ;;  %v15266_v21 = vcombine.low %v5783_v27, %v15090_v11  ;;  %v19363_v51 = vld [vmem:[#allocation100_spill] sm:$0xff] }
 0x70a   :  { %19340 = vst [vmem:[#allocation179_spill] sm:$0xff] %v15254_v44  ;;  %19341 = vst [vmem:[#allocation191_spill] sm:$0xff] %v15260_v40  ;;  %v15269_v60 = vcombine.low %v5784_v63, %v15094_v4  ;;  %v15272_v25 = vcombine.low %v5785_v14, %v15098_v39  ;;  %v15278_v33 = vcombine.low %v15102_v48, %v5787_v61  ;;  %v19352_v4 = vld [vmem:[#allocation142_spill] sm:$0xff] }
 0x70b   :  { %v15275_v8 = vcombine.low %v5813_v49, %v15011_v46  ;;  %v15281_v2 = vcombine.low %v5819_v28, %v15029_v0  ;;  %v15284_v34 = vcombine.low %v5820_v6, %v15032_v50  ;;  %v15288_v27 = vpack.c.bf16 %v15224_v24, %v15224_v24  ;;  %v19347_v46 = vld [vmem:[#allocation121_spill] sm:$0xff]  ;;  %v19348_v0 = vld [vmem:[#allocation155_spill] sm:$0xff] }
 0x70c   :  { %19342 = vst [vmem:[#allocation181_spill] sm:$0xff] %v15272_v25  ;;  %v15292_v14 = vpack.c.bf16 %v15058_v53, %v15058_v53  ;;  %v15296_v49 = vpack.c.bf16 %v15230_v13, %v15230_v13  ;;  %v15300_v63 = vpack.c.bf16 %v15233_v7, %v15233_v7  ;;  %v15304_v22 = vpack.c.bf16 %v15236_v17, %v15236_v17  ;;  %v19350_v53 = vld [vmem:[#allocation150_spill] sm:$0xff] }
 0x70d   :  { %19343 = vst [vmem:[#allocation175_spill] sm:$0xff] %v15281_v2  ;;  %19344 = vst [vmem:[#allocation190_spill] sm:$0xff] %v15284_v34  ;;  %v15307_v61 = vcombine.low %v19347_v46, %v5788_v12  ;;  %v15310_v58 = vcombine.low %v19348_v0, %v5789_v35  ;;  %v15313_v43 = vcombine.low %v5790_v59, %v19350_v53  ;;  %v9604_v48 = vrot.slane %v15288_v27, 9 }
 0x70e   :  { %19345 = vst [vmem:[#allocation204_spill] sm:$0xff] %v15292_v14  ;;  %19346 = vst [vmem:[#allocation195_spill] sm:$0xff] %v15304_v22  ;;  %v15317_v11 = vpack.c.bf16 %v15242_v57, %v15242_v57  ;;  %v15320_v39 = vcombine.low %v5791_v15, %v19352_v4  ;;  %v6213_v28 = vrot.slane %v15296_v49, 5  ;;  %v6216_v12 = vrot.slane %v15300_v63, 5 }
 0x70f   :  { %19349 = vst [vmem:[#allocation203_spill] sm:$0xff] %v15310_v58  ;;  %v15326_v6 = vcombine.low %v5792_v42, %v15121_v1  ;;  %v9605_v59 = vrot.slane %v15304_v22, 9  ;;  %v15338_v20 = vpack.c.bf16 %v15245_v10, %v15245_v10  ;;  %v19357_v37 = vcombine.high %v14951_v19, %v14951_v19 }
 0x710   :  { %19351 = vst [vmem:[#allocation211_spill] sm:$0xff] %v15317_v11  ;;  %v6223_v15 = vrot.slane %v15317_v11, 5  ;;  %v6215_v1 = vrot.slane %v6213_v28, 4  ;;  %v6218_v9 = vrot.slane %v6216_v12, 4  ;;  %v6219_v55 = vrot.slane %v15292_v14, 5 }
 0x711   :  { %19353 = vst [vmem:[#allocation26_spill] sm:$0xff] %v15326_v6  ;;  %19356 = vst [vmem:[#allocation12_spill] sm:$0xff] %v15338_v20  ;;  %v15344_v42 = vcombine.low %v14951_v19, %v19357_v37  ;;  %v19359_v38 = vcombine.high %v14954_v5, %v14954_v5  ;;  %v19360_v62 = vcombine.high %v14957_v30, %v14957_v30  ;;  %v6226_v19 = vrot.slane %v15338_v20, 5 }
 0x712   :  { %v6225_v47 = vrot.slane %v6223_v15, 4  ;;  %v19364_v46 = vcombine.high %v19363_v51, %v19363_v51  ;;  %v6214_v53 = vsel %vm15330_vm11, %v9604_v48, %v6213_v28  ;;  %v6220_v4 = vsel %vm15330_vm11, %v6218_v9, %v6219_v55  ;;  %v11258_v48 = vld [vmem:[%s18194_s5 + $0x80] sm:$0xff]  }
 0x713   :  { %19358 = vst [vmem:[#allocation11_spill] sm:$0xff] %v15344_v42  ;;  %v15351_v54 = vcombine.low %v14954_v5, %v19359_v38  ;;  %v15357_v29 = vcombine.low %v14957_v30, %v19360_v62  ;;  %v6217_v5 = vsel %vm15330_vm11, %v6215_v1, %v6216_v12  ;;  %v15374_v37 = vsel %vm15330_vm11, %v9605_v59, %v6223_v15  ;;  %v19366_v38 = vld [vmem:[#allocation164_spill] sm:$0xff] }
 0x714   :  { %v15364_v0 = vcombine.low %v19364_v46, %v19362_v56  ;;  %v9646_v30 = vcombine.low %v6214_v53, %v6217_v5  ;;  %19365 = vst [vmem:[#allocation13_spill] sm:$0xff] %v15374_v37  ;;  %v15378_v62 = vpack.c.bf16 %v19366_v38, %v19366_v38  ;;  %v15382_v56 = vsel %vm15330_vm11, %v6225_v47, %v6226_v19 }
 0x715   :  { %19361 = vst [vmem:[#allocation14_spill] sm:$0xff] %v15357_v29  ;;  %19368 = vst [vmem:[#allocation19_spill] sm:$0xff] %v15382_v56  ;;  %v19369_v28 = vcombine.high %v14972_v41, %v14972_v41  ;;  %v19371_v59 = vcombine.high %v14975_v31, %v14975_v31  ;;  %v5913_v1 = vpack.c.bf16 %v15230_v13, %v15224_v24  ;;  %v6228_v47 = vrot.slane %v6226_v19, 4  ;;  %v19376_v13 = vld [vmem:[#allocation113_spill] sm:$0xff] }
 0x716   :  { %19367 = vst [vmem:[#allocation30_spill] sm:$0xff] %v15378_v62  ;;  %7302 = vmatprep.mubr.bf16.mxu1 %v9646_v30  ;;  %v9647_v55 = vcombine.low %v6220_v4, %v15374_v37  ;;  %v15410_v46 = vpack.c.bf16 %v15260_v40, %v15260_v40  ;;  %v19377_v53 = vcombine.high %v19376_v13, %v19376_v13  ;;  %v19386_v37 = vld [vmem:[#allocation108_spill] sm:$0xff]  ;;  %v19393_v34 = vrot.slane %v15296_v49, 6 }
 0x717   :  { %v15391_v12 = vcombine.low %v14972_v41, %v19369_v28  ;;  %v15397_v15 = vcombine.low %v14975_v31, %v19371_v59  ;;  %v15406_v41 = vpack.c.bf16 %v15257_v16, %v15257_v16  ;;  %v19374_v31 = vcombine.high %v14978_v23, %v14978_v23  ;;  %7303 = vmatmul.mubr.bf16.vlgmr.msra.gmra.mrb[48].mxu1 %v5913_v1  ;;  %v19380_v28 = vld [vmem:[#allocation101_spill] sm:$0xff] }
 0x718   :  { %19373 = vst [vmem:[#allocation20_spill] sm:$0xff] %v15410_v46  ;;  %v15422_v5 = vcombine.low %v19377_v53, %v14984_v45  ;;  %v19378_v19 = vcombine.high %v14993_v26, %v14993_v26  ;;  %v19381_v59 = vcombine.high %v19380_v28, %v19380_v28  ;;  %v19385_v53 = vld [vmem:[#allocation125_spill] sm:$0xff]  ;;  %7310 = vmatprep.mubr.bf16.mxu1 %v9647_v55  ;;  %v6229_v1 = vrot.slane %v15378_v62, 5 }
 0x719   :  { %19370 = vst [vmem:[#allocation15_spill] sm:$0xff] %v15391_v12  ;;  %19372 = vst [vmem:[#allocation21_spill] sm:$0xff] %v15406_v41  ;;  %v15416_v24 = vcombine.low %v14978_v23, %v19374_v31  ;;  %v19382_v31 = vld [vmem:[#allocation116_spill] sm:$0xff]  ;;  %7448 = vmatpush1.bf16.msra.mxu1 %v11258_v48  ;;  %v19390_v55 = vmov 0   ;;  %v15472_v30 = vpack.c.bf16 %v15272_v25, %v15272_v25  ;;  %v15476_v2 = vrot.slane %v19393_v34, 4 }
 0x71a   :  { %v15428_v4 = vcombine.low %v14993_v26, %v19378_v19  ;;  %v15435_v23 = vcombine.low %v19380_v28, %v19381_v59  ;;  %v19383_v9 = vcombine.high %v19382_v31, %v19382_v31  ;;  %v19387_v26 = vcombine.high %v19386_v37, %v19386_v37  ;;  %v11259_v28 = vld [vmem:[%s18194_s5 + $0x88] sm:$0xff]   ;;  %7449 = vmatprep.subr.bf16.mxu1 %v19390_v55 }
 0x71b   :  { %19375 = vst [vmem:[#allocation25_spill] sm:$0xff] %v15416_v24  ;;  %v6236_v59 = vrot.slane %v15410_v46, 5  ;;  %19392 = vst [vmem:[#allocation54_spill] sm:$0xff] %v15472_v30  ;;  %v9868_v50 = vpack.c.bf16 %v15236_v17, %v15233_v7  ;;  %v15482_v48 = vpack.c.bf16 %v15242_v57, %v15236_v17  ;;  %v19395_v46 = vld [vmem:[#allocation141_spill] sm:$0xff]  ;;  %v15493_v34 = vpack.c.bf16 %v15266_v21, %v15266_v21 }
 0x71c   :  { %19379 = vst [vmem:[#allocation42_spill] sm:$0xff] %v15428_v4  ;;  %v15441_v45 = vcombine.low %v19382_v31, %v19383_v9  ;;  %v15447_v19 = vcombine.low %v19387_v26, %v19385_v53  ;;  %v15456_v9 = vpack.c.bf16 %v15254_v44, %v15254_v44  ;;  %v6233_v31 = vrot.slane %v15406_v41, 5 }
 0x71d   :  { %v15461_v53 = vpack.c.bf16 %v15269_v60, %v15269_v60  ;;  %v15467_v26 = vsel %vm15330_vm11, %v6228_v47, %v6229_v1  ;;  %19394 = vst [vmem:[#allocation46_spill] sm:$0xff] %v15482_v48  ;;  %v5916_v1 = vpack.c.bf16 %v19366_v38, %v15245_v10  ;;  %v15489_v41 = vpack.c.bf16 %v19395_v46, %v19395_v46  ;;  %v11260_v46 = vld [vmem:[%s18194_s5 + $0x90] sm:$0xff]  }
 0x71e   :  { %19384 = vst [vmem:[#allocation34_spill] sm:$0xff] %v15441_v45  ;;  %19388 = vst [vmem:[#allocation23_spill] sm:$0xff] %v15456_v9  ;;  %v6246_v62 = vrot.slane %v15472_v30, 5  ;;  %7450 = vmatpush1.bf16.msra.mxu1 %v11259_v28  ;;  %v9648_v57 = vcombine.low %v15382_v56, %v15467_v26  ;;  %v9606_v7 = vrot.slane %v15456_v9, 9  ;;  %v6235_v17 = vrot.slane %v6233_v31, 4 }
 0x71f   :  { %19389 = vst [vmem:[#allocation36_spill] sm:$0xff] %v15461_v53  ;;  %19391 = vst [vmem:[#allocation35_spill] sm:$0xff] %v15467_v26  ;;  %v6243_v47 = vrot.slane %v15461_v53, 5  ;;  %v19397_v53 = vld [vmem:[#allocation154_spill] sm:$0xff]  ;;  %7451 = vmatprep.subr.bf16.mxu1 %v19390_v55  ;;  %v6238_v20 = vrot.slane %v6236_v59, 4  ;;  %v15509_v28 = vpack.c.bf16 %v15269_v60, %v15266_v21  ;;  %7311 = vmatmul.mubr.bf16.gmra.mrb[52].mxu1 %v9868_v50  ;;  %v6116_v56 = vunpack.c.h.b16 %v15482_v48 }
 0x720   :  { %19396 = vst [vmem:[#allocation37_spill] sm:$0xff] %v15493_v34  ;;  %v15501_v38 = vpack.c.bf16 %v19397_v53, %v19397_v53  ;;  %v5920_v26 = vpack.c.bf16 %v19397_v53, %v15272_v25  ;;  %v6248_v30 = vrot.slane %v6246_v62, 4  ;;  %v15516_v9 = vpack.c.bf16 %v15278_v33, %v15278_v33  ;;  %7318 = vmatprep.mubr.bf16.mxu1 %v9648_v57 }
 0x721   :  { %v6245_v11 = vrot.slane %v6243_v47, 4  ;;  %19399 = vst [vmem:[#allocation47_spill] sm:$0xff] %v15509_v28  ;;  %v15520_v22 = vpack.c.bf16 %v15307_v61, %v15307_v61  ;;  %v6117_v14 = vunpack.c.l.b16 %v5916_v1  ;;  %v15524_v60 = vpack.c.bf16 %v15257_v16, %v15254_v44  ;;  %v11261_v16 = vld [vmem:[%s18194_s5 + $0x98] sm:$0xff]  }
 0x722   :  { %19398 = vst [vmem:[#allocation48_spill] sm:$0xff] %v15501_v38  ;;  %v6239_v53 = vrot.slane %v15489_v41, 5  ;;  %v9607_v50 = vrot.slane %v15493_v34, 9  ;;  %v15530_v48 = vsel %vm15330_vm11, %v9606_v7, %v6233_v31  ;;  %v15534_v25 = vsel %vm15330_vm11, %v6235_v17, %v6236_v59  ;;  %7452 = vmatpush1.bf16.msra.mxu1 %v11260_v46  ;;  %v19406_v34 = vld [vmem:[#allocation153_spill] sm:$0xff] }
 0x723   :  { %19400 = vst [vmem:[#allocation75_spill] sm:$0xff] %v15524_v60  ;;  %19401 = vst [vmem:[#allocation55_spill] sm:$0xff] %v15530_v48  ;;  %v6249_v10 = vrot.slane %v15501_v38, 5  ;;  %v15539_v1 = vpack.c.bf16 %v15310_v58, %v15310_v58  ;;  %v15550_v31 = vsel %vm15330_vm11, %v6245_v11, %v6246_v62  ;;  %v6122_v59 = vunpack.c.h.b16 %v15509_v28  ;;  %7453 = vmatprep.subr.bf16.mxu1 %v19390_v55 }
 0x724   :  { %19402 = vst [vmem:[#allocation49_spill] sm:$0xff] %v15534_v25  ;;  %v15546_v57 = vsel %vm15330_vm11, %v6238_v20, %v6239_v53  ;;  %19404 = vst [vmem:[#allocation56_spill] sm:$0xff] %v15550_v31  ;;  %v6123_v7 = vunpack.c.l.b16 %v5920_v26  ;;  %v9608_v17 = vrot.slane %v15516_v9, 9  ;;  %v6253_v38 = vrot.slane %v15520_v22, 5 }
 0x725   :  { %19403 = vst [vmem:[#allocation57_spill] sm:$0xff] %v15546_v57  ;;  %v15556_v46 = vsel %vm15330_vm11, %v6248_v30, %v6249_v10  ;;  %v15562_v20 = vpack.c.bf16 %v19406_v34, %v19406_v34  ;;  %v6516_v53 = vpack.c.b16 %v6117_v14, %v6116_v56  ;;  %v15566_v11 = vcombine.low %v15530_v48, %v15534_v25  ;;  %v11263_v48 = vld [vmem:[%s18194_s5 + $0xa8] sm:$0xff]  }
 0x726   :  { %19405 = vst [vmem:[#allocation79_spill] sm:$0xff] %v15556_v46  ;;  %v15570_v62 = vsel %vm15330_vm11, %v9607_v50, %v6243_v47  ;;  %v15574_v10 = vpack.c.bf16 %v15266_v21, %v15260_v40  ;;  %v15583_v14 = vpack.c.bf16 %v15313_v43, %v15313_v43  ;;  %v15587_v56 = vpack.c.bf16 %v15344_v42, %v15344_v42  ;;  %v11262_v21 = vld [vmem:[%s18194_s5 + $0xa0] sm:$0xff]  }
 0x727   :  { %19407 = vst [vmem:[#allocation60_spill] sm:$0xff] %v15566_v11  ;;  %19408 = vst [vmem:[#allocation69_spill] sm:$0xff] %v15570_v62  ;;  %v15578_v30 = vcombine.low %v15546_v57, %v15570_v62  ;;  %7454 = vmatpush1.bf16.msra.mxu1 %v11261_v16  ;;  %v15594_v47 = vcombine.low %v15550_v31, %v15556_v46  ;;  %v15596_v50 = vpack.c.b16 %v6123_v7, %v6122_v59 }
 0x728   :  { %19409 = vst [vmem:[#allocation58_spill] sm:$0xff] %v15574_v10  ;;  %19411 = vst [vmem:[#allocation70_spill] sm:$0xff] %v15587_v56  ;;  %v15600_v26 = vpack.c.bf16 %v15307_v61, %v15278_v33  ;;  %v15604_v62 = vpack.c.bf16 %v15320_v39, %v15320_v39  ;;  %7455 = vmatprep.subr.bf16.mxu1 %v19390_v55  ;;  %7319 = vmatmul.mubr.bf16.gmra.mrb[56].mxu1 %v6516_v53  ;;  %v6255_v7 = vrot.slane %v6253_v38, 4 }
 0x729   :  { %19410 = vst [vmem:[#allocation71_spill] sm:$0xff] %v15578_v30  ;;  %19412 = vst [vmem:[#allocation91_spill] sm:$0xff] %v15594_v47  ;;  %v15609_v16 = vsel %vm15330_vm11, %v9608_v17, %v6253_v38  ;;  %v15614_v59 = vpack.c.bf16 %v15313_v43, %v15310_v58  ;;  %v15618_v61 = vpack.c.bf16 %v15326_v6, %v15326_v6  ;;  %7326 = vmatprep.mubr.bf16.mxu1 %v15566_v11 }
 0x72a   :  { %19413 = vst [vmem:[#allocation82_spill] sm:$0xff] %v15596_v50  ;;  %19414 = vst [vmem:[#allocation72_spill] sm:$0xff] %v15600_v26  ;;  %v15623_v53 = vpack.c.bf16 %v15351_v54, %v15351_v54  ;;  %v15627_v17 = vpack.c.bf16 %v15357_v29, %v15357_v29  ;;  %v9610_v46 = vrot.slane %v15587_v56, 9  ;;  %v19419_v31 = vrot.slane %v15539_v1, 5  ;;  %v19426_v56 = vld [vmem:[#allocation167_spill] sm:$0xff] }
 0x72b   :  { %19415 = vst [vmem:[#allocation85_spill] sm:$0xff] %v15609_v16  ;;  %19416 = vst [vmem:[#allocation83_spill] sm:$0xff] %v15614_v59  ;;  %v15637_v11 = vpack.c.bf16 %v15351_v54, %v15344_v42  ;;  %v15641_v38 = vpack.c.bf16 %v19363_v51, %v19363_v51  ;;  %7456 = vmatpush1.bf16.msra.mxu1 %v11262_v21  ;;  %v15651_v57 = vpack.c.bf16 %v15364_v0, %v15364_v0 }
 0x72c   :  { %19417 = vst [vmem:[#allocation114_spill] sm:$0xff] %v15623_v53  ;;  %19418 = vst [vmem:[#allocation95_spill] sm:$0xff] %v15627_v17  ;;  %v15632_v25 = vrot.slane %v19419_v31, 4  ;;  %v6273_v31 = vrot.slane %v15623_v53, 5  ;;  %v6276_v58 = vrot.slane %v15627_v17, 5  ;;  %7457 = vmatprep.subr.bf16.mxu1 %v19390_v55  ;;  %v15656_v54 = vpack.c.bf16 %v15227_v18, %v15227_v18 }
 0x72d   :  { %19420 = vst [vmem:[#allocation86_spill] sm:$0xff] %v15637_v11  ;;  %19421 = vst [vmem:[#allocation97_spill] sm:$0xff] %v15641_v38  ;;  %v6279_v21 = vrot.slane %v15641_v38, 5  ;;  %v15661_v51 = vpack.c.bf16 %v15364_v0, %v15357_v29  ;;  %v15665_v34 = vpack.c.bf16 %v15239_v32, %v15239_v32  ;;  %v9611_v17 = vrot.slane %v15651_v57, 9 }
 0x72e   :  { %19422 = vst [vmem:[#allocation96_spill] sm:$0xff] %v15656_v54  ;;  %v15669_v28 = vsel %vm15330_vm11, %v9610_v46, %v6273_v31  ;;  %v6275_v40 = vrot.slane %v6273_v31, 4  ;;  %v6278_v11 = vrot.slane %v6276_v58, 4  ;;  %v6283_v53 = vrot.slane %v15656_v54, 5  ;;  %v11264_v46 = vld [vmem:[%s18194_s5 + $0xb0] sm:$0xff]  }
 0x72f   :  { %19423 = vst [vmem:[#allocation117_spill] sm:$0xff] %v15661_v51  ;;  %19424 = vst [vmem:[#allocation109_spill] sm:$0xff] %v15665_v34  ;;  %v15675_v38 = vpack.c.bf16 %v19426_v56, %v19426_v56  ;;  %v6286_v29 = vrot.slane %v15665_v34, 5  ;;  %7458 = vmatpush1.bf16.msra.mxu1 %v11263_v48  ;;  %v15680_v51 = vpack.c.bf16 %v15227_v18, %v15364_v0 }
 0x730   :  { %19425 = vst [vmem:[#allocation98_spill] sm:$0xff] %v15669_v28  ;;  %v15687_v31 = vsel %vm15330_vm11, %v6275_v40, %v6276_v58  ;;  %v15691_v54 = vsel %vm15330_vm11, %v6278_v11, %v6279_v21  ;;  %v15697_v48 = vpack.c.bf16 %v15391_v12, %v15391_v12  ;;  %7459 = vmatprep.subr.bf16.mxu1 %v19390_v55  ;;  %v6285_v58 = vrot.slane %v6283_v53, 4  ;;  %v19432_v11 = vld [vmem:[#allocation165_spill] sm:$0xff] }
 0x731   :  { %19427 = vst [vmem:[#allocation111_spill] sm:$0xff] %v15680_v51  ;;  %19428 = vst [vmem:[#allocation110_spill] sm:$0xff] %v15687_v31  ;;  %7327 = vmatmul.mubr.bf16.gmra.mrb[60].mxu1 %v15524_v60  ;;  %v15703_v18 = vcombine.low %v15669_v28, %v15687_v31  ;;  %v15707_v40 = vsel %vm15330_vm11, %v9611_v17, %v6283_v53  ;;  %v6288_v0 = vrot.slane %v6286_v29, 4  ;;  %v6289_v28 = vrot.slane %v15675_v38, 5 }
 0x732   :  { %19429 = vst [vmem:[#allocation105_spill] sm:$0xff] %v15691_v54  ;;  %19431 = vst [vmem:[#allocation119_spill] sm:$0xff] %v15707_v40  ;;  %7334 = vmatprep.mubr.bf16.mxu1 %v15578_v30  ;;  %v15712_v21 = vpack.c.bf16 %v19432_v11, %v19432_v11  ;;  %v15717_v60 = vcombine.low %v15691_v54, %v15707_v40  ;;  %v15722_v17 = vsel %vm15330_vm11, %v6285_v58, %v6286_v29  ;;  %v11265_v40 = vld [vmem:[%s18194_s5 + $0xb8] sm:$0xff]  }
 0x733   :  { %19430 = vst [vmem:[#allocation139_spill] sm:$0xff] %v15703_v18  ;;  %19434 = vst [vmem:[#allocation126_spill] sm:$0xff] %v15722_v17  ;;  %v15726_v53 = vpack.c.bf16 %v15397_v15, %v15397_v15  ;;  %v15730_v30 = vpack.c.bf16 %v15416_v24, %v15416_v24  ;;  %v9612_v34 = vrot.slane %v15697_v48, 9  ;;  %7460 = vmatpush1.bf16.msra.mxu1 %v11264_v46  ;;  %v19436_v31 = vrot.slane %v15539_v1, 5 }
 0x734   :  { %19433 = vst [vmem:[#allocation112_spill] sm:$0xff] %v15717_v60  ;;  %v15744_v58 = vsel %vm15330_vm11, %v6288_v0, %v6289_v28  ;;  %v15748_v54 = vpack.c.bf16 %v15397_v15, %v15391_v12  ;;  %v15752_v46 = vpack.c.bf16 %v19376_v13, %v19376_v13  ;;  %7461 = vmatprep.subr.bf16.mxu1 %v19390_v55  ;;  %v11266_v60 = vld [vmem:[%s18194_s5 + $0xc0] sm:$0xff]  }
 0x735   :  { %19435 = vst [vmem:[#allocation120_spill] sm:$0xff] %v15730_v30  ;;  %v15740_v29 = vsel %vm15330_vm11, %v6255_v7, %v19436_v31  ;;  %19438 = vst [vmem:[#allocation133_spill] sm:$0xff] %v15744_v58  ;;  %v15757_v7 = vcombine.low %v15722_v17, %v15744_v58  ;;  %v6293_v31 = vrot.slane %v15726_v53, 5  ;;  %v6296_v28 = vrot.slane %v15730_v30, 5 }
 0x736   :  { %19437 = vst [vmem:[#allocation144_spill] sm:$0xff] %v15740_v29  ;;  %19439 = vst [vmem:[#allocation127_spill] sm:$0xff] %v15748_v54  ;;  %v15763_v15 = vpack.c.bf16 %v15422_v5, %v15422_v5  ;;  %v15767_v0 = vpack.c.bf16 %v15248_v36, %v15248_v36  ;;  %v6299_v13 = vrot.slane %v15752_v46, 5  ;;  %v15772_v54 = vpack.c.bf16 %v15422_v5, %v15416_v24 }
 0x737   :  { %19440 = vst [vmem:[#allocation135_spill] sm:$0xff] %v15752_v46  ;;  %19441 = vst [vmem:[#allocation134_spill] sm:$0xff] %v15757_v7  ;;  %v15776_v58 = vpack.c.bf16 %v15251_v52, %v15251_v52  ;;  %v15780_v17 = vsel %vm15330_vm11, %v9612_v34, %v6293_v31  ;;  %v6295_v56 = vrot.slane %v6293_v31, 4  ;;  %v6298_v51 = vrot.slane %v6296_v28, 4  ;;  %7462 = vmatpush1.bf16.msra.mxu1 %v11265_v40 }
 0x738   :  { %19442 = vst [vmem:[#allocation166_spill] sm:$0xff] %v15767_v0  ;;  %19443 = vst [vmem:[#allocation148_spill] sm:$0xff] %v15772_v54  ;;  %v9613_v7 = vrot.slane %v15763_v15, 9  ;;  %v6303_v24 = vrot.slane %v15767_v0, 5  ;;  %v19446_v54 = vld [vmem:[#allocation168_spill] sm:$0xff]  ;;  %7463 = vmatprep.subr.bf16.mxu1 %v19390_v55  ;;  %v15795_v34 = vpack.c.bf16 %v15248_v36, %v15422_v5  ;;  %v15830_v0 = vpack.c.bf16 %v15320_v39, %v15313_v43 }
 0x739   :  { %19444 = vst [vmem:[#allocation136_spill] sm:$0xff] %v15776_v58  ;;  %19445 = vst [vmem:[#allocation151_spill] sm:$0xff] %v15780_v17  ;;  %v15789_v46 = vpack.c.bf16 %v19446_v54, %v19446_v54  ;;  %v6306_v30 = vrot.slane %v15776_v58, 5  ;;  %7335 = vmatmul.mubr.bf16.gmra.mrb[64].mxu1 %v15574_v10  ;;  %v15800_v40 = vsel %vm15330_vm11, %v6295_v56, %v6296_v28 }
 0x73a   :  { %19447 = vst [vmem:[#allocation149_spill] sm:$0xff] %v15795_v34  ;;  %19448 = vst [vmem:[#allocation170_spill] sm:$0xff] %v15800_v40  ;;  %v15804_v31 = vsel %vm15330_vm11, %v6298_v51, %v6299_v13  ;;  %v15810_v58 = vpack.c.bf16 %v15428_v4, %v15428_v4  ;;  %7342 = vmatprep.mubr.bf16.mxu1 %v15594_v47  ;;  %v15815_v36 = vcombine.low %v15780_v17, %v15800_v40 }
 0x73b   :  { %19449 = vst [vmem:[#allocation147_spill] sm:$0xff] %v15804_v31  ;;  %v15819_v5 = vsel %vm15330_vm11, %v9613_v7, %v6303_v24  ;;  %v6305_v56 = vrot.slane %v6303_v24, 4  ;;  %v6308_v51 = vrot.slane %v6306_v30, 4  ;;  %v19452_v13 = vrot.slane %v15562_v20, 5  ;;  %19454 = vst [vmem:[#allocation161_spill] sm:$0xff] %v15830_v0  ;;  %7464 = vmatpush1.bf16.msra.mxu1 %v11266_v60  ;;  %v11267_v24 = vld [vmem:[%s18194_s5 + $0xc8] sm:$0xff]  }
 0x73c   :  { %19450 = vst [vmem:[#allocation158_spill] sm:$0xff] %v15815_v36  ;;  %19451 = vst [vmem:[#allocation152_spill] sm:$0xff] %v15819_v5  ;;  %v15834_v47 = vcombine.low %v15804_v31, %v15819_v5  ;;  %v6309_v7 = vrot.slane %v15789_v46, 5  ;;  %v15850_v43 = vpack.c.bf16 %v15441_v45, %v15441_v45  ;;  %v9614_v39 = vrot.slane %v15810_v58, 9  ;;  %7465 = vmatprep.subr.bf16.mxu1 %v19390_v55  ;;  %v19465_v5 = vld [vmem:[#allocation178_spill] sm:$0xff] }
 0x73d   :  { %v15826_v28 = vsel %vm15330_vm11, %v15632_v25, %v19452_v13  ;;  %v15842_v10 = vsel %vm15330_vm11, %v6305_v56, %v6306_v30  ;;  %v15846_v25 = vpack.c.bf16 %v15435_v23, %v15435_v23  ;;  %v15856_v60 = vcombine.low %v15609_v16, %v15740_v29  ;;  %v11268_v16 = vld [vmem:[%s18194_s5 + $0xd0] sm:$0xff]  }
 0x73e   :  { %19453 = vst [vmem:[#allocation162_spill] sm:$0xff] %v15826_v28  ;;  %19455 = vst [vmem:[#allocation180_spill] sm:$0xff] %v15834_v47  ;;  %v15860_v30 = vsel %vm15330_vm11, %v6308_v51, %v6309_v7  ;;  %v15864_v56 = vpack.c.bf16 %v15435_v23, %v15428_v4  ;;  %v15868_v13 = vpack.c.bf16 %v19386_v37, %v19386_v37  ;;  %v6316_v29 = vrot.slane %v15850_v43, 5 }
 0x73f   :  { %19456 = vst [vmem:[#allocation173_spill] sm:$0xff] %v15842_v10  ;;  %19457 = vst [vmem:[#allocation163_spill] sm:$0xff] %v15856_v60  ;;  %v15872_v54 = vcombine.low %v15842_v10, %v15860_v30  ;;  %v6313_v34 = vrot.slane %v15846_v25, 5  ;;  %v15878_v51 = vpack.c.bf16 %v15447_v19, %v15447_v19  ;;  %7466 = vmatpush1.bf16.msra.mxu1 %v11267_v24  ;;  %v19469_v31 = vrot.slane %v15296_v49, 6 }
 0x740   :  { %19458 = vst [vmem:[#allocation176_spill] sm:$0xff] %v15860_v30  ;;  %19459 = vst [vmem:[#allocation174_spill] sm:$0xff] %v15864_v56  ;;  %v15882_v23 = vpack.c.bf16 %v15263_v3, %v15263_v3  ;;  %v6319_v7 = vrot.slane %v15868_v13, 5  ;;  %v15890_v37 = vpack.c.bf16 %v15447_v19, %v15441_v45  ;;  %v15894_v56 = vpack.c.bf16 %v15275_v8, %v15275_v8 }
 0x741   :  { %19460 = vst [vmem:[#allocation202_spill] sm:$0xff] %v15872_v54  ;;  %v15904_v54 = vsel %vm15330_vm11, %v9614_v39, %v6313_v34  ;;  %v6315_v47 = vrot.slane %v6313_v34, 4  ;;  %7467 = vmatprep.subr.bf16.mxu1 %v19390_v55  ;;  %v6318_v30 = vrot.slane %v6316_v29, 4  ;;  %v9615_v45 = vrot.slane %v15878_v51, 9  ;;  %7343 = vmatmul.mubr.bf16.gmra.mrb[68].mxu1 %v15596_v50  ;;  %v19589_v35 = vld [vmem:[#allocation149_spill] sm:$0xff] }
 0x742   :  { %19461 = vst [vmem:[#allocation184_spill] sm:$0xff] %v15890_v37  ;;  %19464 = vst [vmem:[#allocation177_spill] sm:$0xff] %v15904_v54  ;;  %v6323_v37 = vrot.slane %v15882_v23, 5  ;;  %v15912_v10 = vpack.c.bf16 %v19465_v5, %v19465_v5  ;;  %v6326_v36 = vrot.slane %v15894_v56, 5  ;;  %v15917_v39 = vpack.c.bf16 %v15263_v3, %v15447_v19  ;;  %7350 = vmatprep.mubr.bf16.mxu1 %v15856_v60 }
 0x743   :  { %v15922_v34 = vsel %vm15330_vm11, %v6315_v47, %v6316_v29  ;;  %v15926_v50 = vsel %vm15330_vm11, %v6318_v30, %v6319_v7  ;;  %v19470_v17 = vrot.slane %v15288_v27, 10  ;;  %7468 = vmatpush1.bf16.msra.mxu1 %v11268_v16  ;;  %v11269_v29 = vld [vmem:[%s18194_s5 + $0xd8] sm:$0xff]   ;;  %v19474_v27 = vrot.slane %v15604_v62, 5 }
 0x744   :  { %19466 = vst [vmem:[#allocation187_spill] sm:$0xff] %v15917_v39  ;;  %19467 = vst [vmem:[#allocation186_spill] sm:$0xff] %v15922_v34  ;;  %v15940_v19 = vcombine.low %v15904_v54, %v15922_v34  ;;  %v15944_v47 = vsel %vm15330_vm11, %v9615_v45, %v6323_v37  ;;  %v6325_v49 = vrot.slane %v6323_v37, 4  ;;  %v6328_v30 = vrot.slane %v6326_v36, 4  ;;  %7469 = vmatprep.subr.bf16.mxu1 %v19390_v55 }
 0x745   :  { %19468 = vst [vmem:[#allocation205_spill] sm:$0xff] %v15926_v50  ;;  %v15936_v3 = vsel %vm15898_vm14, %v19470_v17, %v19469_v31  ;;  %19473 = vst [vmem:[#allocation200_spill] sm:$0xff] %v15944_v47  ;;  %v19475_v17 = vrot.slane %v15583_v14, 9  ;;  %v19477_v7 = vmov %v19474_v27  ;;  %v15961_v45 = vcombine.low %v15926_v50, %v15944_v47  ;;  %v19486_v47 = vld [vmem:[#allocation204_spill] sm:$0xff]  ;;  %v19574_v50 = vld [vmem:[#allocation175_spill] sm:$0xff] }
 0x746   :  { %19471 = vst [vmem:[#allocation198_spill] sm:$0xff] %v15936_v3  ;;  %19472 = vst [vmem:[#allocation188_spill] sm:$0xff] %v15940_v19  ;;  %v6265_v40 = vrot.slane %v19477_v7, 4  ;;  %v6329_v37 = vrot.slane %v15912_v10, 5  ;;  %v15967_v16 = vsel %vm15330_vm11, %v6325_v49, %v6326_v36  ;;  %v19480_v60 = vrot.slane %v15300_v63, 6 }
 0x747   :  { %v15955_v31 = vsel %vm15330_vm11, %v19475_v17, %v19474_v27  ;;  %19478 = vst [vmem:[#allocation193_spill] sm:$0xff] %v15961_v45  ;;  %19479 = vst [vmem:[#allocation222_spill] sm:$0xff] %v15967_v16  ;;  %v19484_v45 = vrot.slane %v15618_v61, 5  ;;  %v6342_v34 = vrot.slane %v19486_v47, 6  ;;  %7470 = vmatpush1.bf16.msra.mxu1 %v11269_v29  ;;  %v19491_v7 = vrot.slane %v15618_v61, 5  ;;  %v19494_v17 = vld [vmem:[#allocation30_spill] sm:$0xff] }
 0x748   :  { %19476 = vst [vmem:[#allocation199_spill] sm:$0xff] %v15955_v31  ;;  %v15974_v27 = vsel %vm15898_vm14, %v15476_v2, %v19480_v60  ;;  %v19483_v5 = vmov %v19480_v60  ;;  %v15984_v36 = vsel %vm15330_vm11, %v6328_v30, %v6329_v37  ;;  %v15991_v2 = vcombine.low %v15826_v28, %v15955_v31  ;;  %v19489_v60 = vld [vmem:[#allocation195_spill] sm:$0xff]  ;;  %7471 = vmatprep.subr.bf16.mxu1 %v19390_v55  ;;  %v19493_v31 = vld [vmem:[#allocation12_spill] sm:$0xff] }
 0x749   :  { %19481 = vst [vmem:[#allocation207_spill] sm:$0xff] %v15974_v27  ;;  %v6341_v39 = vrot.slane %v19483_v5, 4  ;;  %v6268_v19 = vrot.slane %v19484_v45, 4  ;;  %19485 = vst [vmem:[#allocation201_spill] sm:$0xff] %v15984_v36  ;;  %v15995_v63 = vcombine.low %v15967_v16, %v15984_v36  ;;  %v11270_v5 = vld [vmem:[%s18194_s5 + $0xe0] sm:$0xff]   ;;  %v9617_v30 = vrot.slane %v19489_v60, 10  ;;  %7351 = vmatmul.mubr.bf16.gmra.mrb[72].mxu1 %v15600_v26 }
 0x74a   :  { %19487 = vst [vmem:[#allocation209_spill] sm:$0xff] %v15991_v2  ;;  %v19490_v45 = vld [vmem:[#allocation211_spill] sm:$0xff]  ;;  %v16006_v47 = vsel %vm15330_vm11, %v6265_v40, %v19491_v7  ;;  %v6269_v29 = vrot.slane %v15712_v21, 5  ;;  %v6349_v28 = vrot.slane %v19493_v31, 6  ;;  %v6352_v40 = vrot.slane %v19494_v17, 6  ;;  %7358 = vmatprep.mubr.bf16.mxu1 %v15991_v2  ;;  %v19497_v31 = vld [vmem:[#allocation20_spill] sm:$0xff] }
 0x74b   :  { %19488 = vst [vmem:[#allocation208_spill] sm:$0xff] %v15995_v63  ;;  %v6346_v37 = vrot.slane %v19490_v45, 6  ;;  %19492 = vst [vmem:[#allocation224_spill] sm:$0xff] %v16006_v47  ;;  %v16012_v49 = vsel %vm15898_vm14, %v6341_v39, %v6342_v34  ;;  %v19495_v7 = vld [vmem:[#allocation23_spill] sm:$0xff]  ;;  %v19496_v34 = vld [vmem:[#allocation21_spill] sm:$0xff]  ;;  %v6359_v63 = vrot.slane %v19497_v31, 6  ;;  %7472 = vmatpush1.bf16.msra.mxu1 %v11270_v5 }
 0x74c   :  { %v9618_v44 = vrot.slane %v19495_v7, 10  ;;  %v6351_v39 = vrot.slane %v6349_v28, 4  ;;  %v6356_v3 = vrot.slane %v19496_v34, 6  ;;  %v16029_v26 = vsel %vm15330_vm11, %v6268_v19, %v6269_v29  ;;  %v11271_v17 = vld [vmem:[%s18194_s5 + $0xe8] sm:$0xff]   ;;  %7473 = vmatprep.subr.bf16.mxu1 %v19390_v55  ;;  %v19500_v7 = vld [vmem:[#allocation37_spill] sm:$0xff]  ;;  %v19501_v27 = vld [vmem:[#allocation36_spill] sm:$0xff] }
 0x74d   :  { %v16018_v60 = vsel %vm15898_vm14, %v9617_v30, %v6346_v37  ;;  %v6348_v45 = vrot.slane %v6346_v37, 4  ;;  %19498 = vst [vmem:[#allocation218_spill] sm:$0xff] %v16029_v26  ;;  %v6362_v34 = vrot.slane %v15489_v41, 6  ;;  %v6361_v31 = vrot.slane %v6359_v63, 4  ;;  %v19575_v16 = vld [vmem:[#allocation190_spill] sm:$0xff]  ;;  %v19598_v24 = vld [vmem:[#allocation187_spill] sm:$0xff] }
 0x74e   :  { %v16044_v19 = vsel %vm15898_vm14, %v6351_v39, %v6352_v40  ;;  %v16048_v5 = vsel %vm15898_vm14, %v9618_v44, %v6356_v3  ;;  %v6358_v29 = vrot.slane %v6356_v3, 4  ;;  %v9619_v41 = vrot.slane %v19500_v7, 10  ;;  %v19502_v3 = vld [vmem:[#allocation54_spill] sm:$0xff] }
 0x74f   :  { %v16036_v30 = vsel %vm15898_vm14, %v6348_v45, %v6349_v28  ;;  %v5924_v28 = vpack.c.bf16 %v19432_v11, %v15326_v6  ;;  %v6366_v2 = vrot.slane %v19501_v27, 6  ;;  %v6128_v37 = vunpack.c.h.b16 %v15830_v0  ;;  %7474 = vmatpush1.bf16.msra.mxu1 %v11271_v17  ;;  %v11272_v27 = vld [vmem:[%s18194_s5 + $0xf0] sm:$0xff]  }
 0x750   :  { %v16059_v40 = vsel %vm15898_vm14, %v6358_v29, %v6359_v63  ;;  %v16063_v44 = vsel %vm15898_vm14, %v6361_v31, %v6362_v34  ;;  %v6369_v39 = vrot.slane %v19502_v3, 6  ;;  %v16068_v11 = vcombine.low %v16006_v47, %v16029_v26  ;;  %7475 = vmatprep.subr.bf16.mxu1 %v19390_v55  ;;  %v19505_v31 = vld [vmem:[#allocation48_spill] sm:$0xff] }
 0x751   :  { %v16075_v7 = vcombine.low %v16048_v5, %v16059_v40  ;;  %v16079_v63 = vsel %vm15898_vm14, %v9619_v41, %v6366_v2  ;;  %v6368_v34 = vrot.slane %v6366_v2, 4  ;;  %v6372_v3 = vrot.slane %v19505_v31, 6  ;;  %7359 = vmatmul.mubr.bf16.gmra.mrb[76].mxu1 %v15614_v59 }
 0x752   :  { %19503 = vst [vmem:[#allocation210_spill] sm:$0xff] %v16068_v11  ;;  %v16084_v29 = vcombine.low %v16063_v44, %v16079_v63  ;;  %v6371_v17 = vrot.slane %v6369_v39, 4  ;;  %v9620_v45 = vrot.slane %v15516_v9, 10  ;;  %v6129_v26 = vunpack.c.l.b16 %v5924_v28  ;;  %7366 = vmatprep.mubr.bf16.mxu1 %v16068_v11 }
 0x753   :  { %v16091_v47 = vsel %vm15898_vm14, %v6368_v34, %v6369_v39  ;;  %v6376_v2 = vrot.slane %v15520_v22, 6  ;;  %v6379_v41 = vrot.slane %v15539_v1, 6  ;;  %v6382_v31 = vrot.slane %v15562_v20, 6  ;;  %7476 = vmatpush1.bf16.msra.mxu1 %v11272_v27  ;;  %v11273_v22 = vld [vmem:[%s18194_s5 + $0xf8] sm:$0xff]  }
 0x754   :  { %19504 = vst [vmem:[#allocation220_spill] sm:$0xff] %v16084_v29  ;;  %v16098_v0 = vsel %vm15898_vm14, %v6371_v17, %v6372_v3  ;;  %v9621_v28 = vrot.slane %v15583_v14, 10  ;;  %7477 = vmatprep.subr.bf16.mxu1 %v19390_v55  ;;  %v6386_v20 = vrot.slane %v15604_v62, 6  ;;  %v6389_v14 = vrot.slane %v15618_v61, 6 }
 0x755   :  { %19506 = vst [vmem:[#allocation219_spill] sm:$0xff] %v16098_v0  ;;  %v16109_v1 = vcombine.low %v16091_v47, %v16098_v0  ;;  %v16113_v39 = vsel %vm15898_vm14, %v9620_v45, %v6376_v2  ;;  %v6378_v34 = vrot.slane %v6376_v2, 4  ;;  %v6381_v17 = vrot.slane %v6379_v41, 4  ;;  %v19511_v45 = vld [vmem:[#allocation70_spill] sm:$0xff] }
 0x756   :  { %19508 = vst [vmem:[#allocation221_spill] sm:$0xff] %v16113_v39  ;;  %v16118_v27 = vpack.c.b16 %v6129_v26, %v6128_v37  ;;  %v9622_v11 = vrot.slane %v19511_v45, 10  ;;  %v16135_v62 = vsel %vm15898_vm14, %v9621_v28, %v6386_v20  ;;  %v6388_v26 = vrot.slane %v6386_v20, 4 }
 0x757   :  { %19507 = vst [vmem:[#allocation227_spill] sm:$0xff] %v16109_v1  ;;  %v16122_v3 = vsel %vm15898_vm14, %v6378_v34, %v6379_v41  ;;  %v16126_v9 = vsel %vm15898_vm14, %v6381_v17, %v6382_v31  ;;  %v6392_v61 = vrot.slane %v15712_v21, 6  ;;  %7478 = vmatpush1.bf16.msra.mxu1 %v11273_v22  ;;  %v6391_v41 = vrot.slane %v6389_v14, 4  ;;  %v19514_v31 = vld [vmem:[#allocation114_spill] sm:$0xff]  ;;  %v19515_v17 = vld [vmem:[#allocation95_spill] sm:$0xff]  ;;  %v19516_v21 = vld [vmem:[#allocation97_spill] sm:$0xff] }
 0x758   :  { %19509 = vst [vmem:[#allocation229_spill] sm:$0xff] %v16118_v27  ;;  %19510 = vst [vmem:[#allocation228_spill] sm:$0xff] %v16126_v9  ;;  %v16131_v2 = vcombine.low %v16113_v39, %v16122_v3  ;;  %v16140_v37 = vcombine.low %v16126_v9, %v16135_v62  ;;  %v6396_v34 = vrot.slane %v19514_v31, 6  ;;  %v6399_v45 = vrot.slane %v19515_v17, 6  ;;  %7624 = vmatprep.subr.bf16.mxu1 %v19390_v55  ;;  %v19533_v1 = vld [vmem:[#allocation112_spill] sm:$0xff]  ;;  %v19561_v39 = vld [vmem:[#allocation110_spill] sm:$0xff] }
 0x759   :  { %v16147_v59 = vsel %vm15898_vm14, %v6388_v26, %v6389_v14  ;;  %v6402_v22 = vrot.slane %v19516_v21, 6  ;;  %7367 = vmatmul.mubr.bf16.gmra.mrb[80].mxu1 %v16118_v27  ;;  %v16155_v20 = vsel %vm15898_vm14, %v6391_v41, %v6392_v61  ;;  %v9623_v26 = vrot.slane %v15651_v57, 10  ;;  %v19518_v21 = vld [vmem:[#allocation96_spill] sm:$0xff]  ;;  %v19521_v41 = vld [vmem:[#allocation109_spill] sm:$0xff]  ;;  %v19577_v9 = vld [vmem:[#allocation127_spill] sm:$0xff] }
 0x75a   :  { %19512 = vst [vmem:[#allocation230_spill] sm:$0xff] %v16131_v2  ;;  %19513 = vst [vmem:[#allocation231_spill] sm:$0xff] %v16140_v37  ;;  %v16159_v31 = vsel %vm15898_vm14, %v9622_v11, %v6396_v34  ;;  %v6398_v17 = vrot.slane %v6396_v34, 4  ;;  %v6401_v37 = vrot.slane %v6399_v45, 4  ;;  %7374 = vmatprep.mubr.bf16.mxu1 %v15703_v18  ;;  %v16164_v14 = vcombine.low %v16147_v59, %v16155_v20 }
 0x75b   :  { %v6406_v28 = vrot.slane %v19518_v21, 6  ;;  %v6409_v34 = vrot.slane %v19521_v41, 6  ;;  %v9625_v6 = vrot.slane %v15763_v15, 10 }
 0x75c   :  { %19517 = vst [vmem:[#allocation236_spill] sm:$0xff] %v16164_v14  ;;  %v16170_v61 = vsel %vm15898_vm14, %v6398_v17, %v6399_v45  ;;  %v16174_v11 = vsel %vm15898_vm14, %v6401_v37, %v6402_v22  ;;  %v6412_v17 = vrot.slane %v15675_v38, 6  ;;  %v9624_v37 = vrot.slane %v15697_v48, 10  ;;  %v19524_v22 = vld [vmem:[#allocation122_spill] sm:$0xff] }
 0x75d   :  { %19519 = vst [vmem:[#allocation237_spill] sm:$0xff] %v16170_v61  ;;  %19520 = vst [vmem:[#allocation242_spill] sm:$0xff] %v16174_v11  ;;  %v16179_v18 = vcombine.low %v16159_v31, %v16170_v61  ;;  %v16183_v27 = vsel %vm15898_vm14, %v9623_v26, %v6406_v28  ;;  %v6408_v57 = vrot.slane %v6406_v28, 4  ;;  %v6411_v45 = vrot.slane %v6409_v34, 4  ;;  %v19531_v38 = vld [vmem:[#allocation166_spill] sm:$0xff] }
 0x75e   :  { %v16187_v21 = vcombine.low %v16174_v11, %v16183_v27  ;;  %v5816_v41 = vcombine.high %v19524_v22, %v19524_v22  ;;  %v6416_v26 = vrot.slane %v15726_v53, 6  ;;  %v6426_v4 = vrot.slane %v19531_v38, 6  ;;  %v19566_v11 = vld [vmem:[#allocation147_spill] sm:$0xff]  ;;  %v19567_v61 = vld [vmem:[#allocation170_spill] sm:$0xff] }
 0x75f   :  { %19522 = vst [vmem:[#allocation241_spill] sm:$0xff] %v16179_v18  ;;  %v16195_v12 = vsel %vm15898_vm14, %v6408_v57, %v6409_v34  ;;  %v19525_v18 = vld [vmem:[#allocation120_spill] sm:$0xff]  ;;  %v16201_v14 = vsel %vm15898_vm14, %v6411_v45, %v6412_v17  ;;  %v19530_v17 = vld [vmem:[#allocation86_spill] sm:$0xff] }
 0x760   :  { %19523 = vst [vmem:[#allocation243_spill] sm:$0xff] %v16187_v21  ;;  %v6419_v28 = vrot.slane %v19525_v18, 6  ;;  %v19526_v21 = vld [vmem:[#allocation135_spill] sm:$0xff]  ;;  %v16209_v42 = vcombine.low %v16195_v12, %v16201_v14  ;;  %v16213_v53 = vsel %vm15898_vm14, %v9624_v37, %v6416_v26  ;;  %v6418_v18 = vrot.slane %v6416_v26, 4  ;;  %v19529_v57 = vld [vmem:[#allocation128_spill] sm:$0xff] }
 0x761   :  { %v6422_v48 = vrot.slane %v19526_v21, 6  ;;  %19528 = vst [vmem:[#allocation251_spill] sm:$0xff] %v16213_v53  ;;  %v5815_v45 = vcombine.high %v19529_v57, %v19529_v57  ;;  %7375 = vmatmul.mubr.bf16.gmra.mrb[84].mxu1 %v19530_v17  ;;  %v19532_v21 = vld [vmem:[#allocation136_spill] sm:$0xff]  ;;  %v16221_v15 = vcombine.low %v19524_v22, %v5816_v41  ;;  %v16239_v22 = vsel %vm15898_vm14, %v9625_v6, %v6426_v4 }
 0x762   :  { %19527 = vst [vmem:[#allocation247_spill] sm:$0xff] %v16209_v42  ;;  %v6421_v34 = vrot.slane %v6419_v28, 4  ;;  %v6429_v2 = vrot.slane %v19532_v21, 6  ;;  %7382 = vmatprep.mubr.bf16.mxu1 %v19533_v1  ;;  %v16226_v37 = vsel %vm15898_vm14, %v6418_v18, %v6419_v28  ;;  %v9626_v42 = vrot.slane %v15810_v58, 10  ;;  %19536 = vst [vmem:[#allocation44_spill] sm:$0xff] %v16239_v22 }
 0x763   :  { %v16235_v38 = vcombine.low %v16213_v53, %v16226_v37  ;;  %v6428_v41 = vrot.slane %v6426_v4, 4  ;;  %v6432_v21 = vrot.slane %v15789_v46, 6  ;;  %v6439_v58 = vrot.slane %v15850_v43, 6 }
 0x764   :  { %v16230_v26 = vsel %vm15898_vm14, %v6421_v34, %v6422_v48  ;;  %v6431_v18 = vrot.slane %v6429_v2, 4  ;;  %v6436_v48 = vrot.slane %v15846_v25, 6  ;;  %v19538_v34 = vld [vmem:[#allocation115_spill] sm:$0xff]  ;;  %v16255_v6 = vcombine.low %v19529_v57, %v5815_v45  ;;  %v19543_v45 = vld [vmem:[#allocation138_spill] sm:$0xff] }
 0x765   :  { %19534 = vst [vmem:[#allocation32_spill] sm:$0xff] %v16230_v26  ;;  %19535 = vst [vmem:[#allocation18_spill] sm:$0xff] %v16235_v38  ;;  %v16244_v28 = vcombine.low %v16230_v26, %v16239_v22  ;;  %v5817_v1 = vcombine.high %v19538_v34, %v19538_v34  ;;  %v16252_v38 = vsel %vm15898_vm14, %v6428_v41, %v6429_v2  ;;  %v6442_v4 = vrot.slane %v15868_v13, 6  ;;  %v19550_v2 = vld [vmem:[#allocation134_spill] sm:$0xff]  ;;  %v19578_v22 = vld [vmem:[#allocation180_spill] sm:$0xff] }
 0x766   :  { %19539 = vst [vmem:[#allocation8_spill] sm:$0xff] %v16252_v38  ;;  %v16260_v46 = vsel %vm15898_vm14, %v6431_v18, %v6432_v21  ;;  %v16264_v25 = vsel %vm15898_vm14, %v9626_v42, %v6436_v48  ;;  %v6438_v43 = vrot.slane %v6436_v48, 4  ;;  %v9627_v57 = vrot.slane %v15878_v51, 10  ;;  %v19547_v48 = vld [vmem:[#allocation117_spill] sm:$0xff] }
 0x767   :  { %19537 = vst [vmem:[#allocation33_spill] sm:$0xff] %v16244_v28  ;;  %19540 = vst [vmem:[#allocation9_spill] sm:$0xff] %v16260_v46  ;;  %v6441_v28 = vrot.slane %v6439_v58, 4  ;;  %v16268_v17 = vcombine.low %v16252_v38, %v16260_v46  ;;  %v6446_v13 = vrot.slane %v15882_v23, 6  ;;  %v5818_v41 = vcombine.high %v19543_v45, %v19543_v45 }
 0x768   :  { %19541 = vst [vmem:[#allocation53_spill] sm:$0xff] %v16264_v25  ;;  %v16278_v42 = vsel %vm15898_vm14, %v6438_v43, %v6439_v58  ;;  %v16286_v18 = vpack.c.bf16 %v16221_v15, %v16255_v6  ;;  %v6449_v43 = vrot.slane %v15894_v56, 6  ;;  %v16331_v56 = vcombine.low %v19538_v34, %v5817_v1  ;;  %v19568_v34 = vld [vmem:[#allocation158_spill] sm:$0xff] }
 0x769   :  { %19542 = vst [vmem:[#allocation39_spill] sm:$0xff] %v16268_v17  ;;  %19544 = vst [vmem:[#allocation61_spill] sm:$0xff] %v16278_v42  ;;  %v16282_v21 = vsel %vm15898_vm14, %v6441_v28, %v6442_v4  ;;  %7383 = vmatmul.mubr.bf16.gmra.mrb[88].mxu1 %v19547_v48  ;;  %v16291_v51 = vcombine.low %v16264_v25, %v16278_v42  ;;  %v16295_v23 = vsel %vm15898_vm14, %v9627_v57, %v6446_v13  ;;  %v19551_v28 = vld [vmem:[#allocation111_spill] sm:$0xff] }
 0x76a   :  { %19545 = vst [vmem:[#allocation45_spill] sm:$0xff] %v16282_v21  ;;  %19546 = vst [vmem:[#allocation65_spill] sm:$0xff] %v16286_v18  ;;  %v6448_v58 = vrot.slane %v6446_v13, 4  ;;  %7390 = vmatprep.mubr.bf16.mxu1 %v19550_v2  ;;  %v6134_v4 = vunpack.c.h.b16 %v19551_v28  ;;  %v19552_v17 = vld [vmem:[#allocation167_spill] sm:$0xff]  ;;  %v16305_v48 = vcombine.low %v16282_v21, %v16295_v23  ;;  %v6451_v13 = vrot.slane %v6449_v43, 4 }
 0x76b   :  { %19548 = vst [vmem:[#allocation67_spill] sm:$0xff] %v16291_v51  ;;  %19549 = vst [vmem:[#allocation62_spill] sm:$0xff] %v16295_v23  ;;  %v19553_v18 = vpack.c.bf16 %v19552_v17, %v15239_v32  ;;  %v6452_v51 = vrot.slane %v15912_v10, 6  ;;  %v9863_v1 = vpack.c.bf16 %v19543_v45, %v19543_v45 }
 0x76c   :  { %19554 = vst [vmem:[#allocation78_spill] sm:$0xff] %v16305_v48  ;;  %v16310_v57 = vsel %vm15898_vm14, %v6448_v58, %v6449_v43  ;;  %v19556_v43 = vld [vmem:[#allocation140_spill] sm:$0xff]  ;;  %v19565_v58 = vld [vmem:[#allocation133_spill] sm:$0xff] }
 0x76d   :  { %v6135_v29 = vunpack.c.l.b16 %v19553_v18  ;;  %19555 = vst [vmem:[#allocation66_spill] sm:$0xff] %v16310_v57  ;;  %v16320_v18 = vsel %vm15898_vm14, %v6451_v13, %v6452_v51  ;;  %v16328_v48 = vcombine.high %v19556_v43, %v19556_v43  ;;  %v19557_v13 = vld [vmem:[#allocation129_spill] sm:$0xff]  ;;  %v9862_v43 = vpack.c.bf16 %v16331_v56, %v16331_v56 }
 0x76e   :  { %v16335_v17 = vcombine.low %v16310_v57, %v16320_v18  ;;  %v16340_v2 = vcombine.low %v5818_v41, %v19557_v13  ;;  %v19563_v41 = vld [vmem:[#allocation119_spill] sm:$0xff]  ;;  %v9866_v51 = vpack.c.bf16 %v19575_v16, %v19575_v16  ;;  %v6482_v42 = vrot.slane %v9863_v1, 6 }
 0x76f   :  { %v16342_v10 = vpack.c.b16 %v6135_v29, %v6134_v4  ;;  %v19564_v4 = vld [vmem:[#allocation151_spill] sm:$0xff]  ;;  %v9861_v29 = vpack.c.bf16 %v16221_v15, %v16221_v15  ;;  %v6479_v21 = vrot.slane %v9862_v43, 6  ;;  %v6469_v54 = vrot.slane %v9862_v43, 5 }
 0x770   :  { %19558 = vst [vmem:[#allocation80_spill] sm:$0xff] %v16340_v2  ;;  %v9864_v0 = vpack.c.bf16 %v16340_v2, %v16340_v2  ;;  %v6472_v53 = vrot.slane %v9863_v1, 5 }
 0x771   :  { %19559 = vst [vmem:[#allocation68_spill] sm:$0xff] %v16342_v10  ;;  %7391 = vmatmul.mubr.bf16.gmra.mrb[92].mxu1 %v16342_v10  ;;  %v9860_v10 = vpack.c.bf16 %v16255_v6, %v16255_v6  ;;  %v6476_v15 = vrot.slane %v9861_v29, 6  ;;  %v6466_v26 = vrot.slane %v9861_v29, 5  ;;  %v6481_v43 = vrot.slane %v6479_v21, 4 }
 0x772   :  { %7398 = vmatprep.mubr.bf16.mxu1 %v19568_v34  ;;  %v9865_v34 = vpack.c.bf16 %v19574_v50, %v19574_v50  ;;  %v6471_v1 = vrot.slane %v6469_v54, 4 }
 0x773   :  { %v9633_v57 = vrot.slane %v9860_v10, 10  ;;  %v9632_v23 = vrot.slane %v9860_v10, 9  ;;  %v6478_v38 = vrot.slane %v6476_v15, 4  ;;  %v6468_v13 = vrot.slane %v6466_v26, 4 }
 0x774   :  { %v16422_v10 = vsel %vm15898_vm14, %v6481_v43, %v6482_v42  ;;  %v16426_v29 = vsel %vm15330_vm11, %v6471_v1, %v6472_v53  ;;  %v6499_v43 = vrot.slane %v9866_v51, 5  ;;  %v6509_v53 = vrot.slane %v9866_v51, 6  ;;  %v19593_v51 = vld [vmem:[#allocation188_spill] sm:$0xff] }
 0x775   :  { %v16400_v25 = vsel %vm15898_vm14, %v9633_v57, %v6476_v15  ;;  %v16404_v46 = vsel %vm15330_vm11, %v9632_v23, %v6466_v26  ;;  %v16414_v57 = vsel %vm15898_vm14, %v6478_v38, %v6479_v21  ;;  %v16418_v23 = vsel %vm15330_vm11, %v6468_v13, %v6469_v54 }
 0x776   :  { %19576 = vst [vmem:[#allocation93_spill] sm:$0xff] %v16404_v46  ;;  %19579 = vst [vmem:[#allocation81_spill] sm:$0xff] %v16418_v23  ;;  %v9638_v26 = vrot.slane %v9864_v0, 9  ;;  %v6496_v15 = vrot.slane %v9865_v34, 5  ;;  %v9867_v38 = vpack.c.bf16 %v16328_v48, %v16328_v48  ;;  %v5940_v46 = vpack.c.bf16 %v16328_v48, %v19575_v16  ;;  %v19585_v48 = vld [vmem:[#allocation148_spill] sm:$0xff] }
 0x777   :  { %v9639_v21 = vrot.slane %v9864_v0, 10  ;;  %v6506_v23 = vrot.slane %v9865_v34, 6 }
 0x778   :  { %v16438_v42 = vsel %vm15330_vm11, %v9638_v26, %v6496_v15  ;;  %v6498_v13 = vrot.slane %v6496_v15, 4  ;;  %v6502_v1 = vrot.slane %v9867_v38, 5  ;;  %v6501_v15 = vrot.slane %v6499_v43, 4 }
 0x779   :  { %7399 = vmatmul.mubr.bf16.gmra.mrb[96].mxu1 %v19577_v9  ;;  %19580 = vst [vmem:[#allocation103_spill] sm:$0xff] %v16438_v42  ;;  %v16454_v42 = vunpack.c.l.b16 %v5940_v46  ;;  %v6508_v16 = vrot.slane %v6506_v23, 4 }
 0x77a   :  { %7406 = vmatprep.mubr.bf16.mxu1 %v19578_v22  ;;  %v5939_v22 = vpack.c.bf16 %v19574_v50, %v16340_v2  ;;  %v16450_v26 = vsel %vm15330_vm11, %v6498_v13, %v6499_v43  ;;  %v16458_v50 = vsel %vm15898_vm14, %v9639_v21, %v6506_v23  ;;  %v16463_v0 = vsel %vm15330_vm11, %v6501_v15, %v6502_v1  ;;  %v19587_v43 = vld [vmem:[#allocation202_spill] sm:$0xff]  ;;  %v19590_v1 = vld [vmem:[#allocation168_spill] sm:$0xff] }
 0x77b   :  { %19581 = vst [vmem:[#allocation92_spill] sm:$0xff] %v16450_v26  ;;  %19583 = vst [vmem:[#allocation94_spill] sm:$0xff] %v16454_v42  ;;  %v6511_v13 = vrot.slane %v6509_v53, 4  ;;  %v16474_v23 = vsel %vm15898_vm14, %v6508_v16, %v6509_v53  ;;  %v6140_v21 = vunpack.c.h.b16 %v19589_v35  ;;  %v19591_v15 = vpack.c.bf16 %v19590_v1, %v15251_v52  ;;  %v19594_v53 = vld [vmem:[#allocation174_spill] sm:$0xff]  ;;  %v19595_v16 = vld [vmem:[#allocation193_spill] sm:$0xff] }
 0x77c   :  { %v16452_v36 = vunpack.c.h.b16 %v5939_v22  ;;  %19584 = vst [vmem:[#allocation104_spill] sm:$0xff] %v16458_v50  ;;  %19586 = vst [vmem:[#allocation123_spill] sm:$0xff] %v16463_v0  ;;  %v6512_v22 = vrot.slane %v9867_v38, 6  ;;  %v19596_v50 = vld [vmem:[#allocation184_spill] sm:$0xff]  ;;  %v19605_v0 = vld [vmem:[#allocation198_spill] sm:$0xff] }
 0x77d   :  { %19588 = vst [vmem:[#allocation107_spill] sm:$0xff] %v16474_v23  ;;  %v6141_v34 = vunpack.c.l.b16 %v19591_v15  ;;  %v19597_v1 = vld [vmem:[#allocation208_spill] sm:$0xff]  ;;  %v19603_v23 = vld [vmem:[#allocation191_spill] sm:$0xff] }
 0x77e   :  { %19582 = vst [vmem:[#allocation106_spill] sm:$0xff] %v16452_v36  ;;  %v16482_v38 = vsel %vm15898_vm14, %v6511_v13, %v6512_v22  ;;  %v6146_v13 = vunpack.c.h.b16 %v19598_v24  ;;  %v19599_v22 = vld [vmem:[#allocation178_spill] sm:$0xff]  ;;  %v19604_v36 = vld [vmem:[#allocation141_spill] sm:$0xff]  ;;  %v19606_v26 = vld [vmem:[#allocation207_spill] sm:$0xff] }
 0x77f   :  { %19592 = vst [vmem:[#allocation130_spill] sm:$0xff] %v16482_v38  ;;  %v16486_v46 = vpack.c.b16 %v6141_v34, %v6140_v21  ;;  %v19600_v15 = vpack.c.bf16 %v19599_v22, %v15275_v8  ;;  %v19602_v21 = vld [vmem:[#allocation46_spill] sm:$0xff]  ;;  %v5918_v42 = vpack.c.bf16 %v19604_v36, %v19603_v23  ;;  %v19607_v2 = vcombine.low %v19605_v0, %v19606_v26  ;;  %v19609_v22 = vld [vmem:[#allocation189_spill] sm:$0xff]  ;;  %v11276_v36 = vld [vmem:[%s18194_s5 + $0x110] sm:$0xff]  }
 0x780   :  { %v11274_v38 = vld [vmem:[%s18194_s5 + $0x100] sm:$0xff]   ;;  %v19612_v26 = vcombine.low %v16012_v49, %v16018_v60  ;;  %v11277_v0 = vld [vmem:[%s18194_s5 + $0x118] sm:$0xff]   ;;  %v19613_v23 = vcombine.low %v16036_v30, %v16044_v19  ;;  %v19614_v49 = vld [vmem:[#allocation47_spill] sm:$0xff] }
 0x781   :  { %7407 = vmatmul.mubr.bf16.gmra.mrb[100].mxu1 %v19585_v48  ;;  %v6147_v54 = vunpack.c.l.b16 %v19600_v15 }
 0x782   :  { %7414 = vmatprep.mubr.bf16.mxu1 %v19587_v43 }
 0x783   :  { %v16498_v34 = vpack.c.b16 %v6147_v54, %v6146_v13  ;;  %v11275_v54 = vld [vmem:[%s18194_s5 + $0x108] sm:$0xff]  }
 0x784   :  { %v19611_v13 = vld [vmem:[#allocation75_spill] sm:$0xff] }
 0x785   :  { %19601 = vst [vmem:[#allocation118_spill] sm:$0xff] %v16498_v34 }
 0x789   :  { %7415 = vmatmul.mubr.bf16.gmra.mrb[104].mxu1 %v16486_v46 }
 0x78a   :  { %7422 = vmatprep.mubr.bf16.mxu1 %v19593_v51 }
 0x791   :  { %7423 = vmatmul.mubr.bf16.gmra.mrb[108].mxu1 %v19594_v53 }
 0x792   :  { %7430 = vmatprep.mubr.bf16.mxu1 %v19595_v16 }
 0x799   :  { %7431 = vmatmul.mubr.bf16.gmra.mrb[112].mxu1 %v19596_v50 }
 0x79a   :  { %7438 = vmatprep.mubr.bf16.mxu1 %v19597_v1  ;;  %v19608_v1 = vld [vmem:[#allocation179_spill] sm:$0xff] }
 0x79b   :  { %v19610_v15 = vpack.c.bf16 %v19608_v1, %v19609_v22  ;;  %v11280_v1 = vld [vmem:[%s18194_s5 + $0x130] sm:$0xff]   ;;  %v19616_v22 = vld [vmem:[#allocation153_spill] sm:$0xff] }
 0x7a1   :  { %7439 = vmatmul.mubr.bf16.gmra.mrb[116].mxu1 %v16498_v34  ;;  %v6120_v34 = vunpack.c.l.b16 %v5918_v42  ;;  %v11278_v42 = vld [vmem:[%s18194_s5 + $0x120] sm:$0xff]  }
 0x7a2   :  { %7479 = vmatprep.mubr.bf16.mxu1 %v19602_v21  ;;  %v6119_v21 = vunpack.c.h.b16 %v19611_v13 }
 0x7a9   :  { %7480 = vmatmul.mubr.bf16.vlgmr.msra.gmra.mrb[48].mxu1 %v19607_v2  ;;  %v6696_v2 = vpack.c.b16 %v6120_v34, %v6119_v21  ;;  %v19615_v34 = vld [vmem:[#allocation203_spill] sm:$0xff] }
 0x7aa   :  { %7487 = vmatprep.mubr.bf16.mxu1 %v19610_v15  ;;  %7625 = vmatpush1.bf16.msra.mxu1 %v11274_v38  ;;  %v11279_v38 = vld [vmem:[%s18194_s5 + $0x128] sm:$0xff]   ;;  %v5922_v15 = vpack.c.bf16 %v19616_v22, %v19615_v34  ;;  %v19622_v34 = vld [vmem:[#allocation161_spill] sm:$0xff] }
 0x7ab   :  { %7626 = vmatprep.subr.bf16.mxu1 %v19390_v55  ;;  %v11285_v22 = vld [vmem:[%s18194_s5 + $0x158] sm:$0xff]  }
 0x7ae   :  { %7627 = vmatpush1.bf16.msra.mxu1 %v11275_v54  ;;  %v19617_v54 = vld [vmem:[#allocation181_spill] sm:$0xff] }
 0x7af   :  { %7628 = vmatprep.subr.bf16.mxu1 %v19390_v55  ;;  %v19618_v21 = vpack.c.bf16 %v15278_v33, %v19617_v54  ;;  %v19620_v33 = vld [vmem:[#allocation220_spill] sm:$0xff]  ;;  %v19623_v54 = vld [vmem:[#allocation14_spill] sm:$0xff] }
 0x7b1   :  { %7488 = vmatmul.mubr.bf16.gmra.mrb[52].mxu1 %v19612_v26 }
 0x7b2   :  { %7495 = vmatprep.mubr.bf16.mxu1 %v6696_v2  ;;  %7629 = vmatpush1.bf16.msra.mxu1 %v11276_v36  ;;  %v11281_v36 = vld [vmem:[%s18194_s5 + $0x138] sm:$0xff]   ;;  %v19619_v2 = vld [vmem:[#allocation72_spill] sm:$0xff] }
 0x7b3   :  { %7630 = vmatprep.subr.bf16.mxu1 %v19390_v55  ;;  %v6125_v26 = vunpack.c.h.b16 %v19619_v2 }
 0x7b6   :  { %7631 = vmatpush1.bf16.msra.mxu1 %v11277_v0  ;;  %v6126_v0 = vunpack.c.l.b16 %v5922_v15  ;;  %v11286_v15 = vld [vmem:[%s18194_s5 + $0x160] sm:$0xff]  }
 0x7b7   :  { %7632 = vmatprep.subr.bf16.mxu1 %v19390_v55 }
 0x7b9   :  { %7496 = vmatmul.mubr.bf16.gmra.mrb[56].mxu1 %v19613_v23  ;;  %v6699_v23 = vpack.c.b16 %v6126_v0, %v6125_v26  ;;  %v19625_v26 = vld [vmem:[#allocation230_spill] sm:$0xff]  ;;  %v19626_v0 = vld [vmem:[#allocation11_spill] sm:$0xff] }
 0x7ba   :  { %7503 = vmatprep.mubr.bf16.mxu1 %v19614_v49  ;;  %7633 = vmatpush1.bf16.msra.mxu1 %v11278_v42  ;;  %v11282_v42 = vld [vmem:[%s18194_s5 + $0x140] sm:$0xff]   ;;  %v11283_v49 = vld [vmem:[%s18194_s5 + $0x148] sm:$0xff]  }
 0x7bb   :  { %7634 = vmatprep.subr.bf16.mxu1 %v19390_v55 }
 0x7be   :  { %7635 = vmatpush1.bf16.msra.mxu1 %v11279_v38  ;;  %v11284_v38 = vld [vmem:[%s18194_s5 + $0x150] sm:$0xff]  }
 0x7bf   :  { %7636 = vmatprep.subr.bf16.mxu1 %v19390_v55 }
 0x7c1   :  { %7504 = vmatmul.mubr.bf16.gmra.mrb[60].mxu1 %v16075_v7 }
 0x7c2   :  { %7511 = vmatprep.mubr.bf16.mxu1 %v19618_v21  ;;  %7637 = vmatpush1.bf16.msra.mxu1 %v11280_v1  ;;  %v19621_v1 = vld [vmem:[#allocation227_spill] sm:$0xff]  ;;  %v19624_v21 = vld [vmem:[#allocation100_spill] sm:$0xff] }
 0x7c3   :  { %7638 = vmatprep.subr.bf16.mxu1 %v19390_v55 }
 0x7c6   :  { %7639 = vmatpush1.bf16.msra.mxu1 %v11281_v36  ;;  %v5926_v36 = vpack.c.bf16 %v19624_v21, %v19623_v54  ;;  %v11288_v54 = vld [vmem:[%s18194_s5 + $0x170] sm:$0xff]  }
 0x7c7   :  { %7640 = vmatprep.subr.bf16.mxu1 %v19390_v55 }
 0x7c9   :  { %7512 = vmatmul.mubr.bf16.gmra.mrb[64].mxu1 %v19620_v33 }
 0x7ca   :  { %7519 = vmatprep.mubr.bf16.mxu1 %v6699_v23  ;;  %7641 = vmatpush1.bf16.msra.mxu1 %v11282_v42  ;;  %v19627_v42 = vld [vmem:[#allocation26_spill] sm:$0xff] }
 0x7cb   :  { %7642 = vmatprep.subr.bf16.mxu1 %v19390_v55  ;;  %v19628_v23 = vpack.c.bf16 %v19626_v0, %v19627_v42  ;;  %v19630_v0 = vld [vmem:[#allocation231_spill] sm:$0xff]  ;;  %v19632_v42 = vld [vmem:[#allocation25_spill] sm:$0xff] }
 0x7ce   :  { %7643 = vmatpush1.bf16.msra.mxu1 %v11283_v49  ;;  %v11287_v49 = vld [vmem:[%s18194_s5 + $0x168] sm:$0xff]  }
 0x7cf   :  { %7644 = vmatprep.subr.bf16.mxu1 %v19390_v55 }
 0x7d1   :  { %7520 = vmatmul.mubr.bf16.gmra.mrb[68].mxu1 %v19621_v1  ;;  %v19638_v1 = vld [vmem:[#allocation247_spill] sm:$0xff] }
 0x7d2   :  { %7527 = vmatprep.mubr.bf16.mxu1 %v19622_v34  ;;  %7645 = vmatpush1.bf16.msra.mxu1 %v11284_v38  ;;  %v19629_v38 = vld [vmem:[#allocation86_spill] sm:$0xff] }
 0x7d3   :  { %7646 = vmatprep.subr.bf16.mxu1 %v19390_v55  ;;  %v6131_v34 = vunpack.c.h.b16 %v19629_v38 }
 0x7d6   :  { %7647 = vmatpush1.bf16.msra.mxu1 %v11285_v22  ;;  %v6132_v22 = vunpack.c.l.b16 %v5926_v36  ;;  %v19631_v36 = vld [vmem:[#allocation236_spill] sm:$0xff] }
 0x7d7   :  { %7648 = vmatprep.subr.bf16.mxu1 %v19390_v55 }
 0x7d8   :  { %v6702_v21 = vpack.c.b16 %v6132_v22, %v6131_v34  ;;  %v19634_v34 = vld [vmem:[#allocation241_spill] sm:$0xff]  ;;  %v19635_v22 = vld [vmem:[#allocation15_spill] sm:$0xff] }
 0x7d9   :  { %7528 = vmatmul.mubr.bf16.gmra.mrb[72].mxu1 %v19625_v26 }
 0x7da   :  { %7535 = vmatprep.mubr.bf16.mxu1 %v19628_v23  ;;  %7649 = vmatpush1.bf16.msra.mxu1 %v11286_v15  ;;  %v11289_v15 = vld [vmem:[%s18194_s5 + $0x178] sm:$0xff]  }
 0x7db   :  { %7650 = vmatprep.subr.bf16.mxu1 %v19390_v55  ;;  %v19633_v23 = vld [vmem:[#allocation113_spill] sm:$0xff] }
 0x7de   :  { %7651 = vmatpush1.bf16.msra.mxu1 %v11287_v49  ;;  %v5930_v49 = vpack.c.bf16 %v19633_v23, %v19632_v42  ;;  %v19641_v23 = vld [vmem:[#allocation18_spill] sm:$0xff] }
 0x7df   :  { %7652 = vmatprep.subr.bf16.mxu1 %v19390_v55 }
 0x7e1   :  { %7536 = vmatmul.mubr.bf16.gmra.mrb[76].mxu1 %v19630_v0  ;;  %v6138_v0 = vunpack.c.l.b16 %v5930_v49 }
 0x7e2   :  { %7543 = vmatprep.mubr.bf16.mxu1 %v6702_v21  ;;  %7653 = vmatpush1.bf16.msra.mxu1 %v11288_v54  ;;  %v19636_v54 = vpack.c.bf16 %v19635_v22, %v15239_v32  ;;  %v6137_v21 = vunpack.c.h.b16 %v19577_v9  ;;  %v6143_v22 = vunpack.c.h.b16 %v19594_v53 }
 0x7e3   :  { %7654 = vmatprep.subr.bf16.mxu1 %v19390_v55 }
 0x7e4   :  { %v6705_v26 = vpack.c.b16 %v6138_v0, %v6137_v21 }
 0x7e6   :  { %7655 = vmatpush1.bf16.msra.mxu1 %v11289_v15  ;;  %v19637_v15 = vld [vmem:[#allocation243_spill] sm:$0xff] }
 0x7e7   :  { %7801 = vmatprep.subr.bf16.mxu1 %v19390_v55 }
 0x7e9   :  { %7544 = vmatmul.mubr.bf16.gmra.mrb[80].mxu1 %v19631_v36  ;;  %v19640_v36 = vld [vmem:[#allocation108_spill] sm:$0xff] }
 0x7ea   :  { %7551 = vmatprep.mubr.bf16.mxu1 %v19551_v28  ;;  %v19639_v28 = vld [vmem:[#allocation34_spill] sm:$0xff] }
 0x7eb   :  { %v5934_v42 = vpack.c.bf16 %v19640_v36, %v19639_v28  ;;  %v19646_v36 = vld [vmem:[#allocation67_spill] sm:$0xff] }
 0x7ed   :  { %v6144_v49 = vunpack.c.l.b16 %v5934_v42 }
 0x7ef   :  { %v6708_v0 = vpack.c.b16 %v6144_v49, %v6143_v22  ;;  %v19651_v22 = vld [vmem:[#allocation13_spill] sm:$0xff]  ;;  %v19654_v49 = vcombine.low %v16044_v19, %v16048_v5  ;;  %v19657_v19 = vcombine.low %v16059_v40, %v16063_v44  ;;  %v19660_v40 = vcombine.low %v16079_v63, %v16091_v47  ;;  %v11295_v44 = vld [vmem:[%s18194_s5 + $0x1a8] sm:$0xff]  }
 0x7f0   :  { %v11293_v5 = vld [vmem:[%s18194_s5 + $0x198] sm:$0xff]   ;;  %v19663_v47 = vld [vmem:[#allocation219_spill] sm:$0xff] }
 0x7f1   :  { %7552 = vmatmul.mubr.bf16.gmra.mrb[84].mxu1 %v19634_v34  ;;  %v19642_v34 = vld [vmem:[#allocation42_spill] sm:$0xff]  ;;  %v19664_v63 = vld [vmem:[#allocation221_spill] sm:$0xff] }
 0x7f2   :  { %7559 = vmatprep.mubr.bf16.mxu1 %v19636_v54  ;;  %v19643_v32 = vpack.c.bf16 %v19642_v34, %v15251_v52  ;;  %v19644_v54 = vld [vmem:[#allocation33_spill] sm:$0xff]  ;;  %v19647_v52 = vpack.c.bf16 %v16255_v6, %v15275_v8  ;;  %v19652_v8 = vld [vmem:[#allocation19_spill] sm:$0xff] }
 0x7f3   :  { %v19648_v34 = vld [vmem:[#allocation65_spill] sm:$0xff]  ;;  %v19653_v6 = vcombine.low %v19651_v22, %v19652_v8  ;;  %v19661_v22 = vld [vmem:[#allocation56_spill] sm:$0xff] }
 0x7f4   :  { %v6457_v21 = vunpack.c.h.b16 %v19648_v34  ;;  %v19662_v8 = vld [vmem:[#allocation69_spill] sm:$0xff] }
 0x7f9   :  { %7560 = vmatmul.mubr.bf16.gmra.mrb[88].mxu1 %v19637_v15 }
 0x7fa   :  { %7567 = vmatprep.mubr.bf16.mxu1 %v6705_v26  ;;  %v19645_v26 = vld [vmem:[#allocation39_spill] sm:$0xff] }
 0x801   :  { %7568 = vmatmul.mubr.bf16.gmra.mrb[92].mxu1 %v19638_v1 }
 0x802   :  { %7575 = vmatprep.mubr.bf16.mxu1 %v19589_v35  ;;  %v5938_v35 = vpack.c.bf16 %v19543_v45, %v16331_v56  ;;  %v11290_v45 = vld [vmem:[%s18194_s5 + $0x180] sm:$0xff]  }
 0x804   :  { %v6458_v28 = vunpack.c.l.b16 %v5938_v35  ;;  %v19656_v35 = vld [vmem:[#allocation35_spill] sm:$0xff] }
 0x806   :  { %v6711_v42 = vpack.c.b16 %v6458_v28, %v6457_v21  ;;  %v11294_v21 = vld [vmem:[%s18194_s5 + $0x1a0] sm:$0xff]   ;;  %v19658_v28 = vld [vmem:[#allocation57_spill] sm:$0xff] }
 0x809   :  { %7576 = vmatmul.mubr.bf16.gmra.mrb[96].mxu1 %v19641_v23 }
 0x80a   :  { %7583 = vmatprep.mubr.bf16.mxu1 %v19643_v32  ;;  %v19649_v32 = vld [vmem:[#allocation78_spill] sm:$0xff] }
 0x811   :  { %7584 = vmatmul.mubr.bf16.gmra.mrb[100].mxu1 %v19644_v54 }
 0x812   :  { %7591 = vmatprep.mubr.bf16.mxu1 %v6708_v0  ;;  %v11291_v0 = vld [vmem:[%s18194_s5 + $0x188] sm:$0xff]  }
 0x819   :  { %7592 = vmatmul.mubr.bf16.gmra.mrb[104].mxu1 %v19645_v26 }
 0x81a   :  { %7599 = vmatprep.mubr.bf16.mxu1 %v19598_v24  ;;  %v19650_v24 = vcombine.low %v16018_v60, %v16036_v30  ;;  %v11292_v60 = vld [vmem:[%s18194_s5 + $0x190] sm:$0xff]   ;;  %v19655_v30 = vld [vmem:[#allocation55_spill] sm:$0xff] }
 0x821   :  { %7600 = vmatmul.mubr.bf16.gmra.mrb[108].mxu1 %v19646_v36 }
 0x822   :  { %7607 = vmatprep.mubr.bf16.mxu1 %v19647_v52  ;;  %v9689_v52 = vcombine.low %v19656_v35, %v19655_v30  ;;  %v19666_v30 = vld [vmem:[#allocation85_spill] sm:$0xff]  ;;  %v19667_v35 = vld [vmem:[#allocation79_spill] sm:$0xff] }
 0x829   :  { %7608 = vmatmul.mubr.bf16.gmra.mrb[112].mxu1 %v19649_v32 }
 0x82a   :  { %7615 = vmatprep.mubr.bf16.mxu1 %v6711_v42  ;;  %v19659_v42 = vld [vmem:[#allocation49_spill] sm:$0xff] }
 0x831   :  { %7616 = vmatmul.mubr.bf16.gmra.mrb[116].mxu1 %v16335_v17 }
 0x832   :  { %7656 = vmatprep.mubr.bf16.mxu1 %v19650_v24  ;;  %v9690_v24 = vcombine.low %v19659_v42, %v19658_v28  ;;  %v11300_v28 = vld [vmem:[%s18194_s5 + $0x1d0] sm:$0xff]   ;;  %v19670_v42 = vld [vmem:[#allocation162_spill] sm:$0xff] }
 0x839   :  { %7657 = vmatmul.mubr.bf16.vlgmr.msra.gmra.mrb[48].mxu1 %v19653_v6  ;;  %v9691_v6 = vcombine.low %v19662_v8, %v19661_v22  ;;  %v19673_v22 = vld [vmem:[#allocation224_spill] sm:$0xff]  ;;  %v19674_v8 = vld [vmem:[#allocation199_spill] sm:$0xff] }
 0x83a   :  { %7664 = vmatprep.mubr.bf16.mxu1 %v19654_v49  ;;  %7802 = vmatpush1.bf16.msra.mxu1 %v11290_v45  ;;  %v11296_v45 = vld [vmem:[%s18194_s5 + $0x1b0] sm:$0xff]   ;;  %v19665_v49 = vcombine.low %v19663_v47, %v19664_v63  ;;  %v19676_v63 = vld [vmem:[#allocation98_spill] sm:$0xff] }
 0x83b   :  { %7803 = vmatprep.subr.bf16.mxu1 %v19390_v55  ;;  %v11304_v47 = vld [vmem:[%s18194_s5 + $0x1f0] sm:$0xff]  }
 0x83e   :  { %7804 = vmatpush1.bf16.msra.mxu1 %v11291_v0  ;;  %v11297_v0 = vld [vmem:[%s18194_s5 + $0x1b8] sm:$0xff]  }
 0x83f   :  { %7805 = vmatprep.subr.bf16.mxu1 %v19390_v55 }
 0x841   :  { %7665 = vmatmul.mubr.bf16.gmra.mrb[52].mxu1 %v9689_v52  ;;  %v9692_v52 = vcombine.low %v19667_v35, %v19666_v30  ;;  %v11305_v30 = vld [vmem:[%s18194_s5 + $0x1f8] sm:$0xff]   ;;  %v11306_v35 = vld [vmem:[%s18194_s5 + $0x200] sm:$0xff]  }
 0x842   :  { %7672 = vmatprep.mubr.bf16.mxu1 %v19657_v19  ;;  %7806 = vmatpush1.bf16.msra.mxu1 %v11292_v60  ;;  %v11298_v60 = vld [vmem:[%s18194_s5 + $0x1c0] sm:$0xff]   ;;  %v19668_v19 = vld [vmem:[#allocation228_spill] sm:$0xff] }
 0x843   :  { %7807 = vmatprep.subr.bf16.mxu1 %v19390_v55 }
 0x846   :  { %7808 = vmatpush1.bf16.msra.mxu1 %v11293_v5  ;;  %v19669_v5 = vcombine.low %v16122_v3, %v19668_v19  ;;  %v19672_v3 = vcombine.low %v16135_v62, %v16147_v59  ;;  %v19675_v59 = vcombine.low %v16155_v20, %v16159_v31  ;;  %v11303_v62 = vld [vmem:[%s18194_s5 + $0x1e8] sm:$0xff]   ;;  %v19678_v20 = vld [vmem:[#allocation237_spill] sm:$0xff]  ;;  %v19679_v31 = vld [vmem:[#allocation242_spill] sm:$0xff] }
 0x847   :  { %7809 = vmatprep.subr.bf16.mxu1 %v19390_v55 }
 0x849   :  { %7673 = vmatmul.mubr.bf16.gmra.mrb[56].mxu1 %v9690_v24  ;;  %v19671_v24 = vld [vmem:[#allocation144_spill] sm:$0xff] }
 0x84a   :  { %7680 = vmatprep.mubr.bf16.mxu1 %v19660_v40  ;;  %7810 = vmatpush1.bf16.msra.mxu1 %v11294_v21  ;;  %v11299_v21 = vld [vmem:[%s18194_s5 + $0x1c8] sm:$0xff]   ;;  %v9693_v40 = vcombine.low %v19671_v24, %v19670_v42  ;;  %v19688_v24 = vcombine.low %v19565_v58, %v19564_v4  ;;  %v19701_v4 = vld [vmem:[#allocation176_spill] sm:$0xff] }
 0x84b   :  { %7811 = vmatprep.subr.bf16.mxu1 %v19390_v55 }
 0x84e   :  { %7812 = vmatpush1.bf16.msra.mxu1 %v11295_v44  ;;  %v11301_v44 = vld [vmem:[%s18194_s5 + $0x1d8] sm:$0xff]  }
 0x84f   :  { %7813 = vmatprep.subr.bf16.mxu1 %v19390_v55 }
 0x851   :  { %7681 = vmatmul.mubr.bf16.gmra.mrb[60].mxu1 %v9691_v6  ;;  %v9694_v6 = vcombine.low %v19674_v8, %v19673_v22  ;;  %v19698_v22 = vld [vmem:[#allocation9_spill] sm:$0xff] }
 0x852   :  { %7688 = vmatprep.mubr.bf16.mxu1 %v19665_v49  ;;  %7814 = vmatpush1.bf16.msra.mxu1 %v11296_v45  ;;  %v11302_v45 = vld [vmem:[%s18194_s5 + $0x1e0] sm:$0xff]   ;;  %v19699_v8 = vld [vmem:[#allocation53_spill] sm:$0xff] }
 0x853   :  { %7815 = vmatprep.subr.bf16.mxu1 %v19390_v55  ;;  %v19677_v49 = vld [vmem:[#allocation218_spill] sm:$0xff]  ;;  %v19700_v58 = vcombine.low %v19698_v22, %v19699_v8  ;;  %v19729_v22 = vld [vmem:[#allocation209_spill] sm:$0xff]  ;;  %v19730_v8 = vld [vmem:[#allocation83_spill] sm:$0xff] }
 0x856   :  { %7816 = vmatpush1.bf16.msra.mxu1 %v11297_v0  ;;  %v9695_v0 = vcombine.low %v19677_v49, %v19676_v63  ;;  %v19710_v49 = vld [vmem:[#allocation62_spill] sm:$0xff] }
 0x857   :  { %7817 = vmatprep.subr.bf16.mxu1 %v19390_v55 }
 0x859   :  { %7689 = vmatmul.mubr.bf16.gmra.mrb[64].mxu1 %v9692_v52  ;;  %v19681_v52 = vld [vmem:[#allocation105_spill] sm:$0xff] }
 0x85a   :  { %7696 = vmatprep.mubr.bf16.mxu1 %v19669_v5  ;;  %7818 = vmatpush1.bf16.msra.mxu1 %v11298_v60  ;;  %v19680_v60 = vcombine.low %v19678_v20, %v19679_v31  ;;  %v19682_v19 = vcombine.low %v19561_v39, %v19681_v52  ;;  %v19683_v5 = vcombine.low %v16183_v27, %v16195_v12  ;;  %v19692_v27 = vld [vmem:[#allocation44_spill] sm:$0xff] }
 0x85b   :  { %7819 = vmatprep.subr.bf16.mxu1 %v19390_v55  ;;  %v19691_v12 = vcombine.low %v19567_v61, %v19566_v11  ;;  %v19707_v11 = vld [vmem:[#allocation186_spill] sm:$0xff]  ;;  %v19713_v31 = vld [vmem:[#allocation200_spill] sm:$0xff]  ;;  %v19716_v52 = vcombine.low %v16320_v18, %v16400_v25  ;;  %v19724_v18 = vld [vmem:[#allocation71_spill] sm:$0xff] }
 0x85e   :  { %7820 = vmatpush1.bf16.msra.mxu1 %v11299_v21  ;;  %v19684_v21 = vld [vmem:[#allocation126_spill] sm:$0xff] }
 0x85f   :  { %7821 = vmatprep.subr.bf16.mxu1 %v19390_v55 }
 0x861   :  { %7697 = vmatmul.mubr.bf16.gmra.mrb[68].mxu1 %v9693_v40  ;;  %v19689_v40 = vld [vmem:[#allocation32_spill] sm:$0xff] }
 0x862   :  { %7704 = vmatprep.mubr.bf16.mxu1 %v19672_v3  ;;  %7822 = vmatpush1.bf16.msra.mxu1 %v11300_v28  ;;  %v19685_v28 = vcombine.low %v19563_v41, %v19684_v21  ;;  %v19690_v39 = vcombine.low %v16226_v37, %v19689_v40  ;;  %v19693_v3 = vld [vmem:[#allocation8_spill] sm:$0xff]  ;;  %v11307_v40 = vld [vmem:[%s18194_s5 + $0x208] sm:$0xff]  }
 0x863   :  { %7823 = vmatprep.subr.bf16.mxu1 %v19390_v55  ;;  %v19694_v41 = vcombine.low %v19692_v27, %v19693_v3  ;;  %v19725_v27 = vld [vmem:[#allocation58_spill] sm:$0xff]  ;;  %v19726_v3 = vld [vmem:[#allocation91_spill] sm:$0xff] }
 0x866   :  { %7824 = vmatpush1.bf16.msra.mxu1 %v11301_v44  ;;  %v19695_v44 = vld [vmem:[#allocation152_spill] sm:$0xff] }
 0x867   :  { %7825 = vmatprep.subr.bf16.mxu1 %v19390_v55 }
 0x869   :  { %7705 = vmatmul.mubr.bf16.gmra.mrb[72].mxu1 %v9694_v6  ;;  %v19702_v6 = vld [vmem:[#allocation177_spill] sm:$0xff] }
 0x86a   :  { %7712 = vmatprep.mubr.bf16.mxu1 %v19675_v59  ;;  %7826 = vmatpush1.bf16.msra.mxu1 %v11302_v45  ;;  %v19696_v45 = vld [vmem:[#allocation173_spill] sm:$0xff]  ;;  %v19703_v37 = vcombine.low %v19701_v4, %v19702_v6  ;;  %v19733_v6 = vld [vmem:[#allocation139_spill] sm:$0xff] }
 0x86b   :  { %7827 = vmatprep.subr.bf16.mxu1 %v19390_v55  ;;  %v19704_v59 = vld [vmem:[#allocation61_spill] sm:$0xff] }
 0x86c   :  { %v19732_v4 = vld [vmem:[#allocation229_spill] sm:$0xff] }
 0x86e   :  { %7828 = vmatpush1.bf16.msra.mxu1 %v11303_v62  ;;  %v19705_v62 = vld [vmem:[#allocation45_spill] sm:$0xff] }
 0x86f   :  { %7829 = vmatprep.subr.bf16.mxu1 %v19390_v55  ;;  %v19706_v61 = vcombine.low %v19704_v59, %v19705_v62  ;;  %v19735_v59 = vld [vmem:[#allocation117_spill] sm:$0xff]  ;;  %v19737_v62 = vld [vmem:[#allocation68_spill] sm:$0xff] }
 0x871   :  { %7713 = vmatmul.mubr.bf16.gmra.mrb[76].mxu1 %v9695_v0  ;;  %v19711_v0 = vld [vmem:[#allocation66_spill] sm:$0xff] }
 0x872   :  { %7720 = vmatprep.mubr.bf16.mxu1 %v19680_v60  ;;  %7830 = vmatpush1.bf16.msra.mxu1 %v11304_v47  ;;  %v19708_v47 = vld [vmem:[#allocation205_spill] sm:$0xff]  ;;  %v19712_v20 = vcombine.low %v19710_v49, %v19711_v0  ;;  %v19714_v60 = vld [vmem:[#allocation222_spill] sm:$0xff] }
 0x873   :  { %7831 = vmatprep.subr.bf16.mxu1 %v19390_v55  ;;  %v19686_v55 = vld [vmem:[#allocation251_spill] sm:$0xff]  ;;  %v19709_v63 = vcombine.low %v19707_v11, %v19708_v47  ;;  %v19739_v11 = vld [vmem:[#allocation180_spill] sm:$0xff]  ;;  %v19741_v47 = vld [vmem:[#allocation118_spill] sm:$0xff] }
 0x874   :  { %v19687_v42 = vcombine.low %v16201_v14, %v19686_v55  ;;  %v19697_v14 = vcombine.low %v19695_v44, %v19696_v45  ;;  %v19721_v55 = vld [vmem:[#allocation81_spill] sm:$0xff]  ;;  %v19728_v44 = vld [vmem:[#allocation163_spill] sm:$0xff]  ;;  %v11312_v45 = vld [vmem:[%s18194_s5 + $0x230] sm:$0xff]  }
 0x875   :  { %v19751_v49 = vld [vmem:[#allocation106_spill] sm:$0xff] }
 0x876   :  { %7832 = vmatpush1.bf16.msra.mxu1 %v11305_v30  ;;  %v19715_v30 = vcombine.low %v19713_v31, %v19714_v60  ;;  %v19757_v31 = vld [vmem:[#allocation241_spill] sm:$0xff] }
 0x877   :  { %10206 = vmatprep.subr.bf16.mxu1 %v11306_v35 }
 0x879   :  { %7721 = vmatmul.mubr.bf16.gmra.mrb[80].mxu1 %v19682_v19  ;;  %v19717_v19 = vld [vmem:[#allocation201_spill] sm:$0xff] }
 0x87a   :  { %7728 = vmatprep.mubr.bf16.mxu1 %v19683_v5  ;;  %v19718_v5 = vld [vmem:[#allocation93_spill] sm:$0xff] }
 0x87b   :  { %v19719_v21 = vcombine.low %v19717_v19, %v19718_v5 }
 0x881   :  { %7729 = vmatmul.mubr.bf16.gmra.mrb[84].mxu1 %v19685_v28  ;;  %v19720_v28 = vcombine.low %v16414_v57, %v16422_v10 }
 0x882   :  { %7736 = vmatprep.mubr.bf16.mxu1 %v19687_v42  ;;  %v19722_v42 = vcombine.low %v19721_v55, %v16426_v29 }
 0x889   :  { %7737 = vmatmul.mubr.bf16.gmra.mrb[88].mxu1 %v19688_v24  ;;  %v19723_v24 = vld [vmem:[#allocation60_spill] sm:$0xff] }
 0x88a   :  { %7744 = vmatprep.mubr.bf16.mxu1 %v19690_v39  ;;  %v11308_v39 = vld [vmem:[%s18194_s5 + $0x210] sm:$0xff]  }
 0x891   :  { %7745 = vmatmul.mubr.bf16.gmra.mrb[92].mxu1 %v19691_v12  ;;  %v11309_v12 = vld [vmem:[%s18194_s5 + $0x218] sm:$0xff]  }
 0x892   :  { %7752 = vmatprep.mubr.bf16.mxu1 %v19694_v41  ;;  %v19727_v41 = vld [vmem:[#allocation82_spill] sm:$0xff] }
 0x899   :  { %7753 = vmatmul.mubr.bf16.gmra.mrb[96].mxu1 %v19697_v14  ;;  %v11313_v14 = vld [vmem:[%s18194_s5 + $0x238] sm:$0xff]  }
 0x89a   :  { %7760 = vmatprep.mubr.bf16.mxu1 %v19700_v58  ;;  %v19731_v58 = vld [vmem:[#allocation210_spill] sm:$0xff] }
 0x8a1   :  { %7761 = vmatmul.mubr.bf16.gmra.mrb[100].mxu1 %v19703_v37  ;;  %v19734_v37 = vld [vmem:[#allocation112_spill] sm:$0xff] }
 0x8a2   :  { %7768 = vmatprep.mubr.bf16.mxu1 %v19706_v61  ;;  %v19738_v61 = vld [vmem:[#allocation158_spill] sm:$0xff] }
 0x8a9   :  { %7769 = vmatmul.mubr.bf16.gmra.mrb[104].mxu1 %v19709_v63  ;;  %v19750_v63 = vld [vmem:[#allocation94_spill] sm:$0xff] }
 0x8aa   :  { %7776 = vmatprep.mubr.bf16.mxu1 %v19712_v20  ;;  %v19752_v0 = vpack.c.b16 %v19750_v63, %v19751_v49  ;;  %v19755_v20 = vld [vmem:[#allocation231_spill] sm:$0xff] }
 0x8b1   :  { %7777 = vmatmul.mubr.bf16.gmra.mrb[108].mxu1 %v19715_v30 }
 0x8b2   :  { %7784 = vmatprep.mubr.bf16.mxu1 %v19716_v52 }
 0x8b9   :  { %7785 = vmatmul.mubr.bf16.gmra.mrb[112].mxu1 %v19719_v21 }
 0x8ba   :  { %7792 = vmatprep.mubr.bf16.mxu1 %v19720_v28 }
 0x8c1   :  { %7793 = vmatmul.mubr.bf16.gmra.mrb[116].mxu1 %v19722_v42 }
 0x8c2   :  { %7833 = vmatprep.mubr.bf16.mxu1 %v19723_v24 }
 0x8c9   :  { %7834 = vmatmul.mubr.bf16.vlgmr.msra.gmra.mrb[48].mxu1 %v19611_v13  ;;  %v11310_v13 = vld [vmem:[%s18194_s5 + $0x220] sm:$0xff]  }
 0x8ca   :  { %7841 = vmatprep.mubr.bf16.mxu1 %v19724_v18  ;;  %10207 = vmatpush3.bf16.msra.mxu1 %v11306_v35  ;;  %v11311_v35 = vld [vmem:[%s18194_s5 + $0x228] sm:$0xff]  }
 0x8cb   :  { %10208 = vmatprep.subr.bf16.mxu1 %v11307_v40 }
 0x8ce   :  { %10209 = vmatpush3.bf16.msra.mxu1 %v11307_v40 }
 0x8cf   :  { %10210 = vmatprep.subr.bf16.mxu1 %v11308_v39 }
 0x8d1   :  { %7842 = vmatmul.mubr.bf16.gmra.mrb[52].mxu1 %v19725_v27 }
 0x8d2   :  { %7849 = vmatprep.mubr.bf16.mxu1 %v19726_v3  ;;  %10211 = vmatpush3.bf16.msra.mxu1 %v11308_v39 }
 0x8d3   :  { %10212 = vmatprep.subr.bf16.mxu1 %v11309_v12 }
 0x8d6   :  { %10213 = vmatpush3.bf16.msra.mxu1 %v11309_v12 }
 0x8d7   :  { %10214 = vmatprep.subr.bf16.mxu1 %v11310_v13 }
 0x8d9   :  { %7850 = vmatmul.mubr.bf16.gmra.mrb[56].mxu1 %v19727_v41 }
 0x8da   :  { %7857 = vmatprep.mubr.bf16.mxu1 %v19728_v44  ;;  %10215 = vmatpush3.bf16.msra.mxu1 %v11310_v13 }
 0x8db   :  { %10216 = vmatprep.subr.bf16.mxu1 %v11311_v35 }
 0x8de   :  { %10217 = vmatpush3.bf16.msra.mxu1 %v11311_v35 }
 0x8df   :  { %10218 = vmatprep.subr.bf16.mxu1 %v11312_v45 }
 0x8e1   :  { %7858 = vmatmul.mubr.bf16.gmra.mrb[60].mxu1 %v19619_v2  ;;  %v19736_v2 = vld [vmem:[#allocation134_spill] sm:$0xff] }
 0x8e2   :  { %7865 = vmatprep.mubr.bf16.mxu1 %v19729_v22  ;;  %10219 = vmatpush3.bf16.msra.mxu1 %v11312_v45 }
 0x8e3   :  { %10220 = vmatprep.subr.bf16.mxu1 %v11313_v14 }
 0x8e6   :  { %10221 = vmatpush3.bf16.msra.mxu1 %v11313_v14 }
 0x8e9   :  { %7866 = vmatmul.mubr.bf16.gmra.mrb[64].mxu1 %v19730_v8 }
 0x8ea   :  { %7873 = vmatprep.mubr.bf16.mxu1 %v19731_v58 }
 0x8f1   :  { %7874 = vmatmul.mubr.bf16.gmra.mrb[68].mxu1 %v19732_v4 }
 0x8f2   :  { %7881 = vmatprep.mubr.bf16.mxu1 %v19733_v6 }
 0x8f9   :  { %7882 = vmatmul.mubr.bf16.gmra.mrb[72].mxu1 %v19629_v38  ;;  %v19740_v38 = vld [vmem:[#allocation208_spill] sm:$0xff] }
 0x8fa   :  { %7889 = vmatprep.mubr.bf16.mxu1 %v19734_v37 }
 0x901   :  { %7890 = vmatmul.mubr.bf16.gmra.mrb[76].mxu1 %v19735_v59 }
 0x902   :  { %7897 = vmatprep.mubr.bf16.mxu1 %v19736_v2 }
 0x909   :  { %7898 = vmatmul.mubr.bf16.gmra.mrb[80].mxu1 %v19737_v62 }
 0x90a   :  { %7905 = vmatprep.mubr.bf16.mxu1 %v19738_v61 }
 0x911   :  { %7906 = vmatmul.mubr.bf16.gmra.mrb[84].mxu1 %v19577_v9  ;;  %v19742_v9 = vcombine.low %v19718_v5, %v19721_v55 }
 0x912   :  { %7913 = vmatprep.mubr.bf16.mxu1 %v19739_v11 }
 0x919   :  { %7914 = vmatmul.mubr.bf16.gmra.mrb[88].mxu1 %v19585_v48  ;;  %v19743_v48 = vld [vmem:[#allocation103_spill] sm:$0xff] }
 0x91a   :  { %7921 = vmatprep.mubr.bf16.mxu1 %v19587_v43  ;;  %v19744_v43 = vcombine.low %v16426_v29, %v19743_v48  ;;  %v19754_v29 = vld [vmem:[#allocation230_spill] sm:$0xff] }
 0x921   :  { %7922 = vmatmul.mubr.bf16.gmra.mrb[92].mxu1 %v16486_v46  ;;  %v19745_v46 = vld [vmem:[#allocation80_spill] sm:$0xff] }
 0x922   :  { %7929 = vmatprep.mubr.bf16.mxu1 %v19593_v51  ;;  %v19746_v51 = vpack.c.bf16 %v19745_v46, %v16331_v56  ;;  %v19756_v56 = vld [vmem:[#allocation236_spill] sm:$0xff] }
 0x929   :  { %7930 = vmatmul.mubr.bf16.gmra.mrb[96].mxu1 %v19594_v53  ;;  %v19747_v53 = vld [vmem:[#allocation92_spill] sm:$0xff] }
 0x92a   :  { %7937 = vmatprep.mubr.bf16.mxu1 %v19595_v16 }
 0x931   :  { %7938 = vmatmul.mubr.bf16.gmra.mrb[100].mxu1 %v19596_v50  ;;  %v19748_v50 = vld [vmem:[#allocation123_spill] sm:$0xff] }
 0x932   :  { %7945 = vmatprep.mubr.bf16.mxu1 %v19740_v38  ;;  %v19749_v16 = vcombine.low %v19747_v53, %v19748_v50 }
 0x939   :  { %7946 = vmatmul.mubr.bf16.gmra.mrb[104].mxu1 %v19741_v47 }
 0x93a   :  { %7953 = vmatprep.mubr.bf16.mxu1 %v19742_v9 }
 0x941   :  { %7954 = vmatmul.mubr.bf16.gmra.mrb[108].mxu1 %v19648_v34  ;;  %v19753_v34 = vld [vmem:[#allocation227_spill] sm:$0xff] }
 0x942   :  { %7961 = vmatprep.mubr.bf16.mxu1 %v19744_v43 }
 0x949   :  { %7962 = vmatmul.mubr.bf16.gmra.mrb[112].mxu1 %v19746_v51 }
 0x94a   :  { %7969 = vmatprep.mubr.bf16.mxu1 %v19749_v16 }
 0x951   :  { %7970 = vmatmul.mubr.bf16.gmra.mrb[116].mxu1 %v19752_v0 }
 0x952   :  { %10222 = vmatprep.mubr.bf16.mxu1 %v16075_v7  ;;  %v19758_v7 = vcombine.low %v16400_v25, %v16414_v57 }
 0x959   :  { %10223 = vmatmul.mubr.bf16.vlgmr.msra.gmra.mrb[120].mxu1 %v19620_v33  ;;  %v19759_v33 = vld [vmem:[#allocation104_spill] sm:$0xff] }
 0x95a   :  { %10226 = vmatprep.mubr.bf16.mxu1 %v19753_v34 }
 0x961   :  { %10227 = vmatmul.mubr.bf16.gmra.mrb[124].mxu1 %v19754_v29 }
 0x962   :  { %10230 = vmatprep.mubr.bf16.mxu1 %v19755_v20 }
 0x969   :  { %10231 = vmatmul.mubr.bf16.gmra.mrb[128].mxu1 %v19756_v56 }
 0x96a   :  { %10234 = vmatprep.mubr.bf16.mxu1 %v19757_v31 }
 0x971   :  { %10235 = vmatmul.mubr.bf16.gmra.mrb[132].mxu1 %v19637_v15  ;;  %v19760_v15 = vcombine.low %v16422_v10, %v19759_v33 }
 0x972   :  { %10238 = vmatprep.mubr.bf16.mxu1 %v19638_v1  ;;  %v19761_v1 = vld [vmem:[#allocation107_spill] sm:$0xff] }
 0x979   :  { %10239 = vmatmul.mubr.bf16.gmra.mrb[136].mxu1 %v19641_v23  ;;  %v19762_v23 = vld [vmem:[#allocation130_spill] sm:$0xff] }
 0x97a   :  { %10242 = vmatprep.mubr.bf16.mxu1 %v19644_v54  ;;  %v19763_v60 = vcombine.low %v19761_v1, %v19762_v23  ;;  %v19764_v54 = vmov 1.0  }
 0x981   :  { %10243 = vmatmul.mubr.bf16.gmra.mrb[140].mxu1 %v19645_v26 }
 0x982   :  { %10246 = vmatprep.mubr.bf16.mxu1 %v19646_v36 }
 0x989   :  { %10247 = vmatmul.mubr.bf16.gmra.mrb[144].mxu1 %v19649_v32 }
 0x98a   :  { %10250 = vmatprep.mubr.bf16.mxu1 %v16335_v17 }
 0x991   :  { %10251 = vmatmul.mubr.bf16.gmra.mrb[148].mxu1 %v19758_v7 }
 0x992   :  { %10254 = vmatprep.mubr.bf16.mxu1 %v19760_v15 }
 0x999   :  { %10255 = vmatmul.mubr.bf16.gmra.mrb[152].mxu1 %v19763_v60 }
 0x99a   :  { %8258 = vmatprep.mubr.f32.mxu1 %v19764_v54 }
 0x99c   :  { %v16890_v26 = vpop.f32.mrb[48].mxu1 }
 0x99d   :  { %v7837_v36 = vpop.f32.mrb[49].mxu1 }
 0x99e   :  { %v16892_v32 = vpop.f32.mrb[50].mxu1 }
 0x99f   :  { %v7840_v17 = vpop.f32.mrb[51].mxu1 }
 0x9a4   :  { %v16894_v30 = vpop.f32.mrb[52].mxu1 }
 0x9a5   :  { %v7845_v25 = vpop.f32.mrb[53].mxu1 }
 0x9a6   :  { %v16896_v57 = vpop.f32.mrb[54].mxu1 }
 0x9a7   :  { %v7848_v52 = vpop.f32.mrb[55].mxu1 }
 0x9ac   :  { %v16898_v10 = vpop.f32.mrb[56].mxu1 }
 0x9ad   :  { %v7853_v19 = vpop.f32.mrb[57].mxu1 }
 0x9ae   :  { %v16900_v5 = vpop.f32.mrb[58].mxu1 }
 0x9af   :  { %v7856_v21 = vpop.f32.mrb[59].mxu1 }
 0x9b4   :  { %v16902_v28 = vpop.f32.mrb[60].mxu1 }
 0x9b5   :  { %v7861_v55 = vpop.f32.mrb[61].mxu1 }
 0x9b6   :  { %v16904_v42 = vpop.f32.mrb[62].mxu1 }
 0x9b7   :  { %v7864_v24 = vpop.f32.mrb[63].mxu1 }
 0x9bc   :  { %v16906_v40 = vpop.f32.mrb[64].mxu1 }
 0x9bd   :  { %v7869_v18 = vpop.f32.mrb[65].mxu1 }
 0x9be   :  { %v16908_v39 = vpop.f32.mrb[66].mxu1 }
 0x9bf   :  { %v7872_v12 = vpop.f32.mrb[67].mxu1 }
 0x9c0   :  { %v16965_v12 = vld [vmem:[%s18197_s6] ss:$0 sm:$0xff] }
 0x9c4   :  { %v16910_v27 = vpop.f32.mrb[68].mxu1 }
 0x9c5   :  { %v7877_v3 = vpop.f32.mrb[69].mxu1 }
 0x9c6   :  { %v16912_v13 = vpop.f32.mrb[70].mxu1  ;;  %v10554_v3 = vadd.f32 %v16965_v12, %v16894_v30  ;;  %v10558_v30 = vadd.f32 %v16965_v12, %v16902_v28 }
 0x9c7   :  { %v7880_v35 = vpop.f32.mrb[71].mxu1 }
 0x9c8   :  { %v10552_v35 = vadd.f32 %v16965_v12, %v16890_v26  ;;  %v10556_v26 = vadd.f32 %v16965_v12, %v16898_v10  ;;  %v10562_v10 = vadd.f32 %v16965_v12, %v16910_v27 }
 0x9cc   :  { %v16914_v41 = vpop.f32.mrb[72].mxu1 }
 0x9cd   :  { %v7885_v44 = vpop.f32.mrb[73].mxu1 }
 0x9ce   :  { %v16916_v45 = vpop.f32.mrb[74].mxu1 }
 0x9cf   :  { %v7888_v14 = vpop.f32.mrb[75].mxu1 }
 0x9d0   :  { %v10555_v14 = vadd.f32 %v16965_v12, %v16896_v57  ;;  %v10559_v57 = vadd.f32 %v16965_v12, %v16904_v42  ;;  %v10560_v42 = vadd.f32 %v16965_v12, %v16906_v40 }
 0x9d4   :  { %v16918_v22 = vpop.f32.mrb[76].mxu1 }
 0x9d5   :  { %v7893_v8 = vpop.f32.mrb[77].mxu1  ;;  %v10566_v40 = vadd.f32 %v16965_v12, %v16918_v22 }
 0x9d6   :  { %v16920_v58 = vpop.f32.mrb[78].mxu1 }
 0x9d7   :  { %v7896_v4 = vpop.f32.mrb[79].mxu1 }
 0x9dc   :  { %v16922_v6 = vpop.f32.mrb[80].mxu1 }
 0x9dd   :  { %v7901_v37 = vpop.f32.mrb[81].mxu1 }
 0x9de   :  { %v16924_v59 = vpop.f32.mrb[82].mxu1  ;;  %v10553_v37 = vadd.f32 %v16965_v12, %v16892_v32  ;;  %v10557_v32 = vadd.f32 %v16965_v12, %v16900_v5 }
 0x9df   :  { %v7904_v2 = vpop.f32.mrb[83].mxu1 }
 0x9e4   :  { %v16926_v62 = vpop.f32.mrb[84].mxu1 }
 0x9e5   :  { %v7909_v61 = vpop.f32.mrb[85].mxu1 }
 0x9e6   :  { %v16928_v11 = vpop.f32.mrb[86].mxu1 }
 0x9e7   :  { %v7912_v38 = vpop.f32.mrb[87].mxu1 }
 0x9ec   :  { %v16930_v47 = vpop.f32.mrb[88].mxu1 }
 0x9ed   :  { %v7917_v9 = vpop.f32.mrb[89].mxu1 }
 0x9ee   :  { %v16932_v48 = vpop.f32.mrb[90].mxu1 }
 0x9ef   :  { %v7920_v43 = vpop.f32.mrb[91].mxu1 }
 0x9f4   :  { %v16934_v46 = vpop.f32.mrb[92].mxu1 }
 0x9f5   :  { %v7925_v51 = vpop.f32.mrb[93].mxu1 }
 0x9f6   :  { %v16936_v53 = vpop.f32.mrb[94].mxu1 }
 0x9f7   :  { %v7928_v50 = vpop.f32.mrb[95].mxu1 }
 0x9fc   :  { %v16938_v16 = vpop.f32.mrb[96].mxu1 }
 0x9fd   :  { %v7933_v63 = vpop.f32.mrb[97].mxu1 }
 0x9fe   :  { %v16940_v49 = vpop.f32.mrb[98].mxu1 }
 0x9ff   :  { %v7936_v0 = vpop.f32.mrb[99].mxu1 }
 0xa04   :  { %v16942_v34 = vpop.f32.mrb[100].mxu1 }
 0xa05   :  { %v7941_v29 = vpop.f32.mrb[101].mxu1 }
 0xa06   :  { %v16944_v20 = vpop.f32.mrb[102].mxu1 }
 0xa07   :  { %v7944_v56 = vpop.f32.mrb[103].mxu1 }
 0xa0c   :  { %v16946_v31 = vpop.f32.mrb[104].mxu1 }
 0xa0d   :  { %v7949_v7 = vpop.f32.mrb[105].mxu1 }
 0xa0e   :  { %v16948_v33 = vpop.f32.mrb[106].mxu1 }
 0xa0f   :  { %v7952_v15 = vpop.f32.mrb[107].mxu1 }
 0xa14   :  { %v16950_v1 = vpop.f32.mrb[108].mxu1 }
 0xa15   :  { %v7957_v23 = vpop.f32.mrb[109].mxu1 }
 0xa16   :  { %v16952_v60 = vpop.f32.mrb[110].mxu1  ;;  %v10563_v23 = vadd.f32 %v16965_v12, %v16912_v13  ;;  %v10564_v13 = vadd.f32 %v16965_v12, %v16914_v41  ;;  %v10570_v41 = vadd.f32 %v16965_v12, %v16926_v62 }
 0xa17   :  { %v7960_v36 = vpop.f32.mrb[111].mxu1 }
 0xa1c   :  { %v16954_v17 = vpop.f32.mrb[112].mxu1 }
 0xa1d   :  { %v7965_v25 = vpop.f32.mrb[113].mxu1 }
 0xa1e   :  { %v16956_v52 = vpop.f32.mrb[114].mxu1  ;;  %v10561_v25 = vadd.f32 %v16965_v12, %v16908_v39 }
 0xa1f   :  { %v7968_v19 = vpop.f32.mrb[115].mxu1 }
 0xa24   :  { %v16958_v21 = vpop.f32.mrb[116].mxu1 }
 0xa25   :  { %v7973_v55 = vpop.f32.mrb[117].mxu1 }
 0xa26   :  { %v16960_v24 = vpop.f32.mrb[118].mxu1 }
 0xa27   :  { %v7976_v18 = vpop.f32.mrb[119].mxu1 }
 0xa2c   :  { %v10224_v44 = vpop.f32.mrb[120].mxu1 }
 0xa2d   :  { %v16973_v8 = vadd.f32 %v10554_v3, %v10224_v44  ;;  %v8012_v4 = vpop.f32.mrb[121].mxu1  ;;  %v10567_v44 = vadd.f32 %v16965_v12, %v16920_v58  ;;  %v10568_v58 = vadd.f32 %v16965_v12, %v16922_v6 }
 0xa2e   :  { %v8013_v2 = vadd.f32 %v10552_v35, %v8012_v4  ;;  %v10225_v61 = vpop.f32.mrb[122].mxu1  ;;  %v10565_v4 = vadd.f32 %v16965_v12, %v16916_v45 }
 0xa2f   :  { %v8024_v38 = vadd.f32 %v10555_v14, %v10225_v61  ;;  %v8015_v9 = vpop.f32.mrb[123].mxu1 }
 0xa30   :  { %v8016_v43 = vadd.f32 %v10553_v37, %v8015_v9 }
 0xa34   :  { %v10228_v51 = vpop.f32.mrb[124].mxu1 }
 0xa35   :  { %v16983_v50 = vadd.f32 %v10558_v30, %v10228_v51  ;;  %v8028_v63 = vpop.f32.mrb[125].mxu1  ;;  %v10571_v51 = vadd.f32 %v16965_v12, %v16928_v11  ;;  %v10574_v11 = vadd.f32 %v16965_v12, %v16934_v46 }
 0xa36   :  { %v16987_v0 = vadd.f32 %v10556_v26, %v8028_v63  ;;  %v10229_v29 = vpop.f32.mrb[126].mxu1  ;;  %v10569_v63 = vadd.f32 %v16965_v12, %v16924_v59  ;;  %v10572_v59 = vadd.f32 %v16965_v12, %v16930_v47 }
 0xa37   :  { %v16989_v56 = vadd.f32 %v10559_v57, %v10229_v29  ;;  %v8031_v7 = vpop.f32.mrb[127].mxu1 }
 0xa38   :  { %v16991_v28 = vadd.f32 %v10557_v32, %v8031_v7 }
 0xa3c   :  { %v10232_v15 = vpop.f32.mrb[128].mxu1 }
 0xa3d   :  { %v16999_v36 = vadd.f32 %v10562_v10, %v10232_v15  ;;  %v8044_v5 = vpop.f32.mrb[129].mxu1  ;;  %v17033_v15 = vmax.f32 %v8016_v43, 0.0 }
 0xa3e   :  { %v17003_v19 = vadd.f32 %v10560_v42, %v8044_v5  ;;  %v10233_v55 = vpop.f32.mrb[130].mxu1  ;;  %v17043_v5 = vmax.f32 %v8013_v2, 0.0 }
 0xa3f   :  { %v17005_v18 = vadd.f32 %v10563_v23, %v10233_v55  ;;  %v8047_v3 = vpop.f32.mrb[131].mxu1 }
 0xa40   :  { %v17007_v27 = vadd.f32 %v10561_v25, %v8047_v3  ;;  %v10575_v3 = vadd.f32 %v16965_v12, %v16936_v53 }
 0xa44   :  { %v10236_v35 = vpop.f32.mrb[132].mxu1 }
 0xa45   :  { %v17015_v14 = vadd.f32 %v10566_v40, %v10236_v35  ;;  %v8060_v39 = vpop.f32.mrb[133].mxu1  ;;  %v17053_v40 = vmax.f32 %v8024_v38, 0.0  ;;  %v10573_v35 = vadd.f32 %v16965_v12, %v16932_v48 }
 0xa46   :  { %v17019_v37 = vadd.f32 %v10564_v13, %v8060_v39  ;;  %v10237_v61 = vpop.f32.mrb[134].mxu1  ;;  %v10394_v13 = vpack.c.bf16 %v17033_v15, %v17043_v5 }
 0xa47   :  { %v17021_v9 = vadd.f32 %v10567_v44, %v10237_v61  ;;  %v8063_v30 = vpop.f32.mrb[135].mxu1 }
 0xa48   :  { %v17023_v22 = vadd.f32 %v10565_v4, %v8063_v30  ;;  %v17062_v4 = vmax.f32 %v16973_v8, 0.0  ;;  %v10578_v8 = vadd.f32 %v16965_v12, %v16942_v34 }
 0xa4a   :  { %v10398_v30 = vpack.c.bf16 %v17053_v40, %v17062_v4 }
 0xa4c   :  { %v10240_v26 = vpop.f32.mrb[136].mxu1 }
 0xa4d   :  { %v8085_v57 = vadd.f32 %v10570_v41, %v10240_v26  ;;  %v8076_v45 = vpop.f32.mrb[137].mxu1  ;;  %v17067_v41 = vmax.f32 %v16991_v28, 0.0 }
 0xa4e   :  { %v8077_v32 = vadd.f32 %v10568_v58, %v8076_v45  ;;  %v10241_v29 = vpop.f32.mrb[138].mxu1 }
 0xa4f   :  { %v8088_v7 = vadd.f32 %v10571_v51, %v10241_v29  ;;  %v8079_v10 = vpop.f32.mrb[139].mxu1  ;;  %v17047_v25 = vmax.f32 %v8085_v57, 0.0  ;;  %v17078_v51 = vmax.f32 %v16987_v0, 0.0  ;;  %v10576_v57 = vadd.f32 %v16965_v12, %v16938_v16 }
 0xa50   :  { %v8080_v42 = vadd.f32 %v10569_v63, %v8079_v10  ;;  %v17035_v62 = vmax.f32 %v8077_v32, 0.0  ;;  %v10579_v32 = vadd.f32 %v16965_v12, %v16944_v20  ;;  %v17089_v29 = vmax.f32 %v16989_v56, 0.0 }
 0xa51   :  { %v17037_v23 = vmax.f32 %v8088_v7, 0.0  ;;  %v10402_v34 = vpack.c.bf16 %v17067_v41, %v17078_v51  ;;  %v10577_v16 = vadd.f32 %v16965_v12, %v16940_v49 }
 0xa52   :  { %v17039_v6 = vmax.f32 %v8080_v42, 0.0 }
 0xa53   :  { %v10396_v39 = vpack.c.bf16 %v17037_v23, %v17047_v25 }
 0xa54   :  { %v10244_v55 = vpop.f32.mrb[140].mxu1  ;;  %v10392_v43 = vpack.c.bf16 %v17039_v6, %v17035_v62 }
 0xa55   :  { %v8101_v46 = vadd.f32 %v10574_v11, %v10244_v55  ;;  %v8092_v2 = vpop.f32.mrb[141].mxu1 }
 0xa56   :  { %v8093_v47 = vadd.f32 %v10572_v59, %v8092_v2  ;;  %v10245_v44 = vpop.f32.mrb[142].mxu1  ;;  %10393 = vmatprep.subr.bf16.mxu1 %v10392_v43  ;;  %v17098_v59 = vmax.f32 %v16983_v50, 0.0  ;;  %v10582_v50 = vadd.f32 %v16965_v12, %v16950_v1  ;;  %v17114_v2 = vmax.f32 %v17003_v19, 0.0 }
 0xa57   :  { %v8104_v53 = vadd.f32 %v10575_v3, %v10245_v44  ;;  %v8095_v38 = vpop.f32.mrb[143].mxu1  ;;  %10395 = vmatpush3.bf16.msra.mxu1 %v10394_v13  ;;  %v17082_v45 = vmax.f32 %v8101_v46, 0.0  ;;  %v17103_v3 = vmax.f32 %v17007_v27, 0.0 }
 0xa58   :  { %v8096_v61 = vadd.f32 %v10573_v35, %v8095_v38  ;;  %10397 = vmatprep.subr.bf16.mxu1 %v10396_v39  ;;  %v17069_v48 = vmax.f32 %v8093_v47, 0.0  ;;  %v10406_v43 = vpack.c.bf16 %v17089_v29, %v17098_v59  ;;  %v10580_v35 = vadd.f32 %v16965_v12, %v16946_v31 }
 0xa59   :  { %v17071_v58 = vmax.f32 %v8104_v53, 0.0  ;;  %v10583_v39 = vadd.f32 %v16965_v12, %v16952_v60  ;;  %v17125_v53 = vmax.f32 %v17005_v18, 0.0  ;;  %v10410_v1 = vpack.c.bf16 %v17103_v3, %v17114_v2 }
 0xa5a   :  { %v17073_v26 = vmax.f32 %v8096_v61, 0.0  ;;  %v10581_v31 = vadd.f32 %v16965_v12, %v16948_v33 }
 0xa5b   :  { %10399 = vmatpush3.bf16.msra.mxu1 %v10398_v30  ;;  %v10404_v11 = vpack.c.bf16 %v17071_v58, %v17082_v45 }
 0xa5c   :  { %v10248_v28 = vpop.f32.mrb[144].mxu1  ;;  %v10400_v63 = vpack.c.bf16 %v17073_v26, %v17069_v48 }
 0xa5d   :  { %v8117_v0 = vadd.f32 %v10578_v8, %v10248_v28  ;;  %v8108_v7 = vpop.f32.mrb[145].mxu1 }
 0xa5e   :  { %v8109_v10 = vadd.f32 %v10576_v57, %v8108_v7  ;;  %v10249_v42 = vpop.f32.mrb[146].mxu1  ;;  %10401 = vmatprep.subr.bf16.mxu1 %v10400_v63  ;;  %v17134_v57 = vmax.f32 %v16999_v36, 0.0  ;;  %v10586_v36 = vadd.f32 %v16965_v12, %v16958_v21  ;;  %v17150_v7 = vmax.f32 %v17019_v37, 0.0 }
 0xa5f   :  { %v8120_v20 = vadd.f32 %v10579_v32, %v10249_v42  ;;  %v8111_v56 = vpop.f32.mrb[147].mxu1  ;;  %10403 = vmatpush3.bf16.msra.mxu1 %v10402_v34  ;;  %v17118_v47 = vmax.f32 %v8117_v0, 0.0  ;;  %v17139_v32 = vmax.f32 %v17023_v22, 0.0 }
 0xa60   :  { %v8112_v55 = vadd.f32 %v10577_v16, %v8111_v56  ;;  %10405 = vmatprep.subr.bf16.mxu1 %v10404_v11  ;;  %v17105_v49 = vmax.f32 %v8109_v10, 0.0  ;;  %v10414_v63 = vpack.c.bf16 %v17125_v53, %v17134_v57  ;;  %v10584_v16 = vadd.f32 %v16965_v12, %v16954_v17 }
 0xa61   :  { %v17107_v13 = vmax.f32 %v8120_v20, 0.0  ;;  %v10587_v11 = vadd.f32 %v16965_v12, %v16960_v24  ;;  %v17161_v20 = vmax.f32 %v17021_v9, 0.0  ;;  %v10418_v21 = vpack.c.bf16 %v17139_v32, %v17150_v7 }
 0xa62   :  { %v17109_v46 = vmax.f32 %v8112_v55, 0.0  ;;  %v10585_v17 = vadd.f32 %v16965_v12, %v16956_v52 }
 0xa63   :  { %10407 = vmatpush3.bf16.msra.mxu1 %v10406_v43  ;;  %v10412_v8 = vpack.c.bf16 %v17107_v13, %v17118_v47 }
 0xa64   :  { %v10252_v27 = vpop.f32.mrb[148].mxu1  ;;  %v10408_v44 = vpack.c.bf16 %v17109_v46, %v17105_v49 }
 0xa65   :  { %v8133_v19 = vadd.f32 %v10582_v50, %v10252_v27  ;;  %v8124_v38 = vpop.f32.mrb[149].mxu1 }
 0xa66   :  { %v8125_v61 = vadd.f32 %v10580_v35, %v8124_v38  ;;  %v10253_v30 = vpop.f32.mrb[150].mxu1  ;;  %10409 = vmatprep.subr.bf16.mxu1 %v10408_v44  ;;  %v17170_v35 = vmax.f32 %v17015_v14, 0.0  ;;  %v19767_v38 = vmov 0.0  }
 0xa67   :  { %v8136_v60 = vadd.f32 %v10583_v39, %v10253_v30  ;;  %v8127_v18 = vpop.f32.mrb[151].mxu1  ;;  %10411 = vmatpush3.bf16.msra.mxu1 %v10410_v1  ;;  %v17154_v10 = vmax.f32 %v8133_v19, 0.0  ;;  %v19766_v1 = vmov 0.0|0.0  }
 0xa68   :  { %v8128_v28 = vadd.f32 %v10581_v31, %v8127_v18  ;;  %10413 = vmatprep.subr.bf16.mxu1 %v10412_v8  ;;  %v17141_v33 = vmax.f32 %v8125_v61, 0.0  ;;  %v10422_v44 = vpack.c.bf16 %v17161_v20, %v17170_v35 }
 0xa69   :  { %v17143_v34 = vmax.f32 %v8136_v60, 0.0  ;;  %19765 = vst [vmem:[#allocation132_spill] sm:$0xff] %v17154_v10 }
 0xa6a   :  { %v17145_v0 = vmax.f32 %v8128_v28, 0.0 }
 0xa6b   :  { %10415 = vmatpush3.bf16.msra.mxu1 %v10414_v63  ;;  %v10420_v50 = vpack.c.bf16 %v17143_v34, %v17154_v10 }
 0xa6c   :  { %v10256_v22 = vpop.f32.mrb[152].mxu1  ;;  %v10416_v42 = vpack.c.bf16 %v17145_v0, %v17141_v33 }
 0xa6d   :  { %v8149_v37 = vadd.f32 %v10586_v36, %v10256_v22  ;;  %v8140_v56 = vpop.f32.mrb[153].mxu1  ;;  %v19768_v36 = vld [vmem:[#allocation102_spill] sm:$0xff] }
 0xa6e   :  { %v8141_v55 = vadd.f32 %v10584_v16, %v8140_v56  ;;  %v10257_v43 = vpop.f32.mrb[154].mxu1  ;;  %10417 = vmatprep.subr.bf16.mxu1 %v10416_v42 }
 0xa6f   :  { %v8152_v24 = vadd.f32 %v10587_v11, %v10257_v43  ;;  %v8143_v9 = vpop.f32.mrb[155].mxu1  ;;  %10419 = vmatpush3.bf16.msra.mxu1 %v10418_v21  ;;  %v17184_v19 = vmax.f32 %v8149_v37, 0.0 }
 0xa70   :  { %v8144_v27 = vadd.f32 %v10585_v17, %v8143_v9  ;;  %10421 = vmatprep.subr.bf16.mxu1 %v10420_v50  ;;  %v17174_v39 = vmax.f32 %v8141_v55, 0.0 }
 0xa71   :  { %v17181_v14 = vmax.f32 %v8152_v24, 0.0 }
 0xa72   :  { %v17176_v52 = vmax.f32 %v8144_v27, 0.0 }
 0xa73   :  { %10423 = vmatpush3.bf16.msra.mxu1 %v10422_v44  ;;  %v10428_v31 = vpack.c.bf16 %v17181_v14, %v17184_v19 }
 0xa74   :  { %v10425_v12 = vpack.c.bf16 %v17176_v52, %v17174_v39  ;;  %10424 = vmatprep.subr.bf16.mxu1 %v19766_v1 }
 0xa76   :  { %8259 = vmatmul.mubr.f32.vlgmr.msra.gmra.mrb[156].mxu1 %v19764_v54 }
 0xa77   :  { %10426 = vmatpush3.bf16.msra.mxu1 %v10425_v12  ;;  %10266 = vmatprep.mubr.msk.f32.mxu1 %vm11321_vm7, %v19767_v38 }
 0xa78   :  { %10427 = vmatprep.subr.bf16.mxu1 %v19766_v1 }
 0xa7b   :  { %10429 = vmatpush3.bf16.msra.mxu1 %v10428_v31 }
 0xa7e   :  { %10267 = vmatmul.mubr.msk.f32.vlgmr.msra.gmra.mrb[158].mxu1 %vm8191_vm15, %v19764_v54 }
 0xa7f   :  { %8475 = vmatprep.mubr.f32.mxu1 %v19764_v54 }
 0xb49   :  { %v10042_v61 = vpop.f32.mrb[156].mxu1 }
 0xb4a   :  { %v10043_v30 = vpop.f32.mrb[157].mxu1 }
 0xb4b   :  { %v10044_v8 = vadd.f32 %v10043_v30, %v10042_v61 }
 0xb51   :  { %v8330_v60 = vpop.f32.mrb[158].mxu1 }
 0xb52   :  { %v8331_v18 = vadd.f32 %v10044_v8, %v8330_v60  ;;  %v10268_v28 = vpop.f32.mrb[159].mxu1 }
 0xb54   :  { %v17194_v63 = vmul.f32 0.0034722222, %v8331_v18 }
 0xb56   :  { %v17198_v16 = vrot.slane %v17194_v63, %v19768_v36 }
 0xb58   :  { %v8339_v22 = vsub.f32 %v17043_v5, %v17198_v16  ;;  %v8340_v42 = vsub.f32 %v17033_v15, %v17198_v16  ;;  %v8355_v11 = vsub.f32 %v17035_v62, %v17198_v16  ;;  %v8356_v21 = vsub.f32 %v17039_v6, %v17198_v16 }
 0xb59   :  { %v8357_v37 = vsub.f32 %v17047_v25, %v17198_v16  ;;  %v8358_v55 = vsub.f32 %v17037_v23, %v17198_v16  ;;  %v8341_v43 = vsub.f32 %v17062_v4, %v17198_v16  ;;  %v8342_v50 = vsub.f32 %v17053_v40, %v17198_v16 }
 0xb5a   :  { %v8375_v56 = vmul.f32 %v8339_v22, %v8339_v22  ;;  %v8376_v17 = vmul.f32 %v8340_v42, %v8340_v42  ;;  %v8359_v24 = vsub.f32 %v17069_v48, %v17198_v16  ;;  %v8360_v9 = vsub.f32 %v17073_v26, %v17198_v16 }
 0xb5b   :  { %v8391_v27 = vmul.f32 %v8355_v11, %v8355_v11  ;;  %v8392_v44 = vmul.f32 %v8356_v21, %v8356_v21  ;;  %v8393_v31 = vmul.f32 %v8357_v37, %v8357_v37  ;;  %v8343_v61 = vsub.f32 %v17078_v51, %v17198_v16 }
 0xb5c   :  { %v10432_v12 = vpack.c.bf16 %v8376_v17, %v8375_v56  ;;  %v8394_v8 = vmul.f32 %v8358_v55, %v8358_v55  ;;  %v8344_v60 = vsub.f32 %v17067_v41, %v17198_v16  ;;  %v8361_v18 = vsub.f32 %v17082_v45, %v17198_v16 }
 0xb5d   :  { %v10430_v30 = vpack.c.bf16 %v8392_v44, %v8391_v27  ;;  %v8377_v28 = vmul.f32 %v8341_v43, %v8341_v43  ;;  %v8378_v22 = vmul.f32 %v8342_v50, %v8342_v50  ;;  %v8362_v42 = vsub.f32 %v17071_v58, %v17198_v16 }
 0xb5e   :  { %v10434_v11 = vpack.c.bf16 %v8394_v8, %v8393_v31  ;;  %v8395_v21 = vmul.f32 %v8359_v24, %v8359_v24  ;;  %v8396_v37 = vmul.f32 %v8360_v9, %v8360_v9  ;;  %v8345_v56 = vsub.f32 %v17098_v59, %v17198_v16 }
 0xb5f   :  { %10431 = vmatprep.subr.bf16.mxu1 %v10430_v30  ;;  %v8346_v17 = vsub.f32 %v17089_v29, %v17198_v16  ;;  %v8363_v55 = vsub.f32 %v17105_v49, %v17198_v16  ;;  %v8379_v43 = vmul.f32 %v8343_v61, %v8343_v61  ;;  %v8380_v50 = vmul.f32 %v8344_v60, %v8344_v60 }
 0xb60   :  { %10433 = vmatpush3.bf16.msra.mxu1 %v10432_v12  ;;  %v10436_v27 = vpack.c.bf16 %v8378_v22, %v8377_v28  ;;  %v8364_v44 = vsub.f32 %v17109_v46, %v17198_v16  ;;  %v10438_v31 = vpack.c.bf16 %v8396_v37, %v8395_v21  ;;  %v8397_v24 = vmul.f32 %v8361_v18, %v8361_v18 }
 0xb61   :  { %10435 = vmatprep.subr.bf16.mxu1 %v10434_v11  ;;  %v8398_v9 = vmul.f32 %v8362_v42, %v8362_v42  ;;  %v8347_v12 = vsub.f32 %v17114_v2, %v17198_v16  ;;  %v8348_v30 = vsub.f32 %v17103_v3, %v17198_v16  ;;  %v8365_v8 = vsub.f32 %v17118_v47, %v17198_v16 }
 0xb62   :  { %v8381_v61 = vmul.f32 %v8345_v56, %v8345_v56  ;;  %v8382_v60 = vmul.f32 %v8346_v17, %v8346_v17  ;;  %v10440_v28 = vpack.c.bf16 %v8380_v50, %v8379_v43  ;;  %v8366_v22 = vsub.f32 %v17107_v13, %v17198_v16 }
 0xb63   :  { %v10442_v11 = vpack.c.bf16 %v8398_v9, %v8397_v24  ;;  %v8399_v18 = vmul.f32 %v8363_v55, %v8363_v55  ;;  %v8400_v42 = vmul.f32 %v8364_v44, %v8364_v44  ;;  %v8349_v21 = vsub.f32 %v17134_v57, %v17198_v16 }
 0xb64   :  { %10437 = vmatpush3.bf16.msra.mxu1 %v10436_v27  ;;  %v8350_v37 = vsub.f32 %v17125_v53, %v17198_v16  ;;  %v8367_v27 = vsub.f32 %v17141_v33, %v17198_v16  ;;  %v8383_v56 = vmul.f32 %v8347_v12, %v8347_v12  ;;  %v8384_v17 = vmul.f32 %v8348_v30, %v8348_v30 }
 0xb65   :  { %10439 = vmatprep.subr.bf16.mxu1 %v10438_v31  ;;  %v10444_v43 = vpack.c.bf16 %v8382_v60, %v8381_v61  ;;  %v8368_v50 = vsub.f32 %v17145_v0, %v17198_v16  ;;  %v10446_v31 = vpack.c.bf16 %v8400_v42, %v8399_v18  ;;  %v8401_v55 = vmul.f32 %v8365_v8, %v8365_v8 }
 0xb66   :  { %v8402_v44 = vmul.f32 %v8366_v22, %v8366_v22  ;;  %v8351_v24 = vsub.f32 %v17150_v7, %v17198_v16  ;;  %v8352_v9 = vsub.f32 %v17139_v32, %v17198_v16  ;;  %v8385_v12 = vmul.f32 %v8349_v21, %v8349_v21 }
 0xb67   :  { %v8386_v30 = vmul.f32 %v8350_v37, %v8350_v37  ;;  %v10448_v61 = vpack.c.bf16 %v8384_v17, %v8383_v56  ;;  %v8370_v60 = vsub.f32 %v17143_v34, %v17198_v16  ;;  %v8403_v8 = vmul.f32 %v8367_v27, %v8367_v27 }
 0xb68   :  { %10441 = vmatpush3.bf16.msra.mxu1 %v10440_v28  ;;  %v8369_v28 = vsub.f32 %v17154_v10, %v17198_v16  ;;  %v8404_v22 = vmul.f32 %v8368_v50, %v8368_v50  ;;  %v8353_v18 = vsub.f32 %v17170_v35, %v17198_v16  ;;  %v8354_v42 = vsub.f32 %v17161_v20, %v17198_v16 }
 0xb69   :  { %10443 = vmatprep.subr.bf16.mxu1 %v10442_v11  ;;  %v10450_v11 = vpack.c.bf16 %v8402_v44, %v8401_v55  ;;  %v10452_v10 = vpack.c.bf16 %v8386_v30, %v8385_v12  ;;  %v8406_v56 = vmul.f32 %v8370_v60, %v8370_v60  ;;  %v8371_v17 = vsub.f32 %v17174_v39, %v17198_v16 }
 0xb6a   :  { %v10454_v21 = vpack.c.bf16 %v8404_v22, %v8403_v8  ;;  %v8405_v37 = vmul.f32 %v8369_v28, %v8369_v28  ;;  %v8372_v27 = vsub.f32 %v17176_v52, %v17198_v16  ;;  %v8389_v50 = vmul.f32 %v8353_v18, %v8353_v18 }
 0xb6b   :  { %v8390_v55 = vmul.f32 %v8354_v42, %v8354_v42 }
 0xb6c   :  { %10445 = vmatpush3.bf16.msra.mxu1 %v10444_v43  ;;  %v8387_v43 = vmul.f32 %v8351_v24, %v8351_v24  ;;  %v8373_v24 = vsub.f32 %v17184_v19, %v17198_v16  ;;  %v8408_v28 = vmul.f32 %v8372_v27, %v8372_v27 }
 0xb6d   :  { %10447 = vmatprep.subr.bf16.mxu1 %v10446_v31  ;;  %v8388_v31 = vmul.f32 %v8352_v9, %v8352_v9  ;;  %v8374_v9 = vsub.f32 %v17181_v14, %v17198_v16  ;;  %v10460_v12 = vpack.c.bf16 %v8390_v55, %v8389_v50 }
 0xb6e   :  { %v8409_v30 = vmul.f32 %v8373_v24, %v8373_v24 }
 0xb6f   :  { %v10456_v44 = vpack.c.bf16 %v8388_v31, %v8387_v43  ;;  %v8410_v60 = vmul.f32 %v8374_v9, %v8374_v9 }
 0xb70   :  { %10449 = vmatpush3.bf16.msra.mxu1 %v10448_v61  ;;  %v10458_v61 = vpack.c.bf16 %v8406_v56, %v8405_v37 }
 0xb71   :  { %10451 = vmatprep.subr.bf16.mxu1 %v10450_v11  ;;  %v10466_v8 = vpack.c.bf16 %v8410_v60, %v8409_v30  ;;  %v19769_v60 = vld [vmem:[#allocation132_spill] sm:$0xff] }
 0xb74   :  { %10453 = vmatpush3.bf16.msra.mxu1 %v10452_v10  ;;  %v8407_v10 = vmul.f32 %v8371_v17, %v8371_v17  ;;  %v6087_v17 = vld [vmem:[%s18199_s8] sm:$0x1] }
 0xb75   :  { %10455 = vmatprep.subr.bf16.mxu1 %v10454_v21 }
 0xb76   :  { %v10463_v11 = vpack.c.bf16 %v8408_v28, %v8407_v10 }
 0xb78   :  { %10457 = vmatpush3.bf16.msra.mxu1 %v10456_v44 }
 0xb79   :  { %10459 = vmatprep.subr.bf16.mxu1 %v10458_v61 }
 0xb7c   :  { %10461 = vmatpush3.bf16.msra.mxu1 %v10460_v12 }
 0xb7d   :  { %10462 = vmatprep.subr.bf16.mxu1 %v19766_v1 }
 0xb7f   :  { %8476 = vmatmul.mubr.f32.vlgmr.msra.gmra.mrb[160].mxu1 %v19764_v54 }
 0xb80   :  { %10464 = vmatpush3.bf16.msra.mxu1 %v10463_v11  ;;  %10277 = vmatprep.mubr.msk.f32.mxu1 %vm11321_vm7, %v19767_v38  ;;  %v6086_v38 = vld [vmem:[%s18198_s7] sm:$0x1] }
 0xb81   :  { %10465 = vmatprep.subr.bf16.mxu1 %v19766_v1 }
 0xb84   :  { %10467 = vmatpush3.bf16.msra.mxu1 %v10466_v8 }
 0xb87   :  { %10278 = vmatmul.mubr.msk.f32.vlgmr.msra.gmra.mrb[162].mxu1 %vm8191_vm15, %v19764_v54 }
 0xc52   :  { %v10082_v16 = vpop.f32.mrb[160].mxu1 }
 0xc53   :  { %v10083_v22 = vpop.f32.mrb[161].mxu1 }
 0xc54   :  { %v10084_v18 = vadd.f32 %v10083_v22, %v10082_v16 }
 0xc5a   :  { %v8547_v42 = vpop.f32.mrb[162].mxu1 }
 0xc5b   :  { %v8548_v43 = vadd.f32 %v10084_v18, %v8547_v42  ;;  %v10279_v31 = vpop.f32.mrb[163].mxu1 }
 0xc5d   :  { %v8551_v21 = vmul.f32 0.0034722222, %v8548_v43 }
 0xc5f   :  { %v8552_v37 = vadd.f32 1e-05, %v8551_v21 }
 0xc61   :  { %11316 = vrsqrt.f32 %v8552_v37 }
 0xc6b   :  { %v11317_v56 = vpop.eup %11316 }
 0xc6c   :  { %v8554_v1 = vmul.f32 %v11317_v56, %v6086_v38 }
 0xc6e   :  { %v8555_v54 = vmul.f32 %v8554_v1, %v17194_v63  ;;  %v8561_v27 = vrot.slane %v8554_v1, %v19768_v36 }
 0xc70   :  { %v8556_v50 = vsub.f32 %v6087_v17, %v8555_v54  ;;  %v8563_v55 = vmul.f32 %v8561_v27, %v17043_v5  ;;  %v8564_v44 = vmul.f32 %v8561_v27, %v17033_v15  ;;  %v8565_v61 = vmul.f32 %v8561_v27, %v17062_v4 }
 0xc71   :  { %v8566_v24 = vmul.f32 %v8561_v27, %v17053_v40  ;;  %v8567_v9 = vmul.f32 %v8561_v27, %v17078_v51  ;;  %v8568_v10 = vmul.f32 %v8561_v27, %v17067_v41  ;;  %v8569_v28 = vmul.f32 %v8561_v27, %v17098_v59 }
 0xc72   :  { %v8570_v12 = vmul.f32 %v8561_v27, %v17089_v29  ;;  %v8571_v63 = vmul.f32 %v8561_v27, %v17114_v2  ;;  %v8572_v30 = vmul.f32 %v8561_v27, %v17103_v3  ;;  %v8573_v5 = vmul.f32 %v8561_v27, %v17134_v57 }
 0xc73   :  { %v8574_v15 = vmul.f32 %v8561_v27, %v17125_v53  ;;  %v8575_v4 = vmul.f32 %v8561_v27, %v17150_v7  ;;  %v8576_v40 = vmul.f32 %v8561_v27, %v17139_v32  ;;  %v8577_v51 = vmul.f32 %v8561_v27, %v17170_v35 }
 0xc74   :  { %v8578_v41 = vmul.f32 %v8561_v27, %v17161_v20  ;;  %v8579_v59 = vmul.f32 %v8561_v27, %v17035_v62  ;;  %v8580_v29 = vmul.f32 %v8561_v27, %v17039_v6  ;;  %v8581_v2 = vmul.f32 %v8561_v27, %v17047_v25 }
 0xc75   :  { %v8582_v3 = vmul.f32 %v8561_v27, %v17037_v23  ;;  %v8583_v57 = vmul.f32 %v8561_v27, %v17069_v48  ;;  %v8584_v53 = vmul.f32 %v8561_v27, %v17073_v26  ;;  %v8585_v7 = vmul.f32 %v8561_v27, %v17082_v45 }
 0xc76   :  { %v8586_v32 = vmul.f32 %v8561_v27, %v17071_v58  ;;  %v8587_v35 = vmul.f32 %v8561_v27, %v17105_v49  ;;  %v8588_v20 = vmul.f32 %v8561_v27, %v17109_v46  ;;  %v8589_v62 = vmul.f32 %v8561_v27, %v17118_v47 }
 0xc77   :  { %v8590_v6 = vmul.f32 %v8561_v27, %v17107_v13  ;;  %v8591_v25 = vmul.f32 %v8561_v27, %v17141_v33  ;;  %v8592_v23 = vmul.f32 %v8561_v27, %v17145_v0  ;;  %v8593_v48 = vmul.f32 %v8561_v27, %v19769_v60 }
 0xc78   :  { %v8594_v26 = vmul.f32 %v8561_v27, %v17143_v34  ;;  %v17320_v45 = vrot.slane %v8556_v50, %v19768_v36  ;;  %v8595_v58 = vmul.f32 %v8561_v27, %v17174_v39  ;;  %v8596_v49 = vmul.f32 %v8561_v27, %v17176_v52 }
 0xc79   :  { %v8597_v46 = vmul.f32 %v8561_v27, %v17184_v19  ;;  %v8598_v47 = vmul.f32 %v8561_v27, %v17181_v14 }
 0xc7a   :  { %v17327_v13 = vadd.f32 %v17320_v45, %v8563_v55  ;;  %v17330_v33 = vadd.f32 %v17320_v45, %v8564_v44  ;;  %v17333_v0 = vadd.f32 %v17320_v45, %v8565_v61  ;;  %v17336_v34 = vadd.f32 %v17320_v45, %v8566_v24 }
 0xc7b   :  { %v17339_v39 = vadd.f32 %v17320_v45, %v8567_v9  ;;  %v17342_v52 = vadd.f32 %v17320_v45, %v8568_v10  ;;  %v17345_v14 = vadd.f32 %v17320_v45, %v8569_v28  ;;  %v17348_v19 = vadd.f32 %v17320_v45, %v8570_v12 }
 0xc7c   :  { %v17351_v36 = vadd.f32 %v17320_v45, %v8571_v63  ;;  %v8614_v11 = vadd.f32 %v17320_v45, %v8572_v30  ;;  %v17355_v8 = vadd.f32 %v17320_v45, %v8573_v5  ;;  %v17358_v16 = vadd.f32 %v17320_v45, %v8574_v15  ;;  %8641 = vst [vmem:[%s18200_s9] sm:$0xff] %v17327_v13 }
 0xc7d   :  { %8642 = vst [vmem:[%s18200_s9 + $0x8] sm:$0xff] %v17330_v33  ;;  %8643 = vst [vmem:[%s18200_s9 + $0x10] sm:$0xff] %v17333_v0  ;;  %v8617_v22 = vadd.f32 %v17320_v45, %v8575_v4  ;;  %v8618_v18 = vadd.f32 %v17320_v45, %v8576_v40  ;;  %v8619_v42 = vadd.f32 %v17320_v45, %v8577_v51 }
 0xc7e   :  { %8644 = vst [vmem:[%s18200_s9 + $0x18] sm:$0xff] %v17336_v34  ;;  %v8620_v43 = vadd.f32 %v17320_v45, %v8578_v41  ;;  %8645 = vst [vmem:[%s18200_s9 + $0x20] sm:$0xff] %v17339_v39  ;;  %v8621_v31 = vadd.f32 %v17320_v45, %v8579_v59  ;;  %v8622_v21 = vadd.f32 %v17320_v45, %v8580_v29 }
 0xc7f   :  { %8646 = vst [vmem:[%s18200_s9 + $0x28] sm:$0xff] %v17342_v52  ;;  %8647 = vst [vmem:[%s18200_s9 + $0x30] sm:$0xff] %v17345_v14  ;;  %v8623_v37 = vadd.f32 %v17320_v45, %v8581_v2  ;;  %v8624_v38 = vadd.f32 %v17320_v45, %v8582_v3  ;;  %v8625_v56 = vadd.f32 %v17320_v45, %v8583_v57 }
 0xc80   :  { %8648 = vst [vmem:[%s18200_s9 + $0x38] sm:$0xff] %v17348_v19  ;;  %8649 = vst [vmem:[%s18200_s9 + $0x40] sm:$0xff] %v17351_v36  ;;  %v8626_v1 = vadd.f32 %v17320_v45, %v8584_v53  ;;  %v8627_v17 = vadd.f32 %v17320_v45, %v8585_v7  ;;  %v8628_v54 = vadd.f32 %v17320_v45, %v8586_v32 }
 0xc81   :  { %8650 = vst [vmem:[%s18200_s9 + $0x48] sm:$0xff] %v8614_v11  ;;  %8651 = vst [vmem:[%s18200_s9 + $0x50] sm:$0xff] %v17355_v8  ;;  %v8629_v27 = vadd.f32 %v17320_v45, %v8587_v35  ;;  %v8630_v50 = vadd.f32 %v17320_v45, %v8588_v20  ;;  %v8631_v55 = vadd.f32 %v17320_v45, %v8589_v62 }
 0xc82   :  { %8652 = vst [vmem:[%s18200_s9 + $0x58] sm:$0xff] %v17358_v16  ;;  %8653 = vst [vmem:[%s18200_s9 + $0x60] sm:$0xff] %v8617_v22  ;;  %v8632_v44 = vadd.f32 %v17320_v45, %v8590_v6  ;;  %v8633_v61 = vadd.f32 %v17320_v45, %v8591_v25  ;;  %v8634_v24 = vadd.f32 %v17320_v45, %v8592_v23  ;;  %v19770_v23 = vld [vmem:[#allocation3_spill] sm:$0xff] }
 0xc83   :  { %8654 = vst [vmem:[%s18200_s9 + $0x68] sm:$0xff] %v8618_v18  ;;  %8655 = vst [vmem:[%s18200_s9 + $0x70] sm:$0xff] %v8619_v42  ;;  %v8635_v9 = vadd.f32 %v17320_v45, %v8593_v48  ;;  %v8636_v10 = vadd.f32 %v17320_v45, %v8594_v26  ;;  %v8637_v28 = vadd.f32 %v17320_v45, %v8595_v58 }
 0xc84   :  { %8656 = vst [vmem:[%s18200_s9 + $0x78] sm:$0xff] %v8620_v43  ;;  %8657 = vst [vmem:[%s18200_s9 + $0x80] sm:$0xff] %v8621_v31  ;;  %v8638_v12 = vadd.f32 %v17320_v45, %v8596_v49  ;;  %v8639_v63 = vadd.f32 %v17320_v45, %v8597_v46  ;;  %v8640_v30 = vadd.f32 %v17320_v45, %v8598_v47 }
 0xc85   :  { %8658 = vst [vmem:[%s18200_s9 + $0x88] sm:$0xff] %v8622_v21  ;;  %8659 = vst [vmem:[%s18200_s9 + $0x90] sm:$0xff] %v8623_v37  ;;  %v8677_v5 = vmax.f32 %v17327_v13, %v17336_v34  ;;  %v8678_v15 = vmax.f32 %v17330_v33, %v17339_v39  ;;  %v8679_v4 = vmax.f32 %v17333_v0, %v17342_v52 }
 0xc86   :  { %8660 = vst [vmem:[%s18200_s9 + $0x98] sm:$0xff] %v8624_v38  ;;  %8661 = vst [vmem:[%s18200_s9 + $0xa0] sm:$0xff] %v8625_v56  ;;  %v8680_v40 = vmax.f32 %v17345_v14, %v8614_v11  ;;  %v8681_v51 = vmax.f32 %v17348_v19, %v17355_v8  ;;  %v8682_v41 = vmax.f32 %v17351_v36, %v17358_v16 }
 0xc87   :  { %8662 = vst [vmem:[%s18200_s9 + $0xa8] sm:$0xff] %v8626_v1  ;;  %8663 = vst [vmem:[%s18200_s9 + $0xb0] sm:$0xff] %v8627_v17  ;;  %v8683_v59 = vmax.f32 %v8617_v22, %v8620_v43  ;;  %v8684_v29 = vmax.f32 %v8618_v18, %v8621_v31  ;;  %v8685_v2 = vmax.f32 %v8619_v42, %v8622_v21 }
 0xc88   :  { %8664 = vst [vmem:[%s18200_s9 + $0xb8] sm:$0xff] %v8628_v54  ;;  %8665 = vst [vmem:[%s18200_s9 + $0xc0] sm:$0xff] %v8629_v27  ;;  %v8686_v3 = vmax.f32 %v8623_v37, %v8626_v1  ;;  %v8687_v57 = vmax.f32 %v8624_v38, %v8627_v17  ;;  %v17514_v53 = vmax.f32 %v8625_v56, %v8628_v54 }
 0xc89   :  { %8666 = vst [vmem:[%s18200_s9 + $0xc8] sm:$0xff] %v8630_v50  ;;  %8667 = vst [vmem:[%s18200_s9 + $0xd0] sm:$0xff] %v8631_v55  ;;  %v17516_v7 = vmax.f32 %v8629_v27, %v8632_v44  ;;  %v17518_v32 = vmax.f32 %v8630_v50, %v8633_v61  ;;  %v17520_v35 = vmax.f32 %v8631_v55, %v8634_v24 }
 0xc8a   :  { %8668 = vst [vmem:[%s18200_s9 + $0xd8] sm:$0xff] %v8632_v44  ;;  %8669 = vst [vmem:[%s18200_s9 + $0xe0] sm:$0xff] %v8633_v61  ;;  %v17522_v20 = vmax.f32 %v8635_v9, %v8638_v12  ;;  %v17524_v62 = vmax.f32 %v8636_v10, %v8639_v63  ;;  %v17526_v6 = vmax.f32 %v8637_v28, %v8640_v30 }
 0xc8b   :  { %8670 = vst [vmem:[%s18200_s9 + $0xe8] sm:$0xff] %v8634_v24  ;;  %8671 = vst [vmem:[%s18200_s9 + $0xf0] sm:$0xff] %v8635_v9  ;;  %v8713_v25 = vcombine.high %v8677_v5, %v8677_v5  ;;  %v17529_v60 = vrot.slane %v8677_v5, %v19770_v23  ;;  %v8730_v48 = vcombine.high %v8678_v15, %v8678_v15 }
 0xc8c   :  { %8672 = vst [vmem:[%s18200_s9 + $0xf8] sm:$0xff] %v8636_v10  ;;  %8673 = vst [vmem:[%s18200_s9 + $0x100] sm:$0xff] %v8637_v28  ;;  %v17532_v26 = vrot.slane %v8678_v15, %v19770_v23  ;;  %v8747_v45 = vcombine.high %v8679_v4, %v8679_v4  ;;  %v17535_v58 = vrot.slane %v8679_v4, %v19770_v23 }
 0xc8d   :  { %8674 = vst [vmem:[%s18200_s9 + $0x108] sm:$0xff] %v8638_v12  ;;  %8675 = vst [vmem:[%s18200_s9 + $0x110] sm:$0xff] %v8639_v63  ;;  %v17538_v49 = vrot.slane %v8713_v25, %v19770_v23  ;;  %v8728_v46 = vcombine.high %v17529_v60, %v17529_v60  ;;  %v8764_v47 = vcombine.high %v8680_v40, %v8680_v40 }
 0xc8e   :  { %8676 = vst [vmem:[%s18200_s9 + $0x118] sm:$0xff] %v8640_v30  ;;  %v17543_v13 = vrot.slane %v8680_v40, %v19770_v23  ;;  %v17546_v33 = vrot.slane %v8730_v48, %v19770_v23  ;;  %v8745_v0 = vcombine.high %v17532_v26, %v17532_v26  ;;  %v17551_v34 = vrot.slane %v8747_v45, %v19770_v23 }
 0xc8f   :  { %v8762_v39 = vcombine.high %v17535_v58, %v17535_v58  ;;  %v8729_v52 = vcombine.high %v17538_v49, %v17538_v49  ;;  %v17558_v14 = vrot.slane %v8764_v47, %v19770_v23  ;;  %v8781_v36 = vcombine.high %v8681_v51, %v8681_v51 }
 0xc90   :  { %v8779_v19 = vcombine.high %v17543_v13, %v17543_v13  ;;  %v8746_v11 = vcombine.high %v17546_v33, %v17546_v33  ;;  %v8763_v8 = vcombine.high %v17551_v34, %v17551_v34  ;;  %v17567_v16 = vrot.slane %v8681_v51, %v19770_v23 }
 0xc91   :  { %v8798_v22 = vcombine.high %v8682_v41, %v8682_v41  ;;  %v8780_v18 = vcombine.high %v17558_v14, %v17558_v14  ;;  %v17572_v42 = vrot.slane %v8781_v36, %v19770_v23  ;;  %v17575_v43 = vrot.slane %v8682_v41, %v19770_v23 }
 0xc92   :  { %v8815_v31 = vcombine.high %v8683_v59, %v8683_v59  ;;  %v8796_v21 = vcombine.high %v17567_v16, %v17567_v16  ;;  %v17583_v38 = vrot.slane %v8683_v59, %v19770_v23  ;;  %v8832_v56 = vcombine.high %v8684_v29, %v8684_v29 }
 0xc93   :  { %v17580_v37 = vrot.slane %v8798_v22, %v19770_v23  ;;  %v8797_v1 = vcombine.high %v17572_v42, %v17572_v42  ;;  %v8813_v17 = vcombine.high %v17575_v43, %v17575_v43  ;;  %v17593_v27 = vrot.slane %v8684_v29, %v19770_v23 }
 0xc94   :  { %v17590_v54 = vrot.slane %v8815_v31, %v19770_v23  ;;  %v8830_v55 = vcombine.high %v17583_v38, %v17583_v38  ;;  %v17600_v44 = vrot.slane %v8832_v56, %v19770_v23  ;;  %v8849_v61 = vcombine.high %v8685_v2, %v8685_v2 }
 0xc95   :  { %v8814_v50 = vcombine.high %v17580_v37, %v17580_v37  ;;  %v8847_v9 = vcombine.high %v17593_v27, %v17593_v27  ;;  %v17607_v10 = vrot.slane %v8685_v2, %v19770_v23  ;;  %v8866_v28 = vcombine.high %v8686_v3, %v8686_v3 }
 0xc96   :  { %v8831_v24 = vcombine.high %v17590_v54, %v17590_v54  ;;  %v8848_v12 = vcombine.high %v17600_v44, %v17600_v44  ;;  %v17612_v63 = vrot.slane %v8849_v61, %v19770_v23  ;;  %v17615_v30 = vrot.slane %v8686_v3, %v19770_v23 }
 0xc97   :  { %v8883_v5 = vcombine.high %v8687_v57, %v8687_v57  ;;  %v8864_v15 = vcombine.high %v17607_v10, %v17607_v10  ;;  %v17620_v4 = vrot.slane %v8866_v28, %v19770_v23  ;;  %v17623_v40 = vrot.slane %v8687_v57, %v19770_v23 }
 0xc98   :  { %v8900_v51 = vcombine.high %v17514_v53, %v17514_v53  ;;  %v8865_v41 = vcombine.high %v17612_v63, %v17612_v63  ;;  %v8881_v59 = vcombine.high %v17615_v30, %v17615_v30  ;;  %v17636_v2 = vrot.slane %v17514_v53, %v19770_v23 }
 0xc99   :  { %v17632_v29 = vrot.slane %v8883_v5, %v19770_v23  ;;  %v8882_v3 = vcombine.high %v17620_v4, %v17620_v4  ;;  %v8917_v48 = vcombine.high %v17516_v7, %v17516_v7  ;;  %v17653_v53 = vrot.slane %v17516_v7, %v19770_v23 }
 0xc9a   :  { %v17643_v25 = vrot.slane %v8900_v51, %v19770_v23  ;;  %v8934_v36 = vcombine.high %v17518_v32, %v17518_v32  ;;  %v17664_v56 = vrot.slane %v17518_v32, %v19770_v23  ;;  %v8951_v61 = vcombine.high %v17520_v35, %v17520_v35 }
 0xc9b   :  { %v17660_v31 = vrot.slane %v8917_v48, %v19770_v23  ;;  %v17675_v5 = vrot.slane %v17520_v35, %v19770_v23  ;;  %v8968_v51 = vcombine.high %v17522_v20, %v17522_v20  ;;  %v8985_v32 = vcombine.high %v17524_v62, %v17524_v62 }
 0xc9c   :  { %v17671_v28 = vrot.slane %v8934_v36, %v19770_v23  ;;  %v17684_v22 = vrot.slane %v8951_v61, %v19770_v23  ;;  %v17688_v36 = vrot.slane %v17522_v20, %v19770_v23  ;;  %v17705_v20 = vrot.slane %v17524_v62, %v19770_v23 }
 0xc9d   :  { %v17695_v47 = vrot.slane %v8968_v51, %v19770_v23  ;;  %v9002_v35 = vcombine.high %v17526_v6, %v17526_v6  ;;  %v17712_v7 = vrot.slane %v8985_v32, %v19770_v23  ;;  %v17716_v45 = vrot.slane %v17526_v6, %v19770_v23 }
 0xc9e   :  { %v17720_v48 = vsel %vm6331_vm12, %v17529_v60, -inf  ;;  %v17731_v32 = vsel %vm6331_vm12, %v8728_v46, -inf  ;;  %v17735_v6 = vsel %vm6331_vm12, %v17538_v49, -inf  ;;  %v17747_v60 = vsel %vm6331_vm12, %v8729_v52, -inf }
 0xc9f   :  { %v17725_v61 = vrot.slane %v9002_v35, %v19770_v23  ;;  %v17755_v51 = vsel %vm6331_vm12, %v17532_v26, -inf  ;;  %v17761_v35 = vsel %vm6331_vm12, %v8745_v0, -inf  ;;  %v17767_v52 = vsel %vm6331_vm12, %v17546_v33, -inf }
 0xca0   :  { %v17773_v62 = vsel %vm6331_vm12, %v8746_v11, -inf  ;;  %v17777_v46 = vsel %vm6331_vm12, %v17535_v58, -inf  ;;  %v17785_v0 = vsel %vm6331_vm12, %v8762_v39, -inf  ;;  %v17789_v49 = vsel %vm6331_vm12, %v17551_v34, -inf }
 0xca1   :  { %v17795_v33 = vsel %vm6331_vm12, %v8763_v8, -inf  ;;  %v17803_v58 = vsel %vm6331_vm12, %v17543_v13, -inf  ;;  %v17809_v39 = vsel %vm6331_vm12, %v8779_v19, -inf  ;;  %v17815_v8 = vsel %vm6331_vm12, %v17558_v14, -inf }
 0xca2   :  { %v17821_v11 = vsel %vm6331_vm12, %v8780_v18, -inf  ;;  %v17825_v26 = vsel %vm6331_vm12, %v17567_v16, -inf  ;;  %v17833_v19 = vsel %vm6331_vm12, %v8796_v21, -inf  ;;  %v17837_v34 = vsel %vm6331_vm12, %v17572_v42, -inf }
 0xca3   :  { %v17843_v14 = vsel %vm6331_vm12, %v8797_v1, -inf  ;;  %v17851_v16 = vsel %vm6331_vm12, %v17575_v43, -inf  ;;  %v17857_v21 = vsel %vm6331_vm12, %v8813_v17, -inf  ;;  %v17863_v1 = vsel %vm6331_vm12, %v17580_v37, -inf }
 0xca4   :  { %v17869_v18 = vsel %vm6331_vm12, %v8814_v50, -inf  ;;  %v17873_v13 = vsel %vm6331_vm12, %v17583_v38, -inf  ;;  %v17881_v17 = vsel %vm6331_vm12, %v8830_v55, -inf  ;;  %v17885_v42 = vsel %vm6331_vm12, %v17590_v54, -inf }
 0xca5   :  { %v17891_v37 = vsel %vm6331_vm12, %v8831_v24, -inf  ;;  %v17899_v38 = vsel %vm6331_vm12, %v17593_v27, -inf  ;;  %v17905_v55 = vsel %vm6331_vm12, %v8847_v9, -inf  ;;  %v17911_v24 = vsel %vm6331_vm12, %v17600_v44, -inf }
 0xca6   :  { %v17917_v50 = vsel %vm6331_vm12, %v8848_v12, -inf  ;;  %v17921_v43 = vsel %vm6331_vm12, %v17607_v10, -inf  ;;  %v17929_v9 = vsel %vm6331_vm12, %v8864_v15, -inf  ;;  %v17933_v54 = vsel %vm6331_vm12, %v17612_v63, -inf }
 0xca7   :  { %19771 = vst [vmem:[#allocation124_spill] sm:$0xff] %v17929_v9  ;;  %v17939_v44 = vsel %vm6331_vm12, %v8865_v41, -inf  ;;  %v17947_v10 = vsel %vm6331_vm12, %v17615_v30, -inf  ;;  %v17953_v15 = vsel %vm6331_vm12, %v8881_v59, -inf  ;;  %v17959_v41 = vsel %vm6331_vm12, %v17620_v4, -inf }
 0xca8   :  { %19772 = vst [vmem:[#allocation143_spill] sm:$0xff] %v17947_v10  ;;  %19773 = vst [vmem:[#allocation131_spill] sm:$0xff] %v17953_v15  ;;  %v17965_v12 = vsel %vm6331_vm12, %v8882_v3, -inf  ;;  %v17969_v27 = vsel %vm6331_vm12, %v17623_v40, -inf  ;;  %v19776_v59 = vcombine.high %v17623_v40, %v17623_v40  ;;  %v17981_v57 = vsel %vm6331_vm12, %v17632_v29, -inf }
 0xca9   :  { %19774 = vst [vmem:[#allocation145_spill] sm:$0xff] %v17959_v41  ;;  %19775 = vst [vmem:[#allocation137_spill] sm:$0xff] %v17965_v12  ;;  %v19777_v4 = vcombine.high %v17632_v29, %v17632_v29  ;;  %v17995_v40 = vsel %vm6331_vm12, %v17636_v2, -inf  ;;  %v19783_v9 = vcombine.high %v17671_v28, %v17671_v28 }
 0xcaa   :  { %v17977_v63 = vsel %vm6331_vm12, %v19776_v59, -inf  ;;  %v19778_v59 = vcombine.high %v17636_v2, %v17636_v2  ;;  %v19780_v2 = vcombine.high %v17653_v53, %v17653_v53 }
 0xcab   :  { %v17987_v3 = vsel %vm6331_vm12, %v19777_v4, -inf  ;;  %v9154_v15 = vmax.f32 %v17969_v27, %v17977_v63  ;;  %v9161_v4 = vsel %vm6331_vm12, %v17643_v25, -inf  ;;  %v19779_v27 = vcombine.high %v17643_v25, %v17643_v25 }
 0xcac   :  { %v9157_v30 = vmax.f32 %v17981_v57, %v17987_v3  ;;  %v18001_v10 = vsel %vm6331_vm12, %v19778_v59, -inf  ;;  %v9164_v63 = vsel %vm6331_vm12, %v17653_v53, -inf  ;;  %v9165_v59 = vsel %vm6331_vm12, %v19780_v2, -inf }
 0xcad   :  { %v9160_v29 = vmax.f32 %v17995_v40, %v18001_v10  ;;  %v9162_v57 = vsel %vm6331_vm12, %v19779_v27, -inf  ;;  %v9167_v10 = vsel %vm6331_vm12, %v17660_v31, -inf  ;;  %v19781_v40 = vcombine.high %v17660_v31, %v17660_v31 }
 0xcae   :  { %v9163_v3 = vmax.f32 %v9161_v4, %v9162_v57  ;;  %v9166_v25 = vmax.f32 %v9164_v63, %v9165_v59  ;;  %v9170_v27 = vsel %vm6331_vm12, %v17664_v56, -inf  ;;  %v19782_v4 = vcombine.high %v17664_v56, %v17664_v56 }
 0xcaf   :  { %v9168_v12 = vsel %vm6331_vm12, %v19781_v40, -inf  ;;  %v9173_v2 = vsel %vm6331_vm12, %v17671_v28, -inf  ;;  %v9174_v31 = vsel %vm6331_vm12, %v19783_v9, -inf  ;;  %v19784_v59 = vcombine.high %v17675_v5, %v17675_v5 }
 0xcb0   :  { %v9169_v41 = vmax.f32 %v9167_v10, %v9168_v12  ;;  %v9171_v53 = vsel %vm6331_vm12, %v19782_v4, -inf  ;;  %v9176_v12 = vsel %vm6331_vm12, %v17675_v5, -inf  ;;  %v9175_v63 = vmax.f32 %v9173_v2, %v9174_v31 }
 0xcb1   :  { %v9172_v57 = vmax.f32 %v9170_v27, %v9171_v53  ;;  %v9177_v56 = vsel %vm6331_vm12, %v19784_v59, -inf  ;;  %v9179_v10 = vsel %vm6331_vm12, %v17684_v22, -inf  ;;  %v19785_v40 = vcombine.high %v17684_v22, %v17684_v22 }
 0xcb2   :  { %v9178_v28 = vmax.f32 %v9176_v12, %v9177_v56  ;;  %v9182_v9 = vsel %vm6331_vm12, %v17688_v36, -inf  ;;  %v19786_v53 = vcombine.high %v17688_v36, %v17688_v36  ;;  %v9185_v31 = vsel %vm6331_vm12, %v17695_v47, -inf }
 0xcb3   :  { %v9180_v27 = vsel %vm6331_vm12, %v19785_v40, -inf  ;;  %v19787_v59 = vcombine.high %v17695_v47, %v17695_v47  ;;  %v9188_v12 = vsel %vm6331_vm12, %v17705_v20, -inf  ;;  %v9191_v40 = vsel %vm6331_vm12, %v17712_v7, -inf }
 0xcb4   :  { %v9181_v4 = vmax.f32 %v9179_v10, %v9180_v27  ;;  %v9183_v5 = vsel %vm6331_vm12, %v19786_v53, -inf  ;;  %v19788_v10 = vcombine.high %v17705_v20, %v17705_v20  ;;  %v19789_v27 = vcombine.high %v17712_v7, %v17712_v7 }
 0xcb5   :  { %v9184_v2 = vmax.f32 %v9182_v9, %v9183_v5  ;;  %v9186_v22 = vsel %vm6331_vm12, %v19787_v59, -inf  ;;  %v9194_v5 = vsel %vm6331_vm12, %v17716_v45, -inf }
 0xcb6   :  { %v9187_v56 = vmax.f32 %v9185_v31, %v9186_v22  ;;  %v9189_v36 = vsel %vm6331_vm12, %v19788_v10, -inf  ;;  %v9192_v9 = vsel %vm6331_vm12, %v19789_v27, -inf  ;;  %v19790_v31 = vcombine.high %v17716_v45, %v17716_v45 }
 0xcb7   :  { %v9190_v47 = vmax.f32 %v9188_v12, %v9189_v36  ;;  %v9193_v53 = vmax.f32 %v9191_v40, %v9192_v9  ;;  %v9197_v22 = vsel %vm6331_vm12, %v17725_v61, -inf  ;;  %v19791_v10 = vcombine.high %v17725_v61, %v17725_v61 }
 0xcb8   :  { %v9195_v20 = vsel %vm6331_vm12, %v19790_v31, -inf  ;;  %v19792_v12 = vmax.f32 %v17735_v6, %v17747_v60  ;;  %v19793_v36 = vmax.f32 %v17720_v48, %v17731_v32  ;;  %v19794_v45 = vmax.f32 %v17767_v52, %v17773_v62 }
 0xcb9   :  { %v9196_v59 = vmax.f32 %v9194_v5, %v9195_v20  ;;  %v9198_v7 = vsel %vm6331_vm12, %v19791_v10, -inf  ;;  %v19795_v9 = vmax.f32 %v17755_v51, %v17761_v35  ;;  %v19796_v61 = vmax.f32 %v17789_v49, %v17795_v33 }
 0xcba   :  { %v9236_v40 = vcombine.low %v19793_v36, %v19792_v12  ;;  %v9199_v27 = vmax.f32 %v9197_v22, %v9198_v7  ;;  %v19797_v31 = vmax.f32 %v17777_v46, %v17785_v0  ;;  %v19798_v6 = vmax.f32 %v17815_v8, %v17821_v11 }
 0xcbb   :  { %v9237_v5 = vcombine.low %v19795_v9, %v19794_v45  ;;  %v19799_v48 = vmax.f32 %v17803_v58, %v17809_v39  ;;  %v19800_v51 = vmax.f32 %v17837_v34, %v17843_v14  ;;  %v19801_v35 = vmax.f32 %v17825_v26, %v17833_v19  ;;  %v19809_v14 = vld [vmem:[#allocation124_spill] sm:$0xff] }
 0xcbc   :  { %v9253_v20 = vcombine.low %v19797_v31, %v19796_v61  ;;  %v9244_v62 = vrot.slane %v9236_v40, %v19770_v23  ;;  %v19802_v46 = vmax.f32 %v17863_v1, %v17869_v18  ;;  %v19803_v49 = vmax.f32 %v17851_v16, %v17857_v21  ;;  %v19812_v1 = vld [vmem:[#allocation137_spill] sm:$0xff] }
 0xcbd   :  { %v9261_v32 = vcombine.low %v19799_v48, %v19798_v6  ;;  %v9262_v60 = vcombine.low %v19801_v35, %v19800_v51  ;;  %v19804_v0 = vmax.f32 %v17885_v42, %v17891_v37  ;;  %v19805_v33 = vmax.f32 %v17873_v13, %v17881_v17  ;;  %v19811_v42 = vld [vmem:[#allocation145_spill] sm:$0xff]  ;;  %v19814_v37 = vld [vmem:[#allocation143_spill] sm:$0xff] }
 0xcbe   :  { %v9278_v52 = vcombine.low %v19803_v49, %v19802_v46  ;;  %v9251_v58 = vrot.slane %v9237_v5, %v19770_v23  ;;  %v19806_v26 = vmax.f32 %v17911_v24, %v17917_v50  ;;  %v19807_v34 = vmax.f32 %v17899_v38, %v17905_v55  ;;  %9806 = vst.sshfl [vmem:[%s18201_s10 + $0x8] sm:$0x33 pattern:$0x76325410] %v9253_v20  ;;  %v19815_v50 = vld [vmem:[#allocation131_spill] sm:$0xff] }
 0xcbf   :  { %v9286_v11 = vcombine.low %v19805_v33, %v19804_v0  ;;  %v9269_v39 = vrot.slane %v9261_v32, %v19770_v23  ;;  %v19808_v19 = vmax.f32 %v17933_v54, %v17939_v44  ;;  %v19810_v18 = vmax.f32 %v17921_v43, %v19809_v14 }
 0xcc0   :  { %v9287_v8 = vcombine.low %v19807_v34, %v19806_v26  ;;  %v9276_v13 = vrot.slane %v9262_v60, %v19770_v23  ;;  %v19813_v17 = vmax.f32 %v19811_v42, %v19812_v1  ;;  %v19816_v38 = vmax.f32 %v19814_v37, %v19815_v50  ;;  %9807 = vst.sshfl [vmem:[%s18201_s10 + $0x18] sm:$0x33 pattern:$0x76325410] %v9278_v52 }
 0xcc1   :  { %v9303_v16 = vcombine.low %v19810_v18, %v19808_v19  ;;  %v9294_v21 = vrot.slane %v9286_v11, %v19770_v23  ;;  %v9312_v54 = vcombine.low %v9154_v15, %v9157_v30  ;;  %v9252_v43 = vcombine.low %v9244_v62, %v9251_v58 }
 0xcc2   :  { %v9311_v55 = vcombine.low %v19816_v38, %v19813_v17  ;;  %v9301_v24 = vrot.slane %v9287_v8, %v19770_v23  ;;  %v9328_v44 = vcombine.low %v9160_v29, %v9163_v3  ;;  %v9336_v22 = vcombine.low %v9166_v25, %v9169_v41 }
 0xcc3   :  { %9808 = vst.sshfl [vmem:[%s18201_s10 + $0x28] sm:$0x33 pattern:$0x76325410] %v9303_v16  ;;  %v9277_v10 = vcombine.low %v9269_v39, %v9276_v13  ;;  %v9326_v12 = vrot.slane %v9312_v54, %v19770_v23  ;;  %v9337_v36 = vcombine.low %v9172_v57, %v9175_v63  ;;  %v9353_v40 = vcombine.low %v9178_v28, %v9181_v4 }
 0xcc4   :  { %v9319_v7 = vrot.slane %v9311_v55, %v19770_v23  ;;  %v9302_v15 = vcombine.low %v9294_v21, %v9301_v24  ;;  %v9344_v30 = vrot.slane %v9336_v22, %v19770_v23  ;;  %v9361_v45 = vcombine.low %v9184_v2, %v9187_v56  ;;  %9398 = vst [vmem:[%s18201_s10] sm:$0xff] %v9252_v43 }
 0xcc5   :  { %9809 = vst.sshfl [vmem:[%s18201_s10 + $0x38] sm:$0x33 pattern:$0x76325410] %v9328_v44  ;;  %v9351_v29 = vrot.slane %v9337_v36, %v19770_v23  ;;  %v9362_v3 = vcombine.low %v9190_v47, %v9193_v53  ;;  %v9378_v25 = vcombine.low %v9196_v59, %v9199_v27  ;;  %9400 = vst [vmem:[%s18201_s10 + $0x10] sm:$0xff] %v9277_v10 }
 0xcc6   :  { %v9327_v41 = vcombine.low %v9319_v7, %v9326_v12  ;;  %v9369_v57 = vrot.slane %v9361_v45, %v19770_v23  ;;  %9402 = vst [vmem:[%s18201_s10 + $0x20] sm:$0xff] %v9302_v15  ;;  %9810 = vst.sshfl [vmem:[%s18201_s10 + $0x48] sm:$0x33 pattern:$0x76325410] %v9353_v40 }
 0xcc7   :  { %v9352_v63 = vcombine.low %v9344_v30, %v9351_v29  ;;  %v9376_v28 = vrot.slane %v9362_v3, %v19770_v23  ;;  %9811 = vst.sshfl [vmem:[%s18201_s10 + $0x58] sm:$0x33 pattern:$0x76325410] %v9378_v25 }
 0xcc8   :  { %9404 = vst [vmem:[%s18201_s10 + $0x30] sm:$0xff] %v9327_v41 }
 0xcc9   :  { %v9377_v4 = vcombine.low %v9369_v57, %v9376_v28  ;;  %9406 = vst [vmem:[%s18201_s10 + $0x40] sm:$0xff] %v9352_v63 }
 0xccb   :  { %9408 = vst [vmem:[%s18201_s10 + $0x50] sm:$0xff] %v9377_v4 }

</bundles_post_ra>
